<compile_context>
chip_gen: v7x
topology: tpu7x:2x2x1
jax: 0.10.0
libtpu: 0.0.40
codegen_flags: <defaults>
</compile_context>

<pallas_src>
import functools

import jax
import jax.numpy as jnp
from jax.experimental import pallas as pl
from jax.experimental.pallas import tpu as pltpu


# ----------------------------------------------------------------------------
# Fused forward kernel: one grid step = one chunk of Bc images, all in VMEM.
# ----------------------------------------------------------------------------
def _env_fused_kernel(masks_ref, x_ref,
                      w1_ref, b1_ref, w2_ref, b2_ref, w3_ref, b3_ref,
                      wh_ref, bh_ref, lw_ref, lb_ref,
                      act_ref, goal_ref,
                      *, H, W, Bc):
    HW = H * W
    L = Bc * HW
    masks = masks_ref[...]                                # (9, L) f32 in {0,1}

    def tap_stack(x):
        # x: (Cp, L), Cp a multiple of 8.  Returns (9*Cp, L): the nine rolled
        # and boundary-masked copies of x stacked along the contraction dim so
        # the whole conv becomes a single MXU matmul.  Rolls are XLU lane
        # rotations of the flattened plane; masking is one vmul per plane.
        planes = []
        for kh in range(3):
            for kw in range(3):
                k = kh * 3 + kw
                delta = (kh - 1) * W + (kw - 1)           # flat-index shift
                if delta == 0:
                    planes.append(x)                      # centre tap: mask==1
                else:
                    tap = pltpu.roll(x, shift=(-delta) % L, axis=1)
                    planes.append(tap * masks[k:k + 1, :])
        return jnp.concatenate(planes, axis=0)            # sublane-aligned

    def conv3x3_relu(x, w_ref, b_ref):
        # One (Cout_p, 9*Cp) @ (9*Cp, L) matmul per conv (was 9 tiny matmuls).
        s = tap_stack(x)
        y = jnp.dot(w_ref[...], s, preferred_element_type=jnp.float32)
        return jnp.maximum(y + b_ref[...], 0.0)           # bias + ReLU

    # ---- ReesBlock chain (channel dims zero-padded to 16 / 8 by wrapper) ---
    y = conv3x3_relu(x_ref[0], w1_ref, b1_ref)            # (8, L)
    y = conv3x3_relu(y, w2_ref, b2_ref)                   # (8, L)
    y = conv3x3_relu(y, w3_ref, b3_ref)                   # (8, L)

    # ---- fused policy + goal head: ONE shared tap stack, ONE matmul --------
    # rows 0..5 = policy conv, row 6 = goal conv, row 7 = zero padding.
    head = conv3x3_relu(y, wh_ref, bh_ref)                # (8, L)

    # policy head -> sigmoid
    act_ref[0] = jax.nn.sigmoid(head[0:6, :])

    # goal head: per-image Flatten -> Linear(HW, 1) -> softmax over width-1
    # axis (identically 1.0; kept faithful to the reference math — it is
    # essentially free now that the goal conv shares the head matmul).
    g = head[6:7, :]                                      # (1, L)
    lw = lw_ref[...]                                      # (1, HW)
    lb = lb_ref[...]                                      # (1, 1)
    row_ids = jax.lax.broadcasted_iota(jnp.int32, (Bc, 1), 0)
    goal_vals = jnp.zeros((Bc, 1), jnp.float32)
    for b in range(Bc):                                   # static, Bc <= 4
        logit = jnp.sum(g[:, b * HW:(b + 1) * HW] * lw,
                        axis=-1, keepdims=True) + lb      # (1, 1)
        e = jnp.exp(logit - jnp.max(logit, axis=-1, keepdims=True))
        sm = e / jnp.sum(e, axis=-1, keepdims=True)       # == 1.0 exactly
        goal_vals = goal_vals + jnp.where(row_ids == b, sm, 0.0)
    goal_ref[0] = goal_vals


# ----------------------------------------------------------------------------
# Wrapper-side layout plumbing (weights stacked per tap, masks, batch folding).
# ----------------------------------------------------------------------------
def _stack_conv_weight(w, cin_pad, cout_pad):
    # (Cout, Cin, 3, 3) -> (cout_pad, 9*cin_pad); contraction index = k*Cp + ci
    co, ci = int(w.shape[0]), int(w.shape[1])
    w_t = jnp.transpose(w.astype(jnp.float32), (2, 3, 1, 0))        # (3,3,ci,co)
    w_t = jnp.pad(w_t, ((0, 0), (0, 0), (0, cin_pad - ci), (0, cout_pad - co)))
    return jnp.transpose(w_t.reshape(9 * cin_pad, cout_pad), (1, 0))


def _pad_bias(b, cout_pad):
    return jnp.pad(b.astype(jnp.float32),
                   (0, cout_pad - int(b.shape[0]))).reshape(cout_pad, 1)


def _boundary_masks(H, W, Bc):
    # (9, Bc*HW) f32: 1.0 where the tap stays inside its own image.
    HW = H * W
    pos = jnp.arange(HW, dtype=jnp.int32)
    r, c = pos // W, pos % W
    ms = []
    for kh in range(3):
        for kw in range(3):
            dr, dc = kh - 1, kw - 1
            ms.append((r + dr >= 0) & (r + dr < H) & (c + dc >= 0) & (c + dc < W))
    masks = jnp.stack(ms, axis=0).astype(jnp.float32)                # (9, HW)
    return jnp.tile(masks, (1, Bc))                                  # (9, Bc*HW)


_MAX_BC = 4          # images folded into the lane dimension per grid step


@jax.jit
def environment_forward(params, x):
    f32 = jnp.float32
    B, Cin, H, W = x.shape
    HW = H * W
    CIN_P, C_P = 16, 8               # channel dims padded to sublane multiples

    # Batch folding: Bc images per grid step; keep >= 2 grid steps when
    # possible so both v7x TensorCores get a chunk.
    num_chunks = max(2, pl.cdiv(B, _MAX_BC)) if B >= 2 else 1
    Bc = pl.cdiv(B, num_chunks)
    B_pad = num_chunks * Bc
    L = Bc * HW

    # Input: (B, Cin, H, W) -> (num_chunks, CIN_P, Bc*HW), images concatenated
    # along lanes, channels zero-padded to 16.
    xx = x.astype(f32).reshape(B, Cin, HW)
    xx = jnp.pad(xx, ((0, B_pad - B), (0, CIN_P - Cin), (0, 0)))
    xx = xx.reshape(num_chunks, Bc, CIN_P, HW).transpose(0, 2, 1, 3)
    xx = xx.reshape(num_chunks, CIN_P, L)

    # Fused head weights: rows 0..5 policy, row 6 goal, row 7 zero pad.
    wh = jnp.concatenate([params["policy_w"], params["goal_w"]], axis=0)
    bh = jnp.concatenate([params["policy_b"], params["goal_b"]], axis=0)

    ins = (
        _boundary_masks(H, W, Bc),
        xx,
        _stack_conv_weight(params["conv1_w"], CIN_P, C_P), _pad_bias(params["conv1_b"], C_P),
        _stack_conv_weight(params["conv2_w"], C_P, C_P),   _pad_bias(params["conv2_b"], C_P),
        _stack_conv_weight(params["conv3_w"], C_P, C_P),   _pad_bias(params["conv3_b"], C_P),
        _stack_conv_weight(wh, C_P, C_P),                  _pad_bias(bh, C_P),
        params["lin_w"].reshape(1, HW).astype(f32),
        params["lin_b"].reshape(1, 1).astype(f32),
    )

    def _resident(a):    # small array resident in VMEM, same block every step
        nd = a.ndim
        return pl.BlockSpec(tuple(a.shape), lambda c, _nd=nd: (0,) * _nd)

    in_specs = ([_resident(ins[0]),
                 pl.BlockSpec((1, CIN_P, L), lambda c: (c, 0, 0))]
                + [_resident(a) for a in ins[2:]])

    kernel = functools.partial(_env_fused_kernel, H=H, W=W, Bc=Bc)

    act_flat, goal = pl.pallas_call(
        kernel,
        out_shape=(jax.ShapeDtypeStruct((num_chunks, 6, L), f32),
                   jax.ShapeDtypeStruct((num_chunks, Bc, 1), f32)),
        grid=(num_chunks,),
        in_specs=in_specs,
        out_specs=(pl.BlockSpec((1, 6, L), lambda c: (c, 0, 0)),
                   pl.BlockSpec((1, Bc, 1), lambda c: (c, 0, 0))),
        compiler_params=pltpu.CompilerParams(
            dimension_semantics=("parallel",)),
    )(*ins)

    # Lane-dense kernel outputs -> (B, 6, H, W) / (B, 1) (tiny HBM-side ops).
    action = act_flat.reshape(num_chunks, 6, Bc, HW).transpose(0, 2, 1, 3)
    action = action.reshape(B_pad, 6, H, W)[:B]
    y_goal = goal.reshape(B_pad, 1)[:B]
    return action, y_goal


# ----------------------------------------------------------------------------
# Pure-JAX reference (for correctness check only).
# ----------------------------------------------------------------------------
def _reference_forward(params, x):
    hp = jax.lax.Precision.HIGHEST

    def conv(z, w, b):
        y = jax.lax.conv_general_dilated(
            z, w, window_strides=(1, 1), padding="SAME",
            dimension_numbers=("NCHW", "OIHW", "NCHW"), precision=hp)
        return jnp.maximum(y + b[None, :, None, None], 0.0)

    y = conv(x, params["conv1_w"], params["conv1_b"])
    y = conv(y, params["conv2_w"], params["conv2_b"])
    y = conv(y, params["conv3_w"], params["conv3_b"])
    g = conv(y, params["goal_w"], params["goal_b"])
    logit = jnp.dot(g.reshape(g.shape[0], -1), params["lin_w"],
                    precision=hp) + params["lin_b"]
    y_goal = jax.nn.softmax(logit, axis=-1)
    action = jax.nn.sigmoid(conv(y, params["policy_w"], params["policy_b"]))
    return action, y_goal


def init_params(key):
    ks = jax.random.split(key, 12)

    def cw(k, cout, cin):
        return 0.1 * jax.random.normal(k, (cout, cin, 3, 3), jnp.float32)

    def cb(k, cout):
        return 0.01 * jax.random.normal(k, (cout,), jnp.float32)

    return {
        "conv1_w": cw(ks[0], 6, 9), "conv1_b": cb(ks[1], 6),
        "conv2_w": cw(ks[2], 6, 6), "conv2_b": cb(ks[3], 6),
        "conv3_w": cw(ks[4], 6, 6), "conv3_b": cb(ks[5], 6),
        "goal_w":  cw(ks[6], 1, 6), "goal_b":  cb(ks[7], 1),
        "policy_w": cw(ks[8], 6, 6), "policy_b": cb(ks[9], 6),
        "lin_w": 0.1 * jax.random.normal(ks[10], (32 * 32, 1), jnp.float32),
        "lin_b": 0.01 * jax.random.normal(ks[11], (1,), jnp.float32),
    }


if __name__ == "__main__":
    key = jax.random.PRNGKey(0)
    k_param, k_input = jax.random.split(key)

    params = init_params(k_param)
    # Spatial must be 32x32 (Flatten -> Linear(32*32, 1)); conv1 takes 9
    # channels.  batch=4 exercises batch folding (Bc=2) with a 2-step grid.
    x = jax.random.normal(k_input, (4, 9, 32, 32), jnp.float32)

    action, y_goal = environment_forward(params, x)
    jax.block_until_ready((action, y_goal))

    assert action.shape == (4, 6, 32, 32)
    assert y_goal.shape == (4, 1)

    ref_action, ref_goal = _reference_forward(params, x)
    max_err = float(jnp.max(jnp.abs(action - ref_action)))
    assert jnp.allclose(action, ref_action, atol=1e-3), (
        f"action mismatch vs reference, max|diff|={max_err}")
    assert jnp.allclose(y_goal, ref_goal, atol=1e-6), "goal mismatch vs reference"

    print("KERNEL_OK")
</pallas_src>

<mosaic_0001>
module attributes {stable_mosaic.version = 11 : i64} {
  func.func @_env_fused_kernel(%arg0: i32, %arg1: memref<9x2048xf32, #tpu.memory_space<vmem>>, %arg2: memref<1x16x2048xf32, #tpu.memory_space<vmem>>, %arg3: memref<8x144xf32, #tpu.memory_space<vmem>>, %arg4: memref<8x1xf32, #tpu.memory_space<vmem>>, %arg5: memref<8x72xf32, #tpu.memory_space<vmem>>, %arg6: memref<8x1xf32, #tpu.memory_space<vmem>>, %arg7: memref<8x72xf32, #tpu.memory_space<vmem>>, %arg8: memref<8x1xf32, #tpu.memory_space<vmem>>, %arg9: memref<8x72xf32, #tpu.memory_space<vmem>>, %arg10: memref<8x1xf32, #tpu.memory_space<vmem>>, %arg11: memref<1x1024xf32, #tpu.memory_space<vmem>>, %arg12: memref<1x1xf32, #tpu.memory_space<vmem>>, %arg13: memref<1x6x2048xf32, #tpu.memory_space<vmem>>, %arg14: memref<1x2x1xf32, #tpu.memory_space<vmem>>) attributes {dimension_semantics = [#tpu.dimension_semantics<parallel>], iteration_bounds = array<i64: 2>, scalar_prefetch = 0 : i64, scratch_operands = 0 : i64, tpu.core_type = #tpu.core_type<tc>, window_params = [{pipeline_mode = #tpu.pipeline_mode<synchronous>, transform_indices = @transform_0, window_bounds = array<i64: 9, 2048>}, {transform_indices = @transform_1, window_bounds = array<i64: 1, 16, 2048>}, {pipeline_mode = #tpu.pipeline_mode<synchronous>, transform_indices = @transform_2, window_bounds = array<i64: 8, 144>}, {pipeline_mode = #tpu.pipeline_mode<synchronous>, transform_indices = @transform_3, window_bounds = array<i64: 8, 1>}, {pipeline_mode = #tpu.pipeline_mode<synchronous>, transform_indices = @transform_4, window_bounds = array<i64: 8, 72>}, {pipeline_mode = #tpu.pipeline_mode<synchronous>, transform_indices = @transform_5, window_bounds = array<i64: 8, 1>}, {pipeline_mode = #tpu.pipeline_mode<synchronous>, transform_indices = @transform_6, window_bounds = array<i64: 8, 72>}, {pipeline_mode = #tpu.pipeline_mode<synchronous>, transform_indices = @transform_7, window_bounds = array<i64: 8, 1>}, {pipeline_mode = #tpu.pipeline_mode<synchronous>, transform_indices = @transform_8, window_bounds = array<i64: 8, 72>}, {pipeline_mode = #tpu.pipeline_mode<synchronous>, transform_indices = @transform_9, window_bounds = array<i64: 8, 1>}, {pipeline_mode = #tpu.pipeline_mode<synchronous>, transform_indices = @transform_10, window_bounds = array<i64: 1, 1024>}, {pipeline_mode = #tpu.pipeline_mode<synchronous>, transform_indices = @transform_11, window_bounds = array<i64: 1, 1>}, {transform_indices = @transform_12, window_bounds = array<i64: 1, 6, 2048>}, {transform_indices = @transform_13, window_bounds = array<i64: 1, 2, 1>}]} {
    %c0 = arith.constant 0 : index
    %c0_0 = arith.constant 0 : index
    %0 = vector.load %arg1[%c0, %c0_0] : memref<9x2048xf32, #tpu.memory_space<vmem>>, vector<9x2048xf32>
    %c0_1 = arith.constant 0 : index
    %c0_2 = arith.constant 0 : index
    %c0_3 = arith.constant 0 : index
    %1 = vector.load %arg2[%c0_1, %c0_2, %c0_3] : memref<1x16x2048xf32, #tpu.memory_space<vmem>>, vector<1x16x2048xf32>
    %2 = vector.shape_cast %1 : vector<1x16x2048xf32> to vector<16x2048xf32>
    %c33_i32 = arith.constant 33 : i32
    %3 = tpu.dynamic_rotate %2 by %c33_i32 dim 1 : vector<16x2048xf32>, i32 -> vector<16x2048xf32>
    %4 = vector.extract_strided_slice %0 {offsets = [0, 0], sizes = [1, 2048], strides = [1, 1]} : vector<9x2048xf32> to vector<1x2048xf32>
    %5 = vector.broadcast %4 : vector<1x2048xf32> to vector<16x2048xf32>
    %6 = arith.mulf %3, %5 : vector<16x2048xf32>
    %c32_i32 = arith.constant 32 : i32
    %7 = tpu.dynamic_rotate %2 by %c32_i32 dim 1 : vector<16x2048xf32>, i32 -> vector<16x2048xf32>
    %8 = vector.extract_strided_slice %0 {offsets = [1, 0], sizes = [1, 2048], strides = [1, 1]} : vector<9x2048xf32> to vector<1x2048xf32>
    %9 = vector.broadcast %8 : vector<1x2048xf32> to vector<16x2048xf32>
    %10 = arith.mulf %7, %9 : vector<16x2048xf32>
    %c31_i32 = arith.constant 31 : i32
    %11 = tpu.dynamic_rotate %2 by %c31_i32 dim 1 : vector<16x2048xf32>, i32 -> vector<16x2048xf32>
    %12 = vector.extract_strided_slice %0 {offsets = [2, 0], sizes = [1, 2048], strides = [1, 1]} : vector<9x2048xf32> to vector<1x2048xf32>
    %13 = vector.broadcast %12 : vector<1x2048xf32> to vector<16x2048xf32>
    %14 = arith.mulf %11, %13 : vector<16x2048xf32>
    %c1_i32 = arith.constant 1 : i32
    %15 = tpu.dynamic_rotate %2 by %c1_i32 dim 1 : vector<16x2048xf32>, i32 -> vector<16x2048xf32>
    %16 = vector.extract_strided_slice %0 {offsets = [3, 0], sizes = [1, 2048], strides = [1, 1]} : vector<9x2048xf32> to vector<1x2048xf32>
    %17 = vector.broadcast %16 : vector<1x2048xf32> to vector<16x2048xf32>
    %18 = arith.mulf %15, %17 : vector<16x2048xf32>
    %c2047_i32 = arith.constant 2047 : i32
    %19 = tpu.dynamic_rotate %2 by %c2047_i32 dim 1 : vector<16x2048xf32>, i32 -> vector<16x2048xf32>
    %20 = vector.extract_strided_slice %0 {offsets = [5, 0], sizes = [1, 2048], strides = [1, 1]} : vector<9x2048xf32> to vector<1x2048xf32>
    %21 = vector.broadcast %20 : vector<1x2048xf32> to vector<16x2048xf32>
    %22 = arith.mulf %19, %21 : vector<16x2048xf32>
    %c2017_i32 = arith.constant 2017 : i32
    %23 = tpu.dynamic_rotate %2 by %c2017_i32 dim 1 : vector<16x2048xf32>, i32 -> vector<16x2048xf32>
    %24 = vector.extract_strided_slice %0 {offsets = [6, 0], sizes = [1, 2048], strides = [1, 1]} : vector<9x2048xf32> to vector<1x2048xf32>
    %25 = vector.broadcast %24 : vector<1x2048xf32> to vector<16x2048xf32>
    %26 = arith.mulf %23, %25 : vector<16x2048xf32>
    %c2016_i32 = arith.constant 2016 : i32
    %27 = tpu.dynamic_rotate %2 by %c2016_i32 dim 1 : vector<16x2048xf32>, i32 -> vector<16x2048xf32>
    %28 = vector.extract_strided_slice %0 {offsets = [7, 0], sizes = [1, 2048], strides = [1, 1]} : vector<9x2048xf32> to vector<1x2048xf32>
    %29 = vector.broadcast %28 : vector<1x2048xf32> to vector<16x2048xf32>
    %30 = arith.mulf %27, %29 : vector<16x2048xf32>
    %c2015_i32 = arith.constant 2015 : i32
    %31 = tpu.dynamic_rotate %2 by %c2015_i32 dim 1 : vector<16x2048xf32>, i32 -> vector<16x2048xf32>
    %32 = vector.extract_strided_slice %0 {offsets = [8, 0], sizes = [1, 2048], strides = [1, 1]} : vector<9x2048xf32> to vector<1x2048xf32>
    %33 = vector.broadcast %32 : vector<1x2048xf32> to vector<16x2048xf32>
    %34 = arith.mulf %31, %33 : vector<16x2048xf32>
    %35 = tpu.concatenate %6, %10, %14, %18, %2, %22, %26, %30, %34 in 0 : vector<16x2048xf32>, vector<16x2048xf32>, vector<16x2048xf32>, vector<16x2048xf32>, vector<16x2048xf32>, vector<16x2048xf32>, vector<16x2048xf32>, vector<16x2048xf32>, vector<16x2048xf32> -> vector<144x2048xf32>
    %c0_4 = arith.constant 0 : index
    %c0_5 = arith.constant 0 : index
    %36 = vector.load %arg3[%c0_4, %c0_5] : memref<8x144xf32, #tpu.memory_space<vmem>>, vector<8x144xf32>
    %cst = arith.constant dense<0.000000e+00> : vector<8x2048xf32>
    %37 = tpu.matmul %36, %35, %cst {dimension_numbers = #tpu.dot_dimension_numbers<[1], [0], [0], [1], [0, 0, 1, 1], [], []>} : vector<8x144xf32>, vector<144x2048xf32>, vector<8x2048xf32> -> vector<8x2048xf32>
    %c0_6 = arith.constant 0 : index
    %c0_7 = arith.constant 0 : index
    %38 = vector.load %arg4[%c0_6, %c0_7] : memref<8x1xf32, #tpu.memory_space<vmem>>, vector<8x1xf32>
    %39 = vector.broadcast %38 : vector<8x1xf32> to vector<8x2048xf32>
    %40 = arith.addf %37, %39 : vector<8x2048xf32>
    %cst_8 = arith.constant 0.000000e+00 : f32
    %41 = vector.broadcast %cst_8 : f32 to vector<8x2048xf32>
    %42 = arith.maximumf %40, %41 : vector<8x2048xf32>
    %c33_i32_9 = arith.constant 33 : i32
    %43 = tpu.dynamic_rotate %42 by %c33_i32_9 dim 1 : vector<8x2048xf32>, i32 -> vector<8x2048xf32>
    %44 = vector.extract_strided_slice %0 {offsets = [0, 0], sizes = [1, 2048], strides = [1, 1]} : vector<9x2048xf32> to vector<1x2048xf32>
    %45 = vector.broadcast %44 : vector<1x2048xf32> to vector<8x2048xf32>
    %46 = arith.mulf %43, %45 : vector<8x2048xf32>
    %c32_i32_10 = arith.constant 32 : i32
    %47 = tpu.dynamic_rotate %42 by %c32_i32_10 dim 1 : vector<8x2048xf32>, i32 -> vector<8x2048xf32>
    %48 = vector.extract_strided_slice %0 {offsets = [1, 0], sizes = [1, 2048], strides = [1, 1]} : vector<9x2048xf32> to vector<1x2048xf32>
    %49 = vector.broadcast %48 : vector<1x2048xf32> to vector<8x2048xf32>
    %50 = arith.mulf %47, %49 : vector<8x2048xf32>
    %c31_i32_11 = arith.constant 31 : i32
    %51 = tpu.dynamic_rotate %42 by %c31_i32_11 dim 1 : vector<8x2048xf32>, i32 -> vector<8x2048xf32>
    %52 = vector.extract_strided_slice %0 {offsets = [2, 0], sizes = [1, 2048], strides = [1, 1]} : vector<9x2048xf32> to vector<1x2048xf32>
    %53 = vector.broadcast %52 : vector<1x2048xf32> to vector<8x2048xf32>
    %54 = arith.mulf %51, %53 : vector<8x2048xf32>
    %c1_i32_12 = arith.constant 1 : i32
    %55 = tpu.dynamic_rotate %42 by %c1_i32_12 dim 1 : vector<8x2048xf32>, i32 -> vector<8x2048xf32>
    %56 = vector.extract_strided_slice %0 {offsets = [3, 0], sizes = [1, 2048], strides = [1, 1]} : vector<9x2048xf32> to vector<1x2048xf32>
    %57 = vector.broadcast %56 : vector<1x2048xf32> to vector<8x2048xf32>
    %58 = arith.mulf %55, %57 : vector<8x2048xf32>
    %c2047_i32_13 = arith.constant 2047 : i32
    %59 = tpu.dynamic_rotate %42 by %c2047_i32_13 dim 1 : vector<8x2048xf32>, i32 -> vector<8x2048xf32>
    %60 = vector.extract_strided_slice %0 {offsets = [5, 0], sizes = [1, 2048], strides = [1, 1]} : vector<9x2048xf32> to vector<1x2048xf32>
    %61 = vector.broadcast %60 : vector<1x2048xf32> to vector<8x2048xf32>
    %62 = arith.mulf %59, %61 : vector<8x2048xf32>
    %c2017_i32_14 = arith.constant 2017 : i32
    %63 = tpu.dynamic_rotate %42 by %c2017_i32_14 dim 1 : vector<8x2048xf32>, i32 -> vector<8x2048xf32>
    %64 = vector.extract_strided_slice %0 {offsets = [6, 0], sizes = [1, 2048], strides = [1, 1]} : vector<9x2048xf32> to vector<1x2048xf32>
    %65 = vector.broadcast %64 : vector<1x2048xf32> to vector<8x2048xf32>
    %66 = arith.mulf %63, %65 : vector<8x2048xf32>
    %c2016_i32_15 = arith.constant 2016 : i32
    %67 = tpu.dynamic_rotate %42 by %c2016_i32_15 dim 1 : vector<8x2048xf32>, i32 -> vector<8x2048xf32>
    %68 = vector.extract_strided_slice %0 {offsets = [7, 0], sizes = [1, 2048], strides = [1, 1]} : vector<9x2048xf32> to vector<1x2048xf32>
    %69 = vector.broadcast %68 : vector<1x2048xf32> to vector<8x2048xf32>
    %70 = arith.mulf %67, %69 : vector<8x2048xf32>
    %c2015_i32_16 = arith.constant 2015 : i32
    %71 = tpu.dynamic_rotate %42 by %c2015_i32_16 dim 1 : vector<8x2048xf32>, i32 -> vector<8x2048xf32>
    %72 = vector.extract_strided_slice %0 {offsets = [8, 0], sizes = [1, 2048], strides = [1, 1]} : vector<9x2048xf32> to vector<1x2048xf32>
    %73 = vector.broadcast %72 : vector<1x2048xf32> to vector<8x2048xf32>
    %74 = arith.mulf %71, %73 : vector<8x2048xf32>
    %75 = tpu.concatenate %46, %50, %54, %58, %42, %62, %66, %70, %74 in 0 : vector<8x2048xf32>, vector<8x2048xf32>, vector<8x2048xf32>, vector<8x2048xf32>, vector<8x2048xf32>, vector<8x2048xf32>, vector<8x2048xf32>, vector<8x2048xf32>, vector<8x2048xf32> -> vector<72x2048xf32>
    %c0_17 = arith.constant 0 : index
    %c0_18 = arith.constant 0 : index
    %76 = vector.load %arg5[%c0_17, %c0_18] : memref<8x72xf32, #tpu.memory_space<vmem>>, vector<8x72xf32>
    %cst_19 = arith.constant dense<0.000000e+00> : vector<8x2048xf32>
    %77 = tpu.matmul %76, %75, %cst_19 {dimension_numbers = #tpu.dot_dimension_numbers<[1], [0], [0], [1], [0, 0, 1, 1], [], []>} : vector<8x72xf32>, vector<72x2048xf32>, vector<8x2048xf32> -> vector<8x2048xf32>
    %c0_20 = arith.constant 0 : index
    %c0_21 = arith.constant 0 : index
    %78 = vector.load %arg6[%c0_20, %c0_21] : memref<8x1xf32, #tpu.memory_space<vmem>>, vector<8x1xf32>
    %79 = vector.broadcast %78 : vector<8x1xf32> to vector<8x2048xf32>
    %80 = arith.addf %77, %79 : vector<8x2048xf32>
    %cst_22 = arith.constant 0.000000e+00 : f32
    %81 = vector.broadcast %cst_22 : f32 to vector<8x2048xf32>
    %82 = arith.maximumf %80, %81 : vector<8x2048xf32>
    %c33_i32_23 = arith.constant 33 : i32
    %83 = tpu.dynamic_rotate %82 by %c33_i32_23 dim 1 : vector<8x2048xf32>, i32 -> vector<8x2048xf32>
    %84 = vector.extract_strided_slice %0 {offsets = [0, 0], sizes = [1, 2048], strides = [1, 1]} : vector<9x2048xf32> to vector<1x2048xf32>
    %85 = vector.broadcast %84 : vector<1x2048xf32> to vector<8x2048xf32>
    %86 = arith.mulf %83, %85 : vector<8x2048xf32>
    %c32_i32_24 = arith.constant 32 : i32
    %87 = tpu.dynamic_rotate %82 by %c32_i32_24 dim 1 : vector<8x2048xf32>, i32 -> vector<8x2048xf32>
    %88 = vector.extract_strided_slice %0 {offsets = [1, 0], sizes = [1, 2048], strides = [1, 1]} : vector<9x2048xf32> to vector<1x2048xf32>
    %89 = vector.broadcast %88 : vector<1x2048xf32> to vector<8x2048xf32>
    %90 = arith.mulf %87, %89 : vector<8x2048xf32>
    %c31_i32_25 = arith.constant 31 : i32
    %91 = tpu.dynamic_rotate %82 by %c31_i32_25 dim 1 : vector<8x2048xf32>, i32 -> vector<8x2048xf32>
    %92 = vector.extract_strided_slice %0 {offsets = [2, 0], sizes = [1, 2048], strides = [1, 1]} : vector<9x2048xf32> to vector<1x2048xf32>
    %93 = vector.broadcast %92 : vector<1x2048xf32> to vector<8x2048xf32>
    %94 = arith.mulf %91, %93 : vector<8x2048xf32>
    %c1_i32_26 = arith.constant 1 : i32
    %95 = tpu.dynamic_rotate %82 by %c1_i32_26 dim 1 : vector<8x2048xf32>, i32 -> vector<8x2048xf32>
    %96 = vector.extract_strided_slice %0 {offsets = [3, 0], sizes = [1, 2048], strides = [1, 1]} : vector<9x2048xf32> to vector<1x2048xf32>
    %97 = vector.broadcast %96 : vector<1x2048xf32> to vector<8x2048xf32>
    %98 = arith.mulf %95, %97 : vector<8x2048xf32>
    %c2047_i32_27 = arith.constant 2047 : i32
    %99 = tpu.dynamic_rotate %82 by %c2047_i32_27 dim 1 : vector<8x2048xf32>, i32 -> vector<8x2048xf32>
    %100 = vector.extract_strided_slice %0 {offsets = [5, 0], sizes = [1, 2048], strides = [1, 1]} : vector<9x2048xf32> to vector<1x2048xf32>
    %101 = vector.broadcast %100 : vector<1x2048xf32> to vector<8x2048xf32>
    %102 = arith.mulf %99, %101 : vector<8x2048xf32>
    %c2017_i32_28 = arith.constant 2017 : i32
    %103 = tpu.dynamic_rotate %82 by %c2017_i32_28 dim 1 : vector<8x2048xf32>, i32 -> vector<8x2048xf32>
    %104 = vector.extract_strided_slice %0 {offsets = [6, 0], sizes = [1, 2048], strides = [1, 1]} : vector<9x2048xf32> to vector<1x2048xf32>
    %105 = vector.broadcast %104 : vector<1x2048xf32> to vector<8x2048xf32>
    %106 = arith.mulf %103, %105 : vector<8x2048xf32>
    %c2016_i32_29 = arith.constant 2016 : i32
    %107 = tpu.dynamic_rotate %82 by %c2016_i32_29 dim 1 : vector<8x2048xf32>, i32 -> vector<8x2048xf32>
    %108 = vector.extract_strided_slice %0 {offsets = [7, 0], sizes = [1, 2048], strides = [1, 1]} : vector<9x2048xf32> to vector<1x2048xf32>
    %109 = vector.broadcast %108 : vector<1x2048xf32> to vector<8x2048xf32>
    %110 = arith.mulf %107, %109 : vector<8x2048xf32>
    %c2015_i32_30 = arith.constant 2015 : i32
    %111 = tpu.dynamic_rotate %82 by %c2015_i32_30 dim 1 : vector<8x2048xf32>, i32 -> vector<8x2048xf32>
    %112 = vector.extract_strided_slice %0 {offsets = [8, 0], sizes = [1, 2048], strides = [1, 1]} : vector<9x2048xf32> to vector<1x2048xf32>
    %113 = vector.broadcast %112 : vector<1x2048xf32> to vector<8x2048xf32>
    %114 = arith.mulf %111, %113 : vector<8x2048xf32>
    %115 = tpu.concatenate %86, %90, %94, %98, %82, %102, %106, %110, %114 in 0 : vector<8x2048xf32>, vector<8x2048xf32>, vector<8x2048xf32>, vector<8x2048xf32>, vector<8x2048xf32>, vector<8x2048xf32>, vector<8x2048xf32>, vector<8x2048xf32>, vector<8x2048xf32> -> vector<72x2048xf32>
    %c0_31 = arith.constant 0 : index
    %c0_32 = arith.constant 0 : index
    %116 = vector.load %arg7[%c0_31, %c0_32] : memref<8x72xf32, #tpu.memory_space<vmem>>, vector<8x72xf32>
    %cst_33 = arith.constant dense<0.000000e+00> : vector<8x2048xf32>
    %117 = tpu.matmul %116, %115, %cst_33 {dimension_numbers = #tpu.dot_dimension_numbers<[1], [0], [0], [1], [0, 0, 1, 1], [], []>} : vector<8x72xf32>, vector<72x2048xf32>, vector<8x2048xf32> -> vector<8x2048xf32>
    %c0_34 = arith.constant 0 : index
    %c0_35 = arith.constant 0 : index
    %118 = vector.load %arg8[%c0_34, %c0_35] : memref<8x1xf32, #tpu.memory_space<vmem>>, vector<8x1xf32>
    %119 = vector.broadcast %118 : vector<8x1xf32> to vector<8x2048xf32>
    %120 = arith.addf %117, %119 : vector<8x2048xf32>
    %cst_36 = arith.constant 0.000000e+00 : f32
    %121 = vector.broadcast %cst_36 : f32 to vector<8x2048xf32>
    %122 = arith.maximumf %120, %121 : vector<8x2048xf32>
    %c33_i32_37 = arith.constant 33 : i32
    %123 = tpu.dynamic_rotate %122 by %c33_i32_37 dim 1 : vector<8x2048xf32>, i32 -> vector<8x2048xf32>
    %124 = vector.extract_strided_slice %0 {offsets = [0, 0], sizes = [1, 2048], strides = [1, 1]} : vector<9x2048xf32> to vector<1x2048xf32>
    %125 = vector.broadcast %124 : vector<1x2048xf32> to vector<8x2048xf32>
    %126 = arith.mulf %123, %125 : vector<8x2048xf32>
    %c32_i32_38 = arith.constant 32 : i32
    %127 = tpu.dynamic_rotate %122 by %c32_i32_38 dim 1 : vector<8x2048xf32>, i32 -> vector<8x2048xf32>
    %128 = vector.extract_strided_slice %0 {offsets = [1, 0], sizes = [1, 2048], strides = [1, 1]} : vector<9x2048xf32> to vector<1x2048xf32>
    %129 = vector.broadcast %128 : vector<1x2048xf32> to vector<8x2048xf32>
    %130 = arith.mulf %127, %129 : vector<8x2048xf32>
    %c31_i32_39 = arith.constant 31 : i32
    %131 = tpu.dynamic_rotate %122 by %c31_i32_39 dim 1 : vector<8x2048xf32>, i32 -> vector<8x2048xf32>
    %132 = vector.extract_strided_slice %0 {offsets = [2, 0], sizes = [1, 2048], strides = [1, 1]} : vector<9x2048xf32> to vector<1x2048xf32>
    %133 = vector.broadcast %132 : vector<1x2048xf32> to vector<8x2048xf32>
    %134 = arith.mulf %131, %133 : vector<8x2048xf32>
    %c1_i32_40 = arith.constant 1 : i32
    %135 = tpu.dynamic_rotate %122 by %c1_i32_40 dim 1 : vector<8x2048xf32>, i32 -> vector<8x2048xf32>
    %136 = vector.extract_strided_slice %0 {offsets = [3, 0], sizes = [1, 2048], strides = [1, 1]} : vector<9x2048xf32> to vector<1x2048xf32>
    %137 = vector.broadcast %136 : vector<1x2048xf32> to vector<8x2048xf32>
    %138 = arith.mulf %135, %137 : vector<8x2048xf32>
    %c2047_i32_41 = arith.constant 2047 : i32
    %139 = tpu.dynamic_rotate %122 by %c2047_i32_41 dim 1 : vector<8x2048xf32>, i32 -> vector<8x2048xf32>
    %140 = vector.extract_strided_slice %0 {offsets = [5, 0], sizes = [1, 2048], strides = [1, 1]} : vector<9x2048xf32> to vector<1x2048xf32>
    %141 = vector.broadcast %140 : vector<1x2048xf32> to vector<8x2048xf32>
    %142 = arith.mulf %139, %141 : vector<8x2048xf32>
    %c2017_i32_42 = arith.constant 2017 : i32
    %143 = tpu.dynamic_rotate %122 by %c2017_i32_42 dim 1 : vector<8x2048xf32>, i32 -> vector<8x2048xf32>
    %144 = vector.extract_strided_slice %0 {offsets = [6, 0], sizes = [1, 2048], strides = [1, 1]} : vector<9x2048xf32> to vector<1x2048xf32>
    %145 = vector.broadcast %144 : vector<1x2048xf32> to vector<8x2048xf32>
    %146 = arith.mulf %143, %145 : vector<8x2048xf32>
    %c2016_i32_43 = arith.constant 2016 : i32
    %147 = tpu.dynamic_rotate %122 by %c2016_i32_43 dim 1 : vector<8x2048xf32>, i32 -> vector<8x2048xf32>
    %148 = vector.extract_strided_slice %0 {offsets = [7, 0], sizes = [1, 2048], strides = [1, 1]} : vector<9x2048xf32> to vector<1x2048xf32>
    %149 = vector.broadcast %148 : vector<1x2048xf32> to vector<8x2048xf32>
    %150 = arith.mulf %147, %149 : vector<8x2048xf32>
    %c2015_i32_44 = arith.constant 2015 : i32
    %151 = tpu.dynamic_rotate %122 by %c2015_i32_44 dim 1 : vector<8x2048xf32>, i32 -> vector<8x2048xf32>
    %152 = vector.extract_strided_slice %0 {offsets = [8, 0], sizes = [1, 2048], strides = [1, 1]} : vector<9x2048xf32> to vector<1x2048xf32>
    %153 = vector.broadcast %152 : vector<1x2048xf32> to vector<8x2048xf32>
    %154 = arith.mulf %151, %153 : vector<8x2048xf32>
    %155 = tpu.concatenate %126, %130, %134, %138, %122, %142, %146, %150, %154 in 0 : vector<8x2048xf32>, vector<8x2048xf32>, vector<8x2048xf32>, vector<8x2048xf32>, vector<8x2048xf32>, vector<8x2048xf32>, vector<8x2048xf32>, vector<8x2048xf32>, vector<8x2048xf32> -> vector<72x2048xf32>
    %c0_45 = arith.constant 0 : index
    %c0_46 = arith.constant 0 : index
    %156 = vector.load %arg9[%c0_45, %c0_46] : memref<8x72xf32, #tpu.memory_space<vmem>>, vector<8x72xf32>
    %cst_47 = arith.constant dense<0.000000e+00> : vector<8x2048xf32>
    %157 = tpu.matmul %156, %155, %cst_47 {dimension_numbers = #tpu.dot_dimension_numbers<[1], [0], [0], [1], [0, 0, 1, 1], [], []>} : vector<8x72xf32>, vector<72x2048xf32>, vector<8x2048xf32> -> vector<8x2048xf32>
    %c0_48 = arith.constant 0 : index
    %c0_49 = arith.constant 0 : index
    %158 = vector.load %arg10[%c0_48, %c0_49] : memref<8x1xf32, #tpu.memory_space<vmem>>, vector<8x1xf32>
    %159 = vector.broadcast %158 : vector<8x1xf32> to vector<8x2048xf32>
    %160 = arith.addf %157, %159 : vector<8x2048xf32>
    %cst_50 = arith.constant 0.000000e+00 : f32
    %161 = vector.broadcast %cst_50 : f32 to vector<8x2048xf32>
    %162 = arith.maximumf %160, %161 : vector<8x2048xf32>
    %163 = vector.extract_strided_slice %162 {offsets = [0, 0], sizes = [6, 2048], strides = [1, 1]} : vector<8x2048xf32> to vector<6x2048xf32>
    %164 = arith.negf %163 : vector<6x2048xf32>
    %165 = math.exp %164 : vector<6x2048xf32>
    %cst_51 = arith.constant 1.000000e+00 : f32
    %166 = vector.broadcast %cst_51 : f32 to vector<6x2048xf32>
    %167 = arith.addf %166, %165 : vector<6x2048xf32>
    %168 = arith.divf %166, %167 : vector<6x2048xf32>
    %c0_52 = arith.constant 0 : index
    %c0_53 = arith.constant 0 : index
    %c0_54 = arith.constant 0 : index
    %169 = vector.load %arg13[%c0_52, %c0_53, %c0_54] : memref<1x6x2048xf32, #tpu.memory_space<vmem>>, vector<1x6x2048xf32>
    %170 = vector.shape_cast %169 : vector<1x6x2048xf32> to vector<6x2048xf32>
    %171 = vector.shape_cast %168 : vector<6x2048xf32> to vector<1x6x2048xf32>
    tpu.vector_store %arg13[%c0_52, %c0_53, %c0_54], %171 {strides = array<i32>} : memref<1x6x2048xf32, #tpu.memory_space<vmem>>, vector<1x6x2048xf32>,
    %172 = vector.extract_strided_slice %162 {offsets = [6, 0], sizes = [1, 2048], strides = [1, 1]} : vector<8x2048xf32> to vector<1x2048xf32>
    %c0_55 = arith.constant 0 : index
    %c0_56 = arith.constant 0 : index
    %173 = vector.load %arg11[%c0_55, %c0_56] : memref<1x1024xf32, #tpu.memory_space<vmem>>, vector<1x1024xf32>
    %c0_57 = arith.constant 0 : index
    %c0_58 = arith.constant 0 : index
    %174 = vector.load %arg12[%c0_57, %c0_58] : memref<1x1xf32, #tpu.memory_space<vmem>>, vector<1x1xf32>
    %175 = tpu.iota {dimensions = array<i32: 0>} : vector<2x1xi32>
    %cst_59 = arith.constant 0.000000e+00 : f32
    %176 = vector.broadcast %cst_59 : f32 to vector<2x1xf32>
    %177 = vector.extract_strided_slice %172 {offsets = [0, 0], sizes = [1, 1024], strides = [1, 1]} : vector<1x2048xf32> to vector<1x1024xf32>
    %178 = arith.mulf %177, %173 : vector<1x1024xf32>
    %cst_60 = arith.constant dense<0.000000e+00> : vector<1xf32>
    %179 = vector.multi_reduction <add>, %178, %cst_60 [1] : vector<1x1024xf32> to vector<1xf32>
    %180 = vector.shape_cast %179 : vector<1xf32> to vector<1x1xf32>
    %181 = arith.addf %180, %174 : vector<1x1xf32>
    %cst_61 = arith.constant dense<0xFF800000> : vector<1xf32>
    %182 = vector.multi_reduction <maximumf>, %181, %cst_61 [1] : vector<1x1xf32> to vector<1xf32>
    %183 = vector.shape_cast %182 : vector<1xf32> to vector<1x1xf32>
    %184 = arith.subf %181, %183 : vector<1x1xf32>
    %185 = math.exp %184 : vector<1x1xf32>
    %cst_62 = arith.constant dense<0.000000e+00> : vector<1xf32>
    %186 = vector.multi_reduction <add>, %185, %cst_62 [1] : vector<1x1xf32> to vector<1xf32>
    %187 = vector.shape_cast %186 : vector<1xf32> to vector<1x1xf32>
    %188 = arith.divf %185, %187 : vector<1x1xf32>
    %c0_i32 = arith.constant 0 : i32
    %189 = vector.broadcast %c0_i32 : i32 to vector<2x1xi32>
    %190 = arith.cmpi eq, %175, %189 : vector<2x1xi32>
    %cst_63 = arith.constant 0.000000e+00 : f32
    %191 = vector.shape_cast %188 : vector<1x1xf32> to vector<1x1xf32>
    %192 = vector.broadcast %191 : vector<1x1xf32> to vector<2x1xf32>
    %193 = vector.broadcast %cst_63 : f32 to vector<2x1xf32>
    %194 = arith.select %190, %192, %193 : vector<2x1xi1>, vector<2x1xf32>
    %195 = arith.addf %176, %194 : vector<2x1xf32>
    %196 = vector.extract_strided_slice %172 {offsets = [0, 1024], sizes = [1, 1024], strides = [1, 1]} : vector<1x2048xf32> to vector<1x1024xf32>
    %197 = arith.mulf %196, %173 : vector<1x1024xf32>
    %cst_64 = arith.constant dense<0.000000e+00> : vector<1xf32>
    %198 = vector.multi_reduction <add>, %197, %cst_64 [1] : vector<1x1024xf32> to vector<1xf32>
    %199 = vector.shape_cast %198 : vector<1xf32> to vector<1x1xf32>
    %200 = arith.addf %199, %174 : vector<1x1xf32>
    %cst_65 = arith.constant dense<0xFF800000> : vector<1xf32>
    %201 = vector.multi_reduction <maximumf>, %200, %cst_65 [1] : vector<1x1xf32> to vector<1xf32>
    %202 = vector.shape_cast %201 : vector<1xf32> to vector<1x1xf32>
    %203 = arith.subf %200, %202 : vector<1x1xf32>
    %204 = math.exp %203 : vector<1x1xf32>
    %cst_66 = arith.constant dense<0.000000e+00> : vector<1xf32>
    %205 = vector.multi_reduction <add>, %204, %cst_66 [1] : vector<1x1xf32> to vector<1xf32>
    %206 = vector.shape_cast %205 : vector<1xf32> to vector<1x1xf32>
    %207 = arith.divf %204, %206 : vector<1x1xf32>
    %c1_i32_67 = arith.constant 1 : i32
    %208 = vector.broadcast %c1_i32_67 : i32 to vector<2x1xi32>
    %209 = arith.cmpi eq, %175, %208 : vector<2x1xi32>
    %cst_68 = arith.constant 0.000000e+00 : f32
    %210 = vector.shape_cast %207 : vector<1x1xf32> to vector<1x1xf32>
    %211 = vector.broadcast %210 : vector<1x1xf32> to vector<2x1xf32>
    %212 = vector.broadcast %cst_68 : f32 to vector<2x1xf32>
    %213 = arith.select %209, %211, %212 : vector<2x1xi1>, vector<2x1xf32>
    %214 = arith.addf %195, %213 : vector<2x1xf32>
    %c0_69 = arith.constant 0 : index
    %c0_70 = arith.constant 0 : index
    %c0_71 = arith.constant 0 : index
    %215 = vector.load %arg14[%c0_69, %c0_70, %c0_71] : memref<1x2x1xf32, #tpu.memory_space<vmem>>, vector<1x2x1xf32>
    %216 = vector.shape_cast %215 : vector<1x2x1xf32> to vector<2x1xf32>
    %217 = vector.shape_cast %214 : vector<2x1xf32> to vector<1x2x1xf32>
    tpu.vector_store %arg14[%c0_69, %c0_70, %c0_71], %217 {strides = array<i32>} : memref<1x2x1xf32, #tpu.memory_space<vmem>>, vector<1x2x1xf32>,
    return
  }
  func.func @transform_0(%arg0: i32) -> (i32, i32) {
    %c0_i32 = arith.constant 0 : i32
    %c0_i32_0 = arith.constant 0 : i32
    %c0_i32_1 = arith.constant 0 : i32
    return %c0_i32, %c0_i32_0 : i32, i32
  }
  func.func @transform_1(%arg0: i32) -> (i32, i32, i32) {
    %c0_i32 = arith.constant 0 : i32
    %c0_i32_0 = arith.constant 0 : i32
    %c0_i32_1 = arith.constant 0 : i32
    return %arg0, %c0_i32, %c0_i32_0 : i32, i32, i32
  }
  func.func @transform_2(%arg0: i32) -> (i32, i32) {
    %c0_i32 = arith.constant 0 : i32
    %c0_i32_0 = arith.constant 0 : i32
    %c0_i32_1 = arith.constant 0 : i32
    return %c0_i32, %c0_i32_0 : i32, i32
  }
  func.func @transform_3(%arg0: i32) -> (i32, i32) {
    %c0_i32 = arith.constant 0 : i32
    %c0_i32_0 = arith.constant 0 : i32
    %c0_i32_1 = arith.constant 0 : i32
    return %c0_i32, %c0_i32_0 : i32, i32
  }
  func.func @transform_4(%arg0: i32) -> (i32, i32) {
    %c0_i32 = arith.constant 0 : i32
    %c0_i32_0 = arith.constant 0 : i32
    %c0_i32_1 = arith.constant 0 : i32
    return %c0_i32, %c0_i32_0 : i32, i32
  }
  func.func @transform_5(%arg0: i32) -> (i32, i32) {
    %c0_i32 = arith.constant 0 : i32
    %c0_i32_0 = arith.constant 0 : i32
    %c0_i32_1 = arith.constant 0 : i32
    return %c0_i32, %c0_i32_0 : i32, i32
  }
  func.func @transform_6(%arg0: i32) -> (i32, i32) {
    %c0_i32 = arith.constant 0 : i32
    %c0_i32_0 = arith.constant 0 : i32
    %c0_i32_1 = arith.constant 0 : i32
    return %c0_i32, %c0_i32_0 : i32, i32
  }
  func.func @transform_7(%arg0: i32) -> (i32, i32) {
    %c0_i32 = arith.constant 0 : i32
    %c0_i32_0 = arith.constant 0 : i32
    %c0_i32_1 = arith.constant 0 : i32
    return %c0_i32, %c0_i32_0 : i32, i32
  }
  func.func @transform_8(%arg0: i32) -> (i32, i32) {
    %c0_i32 = arith.constant 0 : i32
    %c0_i32_0 = arith.constant 0 : i32
    %c0_i32_1 = arith.constant 0 : i32
    return %c0_i32, %c0_i32_0 : i32, i32
  }
  func.func @transform_9(%arg0: i32) -> (i32, i32) {
    %c0_i32 = arith.constant 0 : i32
    %c0_i32_0 = arith.constant 0 : i32
    %c0_i32_1 = arith.constant 0 : i32
    return %c0_i32, %c0_i32_0 : i32, i32
  }
  func.func @transform_10(%arg0: i32) -> (i32, i32) {
    %c0_i32 = arith.constant 0 : i32
    %c0_i32_0 = arith.constant 0 : i32
    %c0_i32_1 = arith.constant 0 : i32
    return %c0_i32, %c0_i32_0 : i32, i32
  }
  func.func @transform_11(%arg0: i32) -> (i32, i32) {
    %c0_i32 = arith.constant 0 : i32
    %c0_i32_0 = arith.constant 0 : i32
    %c0_i32_1 = arith.constant 0 : i32
    return %c0_i32, %c0_i32_0 : i32, i32
  }
  func.func @transform_12(%arg0: i32) -> (i32, i32, i32) {
    %c0_i32 = arith.constant 0 : i32
    %c0_i32_0 = arith.constant 0 : i32
    %c0_i32_1 = arith.constant 0 : i32
    return %arg0, %c0_i32, %c0_i32_0 : i32, i32, i32
  }
  func.func @transform_13(%arg0: i32) -> (i32, i32, i32) {
    %c0_i32 = arith.constant 0 : i32
    %c0_i32_0 = arith.constant 0 : i32
    %c0_i32_1 = arith.constant 0 : i32
    return %arg0, %c0_i32, %c0_i32_0 : i32, i32, i32
  }
}

</mosaic_0001>

<bundles_post_ra>
// kernel: environment_forward.1
= control target key start
LH: loop header
LB: loop body
LE: loop exit
PB: predicated region body
PF: predicated region fallthrough
CT: control target
= control target key end

     0   :  { %s7311_s27 = smov 0   ;;  %s13248_s0 = inlined_call_operand.vmem [shape: f32[9,2048], index: 0, kind: input, shape index: {}]   ;;  %s13249_s1 = inlined_call_operand.vmem [shape: f32[2,16,2048], index: 1, kind: input, shape index: {}]   ;;  %s13250_s2 = inlined_call_operand.vmem [shape: f32[8,144], index: 2, kind: input, shape index: {}]   ;;  %s13251_s3 = inlined_call_operand.vmem [shape: f32[8,1], index: 3, kind: input, shape index: {}]   ;;  %s13252_s4 = inlined_call_operand.vmem [shape: f32[8,72], index: 4, kind: input, shape index: {}]   ;;  %s13253_s5 = inlined_call_operand.vmem [shape: f32[8,1], index: 5, kind: input, shape index: {}]   ;;  %s13254_s6 = inlined_call_operand.vmem [shape: f32[8,72], index: 6, kind: input, shape index: {}]   ;;  %s13255_s7 = inlined_call_operand.vmem [shape: f32[8,1], index: 7, kind: input, shape index: {}]   ;;  %s13256_s8 = inlined_call_operand.vmem [shape: f32[8,72], index: 8, kind: input, shape index: {}]   ;;  %s13257_s9 = inlined_call_operand.vmem [shape: f32[8,1], index: 9, kind: input, shape index: {}]   ;;  %s13258_s10 = inlined_call_operand.vmem [shape: f32[1,1024], index: 10, kind: input, shape index: {}]   ;;  %s13259_s11 = inlined_call_operand.<no memory space> [shape: f32[1,1], index: 11, kind: input, shape index: {}]   ;;  %s13260_s12 = inlined_call_operand.vmem [shape: f32[2,6,2048], index: 12, kind: output, shape index: {0}]   ;;  %s13261_s13 = inlined_call_operand.vmem [shape: f32[2,2,1], index: 13, kind: output, shape index: {1}]  }
   0x1   :  { %v19_v0 = vstv %s13259_s11 }
   0x2   :  { %20 = vst [vmem:[#allocation2] sm:$0x1] %v19_v0 }
   0x3 LB: > { %s6309_s28 = sadd.s32 4294967295, %s7226_s27   ;;  %p6313_p0 = scmp.ge.s32.totalorder %s7226_s27, 1  ;;  %s7226_s27 = sphi %s7311_s27, %s26_s27  }
   0x4   : > { %p392_p1 = scmp.lt.s32.totalorder %s7226_s27, 3 }
   0x6   : > { %p393_p2 = pnand %p6313_p0, %p392_p1 }
   0x8   : > { %396 = sbr.rel (%p393_p2) target bundleno = 2629 (0xa45), region = 68 }
   0xf   : > { %p440_p3 = scmp.lt.s32.totalorder %s6309_s28, 1  ;;  %s7228_s15 = smov 33   ;;  %v7456_v11 = vld [vmem:[%s13250_s2 + $0x8] sm:$0xff]  ;;  %vm2072_vm0 = vcmask 130048   ;;  %v582_v16 = vlaneseq  ;;  %v7504_v20 = vld [vmem:[%s13248_s0 + $0x18] sm:$0xff]  ;;  %v7523_v25 = vld [vmem:[%s13248_s0 + $0x10] sm:$0xff] }
  0x10   : > { %s7229_s16 = smov 32   ;;  %s7230_s17 = smov 31   ;;  %6336 = vmatprep.mubr.msk.f32.mxu1 %vm2072_vm0, %v7456_v11  ;;  %6335 = vmatprep.mubr.msk.f32.mxu0 %vm2072_vm0, %v7456_v11  ;;  %vm3179_vm9 = vcmask 588800   ;;  %vm6144_vm10 = vcmask 1046534   ;;  %vm6221_vm13 = vcmask 1024  }
  0x11   : > { %s14295_s28 = smov (!%p440_p3, %s6309_s28), 1  ;;  %s7231_s18 = smov 1   ;;  %v7490_v17 = vshrl.u32 %v582_v16, 7  ;;  %v7492_v18 = vand.u32 127, %v582_v16 }
  0x12   : > { %s6386_s11 = sshll.u32 %s14295_s28, 8  ;;  %s7232_s19 = smov 127  }
  0x13   : > { %s7325_s14 = scalar_lea.vmem %s13249_s1, %s6386_s11  ;;  %s7233_s20 = smov 97   ;;  %13627 = vst [vmem:[#allocation3_spill] sm:$0xff] %v7490_v17  ;;  %v7499_v19 = vsub.s32 0, %v7490_v17  ;;  %vm584_vm1 = vcmp.lt.s32.totalorder %v7492_v18, 33  ;;  %v7555_v39 = vsub.s32 1, %v7490_v17  ;;  %vm777_vm2 = vcmp.lt.s32.totalorder %v7492_v18, 32 }
  0x14   : > { %v7328_v1 = vld [vmem:[%s7325_s14 + $0x18] sm:$0xff]  ;;  %v7331_v2 = vld [vmem:[%s7325_s14 + $0x10] sm:$0xff]  ;;  %v7348_v5 = vld [vmem:[%s7325_s14 + $0x88] sm:$0xff]  ;;  %s7234_s21 = smov 96   ;;  %s7235_s22 = smov 95   ;;  %v7609_v60 = vsub.s32 2, %v7490_v17 }
  0x15   : > { %530 = vrot.lane.b32.xlu1 %v7328_v1, %s7228_s15  ;;  %526 = vrot.lane.b32.xlu0 %v7331_v2, %s7228_s15  ;;  %v7338_v3 = vld [vmem:[%s7325_s14 + $0x98] sm:$0xff]  ;;  %v7341_v4 = vld [vmem:[%s7325_s14 + $0x90] sm:$0xff]  ;;  %13628 = vst [vmem:[#allocation4_spill] sm:$0xff] %v7499_v19  ;;  %v7515_v23 = vrot.slane %v7504_v20, %v7499_v19  ;;  %v7538_v31 = vrot.slane %v7523_v25, %v7499_v19  ;;  %13631 = vst [vmem:[#allocation7_spill] sm:$0xff] %v7555_v39  ;;  %vm970_vm3 = vcmp.lt.s32.totalorder %v7492_v18, 31 }
  0x16   : > { %v7351_v6 = vld [vmem:[%s7325_s14 + $0x8] sm:$0xff]  ;;  %v7398_v7 = vld [vmem:[%s7325_s14 + $0xa0] sm:$0xff]  ;;  %v7448_v9 = vld [vmem:[%s7325_s14 + $0xb0] sm:$0xff]  ;;  %v7564_v43 = vrot.slane %v7504_v20, %v7555_v39  ;;  %v7590_v52 = vrot.slane %v7523_v25, %v7555_v39  ;;  %13635 = vst [vmem:[#allocation11_spill] sm:$0xff] %v7609_v60  ;;  %v7618_v0 = vrot.slane %v7504_v20, %v7609_v60  ;;  %vm1163_vm4 = vcmp.lt.s32.totalorder %v7492_v18, 1 }
  0x17   : > { %v7401_v8 = vld [vmem:[%s7325_s14 + $0x20] sm:$0xff]  ;;  %v7451_v10 = vld [vmem:[%s7325_s14 + $0x30] sm:$0xff]  ;;  %v7467_v12 = vld [vmem:[%s7325_s14 + $0xb8] sm:$0xff]  ;;  %13629 = vst [vmem:[#allocation5_spill] sm:$0xff] %v7515_v23  ;;  %vm1356_vm5 = vcmp.lt.s32.totalorder %v7492_v18, 127  ;;  %vm1549_vm6 = vcmp.lt.s32.totalorder %v7492_v18, 97 }
  0x18   : > { %v7470_v13 = vld [vmem:[%s7325_s14 + $0x38] sm:$0xff]  ;;  %v7477_v14 = vld [vmem:[%s7325_s14 + $0xa8] sm:$0xff]  ;;  %13630 = vst [vmem:[#allocation6_spill] sm:$0xff] %v7538_v31  ;;  %13632 = vst [vmem:[#allocation8_spill] sm:$0xff] %v7564_v43  ;;  %vm1742_vm7 = vcmp.lt.s32.totalorder %v7492_v18, 96  ;;  %vm1935_vm8 = vcmp.lt.s32.totalorder %v7492_v18, 95 }
  0x19   : > { %532 = vrot.lane.b32.xlu1 %v7338_v3, %s7228_s15  ;;  %528 = vrot.lane.b32.xlu0 %v7341_v4, %s7228_s15  ;;  %v7480_v15 = vld [vmem:[%s7325_s14 + $0x28] sm:$0xff]  ;;  %v7569_v44 = vld [vmem:[%s7325_s14 + $0x80] sm:$0xff]  ;;  %13634 = vst [vmem:[#allocation10_spill] sm:$0xff] %v7590_v52  ;;  %13636 = vst [vmem:[#allocation12_spill] sm:$0xff] %v7618_v0 }
  0x1a   : > { %v7576_v47 = vld [vmem:[%s7325_s14] sm:$0xff]  ;;  %v7623_v16 = vld [vmem:[%s7325_s14 + $0xf8] sm:$0xff] }
  0x1d   : > { %524 = vrot.lane.b32.xlu1 %v7348_v5, %s7228_s15  ;;  %522 = vrot.lane.b32.xlu0 %v7351_v6, %s7228_s15 }
  0x21   : > { %723 = vrot.lane.b32.xlu1 %v7341_v4, %s7229_s16  ;;  %721 = vrot.lane.b32.xlu0 %v7331_v2, %s7229_s16 }
  0x25   : > { %727 = vrot.lane.b32.xlu1 %v7338_v3, %s7229_s16  ;;  %725 = vrot.lane.b32.xlu0 %v7328_v1, %s7229_s16 }
  0x29   : > { %719 = vrot.lane.b32.xlu1 %v7348_v5, %s7229_s16  ;;  %717 = vrot.lane.b32.xlu0 %v7351_v6, %s7229_s16 }
  0x2d   : > { %916 = vrot.lane.b32.xlu1 %v7341_v4, %s7230_s17  ;;  %914 = vrot.lane.b32.xlu0 %v7331_v2, %s7230_s17 }
  0x31   : > { %920 = vrot.lane.b32.xlu1 %v7338_v3, %s7230_s17  ;;  %918 = vrot.lane.b32.xlu0 %v7328_v1, %s7230_s17 }
  0x35   : > { %912 = vrot.lane.b32.xlu1 %v7348_v5, %s7230_s17  ;;  %910 = vrot.lane.b32.xlu0 %v7351_v6, %s7230_s17 }
  0x39   : > { %1109 = vrot.lane.b32.xlu1 %v7341_v4, %s7231_s18  ;;  %1107 = vrot.lane.b32.xlu0 %v7331_v2, %s7231_s18 }
  0x3d   : > { %1113 = vrot.lane.b32.xlu1 %v7338_v3, %s7231_s18  ;;  %1111 = vrot.lane.b32.xlu0 %v7328_v1, %s7231_s18 }
  0x41   : > { %1105 = vrot.lane.b32.xlu1 %v7348_v5, %s7231_s18  ;;  %1103 = vrot.lane.b32.xlu0 %v7351_v6, %s7231_s18 }
  0x45   : > { %1306 = vrot.lane.b32.xlu1 %v7338_v3, %s7232_s19  ;;  %1304 = vrot.lane.b32.xlu0 %v7328_v1, %s7232_s19 }
  0x49   : > { %1310 = vrot.lane.b32.xlu1 %v7398_v7, %s7232_s19  ;;  %1308 = vrot.lane.b32.xlu0 %v7401_v8, %s7232_s19 }
  0x4d   : > { %1302 = vrot.lane.b32.xlu1 %v7341_v4, %s7232_s19  ;;  %1300 = vrot.lane.b32.xlu0 %v7331_v2, %s7232_s19 }
  0x51   : > { %1499 = vrot.lane.b32.xlu1 %v7338_v3, %s7233_s20  ;;  %1497 = vrot.lane.b32.xlu0 %v7328_v1, %s7233_s20 }
  0x55   : > { %1503 = vrot.lane.b32.xlu1 %v7398_v7, %s7233_s20  ;;  %1501 = vrot.lane.b32.xlu0 %v7401_v8, %s7233_s20 }
  0x59   : > { %1495 = vrot.lane.b32.xlu1 %v7341_v4, %s7233_s20  ;;  %1493 = vrot.lane.b32.xlu0 %v7331_v2, %s7233_s20 }
  0x5d   : > { %1692 = vrot.lane.b32.xlu1 %v7338_v3, %s7234_s21  ;;  %1690 = vrot.lane.b32.xlu0 %v7328_v1, %s7234_s21 }
  0x61   : > { %1696 = vrot.lane.b32.xlu1 %v7398_v7, %s7234_s21  ;;  %1694 = vrot.lane.b32.xlu0 %v7401_v8, %s7234_s21 }
  0x65   : > { %1688 = vrot.lane.b32.xlu1 %v7341_v4, %s7234_s21  ;;  %1686 = vrot.lane.b32.xlu0 %v7331_v2, %s7234_s21 }
  0x69   : > { %1885 = vrot.lane.b32.xlu1 %v7338_v3, %s7235_s22  ;;  %1883 = vrot.lane.b32.xlu0 %v7328_v1, %s7235_s22 }
  0x6d   : > { %1889 = vrot.lane.b32.xlu1 %v7398_v7, %s7235_s22  ;;  %1887 = vrot.lane.b32.xlu0 %v7401_v8, %s7235_s22 }
  0x71   : > { %1881 = vrot.lane.b32.xlu1 %v7341_v4, %s7235_s22  ;;  %1879 = vrot.lane.b32.xlu0 %v7331_v2, %s7235_s22 }
  0x75   : > { %544 = vrot.lane.b32.xlu1 %v7448_v9, %s7228_s15  ;;  %542 = vrot.lane.b32.xlu0 %v7451_v10, %s7228_s15 }
  0x79   : > { %548 = vrot.lane.b32.xlu1 %v7467_v12, %s7228_s15  ;;  %546 = vrot.lane.b32.xlu0 %v7470_v13, %s7228_s15 }
  0x7d   : > { %540 = vrot.lane.b32.xlu1 %v7477_v14, %s7228_s15  ;;  %538 = vrot.lane.b32.xlu0 %v7480_v15, %s7228_s15 }
  0x81   : > { %739 = vrot.lane.b32.xlu1 %v7448_v9, %s7229_s16  ;;  %737 = vrot.lane.b32.xlu0 %v7451_v10, %s7229_s16 }
  0x85   : > { %743 = vrot.lane.b32.xlu1 %v7467_v12, %s7229_s16  ;;  %741 = vrot.lane.b32.xlu0 %v7470_v13, %s7229_s16 }
  0x87   : > { %v7506_v21 = vpop.permute.xlu1 %530  ;;  %v527_v22 = vpop.permute.xlu0 %526 }
  0x88   : > { %v609_v24 = vsel %vm584_vm1, %v527_v22, %v7506_v21 }
  0x89   : > { %735 = vrot.lane.b32.xlu1 %v7477_v14, %s7229_s16  ;;  %733 = vrot.lane.b32.xlu0 %v7480_v15, %s7229_s16  ;;  %v684_v29 = vmul.f32 %v7515_v23, %v609_v24 }
  0x8b   : > { %v7525_v26 = vpop.permute.xlu1 %532  ;;  %v529_v27 = vpop.permute.xlu0 %528 }
  0x8c   : > { %v610_v28 = vsel %vm584_vm1, %v529_v27, %v7525_v26 }
  0x8d   : > { %932 = vrot.lane.b32.xlu1 %v7448_v9, %s7230_s17  ;;  %930 = vrot.lane.b32.xlu0 %v7451_v10, %s7230_s17  ;;  %v700_v30 = vmul.f32 %v7515_v23, %v610_v28 }
  0x8f   : > { %v7540_v32 = vpop.permute.xlu1 %524  ;;  %v7542_v33 = vpop.permute.xlu0 %522  ;;  %v6424_v34 = vpack.c.bf16 %v700_v30, %v684_v29 }
  0x90   : > { %v612_v35 = vsel %vm584_vm1, %v7540_v32, %v529_v27  ;;  %v611_v36 = vsel %vm584_vm1, %v7542_v33, %v527_v22  ;;  %v7630_v27 = vld [vmem:[%s7325_s14 + $0x78] sm:$0xff] }
  0x91   : > { %936 = vrot.lane.b32.xlu1 %v7467_v12, %s7230_s17  ;;  %6425 = vmatprep.subr.bf16.mxu1 %v6424_v34  ;;  %v683_v37 = vmul.f32 %v7538_v31, %v611_v36  ;;  %v699_v38 = vmul.f32 %v7538_v31, %v612_v35  ;;  %v7644_v35 = vrot.slane %v7523_v25, %v7609_v60 }
  0x92   : > { %934 = vrot.lane.b32.xlu0 %v7470_v13, %s7230_s17 }
  0x93   : > { %v724_v40 = vpop.permute.xlu1 %723  ;;  %v722_v41 = vpop.permute.xlu0 %721  ;;  %v6426_v42 = vpack.c.bf16 %v699_v38, %v683_v37  ;;  %13639 = vst [vmem:[#allocation15_spill] sm:$0xff] %v7644_v35 }
  0x95   : > { %928 = vrot.lane.b32.xlu1 %v7477_v14, %s7230_s17  ;;  %6427 = vmatpush1.bf16.msra.mxu1 %v6426_v42 }
  0x96   : > { %926 = vrot.lane.b32.xlu0 %v7480_v15, %s7230_s17 }
  0x97   : > { %v7571_v45 = vpop.permute.xlu1 %727  ;;  %v7573_v46 = vpop.permute.xlu0 %725 }
  0x98   : > { %13633 = vst [vmem:[#allocation9_spill] sm:$0xff] %v7573_v46  ;;  %v803_v48 = vsel %vm777_vm2, %v724_v40, %v7571_v45  ;;  %v802_v49 = vsel %vm777_vm2, %v722_v41, %v7573_v46 }
  0x99   : > { %v893_v50 = vmul.f32 %v7564_v43, %v803_v48  ;;  %v877_v51 = vmul.f32 %v7564_v43, %v802_v49  ;;  %520 = vrot.lane.b32.xlu1 %v7569_v44, %s7228_s15  ;;  %v7663_v49 = vsub.s32 3, %v7490_v17 }
  0x9a   : > { %518 = vrot.lane.b32.xlu0 %v7576_v47, %s7228_s15 }
  0x9b   : > { %v7594_v53 = vpop.permute.xlu1 %719  ;;  %v7596_v54 = vpop.permute.xlu0 %717  ;;  %v6428_v55 = vpack.c.bf16 %v893_v50, %v877_v51  ;;  %13640 = vst [vmem:[#allocation16_spill] sm:$0xff] %v7663_v49 }
  0x9c   : > { %v805_v56 = vsel %vm777_vm2, %v7594_v53, %v724_v40  ;;  %v804_v57 = vsel %vm777_vm2, %v7596_v54, %v722_v41 }
  0x9d   : > { %v892_v58 = vmul.f32 %v7590_v52, %v805_v56  ;;  %v876_v59 = vmul.f32 %v7590_v52, %v804_v57  ;;  %1125 = vrot.lane.b32.xlu1 %v7448_v9, %s7231_s18  ;;  %6429 = vmatprep.subr.bf16.mxu1 %v6428_v55  ;;  %v7672_v56 = vrot.slane %v7504_v20, %v7663_v49 }
  0x9e   : > { %1123 = vrot.lane.b32.xlu0 %v7451_v10, %s7231_s18 }
  0x9f   : > { %v917_v61 = vpop.permute.xlu1 %916  ;;  %v915_v62 = vpop.permute.xlu0 %914  ;;  %v6430_v63 = vpack.c.bf16 %v892_v58, %v876_v59  ;;  %13641 = vst [vmem:[#allocation17_spill] sm:$0xff] %v7672_v56 }
  0xa1   : > { %1129 = vrot.lane.b32.xlu1 %v7467_v12, %s7231_s18  ;;  %6431 = vmatpush1.bf16.msra.mxu1 %v6430_v63 }
  0xa2   : > { %1127 = vrot.lane.b32.xlu0 %v7470_v13, %s7231_s18 }
  0xa3   : > { %v7625_v22 = vpop.permute.xlu1 %920  ;;  %v7627_v24 = vpop.permute.xlu0 %918 }
  0xa4   : > { %13637 = vst [vmem:[#allocation13_spill] sm:$0xff] %v7625_v22  ;;  %13638 = vst [vmem:[#allocation14_spill] sm:$0xff] %v7627_v24  ;;  %v996_v28 = vsel %vm970_vm3, %v917_v61, %v7625_v22  ;;  %v995_v29 = vsel %vm970_vm3, %v915_v62, %v7627_v24 }
  0xa5   : > { %v1086_v30 = vmul.f32 %v7618_v0, %v996_v28  ;;  %v1070_v34 = vmul.f32 %v7618_v0, %v995_v29  ;;  %580 = vrot.lane.b32.xlu1 %v7623_v16, %s7228_s15 }
  0xa6   : > { %578 = vrot.lane.b32.xlu0 %v7630_v27, %s7228_s15 }
  0xa7   : > { %v7648_v36 = vpop.permute.xlu1 %912  ;;  %v7650_v37 = vpop.permute.xlu0 %910  ;;  %v6432_v38 = vpack.c.bf16 %v1086_v30, %v1070_v34 }
  0xa8   : > { %v998_v40 = vsel %vm970_vm3, %v7648_v36, %v917_v61  ;;  %v997_v41 = vsel %vm970_vm3, %v7650_v37, %v915_v62  ;;  %v7692_v62 = vrot.slane %v7523_v25, %v7663_v49 }
  0xa9   : > { %v1085_v42 = vmul.f32 %v7644_v35, %v998_v40  ;;  %v1069_v48 = vmul.f32 %v7644_v35, %v997_v41  ;;  %1121 = vrot.lane.b32.xlu1 %v7477_v14, %s7231_s18  ;;  %6433 = vmatprep.subr.bf16.mxu1 %v6432_v38  ;;  %v7711_v41 = vsub.s32 5, %v7490_v17  ;;  %v7817_v35 = vsub.s32 7, %v7490_v17 }
  0xaa   : > { %1119 = vrot.lane.b32.xlu0 %v7480_v15, %s7231_s18  ;;  %13644 = vst [vmem:[#allocation20_spill] sm:$0xff] %v7692_v62 }
  0xab   : > { %v1110_v50 = vpop.permute.xlu1 %1109  ;;  %v1108_v51 = vpop.permute.xlu0 %1107  ;;  %v6434_v55 = vpack.c.bf16 %v1085_v42, %v1069_v48  ;;  %13645 = vst [vmem:[#allocation21_spill] sm:$0xff] %v7711_v41  ;;  %v6440_v42 = vpack.c.bf16 %v7338_v3, %v7328_v1  ;;  %v7729_v1 = vld [vmem:[%s7325_s14 + $0xc0] sm:$0xff]  ;;  %13655 = vst [vmem:[#allocation31_spill] sm:$0xff] %v7817_v35 }
  0xad   : > { %715 = vrot.lane.b32.xlu1 %v7569_v44, %s7229_s16  ;;  %6435 = vmatpush1.bf16.msra.mxu1 %v6434_v55  ;;  %v7722_v55 = vrot.slane %v7504_v20, %v7711_v41 }
  0xae   : > { %713 = vrot.lane.b32.xlu0 %v7576_v47, %s7229_s16 }
  0xaf   : > { %v7676_v14 = vpop.permute.xlu1 %1113  ;;  %v7678_v57 = vpop.permute.xlu0 %1111  ;;  %13646 = vst [vmem:[#allocation22_spill] sm:$0xff] %v7722_v55 }
  0xb0   : > { %13642 = vst [vmem:[#allocation18_spill] sm:$0xff] %v7676_v14  ;;  %13643 = vst [vmem:[#allocation19_spill] sm:$0xff] %v7678_v57  ;;  %v1189_v15 = vsel %vm1163_vm4, %v1110_v50, %v7676_v14  ;;  %v1188_v58 = vsel %vm1163_vm4, %v1108_v51, %v7678_v57 }
  0xb1   : > { %v1279_v59 = vmul.f32 %v7672_v56, %v1189_v15  ;;  %v1263_v61 = vmul.f32 %v7672_v56, %v1188_v58  ;;  %775 = vrot.lane.b32.xlu1 %v7623_v16, %s7229_s16  ;;  %v6442_v15 = vpack.c.bf16 %v7341_v4, %v7331_v2 }
  0xb2   : > { %773 = vrot.lane.b32.xlu0 %v7630_v27, %s7229_s16 }
  0xb3   : > { %v7696_v63 = vpop.permute.xlu1 %1105  ;;  %v7698_v28 = vpop.permute.xlu0 %1103  ;;  %v6436_v29 = vpack.c.bf16 %v1279_v59, %v1263_v61  ;;  %v7736_v59 = vld [vmem:[%s7325_s14 + $0x40] sm:$0xff] }
  0xb4   : > { %v1191_v30 = vsel %vm1163_vm4, %v7696_v63, %v1110_v50  ;;  %v1190_v34 = vsel %vm1163_vm4, %v7698_v28, %v1108_v51 }
  0xb5   : > { %v1278_v38 = vmul.f32 %v7692_v62, %v1191_v30  ;;  %v1262_v40 = vmul.f32 %v7692_v62, %v1190_v34  ;;  %908 = vrot.lane.b32.xlu1 %v7569_v44, %s7230_s17  ;;  %6437 = vmatprep.subr.bf16.mxu1 %v6436_v29  ;;  %v7750_v30 = vrot.slane %v7523_v25, %v7711_v41 }
  0xb6   : > { %906 = vrot.lane.b32.xlu0 %v7576_v47, %s7230_s17 }
  0xb7   : > { %v1307_v48 = vpop.permute.xlu1 %1306  ;;  %v1305_v50 = vpop.permute.xlu0 %1304  ;;  %v6438_v51 = vpack.c.bf16 %v1278_v38, %v1262_v40  ;;  %13649 = vst [vmem:[#allocation25_spill] sm:$0xff] %v7750_v30 }
  0xb9   : > { %1322 = vrot.lane.b32.xlu1 %v7467_v12, %s7232_s19  ;;  %6439 = vmatpush1.bf16.msra.mxu1 %v6438_v51 }
  0xba   : > { %1320 = vrot.lane.b32.xlu0 %v7470_v13, %s7232_s19  ;;  %6441 = vmatprep.subr.bf16.mxu1 %v6440_v42 }
  0xbb   : > { %v7731_v3 = vpop.permute.xlu1 %1310  ;;  %v7733_v58 = vpop.permute.xlu0 %1308 }
  0xbc   : > { %13647 = vst [vmem:[#allocation23_spill] sm:$0xff] %v7731_v3  ;;  %13648 = vst [vmem:[#allocation24_spill] sm:$0xff] %v7733_v58  ;;  %v1380_v61 = vsel %vm1356_vm5, %v1307_v48, %v7731_v3  ;;  %v1379_v2 = vsel %vm1356_vm5, %v1305_v50, %v7733_v58  ;;  %v8021_v58 = vld [vmem:[%s7325_s14 + $0x58] sm:$0xff]  ;;  %v8062_v3 = vld [vmem:[%s7325_s14 + $0x48] sm:$0xff] }
  0xbd   : > { %v1472_v4 = vmul.f32 %v7722_v55, %v1380_v61  ;;  %v1456_v29 = vmul.f32 %v7722_v55, %v1379_v2  ;;  %1326 = vrot.lane.b32.xlu1 %v7729_v1, %s7232_s19  ;;  %6443 = vmatpush1.bf16.msra.mxu1 %v6442_v15  ;;  %v7769_v2 = vsub.s32 6, %v7490_v17 }
  0xbe   : > { %1324 = vrot.lane.b32.xlu0 %v7736_v59, %s7232_s19 }
  0xbf   : > { %v7754_v34 = vpop.permute.xlu1 %1302  ;;  %v7756_v38 = vpop.permute.xlu0 %1300  ;;  %v6444_v40 = vpack.c.bf16 %v1472_v4, %v1456_v29  ;;  %13650 = vst [vmem:[#allocation26_spill] sm:$0xff] %v7769_v2  ;;  %v7798_v55 = vrot.slane %v7523_v25, %v7769_v2 }
  0xc0   : > { %v1382_v42 = vsel %vm1356_vm5, %v7754_v34, %v1307_v48  ;;  %v1381_v51 = vsel %vm1356_vm5, %v7756_v38, %v1305_v50  ;;  %v7778_v50 = vrot.slane %v7504_v20, %v7769_v2 }
  0xc1   : > { %v1471_v61 = vmul.f32 %v7750_v30, %v1382_v42  ;;  %v1455_v15 = vmul.f32 %v7750_v30, %v1381_v51  ;;  %968 = vrot.lane.b32.xlu1 %v7623_v16, %s7230_s17  ;;  %6445 = vmatprep.subr.bf16.mxu1 %v6444_v40  ;;  %13654 = vst [vmem:[#allocation30_spill] sm:$0xff] %v7798_v55 }
  0xc2   : > { %966 = vrot.lane.b32.xlu0 %v7630_v27, %s7230_s17  ;;  %13651 = vst [vmem:[#allocation27_spill] sm:$0xff] %v7778_v50 }
  0xc3   : > { %v1500_v4 = vpop.permute.xlu1 %1499  ;;  %v1498_v48 = vpop.permute.xlu0 %1497  ;;  %v6446_v29 = vpack.c.bf16 %v1471_v61, %v1455_v15 }
  0xc5   : > { %1318 = vrot.lane.b32.xlu1 %v7448_v9, %s7232_s19  ;;  %6447 = vmatpush1.bf16.msra.mxu1 %v6446_v29 }
  0xc6   : > { %1316 = vrot.lane.b32.xlu0 %v7451_v10, %s7232_s19 }
  0xc7   : > { %v7782_v40 = vpop.permute.xlu1 %1503  ;;  %v7784_v42 = vpop.permute.xlu0 %1501 }
  0xc8   : > { %13652 = vst [vmem:[#allocation28_spill] sm:$0xff] %v7782_v40  ;;  %13653 = vst [vmem:[#allocation29_spill] sm:$0xff] %v7784_v42  ;;  %v1573_v51 = vsel %vm1549_vm6, %v1500_v4, %v7782_v40  ;;  %v1572_v61 = vsel %vm1549_vm6, %v1498_v48, %v7784_v42 }
  0xc9   : > { %v1665_v15 = vmul.f32 %v7778_v50, %v1573_v51  ;;  %v1649_v29 = vmul.f32 %v7778_v50, %v1572_v61  ;;  %1101 = vrot.lane.b32.xlu1 %v7569_v44, %s7231_s18 }
  0xca   : > { %1099 = vrot.lane.b32.xlu0 %v7576_v47, %s7231_s18 }
  0xcb   : > { %v7802_v30 = vpop.permute.xlu1 %1495  ;;  %v7804_v56 = vpop.permute.xlu0 %1493  ;;  %v6448_v62 = vpack.c.bf16 %v1665_v15, %v1649_v29 }
  0xcc   : > { %v1575_v51 = vsel %vm1549_vm6, %v7802_v30, %v1500_v4  ;;  %v1574_v61 = vsel %vm1549_vm6, %v7804_v56, %v1498_v48  ;;  %v7826_v48 = vrot.slane %v7504_v20, %v7817_v35 }
  0xcd   : > { %v1664_v50 = vmul.f32 %v7798_v55, %v1575_v51  ;;  %v1648_v0 = vmul.f32 %v7798_v55, %v1574_v61  ;;  %1515 = vrot.lane.b32.xlu1 %v7467_v12, %s7233_s20  ;;  %6449 = vmatprep.subr.bf16.mxu1 %v6448_v62 }
  0xce   : > { %1513 = vrot.lane.b32.xlu0 %v7470_v13, %s7233_s20  ;;  %13656 = vst [vmem:[#allocation32_spill] sm:$0xff] %v7826_v48 }
  0xcf   : > { %v1693_v15 = vpop.permute.xlu1 %1692  ;;  %v1691_v4 = vpop.permute.xlu0 %1690  ;;  %v6450_v29 = vpack.c.bf16 %v1664_v50, %v1648_v0 }
  0xd1   : > { %1519 = vrot.lane.b32.xlu1 %v7729_v1, %s7233_s20  ;;  %6451 = vmatpush1.bf16.msra.mxu1 %v6450_v29  ;;  %v7846_v29 = vrot.slane %v7523_v25, %v7817_v35 }
  0xd2   : > { %1517 = vrot.lane.b32.xlu0 %v7736_v59, %s7233_s20 }
  0xd3   : > { %v7830_v62 = vpop.permute.xlu1 %1696  ;;  %v7832_v51 = vpop.permute.xlu0 %1694  ;;  %13659 = vst [vmem:[#allocation35_spill] sm:$0xff] %v7846_v29 }
  0xd4   : > { %13657 = vst [vmem:[#allocation33_spill] sm:$0xff] %v7830_v62  ;;  %13658 = vst [vmem:[#allocation34_spill] sm:$0xff] %v7832_v51  ;;  %v1766_v0 = vsel %vm1742_vm7, %v1693_v15, %v7830_v62  ;;  %v1765_v50 = vsel %vm1742_vm7, %v1691_v4, %v7832_v51 }
  0xd5   : > { %v1858_v61 = vmul.f32 %v7826_v48, %v1766_v0  ;;  %v1842_v20 = vmul.f32 %v7826_v48, %v1765_v50  ;;  %1161 = vrot.lane.b32.xlu1 %v7623_v16, %s7231_s18 }
  0xd6   : > { %1159 = vrot.lane.b32.xlu0 %v7630_v27, %s7231_s18 }
  0xd7   : > { %v7850_v17 = vpop.permute.xlu1 %1688  ;;  %v7852_v55 = vpop.permute.xlu0 %1686  ;;  %v6452_v43 = vpack.c.bf16 %v1858_v61, %v1842_v20 }
  0xd8   : > { %v1768_v0 = vsel %vm1742_vm7, %v7850_v17, %v1693_v15  ;;  %v1767_v16 = vsel %vm1742_vm7, %v7852_v55, %v1691_v4  ;;  %v6322_v15 = vld [vmem:[%s13248_s0 + $0x98] ss:$0 sm:$0xff] }
  0xd9   : > { %v1857_v50 = vmul.f32 %v7846_v29, %v1768_v0  ;;  %v1841_v25 = vmul.f32 %v7846_v29, %v1767_v16  ;;  %1511 = vrot.lane.b32.xlu1 %v7448_v9, %s7233_s20  ;;  %6453 = vmatprep.subr.bf16.mxu1 %v6452_v43 }
  0xda   : > { %1509 = vrot.lane.b32.xlu0 %v7451_v10, %s7233_s20 }
  0xdb   : > { %v1886_v27 = vpop.permute.xlu1 %1885  ;;  %v1884_v61 = vpop.permute.xlu0 %1883  ;;  %v6454_v20 = vpack.c.bf16 %v1857_v50, %v1841_v25 }
  0xdd   : > { %1708 = vrot.lane.b32.xlu1 %v7467_v12, %s7234_s21  ;;  %6455 = vmatpush1.bf16.msra.mxu1 %v6454_v20  ;;  %v6321_v20 = vld [vmem:[%s13248_s0 + $0x90] ss:$0 sm:$0xff] }
  0xde   : > { %1706 = vrot.lane.b32.xlu0 %v7470_v13, %s7234_s21 }
  0xdf   : > { %v7874_v43 = vpop.permute.xlu1 %1889  ;;  %v7876_v4 = vpop.permute.xlu0 %1887 }
  0xe0   : > { %13660 = vst [vmem:[#allocation36_spill] sm:$0xff] %v7874_v43  ;;  %13661 = vst [vmem:[#allocation37_spill] sm:$0xff] %v7876_v4  ;;  %v1959_v0 = vsel %vm1935_vm8, %v1886_v27, %v7874_v43  ;;  %v1958_v16 = vsel %vm1935_vm8, %v1884_v61, %v7876_v4 }
  0xe1   : > { %v2051_v50 = vmul.f32 %v6322_v15, %v1959_v0  ;;  %v2035_v25 = vmul.f32 %v6322_v15, %v1958_v16  ;;  %1712 = vrot.lane.b32.xlu1 %v7729_v1, %s7234_s21 }
  0xe2   : > { %1710 = vrot.lane.b32.xlu0 %v7736_v59, %s7234_s21 }
  0xe3   : > { %v7891_v48 = vpop.permute.xlu1 %1881  ;;  %v7893_v29 = vpop.permute.xlu0 %1879  ;;  %v6456_v52 = vpack.c.bf16 %v2051_v50, %v2035_v25  ;;  %v7908_v50 = vld [vmem:[%s13248_s0 + $0x38] sm:$0xff] }
  0xe4   : > { %v1961_v0 = vsel %vm1935_vm8, %v7891_v48, %v1886_v27  ;;  %v1960_v15 = vsel %vm1935_vm8, %v7893_v29, %v1884_v61  ;;  %v7914_v61 = vrot.slane %v7908_v50, %v7499_v19 }
  0xe5   : > { %v2050_v16 = vmul.f32 %v6321_v20, %v1961_v0  ;;  %v2034_v23 = vmul.f32 %v6321_v20, %v1960_v15  ;;  %1704 = vrot.lane.b32.xlu1 %v7448_v9, %s7234_s21  ;;  %6457 = vmatprep.subr.bf16.mxu1 %v6456_v52  ;;  %v7919_v52 = vld [vmem:[%s13250_s2] sm:$0xff] }
  0xe6   : > { %1702 = vrot.lane.b32.xlu0 %v7451_v10, %s7234_s21  ;;  %13662 = vst [vmem:[#allocation38_spill] sm:$0xff] %v7914_v61 }
  0xe7   : > { %v545_v25 = vpop.permute.xlu1 %544  ;;  %v543_v27 = vpop.permute.xlu0 %542  ;;  %v6458_v31 = vpack.c.bf16 %v2050_v16, %v2034_v23  ;;  %v7926_v23 = vld [vmem:[%s13248_s0 + $0x30] sm:$0xff] }
  0xe8   : > { %v7945_v43 = vrot.slane %v7926_v23, %v7499_v19 }
  0xe9   : > { %1298 = vrot.lane.b32.xlu1 %v7348_v5, %s7232_s19  ;;  %6459 = vmatpush1.bf16.msra.mxu1 %v6458_v31 }
  0xea   : > { %1296 = vrot.lane.b32.xlu0 %v7351_v6, %s7232_s19  ;;  %13665 = vst [vmem:[#allocation41_spill] sm:$0xff] %v7945_v43 }
  0xeb   : > { %v7928_v20 = vpop.permute.xlu1 %548  ;;  %v7930_v31 = vpop.permute.xlu0 %546 }
  0xec   : > { %13663 = vst [vmem:[#allocation39_spill] sm:$0xff] %v7928_v20  ;;  %13664 = vst [vmem:[#allocation40_spill] sm:$0xff] %v7930_v31  ;;  %v602_v0 = vsel %vm584_vm1, %v545_v25, %v7928_v20  ;;  %v601_v15 = vsel %vm584_vm1, %v543_v27, %v7930_v31  ;;  %2212 = vmatmul.mubr.f32.vlgmr.msra.gmra.mrb[0].mxu1 %v7919_v52 }
  0xed   : > { %v704_v16 = vmul.f32 %v7914_v61, %v602_v0  ;;  %v688_v4 = vmul.f32 %v7914_v61, %v601_v15  ;;  %1901 = vrot.lane.b32.xlu1 %v7467_v12, %s7235_s22  ;;  %6338 = vmatprep.mubr.msk.f32.mxu1 %vm2072_vm0, %v7456_v11 }
  0xee   : > { %1899 = vrot.lane.b32.xlu0 %v7470_v13, %s7235_s22 }
  0xef   : > { %v7951_v31 = vpop.permute.xlu1 %540  ;;  %v7953_v20 = vpop.permute.xlu0 %538  ;;  %v6496_v0 = vpack.c.bf16 %v704_v16, %v688_v4 }
  0xf0   : > { %v604_v15 = vsel %vm584_vm1, %v7951_v31, %v545_v25  ;;  %v603_v61 = vsel %vm584_vm1, %v7953_v20, %v543_v27  ;;  %v7971_v25 = vrot.slane %v7908_v50, %v7555_v39 }
  0xf1   : > { %v703_v51 = vmul.f32 %v7945_v43, %v604_v15  ;;  %v687_v11 = vmul.f32 %v7945_v43, %v603_v61  ;;  %1905 = vrot.lane.b32.xlu1 %v7729_v1, %s7235_s22  ;;  %6497 = vmatprep.subr.bf16.mxu1 %v6496_v0  ;;  %v7991_v15 = vrot.slane %v7926_v23, %v7555_v39 }
  0xf2   : > { %1903 = vrot.lane.b32.xlu0 %v7736_v59, %s7235_s22  ;;  %13666 = vst [vmem:[#allocation42_spill] sm:$0xff] %v7971_v25 }
  0xf3   : > { %v6498_v4 = vpack.c.bf16 %v703_v51, %v687_v11  ;;  %v740_v16 = vpop.permute.xlu1 %739  ;;  %v738_v62 = vpop.permute.xlu0 %737  ;;  %13669 = vst [vmem:[#allocation45_spill] sm:$0xff] %v7991_v15  ;;  %v7996_v11 = vld [vmem:[%s7325_s14 + $0xd0] sm:$0xff] }
  0xf5   : > { %1294 = vrot.lane.b32.xlu1 %v7569_v44, %s7232_s19  ;;  %6499 = vmatpush1.bf16.msra.mxu1 %v6498_v4 }
  0xf6   : > { %1292 = vrot.lane.b32.xlu0 %v7576_v47, %s7232_s19 }
  0xf7   : > { %v7975_v1 = vpop.permute.xlu1 %743  ;;  %v7977_v27 = vpop.permute.xlu0 %741 }
  0xf8   : > { %13667 = vst [vmem:[#allocation43_spill] sm:$0xff] %v7975_v1  ;;  %13668 = vst [vmem:[#allocation44_spill] sm:$0xff] %v7977_v27  ;;  %v795_v59 = vsel %vm777_vm2, %v740_v16, %v7975_v1  ;;  %v794_v51 = vsel %vm777_vm2, %v738_v62, %v7977_v27 }
  0xf9   : > { %v897_v61 = vmul.f32 %v7971_v25, %v795_v59  ;;  %v881_v0 = vmul.f32 %v7971_v25, %v794_v51  ;;  %1897 = vrot.lane.b32.xlu1 %v7448_v9, %s7235_s22  ;;  %v8003_v51 = vld [vmem:[%s7325_s14 + $0x50] sm:$0xff] }
  0xfa   : > { %1895 = vrot.lane.b32.xlu0 %v7451_v10, %s7235_s22 }
  0xfb   : > { %v7998_v4 = vpop.permute.xlu1 %735  ;;  %v8000_v43 = vpop.permute.xlu0 %733  ;;  %v6500_v59 = vpack.c.bf16 %v897_v61, %v881_v0  ;;  %v8018_v61 = vld [vmem:[%s7325_s14 + $0xd8] sm:$0xff] }
  0xfc   : > { %v797_v25 = vsel %vm777_vm2, %v7998_v4, %v740_v16  ;;  %v796_v27 = vsel %vm777_vm2, %v8000_v43, %v738_v62  ;;  %v8027_v62 = vrot.slane %v7908_v50, %v7609_v60 }
  0xfd   : > { %v896_v1 = vmul.f32 %v7991_v15, %v797_v25  ;;  %v880_v42 = vmul.f32 %v7991_v15, %v796_v27  ;;  %560 = vrot.lane.b32.xlu1 %v7996_v11, %s7228_s15  ;;  %6501 = vmatprep.subr.bf16.mxu1 %v6500_v59 }
  0xfe   : > { %558 = vrot.lane.b32.xlu0 %v8003_v51, %s7228_s15  ;;  %13670 = vst [vmem:[#allocation46_spill] sm:$0xff] %v8027_v62 }
  0xff   : > { %v6502_v0 = vpack.c.bf16 %v896_v1, %v880_v42  ;;  %v933_v40 = vpop.permute.xlu1 %932  ;;  %v931_v16 = vpop.permute.xlu0 %930 }
 0x101   : > { %564 = vrot.lane.b32.xlu1 %v8018_v61, %s7228_s15  ;;  %6503 = vmatpush1.bf16.msra.mxu1 %v6502_v0  ;;  %v8046_v0 = vrot.slane %v7926_v23, %v7609_v60 }
 0x102   : > { %562 = vrot.lane.b32.xlu0 %v8021_v58, %s7228_s15 }
 0x103   : > { %v8031_v25 = vpop.permute.xlu1 %936  ;;  %13673 = vst [vmem:[#allocation49_spill] sm:$0xff] %v8046_v0 }
 0x104   : > { %13671 = vst [vmem:[#allocation47_spill] sm:$0xff] %v8031_v25  ;;  %v988_v42 = vsel %vm970_vm3, %v933_v40, %v8031_v25  ;;  %v8036_v1 = vpop.permute.xlu0 %934  ;;  %v8052_v25 = vld [vmem:[%s7325_s14 + $0xc8] sm:$0xff] }
 0x105   : > { %13672 = vst [vmem:[#allocation48_spill] sm:$0xff] %v8036_v1  ;;  %v1090_v27 = vmul.f32 %v8027_v62, %v988_v42  ;;  %v987_v59 = vsel %vm970_vm3, %v931_v16, %v8036_v1  ;;  %1491 = vrot.lane.b32.xlu1 %v7348_v5, %s7233_s20  ;;  %v8057_v42 = vld [vmem:[%s13248_s0 + $0x8] sm:$0xff] }
 0x106   : > { %v1074_v15 = vmul.f32 %v8027_v62, %v987_v59  ;;  %1489 = vrot.lane.b32.xlu0 %v7351_v6, %s7233_s20  ;;  %v8077_v22 = vrot.slane %v8057_v42, %v7499_v19 }
 0x107   : > { %v8059_v1 = vpop.permute.xlu1 %928 }
 0x108   : > { %13674 = vst [vmem:[#allocation50_spill] sm:$0xff] %v8059_v1  ;;  %v990_v57 = vsel %vm970_vm3, %v8059_v1, %v933_v40  ;;  %v8067_v14 = vpop.permute.xlu0 %926  ;;  %v6504_v59 = vpack.c.bf16 %v1090_v27, %v1074_v15  ;;  %13676 = vst [vmem:[#allocation52_spill] sm:$0xff] %v8077_v22 }
 0x109   : > { %13675 = vst [vmem:[#allocation51_spill] sm:$0xff] %v8067_v14  ;;  %v1089_v62 = vmul.f32 %v8046_v0, %v990_v57  ;;  %v989_v24 = vsel %vm970_vm3, %v8067_v14, %v931_v16  ;;  %556 = vrot.lane.b32.xlu1 %v8052_v25, %s7228_s15 }
 0x10a   : > { %v1073_v46 = vmul.f32 %v8046_v0, %v989_v24  ;;  %6505 = vmatprep.subr.bf16.mxu1 %v6504_v59  ;;  %554 = vrot.lane.b32.xlu0 %v8062_v3, %s7228_s15 }
 0x10b   : > { %v521_v40 = vpop.permute.xlu1 %520 }
 0x10c   : > { %v6506_v15 = vpack.c.bf16 %v1089_v62, %v1073_v46  ;;  %v519_v57 = vpop.permute.xlu0 %518  ;;  %v614_v16 = vsel %vm584_vm1, %v521_v40, %v7540_v32  ;;  %v8098_v32 = vrot.slane %v7908_v50, %v7663_v49 }
 0x10d   : > { %1487 = vrot.lane.b32.xlu1 %v7569_v44, %s7233_s20  ;;  %v613_v27 = vsel %vm584_vm1, %v519_v57, %v7542_v33  ;;  %v698_v24 = vmul.f32 %v8077_v22, %v614_v16  ;;  %v8105_v33 = vld [vmem:[%s13248_s0] sm:$0xff] }
 0x10e   : > { %6507 = vmatpush1.bf16.msra.mxu1 %v6506_v15  ;;  %1485 = vrot.lane.b32.xlu0 %v7576_v47, %s7233_s20  ;;  %v682_v46 = vmul.f32 %v8077_v22, %v613_v27  ;;  %13677 = vst [vmem:[#allocation53_spill] sm:$0xff] %v8098_v32 }
 0x10f   : > { %v1126_v62 = vpop.permute.xlu1 %1125 }
 0x110   : > { %v1124_v59 = vpop.permute.xlu0 %1123  ;;  %v6388_v0 = vpack.c.bf16 %v698_v24, %v682_v46 }
 0x111   : > { %755 = vrot.lane.b32.xlu1 %v7996_v11, %s7229_s16 }
 0x112   : > { %753 = vrot.lane.b32.xlu0 %v8003_v51, %s7229_s16  ;;  %6389 = vmatprep.subr.bf16.mxu0 %v6388_v0  ;;  %v8122_v0 = vrot.slane %v8105_v33, %v7499_v19 }
 0x113   : > { %v8107_v15 = vpop.permute.xlu1 %1129 }
 0x114   : > { %13678 = vst [vmem:[#allocation54_spill] sm:$0xff] %v8107_v15  ;;  %v1181_v16 = vsel %vm1163_vm4, %v1126_v62, %v8107_v15  ;;  %v8112_v27 = vpop.permute.xlu0 %1127  ;;  %13680 = vst [vmem:[#allocation56_spill] sm:$0xff] %v8122_v0 }
 0x115   : > { %13679 = vst [vmem:[#allocation55_spill] sm:$0xff] %v8112_v27  ;;  %v1283_v24 = vmul.f32 %v8098_v32, %v1181_v16  ;;  %v1180_v46 = vsel %vm1163_vm4, %v1124_v59, %v8112_v27  ;;  %759 = vrot.lane.b32.xlu1 %v8018_v61, %s7229_s16 }
 0x116   : > { %v1267_v22 = vmul.f32 %v8098_v32, %v1180_v46  ;;  %757 = vrot.lane.b32.xlu0 %v8021_v58, %s7229_s16  ;;  %v8141_v46 = vrot.slane %v7926_v23, %v7663_v49 }
 0x117   : > { %v8127_v15 = vpop.permute.xlu1 %580 }
 0x118   : > { %13681 = vst [vmem:[#allocation57_spill] sm:$0xff] %v8127_v15  ;;  %v616_v16 = vsel %vm584_vm1, %v8127_v15, %v521_v40  ;;  %v8132_v14 = vpop.permute.xlu0 %578  ;;  %v6508_v27 = vpack.c.bf16 %v1283_v24, %v1267_v22  ;;  %13683 = vst [vmem:[#allocation59_spill] sm:$0xff] %v8141_v46 }
 0x119   : > { %13682 = vst [vmem:[#allocation58_spill] sm:$0xff] %v8132_v14  ;;  %v615_v1 = vsel %vm584_vm1, %v8132_v14, %v519_v57  ;;  %1684 = vrot.lane.b32.xlu1 %v7348_v5, %s7234_s21  ;;  %v697_v32 = vmul.f32 %v8122_v0, %v616_v16 }
 0x11a   : > { %1682 = vrot.lane.b32.xlu0 %v7351_v6, %s7234_s21  ;;  %6509 = vmatprep.subr.bf16.mxu1 %v6508_v27  ;;  %v681_v40 = vmul.f32 %v8122_v0, %v615_v1  ;;  %v8162_v1 = vrot.slane %v8057_v42, %v7555_v39 }
 0x11b   : > { %v8147_v22 = vpop.permute.xlu1 %1121 }
 0x11c   : > { %v1183_v57 = vsel %vm1163_vm4, %v8147_v22, %v1126_v62  ;;  %v8152_v24 = vpop.permute.xlu0 %1119  ;;  %v6390_v14 = vpack.c.bf16 %v697_v32, %v681_v40  ;;  %13684 = vst [vmem:[#allocation60_spill] sm:$0xff] %v8162_v1  ;;  %v6512_v32 = vpack.c.bf16 %v7467_v12, %v7470_v13 }
 0x11d   : > { %v1282_v15 = vmul.f32 %v8141_v46, %v1183_v57  ;;  %v1182_v16 = vsel %vm1163_vm4, %v8152_v24, %v1124_v59  ;;  %751 = vrot.lane.b32.xlu1 %v8052_v25, %s7229_s16 }
 0x11e   : > { %v1266_v27 = vmul.f32 %v8141_v46, %v1182_v16  ;;  %749 = vrot.lane.b32.xlu0 %v8062_v3, %s7229_s16  ;;  %6391 = vmatpush1.bf16.msra.mxu0 %v6390_v14  ;;  %v8180_v14 = vrot.slane %v8105_v33, %v7555_v39 }
 0x11f   : > { %v716_v62 = vpop.permute.xlu1 %715 }
 0x120   : > { %v6510_v40 = vpack.c.bf16 %v1282_v15, %v1266_v27  ;;  %v807_v59 = vsel %vm777_vm2, %v716_v62, %v7594_v53  ;;  %v714_v57 = vpop.permute.xlu0 %713  ;;  %13685 = vst [vmem:[#allocation61_spill] sm:$0xff] %v8180_v14  ;;  %v6514_v53 = vpack.c.bf16 %v7448_v9, %v7451_v10 }
 0x121   : > { %v891_v0 = vmul.f32 %v8162_v1, %v807_v59  ;;  %v806_v16 = vsel %vm777_vm2, %v714_v57, %v7596_v54  ;;  %1680 = vrot.lane.b32.xlu1 %v7569_v44, %s7234_s21 }
 0x122   : > { %v875_v12 = vmul.f32 %v8162_v1, %v806_v16  ;;  %1678 = vrot.lane.b32.xlu0 %v7576_v47, %s7234_s21  ;;  %6511 = vmatpush1.bf16.msra.mxu1 %v6510_v40 }
 0x123   : > { %v8185_v13 = vpop.permute.xlu1 %775  ;;  %6513 = vmatprep.subr.bf16.mxu1 %v6512_v32  ;;  %v8202_v32 = vrot.slane %v8057_v42, %v7609_v60 }
 0x124   : > { %v809_v54 = vsel %vm777_vm2, %v8185_v13, %v716_v62  ;;  %v8192_v15 = vpop.permute.xlu0 %773  ;;  %v6392_v27 = vpack.c.bf16 %v891_v0, %v875_v12 }
 0x125   : > { %v890_v59 = vmul.f32 %v8180_v14, %v809_v54  ;;  %v808_v16 = vsel %vm777_vm2, %v8192_v15, %v714_v57  ;;  %948 = vrot.lane.b32.xlu1 %v7996_v11, %s7230_s17  ;;  %13686 = vst [vmem:[#allocation62_spill] sm:$0xff] %v8202_v32 }
 0x126   : > { %v874_v9 = vmul.f32 %v8180_v14, %v808_v16  ;;  %946 = vrot.lane.b32.xlu0 %v8003_v51, %s7230_s17  ;;  %6393 = vmatprep.subr.bf16.mxu0 %v6392_v27 }
 0x127   : > { %v909_v10 = vpop.permute.xlu1 %908  ;;  %6515 = vmatpush1.bf16.msra.mxu1 %v6514_v53 }
 0x128   : > { %v1000_v0 = vsel %vm970_vm3, %v909_v10, %v7648_v36  ;;  %v907_v62 = vpop.permute.xlu0 %906  ;;  %v6394_v40 = vpack.c.bf16 %v890_v59, %v874_v9  ;;  %v8223_v59 = vrot.slane %v7908_v50, %v7711_v41 }
 0x129   : > { %v1084_v57 = vmul.f32 %v8202_v32, %v1000_v0  ;;  %v999_v12 = vsel %vm970_vm3, %v907_v62, %v7650_v37  ;;  %952 = vrot.lane.b32.xlu1 %v8018_v61, %s7230_s17 }
 0x12a   : > { %v1068_v54 = vmul.f32 %v8202_v32, %v999_v12  ;;  %950 = vrot.lane.b32.xlu0 %v8021_v58, %s7230_s17  ;;  %6395 = vmatpush1.bf16.msra.mxu0 %v6394_v40  ;;  %13687 = vst [vmem:[#allocation63_spill] sm:$0xff] %v8223_v59 }
 0x12b   : > { %v1323_v53 = vpop.permute.xlu1 %1322 }
 0x12c   : > { %v1321_v27 = vpop.permute.xlu0 %1320  ;;  %v6396_v36 = vpack.c.bf16 %v1084_v57, %v1068_v54 }
 0x12d   : > { %1877 = vrot.lane.b32.xlu1 %v7348_v5, %s7235_s22 }
 0x12e   : > { %1875 = vrot.lane.b32.xlu0 %v7351_v6, %s7235_s22  ;;  %6397 = vmatprep.subr.bf16.mxu0 %v6396_v36  ;;  %v8242_v6 = vrot.slane %v8105_v33, %v7609_v60 }
 0x12f   : > { %v8227_v37 = vpop.permute.xlu1 %1326 }
 0x130   : > { %13688 = vst [vmem:[#allocation64_spill] sm:$0xff] %v8227_v37  ;;  %v1372_v16 = vsel %vm1356_vm5, %v1323_v53, %v8227_v37  ;;  %v8232_v9 = vpop.permute.xlu0 %1324  ;;  %13690 = vst [vmem:[#allocation66_spill] sm:$0xff] %v8242_v6 }
 0x131   : > { %13689 = vst [vmem:[#allocation65_spill] sm:$0xff] %v8232_v9  ;;  %v1476_v0 = vmul.f32 %v8223_v59, %v1372_v16  ;;  %v1371_v5 = vsel %vm1356_vm5, %v1321_v27, %v8232_v9  ;;  %944 = vrot.lane.b32.xlu1 %v8052_v25, %s7230_s17 }
 0x132   : > { %v1460_v40 = vmul.f32 %v8223_v59, %v1371_v5  ;;  %942 = vrot.lane.b32.xlu0 %v8062_v3, %s7230_s17  ;;  %v8262_v5 = vrot.slane %v7926_v23, %v7711_v41 }
 0x133   : > { %v8247_v57 = vpop.permute.xlu1 %968 }
 0x134   : > { %v1002_v12 = vsel %vm970_vm3, %v8247_v57, %v909_v10  ;;  %v8252_v54 = vpop.permute.xlu0 %966  ;;  %v6516_v36 = vpack.c.bf16 %v1476_v0, %v1460_v40  ;;  %13691 = vst [vmem:[#allocation67_spill] sm:$0xff] %v8262_v5 }
 0x135   : > { %v1083_v16 = vmul.f32 %v8242_v6, %v1002_v12  ;;  %v1001_v46 = vsel %vm970_vm3, %v8252_v54, %v907_v62  ;;  %1873 = vrot.lane.b32.xlu1 %v7569_v44, %s7235_s22 }
 0x136   : > { %v1067_v59 = vmul.f32 %v8242_v6, %v1001_v46  ;;  %1871 = vrot.lane.b32.xlu0 %v7576_v47, %s7235_s22  ;;  %6517 = vmatprep.subr.bf16.mxu1 %v6516_v36  ;;  %v8282_v46 = vrot.slane %v8057_v42, %v7663_v49 }
 0x137   : > { %v8267_v10 = vpop.permute.xlu1 %1318 }
 0x138   : > { %v1374_v0 = vsel %vm1356_vm5, %v8267_v10, %v1323_v53  ;;  %v8272_v62 = vpop.permute.xlu0 %1316  ;;  %v6398_v40 = vpack.c.bf16 %v1083_v16, %v1067_v59  ;;  %13692 = vst [vmem:[#allocation68_spill] sm:$0xff] %v8282_v46 }
 0x139   : > { %v1475_v12 = vmul.f32 %v8262_v5, %v1374_v0  ;;  %v1373_v32 = vsel %vm1356_vm5, %v8272_v62, %v1321_v27  ;;  %536 = vrot.lane.b32.xlu1 %v7398_v7, %s7228_s15 }
 0x13a   : > { %v1459_v36 = vmul.f32 %v8262_v5, %v1373_v32  ;;  %534 = vrot.lane.b32.xlu0 %v7401_v8, %s7228_s15  ;;  %6399 = vmatpush1.bf16.msra.mxu0 %v6398_v40 }
 0x13b   : > { %v1102_v53 = vpop.permute.xlu1 %1101 }
 0x13c   : > { %v6518_v59 = vpack.c.bf16 %v1475_v12, %v1459_v36  ;;  %v1193_v16 = vsel %vm1163_vm4, %v1102_v53, %v7696_v63  ;;  %v1100_v27 = vpop.permute.xlu0 %1099  ;;  %v8303_v63 = vrot.slane %v7908_v50, %v7769_v2 }
 0x13d   : > { %v1277_v0 = vmul.f32 %v8282_v46, %v1193_v16  ;;  %v1192_v7 = vsel %vm1163_vm4, %v1100_v27, %v7698_v28  ;;  %1141 = vrot.lane.b32.xlu1 %v7996_v11, %s7231_s18 }
 0x13e   : > { %v1261_v32 = vmul.f32 %v8282_v46, %v1192_v7  ;;  %1139 = vrot.lane.b32.xlu0 %v8003_v51, %s7231_s18  ;;  %6519 = vmatpush1.bf16.msra.mxu1 %v6518_v59  ;;  %13693 = vst [vmem:[#allocation69_spill] sm:$0xff] %v8303_v63  ;;  %v8322_v7 = vrot.slane %v8105_v33, %v7663_v49  ;;  %v8349_v46 = vld [vmem:[%s7325_s14 + $0x20] sm:$0xff] }
 0x13f   : > { %v1516_v8 = vpop.permute.xlu1 %1515 }
 0x140   : > { %v1514_v40 = vpop.permute.xlu0 %1513  ;;  %v6400_v12 = vpack.c.bf16 %v1277_v0, %v1261_v32  ;;  %13696 = vst [vmem:[#allocation72_spill] sm:$0xff] %v8322_v7 }
 0x141   : > { %1145 = vrot.lane.b32.xlu1 %v8018_v61, %s7231_s18 }
 0x142   : > { %1143 = vrot.lane.b32.xlu0 %v8021_v58, %s7231_s18  ;;  %6401 = vmatprep.subr.bf16.mxu0 %v6400_v12 }
 0x143   : > { %v8307_v28 = vpop.permute.xlu1 %1519 }
 0x144   : > { %13694 = vst [vmem:[#allocation70_spill] sm:$0xff] %v8307_v28  ;;  %v1565_v36 = vsel %vm1549_vm6, %v1516_v8, %v8307_v28  ;;  %v8312_v59 = vpop.permute.xlu0 %1517 }
 0x145   : > { %13695 = vst [vmem:[#allocation71_spill] sm:$0xff] %v8312_v59  ;;  %v1669_v16 = vmul.f32 %v8303_v63, %v1565_v36  ;;  %v1564_v0 = vsel %vm1549_vm6, %v1514_v40, %v8312_v59  ;;  %1137 = vrot.lane.b32.xlu1 %v8052_v25, %s7231_s18 }
 0x146   : > { %v1653_v32 = vmul.f32 %v8303_v63, %v1564_v0  ;;  %1135 = vrot.lane.b32.xlu0 %v8062_v3, %s7231_s18  ;;  %v8339_v63 = vld [vmem:[%s7325_s14 + $0xa0] sm:$0xff]  ;;  %v8345_v3 = vrot.slane %v7926_v23, %v7769_v2 }
 0x147   : > { %v8327_v12 = vpop.permute.xlu1 %1161 }
 0x148   : > { %13697 = vst [vmem:[#allocation73_spill] sm:$0xff] %v8327_v12  ;;  %v1195_v36 = vsel %vm1163_vm4, %v8327_v12, %v1102_v53  ;;  %v8332_v5 = vpop.permute.xlu0 %1159  ;;  %v6520_v25 = vpack.c.bf16 %v1669_v16, %v1653_v32  ;;  %13699 = vst [vmem:[#allocation75_spill] sm:$0xff] %v8345_v3  ;;  %v7155_v32 = vld [vmem:[%s7325_s14 + $0x8] sm:$0xff] }
 0x149   : > { %13698 = vst [vmem:[#allocation74_spill] sm:$0xff] %v8332_v5  ;;  %v1276_v6 = vmul.f32 %v8322_v7, %v1195_v36  ;;  %v1194_v0 = vsel %vm1163_vm4, %v8332_v5, %v1100_v27  ;;  %731 = vrot.lane.b32.xlu1 %v8339_v63, %s7229_s16  ;;  %v7154_v27 = vld [vmem:[%s7325_s14 + $0x88] sm:$0xff] }
 0x14a   : > { %v1260_v53 = vmul.f32 %v8322_v7, %v1194_v0  ;;  %729 = vrot.lane.b32.xlu0 %v8349_v46, %s7229_s16  ;;  %6521 = vmatprep.subr.bf16.mxu1 %v6520_v25  ;;  %v6404_v36 = vpack.c.bf16 %v7154_v27, %v7155_v32  ;;  %v8387_v27 = vld [vmem:[%s7325_s14 + $0x60] sm:$0xff] }
 0x14b   : > { %v8353_v16 = vpop.permute.xlu1 %1511 }
 0x14c   : > { %v1567_v14 = vsel %vm1549_vm6, %v8353_v16, %v1516_v8  ;;  %v8360_v1 = vpop.permute.xlu0 %1509  ;;  %v6402_v59 = vpack.c.bf16 %v1276_v6, %v1260_v53  ;;  %v6406_v6 = vpack.c.bf16 %v7569_v44, %v7576_v47 }
 0x14d   : > { %v1668_v0 = vmul.f32 %v8345_v3, %v1567_v14  ;;  %v1566_v7 = vsel %vm1549_vm6, %v8360_v1, %v1514_v40  ;;  %924 = vrot.lane.b32.xlu1 %v8339_v63, %s7230_s17  ;;  %v8377_v40 = vrot.slane %v7908_v50, %v7817_v35 }
 0x14e   : > { %v1652_v25 = vmul.f32 %v8345_v3, %v1566_v7  ;;  %922 = vrot.lane.b32.xlu0 %v8349_v46, %s7230_s17  ;;  %6403 = vmatpush1.bf16.msra.mxu0 %v6402_v59  ;;  %v8382_v7 = vld [vmem:[%s7325_s14 + $0xe0] sm:$0xff] }
 0x14f   : > { %v1709_v8 = vpop.permute.xlu1 %1708  ;;  %6405 = vmatprep.subr.bf16.mxu0 %v6404_v36  ;;  %13700 = vst [vmem:[#allocation76_spill] sm:$0xff] %v8377_v40  ;;  %v8402_v36 = vrot.slane %v7926_v23, %v7817_v35 }
 0x150   : > { %v6522_v14 = vpack.c.bf16 %v1668_v0, %v1652_v25  ;;  %v1707_v53 = vpop.permute.xlu0 %1706 }
 0x151   : > { %1338 = vrot.lane.b32.xlu1 %v8018_v61, %s7232_s19  ;;  %13703 = vst [vmem:[#allocation79_spill] sm:$0xff] %v8402_v36 }
 0x152   : > { %1336 = vrot.lane.b32.xlu0 %v8021_v58, %s7232_s19  ;;  %6523 = vmatpush1.bf16.msra.mxu1 %v6522_v14 }
 0x153   : > { %v8384_v59 = vpop.permute.xlu1 %1712  ;;  %6407 = vmatpush1.bf16.msra.mxu0 %v6406_v6 }
 0x154   : > { %13701 = vst [vmem:[#allocation77_spill] sm:$0xff] %v8384_v59  ;;  %v1758_v44 = vsel %vm1742_vm7, %v1709_v8, %v8384_v59  ;;  %v8392_v47 = vpop.permute.xlu0 %1710 }
 0x155   : > { %13702 = vst [vmem:[#allocation78_spill] sm:$0xff] %v8392_v47  ;;  %v1862_v50 = vmul.f32 %v8377_v40, %v1758_v44  ;;  %v1757_v32 = vsel %vm1742_vm7, %v1707_v53, %v8392_v47  ;;  %1342 = vrot.lane.b32.xlu1 %v8382_v7, %s7232_s19 }
 0x156   : > { %v1846_v0 = vmul.f32 %v8377_v40, %v1757_v32  ;;  %1340 = vrot.lane.b32.xlu0 %v8387_v27, %s7232_s19  ;;  %v8422_v32 = vrot.slane %v8057_v42, %v7711_v41 }
 0x157   : > { %v8407_v25 = vpop.permute.xlu1 %1704 }
 0x158   : > { %v1760_v6 = vsel %vm1742_vm7, %v8407_v25, %v1709_v8  ;;  %v8412_v14 = vpop.permute.xlu0 %1702  ;;  %v6524_v44 = vpack.c.bf16 %v1862_v50, %v1846_v0  ;;  %13704 = vst [vmem:[#allocation80_spill] sm:$0xff] %v8422_v32 }
 0x159   : > { %v1861_v3 = vmul.f32 %v8402_v36, %v1760_v6  ;;  %v1759_v23 = vsel %vm1742_vm7, %v8412_v14, %v1707_v53  ;;  %1334 = vrot.lane.b32.xlu1 %v7996_v11, %s7232_s19 }
 0x15a   : > { %v1845_v40 = vmul.f32 %v8402_v36, %v1759_v23  ;;  %1332 = vrot.lane.b32.xlu0 %v8003_v51, %s7232_s19  ;;  %6525 = vmatprep.subr.bf16.mxu1 %v6524_v44 }
 0x15b   : > { %v1299_v8 = vpop.permute.xlu1 %1298 }
 0x15c   : > { %v6526_v50 = vpack.c.bf16 %v1861_v3, %v1845_v40  ;;  %v1384_v0 = vsel %vm1356_vm5, %v1299_v8, %v7754_v34  ;;  %v1297_v53 = vpop.permute.xlu0 %1296  ;;  %v6326_v34 = vld [vmem:[%s13248_s0 + $0xb8] ss:$0 sm:$0xff] }
 0x15d   : > { %v1470_v6 = vmul.f32 %v8422_v32, %v1384_v0  ;;  %v1383_v47 = vsel %vm1356_vm5, %v1297_v53, %v7756_v38  ;;  %1117 = vrot.lane.b32.xlu1 %v8339_v63, %s7231_s18 }
 0x15e   : > { %v1454_v23 = vmul.f32 %v8422_v32, %v1383_v47  ;;  %1115 = vrot.lane.b32.xlu0 %v8349_v46, %s7231_s18  ;;  %6527 = vmatpush1.bf16.msra.mxu1 %v6526_v50 }
 0x15f   : > { %v1902_v3 = vpop.permute.xlu1 %1901 }
 0x160   : > { %v1900_v40 = vpop.permute.xlu0 %1899  ;;  %v6408_v44 = vpack.c.bf16 %v1470_v6, %v1454_v23  ;;  %v8460_v23 = vrot.slane %v8105_v33, %v7711_v41 }
 0x161   : > { %1531 = vrot.lane.b32.xlu1 %v8018_v61, %s7233_s20 }
 0x162   : > { %1529 = vrot.lane.b32.xlu0 %v8021_v58, %s7233_s20  ;;  %6409 = vmatprep.subr.bf16.mxu0 %v6408_v44  ;;  %13707 = vst [vmem:[#allocation83_spill] sm:$0xff] %v8460_v23 }
 0x163   : > { %v8446_v38 = vpop.permute.xlu1 %1905 }
 0x164   : > { %13705 = vst [vmem:[#allocation81_spill] sm:$0xff] %v8446_v38  ;;  %v1951_v47 = vsel %vm1935_vm8, %v1902_v3, %v8446_v38  ;;  %v8451_v50 = vpop.permute.xlu0 %1903 }
 0x165   : > { %13706 = vst [vmem:[#allocation82_spill] sm:$0xff] %v8451_v50  ;;  %v2055_v0 = vmul.f32 %v6326_v34, %v1951_v47  ;;  %v1950_v6 = vsel %vm1935_vm8, %v1900_v40, %v8451_v50  ;;  %1535 = vrot.lane.b32.xlu1 %v8382_v7, %s7233_s20 }
 0x166   : > { %v2039_v44 = vmul.f32 %v6326_v34, %v1950_v6  ;;  %1533 = vrot.lane.b32.xlu0 %v8387_v27, %s7233_s20 }
 0x167   : > { %v8464_v36 = vpop.permute.xlu1 %1294 }
 0x168   : > { %13708 = vst [vmem:[#allocation84_spill] sm:$0xff] %v8464_v36  ;;  %v1386_v47 = vsel %vm1356_vm5, %v8464_v36, %v1299_v8  ;;  %v8469_v32 = vpop.permute.xlu0 %1292  ;;  %v6528_v50 = vpack.c.bf16 %v2055_v0, %v2039_v44  ;;  %v6325_v8 = vld [vmem:[%s13248_s0 + $0xb0] ss:$0 sm:$0xff] }
 0x169   : > { %13709 = vst [vmem:[#allocation85_spill] sm:$0xff] %v8469_v32  ;;  %v1469_v38 = vmul.f32 %v8460_v23, %v1386_v47  ;;  %v1385_v59 = vsel %vm1356_vm5, %v8469_v32, %v1297_v53  ;;  %1527 = vrot.lane.b32.xlu1 %v7996_v11, %s7233_s20  ;;  %v8551_v32 = vld [vmem:[%s7325_s14 + $0xa8] sm:$0xff] }
 0x16a   : > { %v1453_v34 = vmul.f32 %v8460_v23, %v1385_v59  ;;  %1525 = vrot.lane.b32.xlu0 %v8003_v51, %s7233_s20  ;;  %6529 = vmatprep.subr.bf16.mxu1 %v6528_v50 }
 0x16b   : > { %v8483_v0 = vpop.permute.xlu1 %1897 }
 0x16c   : > { %v1953_v6 = vsel %vm1935_vm8, %v8483_v0, %v1902_v3  ;;  %v8488_v53 = vpop.permute.xlu0 %1895  ;;  %v6410_v44 = vpack.c.bf16 %v1469_v38, %v1453_v34  ;;  %v8500_v3 = vld [vmem:[%s13248_s0 + $0x58] sm:$0xff] }
 0x16d   : > { %v2054_v47 = vmul.f32 %v6325_v8, %v1953_v6  ;;  %v1952_v59 = vsel %vm1935_vm8, %v8488_v53, %v1900_v40  ;;  %1724 = vrot.lane.b32.xlu1 %v8018_v61, %s7234_s21  ;;  %v8506_v40 = vrot.slane %v8500_v3, %v7499_v19 }
 0x16e   : > { %v2038_v50 = vmul.f32 %v6325_v8, %v1952_v59  ;;  %1722 = vrot.lane.b32.xlu0 %v8021_v58, %s7234_s21  ;;  %6411 = vmatpush1.bf16.msra.mxu0 %v6410_v44 }
 0x16f   : > { %v561_v23 = vpop.permute.xlu1 %560  ;;  %13710 = vst [vmem:[#allocation86_spill] sm:$0xff] %v8506_v40 }
 0x170   : > { %v6530_v38 = vpack.c.bf16 %v2054_v47, %v2038_v50  ;;  %v559_v34 = vpop.permute.xlu0 %558  ;;  %v8525_v50 = vrot.slane %v8057_v42, %v7769_v2 }
 0x171   : > { %1728 = vrot.lane.b32.xlu1 %v8382_v7, %s7234_s21 }
 0x172   : > { %1726 = vrot.lane.b32.xlu0 %v8387_v27, %s7234_s21  ;;  %6531 = vmatpush1.bf16.msra.mxu1 %v6530_v38  ;;  %13713 = vst [vmem:[#allocation89_spill] sm:$0xff] %v8525_v50 }
 0x173   : > { %v8510_v8 = vpop.permute.xlu1 %564 }
 0x174   : > { %13711 = vst [vmem:[#allocation87_spill] sm:$0xff] %v8510_v8  ;;  %v594_v6 = vsel %vm584_vm1, %v561_v23, %v8510_v8  ;;  %v8515_v44 = vpop.permute.xlu0 %562 }
 0x175   : > { %13712 = vst [vmem:[#allocation88_spill] sm:$0xff] %v8515_v44  ;;  %v708_v47 = vmul.f32 %v8506_v40, %v594_v6  ;;  %v593_v59 = vsel %vm584_vm1, %v559_v34, %v8515_v44  ;;  %1720 = vrot.lane.b32.xlu1 %v7996_v11, %s7234_s21  ;;  %2354 = vmatmul.mubr.f32.vlgmr.msra.gmra.mrb[2].mxu1 %v7919_v52  ;;  %v8534_v6 = vld [vmem:[%s13248_s0 + $0x50] sm:$0xff]  ;;  %v8539_v44 = vld [vmem:[%s13250_s2 + $0x8] sm:$0xff] }
 0x176   : > { %v692_v38 = vmul.f32 %v8506_v40, %v593_v59  ;;  %1718 = vrot.lane.b32.xlu0 %v8003_v51, %s7234_s21  ;;  %6340 = vmatprep.mubr.msk.f32.mxu1 %vm2072_vm0, %v8539_v44  ;;  %v8557_v36 = vrot.slane %v8534_v6, %v7499_v19 }
 0x177   : > { %v1492_v8 = vpop.permute.xlu1 %1491 }
 0x178   : > { %v1577_v59 = vsel %vm1549_vm6, %v1492_v8, %v7802_v30  ;;  %v1490_v40 = vpop.permute.xlu0 %1489  ;;  %v6568_v28 = vpack.c.bf16 %v708_v47, %v692_v38  ;;  %13714 = vst [vmem:[#allocation90_spill] sm:$0xff] %v8557_v36  ;;  %v8561_v30 = vld [vmem:[%s7325_s14 + $0x28] sm:$0xff] }
 0x179   : > { %v1663_v9 = vmul.f32 %v8525_v50, %v1577_v59  ;;  %v1576_v37 = vsel %vm1549_vm6, %v1490_v40, %v7804_v56  ;;  %1314 = vrot.lane.b32.xlu1 %v8551_v32, %s7232_s19 }
 0x17a   : > { %v1647_v5 = vmul.f32 %v8525_v50, %v1576_v37  ;;  %1312 = vrot.lane.b32.xlu0 %v8561_v30, %s7232_s19  ;;  %6569 = vmatprep.subr.bf16.mxu1 %v6568_v28  ;;  %v8580_v28 = vrot.slane %v8105_v33, %v7769_v2 }
 0x17b   : > { %v8565_v47 = vpop.permute.xlu1 %556 }
 0x17c   : > { %13715 = vst [vmem:[#allocation91_spill] sm:$0xff] %v8565_v47  ;;  %v596_v56 = vsel %vm584_vm1, %v8565_v47, %v561_v23  ;;  %v8570_v38 = vpop.permute.xlu0 %554  ;;  %v6412_v59 = vpack.c.bf16 %v1663_v9, %v1647_v5  ;;  %13717 = vst [vmem:[#allocation93_spill] sm:$0xff] %v8580_v28 }
 0x17d   : > { %13716 = vst [vmem:[#allocation92_spill] sm:$0xff] %v8570_v38  ;;  %v707_v12 = vmul.f32 %v8557_v36, %v596_v56  ;;  %v595_v37 = vsel %vm584_vm1, %v8570_v38, %v559_v34  ;;  %1917 = vrot.lane.b32.xlu1 %v8018_v61, %s7235_s22 }
 0x17e   : > { %v691_v50 = vmul.f32 %v8557_v36, %v595_v37  ;;  %1915 = vrot.lane.b32.xlu0 %v8021_v58, %s7235_s22  ;;  %6413 = vmatprep.subr.bf16.mxu0 %v6412_v59  ;;  %v8615_v36 = vld [vmem:[%s7325_s14 + $0x70] sm:$0xff] }
 0x17f   : > { %v8585_v9 = vpop.permute.xlu1 %1487 }
 0x180   : > { %13718 = vst [vmem:[#allocation94_spill] sm:$0xff] %v8585_v9  ;;  %v6570_v5 = vpack.c.bf16 %v707_v12, %v691_v50  ;;  %v1579_v23 = vsel %vm1549_vm6, %v8585_v9, %v1492_v8  ;;  %v8590_v34 = vpop.permute.xlu0 %1485 }
 0x181   : > { %13719 = vst [vmem:[#allocation95_spill] sm:$0xff] %v8590_v34  ;;  %v1662_v56 = vmul.f32 %v8580_v28, %v1579_v23  ;;  %v1578_v37 = vsel %vm1549_vm6, %v8590_v34, %v1490_v40  ;;  %1921 = vrot.lane.b32.xlu1 %v8382_v7, %s7235_s22  ;;  %v8605_v23 = vrot.slane %v8500_v3, %v7555_v39  ;;  %v8610_v40 = vld [vmem:[%s7325_s14 + $0xf0] sm:$0xff] }
 0x182   : > { %v1646_v59 = vmul.f32 %v8580_v28, %v1578_v37  ;;  %1919 = vrot.lane.b32.xlu0 %v8387_v27, %s7235_s22  ;;  %6571 = vmatpush1.bf16.msra.mxu1 %v6570_v5 }
 0x183   : > { %v756_v12 = vpop.permute.xlu1 %755  ;;  %13720 = vst [vmem:[#allocation96_spill] sm:$0xff] %v8605_v23 }
 0x184   : > { %v754_v8 = vpop.permute.xlu0 %753  ;;  %v6414_v50 = vpack.c.bf16 %v1662_v56, %v1646_v59 }
 0x185   : > { %1913 = vrot.lane.b32.xlu1 %v7996_v11, %s7235_s22 }
 0x186   : > { %1911 = vrot.lane.b32.xlu0 %v8003_v51, %s7235_s22  ;;  %6415 = vmatpush1.bf16.msra.mxu0 %v6414_v50  ;;  %v8630_v50 = vrot.slane %v8057_v42, %v7817_v35 }
 0x187   : > { %v8612_v37 = vpop.permute.xlu1 %759 }
 0x188   : > { %13721 = vst [vmem:[#allocation97_spill] sm:$0xff] %v8612_v37  ;;  %v787_v5 = vsel %vm777_vm2, %v756_v12, %v8612_v37  ;;  %v8620_v56 = vpop.permute.xlu0 %757  ;;  %13723 = vst [vmem:[#allocation99_spill] sm:$0xff] %v8630_v50 }
 0x189   : > { %13722 = vst [vmem:[#allocation98_spill] sm:$0xff] %v8620_v56  ;;  %v901_v11 = vmul.f32 %v8605_v23, %v787_v5  ;;  %v786_v59 = vsel %vm777_vm2, %v754_v8, %v8620_v56  ;;  %576 = vrot.lane.b32.xlu1 %v8610_v40, %s7228_s15 }
 0x18a   : > { %v885_v28 = vmul.f32 %v8605_v23, %v786_v59  ;;  %574 = vrot.lane.b32.xlu0 %v8615_v36, %s7228_s15  ;;  %v8646_v59 = vrot.slane %v8534_v6, %v7555_v39 }
 0x18b   : > { %v1685_v37 = vpop.permute.xlu1 %1684 }
 0x18c   : > { %v1770_v5 = vsel %vm1742_vm7, %v1685_v37, %v7850_v17  ;;  %v1683_v56 = vpop.permute.xlu0 %1682  ;;  %v6572_v34 = vpack.c.bf16 %v901_v11, %v885_v28  ;;  %13724 = vst [vmem:[#allocation100_spill] sm:$0xff] %v8646_v59  ;;  %v8652_v17 = vld [vmem:[%s7325_s14 + $0xe8] sm:$0xff] }
 0x18d   : > { %v1856_v9 = vmul.f32 %v8630_v50, %v1770_v5  ;;  %v1769_v42 = vsel %vm1742_vm7, %v1683_v56, %v7852_v55  ;;  %1507 = vrot.lane.b32.xlu1 %v8551_v32, %s7233_s20  ;;  %v8657_v11 = vld [vmem:[%s7325_s14 + $0x68] sm:$0xff] }
 0x18e   : > { %v1840_v23 = vmul.f32 %v8630_v50, %v1769_v42  ;;  %1505 = vrot.lane.b32.xlu0 %v8561_v30, %s7233_s20  ;;  %6573 = vmatprep.subr.bf16.mxu1 %v6572_v34  ;;  %v8672_v34 = vrot.slane %v8105_v33, %v7817_v35 }
 0x18f   : > { %v8654_v28 = vpop.permute.xlu1 %751 }
 0x190   : > { %v789_v55 = vsel %vm777_vm2, %v8654_v28, %v756_v12  ;;  %v8662_v5 = vpop.permute.xlu0 %749  ;;  %v6416_v38 = vpack.c.bf16 %v1856_v9, %v1840_v23  ;;  %13725 = vst [vmem:[#allocation101_spill] sm:$0xff] %v8672_v34 }
 0x191   : > { %v900_v47 = vmul.f32 %v8646_v59, %v789_v55  ;;  %v788_v42 = vsel %vm777_vm2, %v8662_v5, %v754_v8  ;;  %572 = vrot.lane.b32.xlu1 %v8652_v17, %s7228_s15 }
 0x192   : > { %v884_v50 = vmul.f32 %v8646_v59, %v788_v42  ;;  %570 = vrot.lane.b32.xlu0 %v8657_v11, %s7228_s15  ;;  %6417 = vmatprep.subr.bf16.mxu0 %v6416_v38  ;;  %v8697_v42 = vrot.slane %v8500_v3, %v7609_v60 }
 0x193   : > { %v8677_v9 = vpop.permute.xlu1 %1680 }
 0x194   : > { %13726 = vst [vmem:[#allocation102_spill] sm:$0xff] %v8677_v9  ;;  %v6574_v12 = vpack.c.bf16 %v900_v47, %v884_v50  ;;  %v1772_v8 = vsel %vm1742_vm7, %v8677_v9, %v1685_v37  ;;  %v8682_v23 = vpop.permute.xlu0 %1678  ;;  %13728 = vst [vmem:[#allocation104_spill] sm:$0xff] %v8697_v42 }
 0x195   : > { %13727 = vst [vmem:[#allocation103_spill] sm:$0xff] %v8682_v23  ;;  %v1855_v55 = vmul.f32 %v8672_v34, %v1772_v8  ;;  %v1771_v33 = vsel %vm1742_vm7, %v8682_v23, %v1683_v56  ;;  %771 = vrot.lane.b32.xlu1 %v8610_v40, %s7229_s16 }
 0x196   : > { %v1839_v38 = vmul.f32 %v8672_v34, %v1771_v33  ;;  %769 = vrot.lane.b32.xlu0 %v8615_v36, %s7229_s16  ;;  %6575 = vmatpush1.bf16.msra.mxu1 %v6574_v12 }
 0x197   : > { %v949_v47 = vpop.permute.xlu1 %948 }
 0x198   : > { %v947_v50 = vpop.permute.xlu0 %946  ;;  %v6418_v37 = vpack.c.bf16 %v1855_v55, %v1839_v38 }
 0x199   : > { %1700 = vrot.lane.b32.xlu1 %v8551_v32, %s7234_s21 }
 0x19a   : > { %1698 = vrot.lane.b32.xlu0 %v8561_v30, %s7234_s21  ;;  %6419 = vmatpush1.bf16.msra.mxu0 %v6418_v37  ;;  %v6320_v37 = vld [vmem:[%s13248_s0 + $0x88] ss:$0 sm:$0xff] }
 0x19b   : > { %v8701_v56 = vpop.permute.xlu1 %952 }
 0x19c   : > { %13729 = vst [vmem:[#allocation105_spill] sm:$0xff] %v8701_v56  ;;  %v980_v12 = vsel %vm970_vm3, %v949_v47, %v8701_v56  ;;  %v8706_v8 = vpop.permute.xlu0 %950 }
 0x19d   : > { %13730 = vst [vmem:[#allocation106_spill] sm:$0xff] %v8706_v8  ;;  %v1094_v55 = vmul.f32 %v8697_v42, %v980_v12  ;;  %v979_v33 = vsel %vm970_vm3, %v947_v50, %v8706_v8  ;;  %767 = vrot.lane.b32.xlu1 %v8652_v17, %s7229_s16 }
 0x19e   : > { %v1078_v38 = vmul.f32 %v8697_v42, %v979_v33  ;;  %765 = vrot.lane.b32.xlu0 %v8657_v11, %s7229_s16  ;;  %v8730_v33 = vrot.slane %v8534_v6, %v7609_v60 }
 0x19f   : > { %v1878_v59 = vpop.permute.xlu1 %1877 }
 0x1a0   : > { %v1963_v12 = vsel %vm1935_vm8, %v1878_v59, %v7891_v48  ;;  %v1876_v34 = vpop.permute.xlu0 %1875  ;;  %v6576_v56 = vpack.c.bf16 %v1094_v55, %v1078_v38  ;;  %13731 = vst [vmem:[#allocation107_spill] sm:$0xff] %v8730_v33 }
 0x1a1   : > { %v2049_v8 = vmul.f32 %v6320_v37, %v1963_v12  ;;  %v1962_v23 = vsel %vm1935_vm8, %v1876_v34, %v7893_v29  ;;  %964 = vrot.lane.b32.xlu1 %v8610_v40, %s7230_s17 }
 0x1a2   : > { %v2033_v42 = vmul.f32 %v6320_v37, %v1962_v23  ;;  %962 = vrot.lane.b32.xlu0 %v8615_v36, %s7230_s17  ;;  %6577 = vmatprep.subr.bf16.mxu1 %v6576_v56 }
 0x1a3   : > { %v8734_v48 = vpop.permute.xlu1 %944 }
 0x1a4   : > { %13732 = vst [vmem:[#allocation108_spill] sm:$0xff] %v8734_v48  ;;  %v982_v55 = vsel %vm970_vm3, %v8734_v48, %v949_v47  ;;  %v8739_v38 = vpop.permute.xlu0 %942  ;;  %v6420_v29 = vpack.c.bf16 %v2049_v8, %v2033_v42  ;;  %v6319_v47 = vld [vmem:[%s13248_s0 + $0x80] ss:$0 sm:$0xff] }
 0x1a5   : > { %13733 = vst [vmem:[#allocation109_spill] sm:$0xff] %v8739_v38  ;;  %v1093_v12 = vmul.f32 %v8730_v33, %v982_v55  ;;  %v981_v9 = vsel %vm970_vm3, %v8739_v38, %v947_v50  ;;  %1893 = vrot.lane.b32.xlu1 %v8551_v32, %s7235_s22  ;;  %v8756_v42 = vld [vmem:[%s13248_s0 + $0x20] sm:$0xff]  ;;  %v8761_v50 = vld [vmem:[%s13248_s0 + $0x28] sm:$0xff] }
 0x1a6   : > { %v1077_v23 = vmul.f32 %v8730_v33, %v981_v9  ;;  %1891 = vrot.lane.b32.xlu0 %v8561_v30, %s7235_s22  ;;  %6421 = vmatprep.subr.bf16.mxu0 %v6420_v29  ;;  %v8777_v33 = vrot.slane %v8756_v42, %v7499_v19  ;;  %v8800_v48 = vld [vmem:[%s7325_s14 + $0xc0] sm:$0xff] }
 0x1a7   : > { %v8763_v56 = vpop.permute.xlu1 %1873 }
 0x1a8   : > { %13734 = vst [vmem:[#allocation110_spill] sm:$0xff] %v8763_v56  ;;  %v6578_v9 = vpack.c.bf16 %v1093_v12, %v1077_v23  ;;  %v1965_v8 = vsel %vm1935_vm8, %v8763_v56, %v1878_v59  ;;  %v8768_v37 = vpop.permute.xlu0 %1871  ;;  %13736 = vst [vmem:[#allocation112_spill] sm:$0xff] %v8777_v33  ;;  %v8781_v12 = vrot.slane %v8761_v50, %v7499_v19 }
 0x1a9   : > { %13735 = vst [vmem:[#allocation111_spill] sm:$0xff] %v8768_v37  ;;  %v2048_v55 = vmul.f32 %v6319_v47, %v1965_v8  ;;  %v1964_v29 = vsel %vm1935_vm8, %v8768_v37, %v1876_v34  ;;  %960 = vrot.lane.b32.xlu1 %v8652_v17, %s7230_s17 }
 0x1aa   : > { %13737 = vst [vmem:[#allocation113_spill] sm:$0xff] %v8781_v12  ;;  %v2032_v59 = vmul.f32 %v6319_v47, %v1964_v29  ;;  %958 = vrot.lane.b32.xlu0 %v8657_v11, %s7230_s17  ;;  %6579 = vmatpush1.bf16.msra.mxu1 %v6578_v9 }
 0x1ab   : > { %v537_v23 = vpop.permute.xlu1 %536 }
 0x1ac   : > { %v606_v34 = vsel %vm584_vm1, %v537_v23, %v7951_v31  ;;  %v608_v8 = vsel %vm584_vm1, %v7525_v26, %v537_v23  ;;  %v535_v37 = vpop.permute.xlu0 %534  ;;  %v6422_v56 = vpack.c.bf16 %v2048_v55, %v2032_v59  ;;  %v8807_v55 = vld [vmem:[%s7325_s14 + $0x40] sm:$0xff] }
 0x1ad   : > { %v701_v38 = vmul.f32 %v8777_v33, %v608_v8  ;;  %v702_v47 = vmul.f32 %v8781_v12, %v606_v34  ;;  %v605_v29 = vsel %vm584_vm1, %v535_v37, %v7953_v20  ;;  %v607_v9 = vsel %vm584_vm1, %v7506_v21, %v535_v37  ;;  %552 = vrot.lane.b32.xlu1 %v8800_v48, %s7228_s15 }
 0x1ae   : > { %v685_v26 = vmul.f32 %v8777_v33, %v607_v9  ;;  %v686_v31 = vmul.f32 %v8781_v12, %v605_v29  ;;  %550 = vrot.lane.b32.xlu0 %v8807_v55, %s7228_s15  ;;  %6423 = vmatpush1.bf16.msra.mxu0 %v6422_v56  ;;  %v8816_v21 = vrot.slane %v8500_v3, %v7663_v49 }
 0x1af   : > { %v1142_v20 = vpop.permute.xlu1 %1141 }
 0x1b0   : > { %v6462_v59 = vpack.c.bf16 %v701_v38, %v685_v26  ;;  %v1140_v23 = vpop.permute.xlu0 %1139  ;;  %v6460_v34 = vpack.c.bf16 %v702_v47, %v686_v31  ;;  %13738 = vst [vmem:[#allocation114_spill] sm:$0xff] %v8816_v21  ;;  %v8837_v47 = vrot.slane %v8534_v6, %v7663_v49 }
 0x1b1   : > { %1157 = vrot.lane.b32.xlu1 %v8610_v40, %s7231_s18  ;;  %2141 = vmatmul.mubr.f32.vlgmr.msra.gmra.mrb[0].mxu0 %v7919_v52 }
 0x1b2   : > { %1155 = vrot.lane.b32.xlu0 %v8615_v36, %s7231_s18  ;;  %6461 = vmatprep.subr.bf16.mxu0 %v6460_v34  ;;  %13741 = vst [vmem:[#allocation117_spill] sm:$0xff] %v8837_v47 }
 0x1b3   : > { %6463 = vmatpush1.bf16.msra.mxu0 %v6462_v59  ;;  %v8820_v37 = vpop.permute.xlu1 %1145  ;;  %6337 = vmatprep.mubr.msk.f32.mxu0 %vm2072_vm0, %v8539_v44 }
 0x1b4   : > { %13739 = vst [vmem:[#allocation115_spill] sm:$0xff] %v8820_v37  ;;  %v1173_v38 = vsel %vm1163_vm4, %v1142_v20, %v8820_v37  ;;  %v8827_v56 = vpop.permute.xlu0 %1143 }
 0x1b5   : > { %13740 = vst [vmem:[#allocation116_spill] sm:$0xff] %v8827_v56  ;;  %v1287_v52 = vmul.f32 %v8816_v21, %v1173_v38  ;;  %v1172_v8 = vsel %vm1163_vm4, %v1140_v23, %v8827_v56  ;;  %1153 = vrot.lane.b32.xlu1 %v8652_v17, %s7231_s18 }
 0x1b6   : > { %v1271_v29 = vmul.f32 %v8816_v21, %v1172_v8  ;;  %1151 = vrot.lane.b32.xlu0 %v8657_v11, %s7231_s18  ;;  %v8857_v8 = vrot.slane %v8756_v42, %v7555_v39  ;;  %v8861_v21 = vrot.slane %v8761_v50, %v7555_v39 }
 0x1b7   : > { %v8842_v9 = vpop.permute.xlu1 %1137 }
 0x1b8   : > { %v1175_v26 = vsel %vm1163_vm4, %v8842_v9, %v1142_v20  ;;  %v8847_v31 = vpop.permute.xlu0 %1135  ;;  %v6580_v59 = vpack.c.bf16 %v1287_v52, %v1271_v29  ;;  %13742 = vst [vmem:[#allocation118_spill] sm:$0xff] %v8857_v8  ;;  %13743 = vst [vmem:[#allocation119_spill] sm:$0xff] %v8861_v21  ;;  %v6584_v29 = vpack.c.bf16 %v8018_v61, %v8021_v58  ;;  %v13746_v61 = vld [vmem:[#allocation9_spill] sm:$0xff] }
 0x1b9   : > { %v1286_v34 = vmul.f32 %v8837_v47, %v1175_v26  ;;  %v1174_v38 = vsel %vm1163_vm4, %v8847_v31, %v1140_v23  ;;  %747 = vrot.lane.b32.xlu1 %v8800_v48, %s7229_s16  ;;  %v8868_v23 = vrot.slane %v8756_v42, %v7609_v60 }
 0x1ba   : > { %v1270_v20 = vmul.f32 %v8837_v47, %v1174_v38  ;;  %745 = vrot.lane.b32.xlu0 %v8807_v55, %s7229_s16  ;;  %6581 = vmatprep.subr.bf16.mxu1 %v6580_v59  ;;  %v8880_v59 = vrot.slane %v8761_v50, %v7609_v60 }
 0x1bb   : > { %v732_v52 = vpop.permute.xlu1 %731  ;;  %13744 = vst [vmem:[#allocation120_spill] sm:$0xff] %v8868_v23 }
 0x1bc   : > { %v6582_v26 = vpack.c.bf16 %v1286_v34, %v1270_v20  ;;  %v799_v33 = vsel %vm777_vm2, %v732_v52, %v7998_v4  ;;  %v801_v38 = vsel %vm777_vm2, %v7571_v45, %v732_v52  ;;  %v730_v47 = vpop.permute.xlu0 %729  ;;  %13745 = vst [vmem:[#allocation121_spill] sm:$0xff] %v8880_v59 }
 0x1bd   : > { %v894_v12 = vmul.f32 %v8857_v8, %v801_v38  ;;  %v895_v56 = vmul.f32 %v8861_v21, %v799_v33  ;;  %v798_v58 = vsel %vm777_vm2, %v730_v47, %v8000_v43  ;;  %v800_v4 = vsel %vm777_vm2, %v13746_v61, %v730_v47  ;;  %940 = vrot.lane.b32.xlu1 %v8800_v48, %s7230_s17  ;;  %v7161_v43 = vld [vmem:[%s7325_s14 + $0xd0] sm:$0xff]  ;;  %v13747_v47 = vld [vmem:[#allocation50_spill] sm:$0xff] }
 0x1be   : > { %v878_v45 = vmul.f32 %v8857_v8, %v800_v4  ;;  %v879_v34 = vmul.f32 %v8861_v21, %v798_v58  ;;  %938 = vrot.lane.b32.xlu0 %v8807_v55, %s7230_s17  ;;  %6583 = vmatpush1.bf16.msra.mxu1 %v6582_v26  ;;  %v6586_v20 = vpack.c.bf16 %v7161_v43, %v8003_v51  ;;  %v13748_v61 = vld [vmem:[#allocation13_spill] sm:$0xff]  ;;  %v13750_v51 = vld [vmem:[#allocation14_spill] sm:$0xff] }
 0x1bf   : > { %v925_v33 = vpop.permute.xlu1 %924  ;;  %6585 = vmatprep.subr.bf16.mxu1 %v6584_v29  ;;  %v13749_v29 = vld [vmem:[#allocation51_spill] sm:$0xff] }
 0x1c0   : > { %v6466_v52 = vpack.c.bf16 %v894_v12, %v878_v45  ;;  %v992_v38 = vsel %vm970_vm3, %v925_v33, %v13747_v47  ;;  %v994_v58 = vsel %vm970_vm3, %v13748_v61, %v925_v33  ;;  %v923_v4 = vpop.permute.xlu0 %922  ;;  %v6464_v8 = vpack.c.bf16 %v895_v56, %v879_v34  ;;  %v8913_v45 = vld [vmem:[%s7325_s14 + $0xf8] sm:$0xff] }
 0x1c1   : > { %v1087_v21 = vmul.f32 %v8868_v23, %v994_v58  ;;  %v1088_v26 = vmul.f32 %v8880_v59, %v992_v38  ;;  %v991_v37 = vsel %vm970_vm3, %v923_v4, %v13749_v29  ;;  %v993_v12 = vsel %vm970_vm3, %v13750_v51, %v923_v4  ;;  %1354 = vrot.lane.b32.xlu1 %v8913_v45, %s7232_s19  ;;  %v8920_v34 = vld [vmem:[%s7325_s14 + $0x78] sm:$0xff] }
 0x1c2   : > { %v1071_v33 = vmul.f32 %v8868_v23, %v993_v12  ;;  %v1072_v56 = vmul.f32 %v8880_v59, %v991_v37  ;;  %1352 = vrot.lane.b32.xlu0 %v8920_v34, %s7232_s19  ;;  %6465 = vmatprep.subr.bf16.mxu0 %v6464_v8  ;;  %v8928_v58 = vrot.slane %v8500_v3, %v7711_v41 }
 0x1c3   : > { %6467 = vmatpush1.bf16.msra.mxu0 %v6466_v52  ;;  %v1339_v43 = vpop.permute.xlu1 %1338  ;;  %6587 = vmatpush1.bf16.msra.mxu1 %v6586_v20  ;;  %v8947_v4 = vrot.slane %v8534_v6, %v7711_v41 }
 0x1c4   : > { %v6470_v47 = vpack.c.bf16 %v1087_v21, %v1071_v33  ;;  %v1337_v38 = vpop.permute.xlu0 %1336  ;;  %v6468_v61 = vpack.c.bf16 %v1088_v26, %v1072_v56  ;;  %13751 = vst [vmem:[#allocation9_spill] sm:$0xff] %v8928_v58  ;;  %v7236_v26 = vmov 0  }
 0x1c5   : > { %1350 = vrot.lane.b32.xlu1 %v8610_v40, %s7232_s19  ;;  %13754 = vst [vmem:[#allocation51_spill] sm:$0xff] %v8947_v4  ;;  %7078 = vset.pattern.permute.xlu0 %v7236_v26 }
 0x1c6   : > { %1348 = vrot.lane.b32.xlu0 %v8615_v36, %s7232_s19  ;;  %6469 = vmatprep.subr.bf16.mxu0 %v6468_v61 }
 0x1c7   : > { %6471 = vmatpush1.bf16.msra.mxu0 %v6470_v47  ;;  %v8932_v37 = vpop.permute.xlu1 %1342  ;;  %7079 = vset.pattern.permute.xlu1 %v7236_v26 }
 0x1c8   : > { %13752 = vst [vmem:[#allocation50_spill] sm:$0xff] %v8932_v37  ;;  %v1364_v21 = vsel %vm1356_vm5, %v1339_v43, %v8932_v37  ;;  %v8937_v8 = vpop.permute.xlu0 %1340  ;;  %v13780_v37 = vld [vmem:[#allocation29_spill] sm:$0xff] }
 0x1c9   : > { %13753 = vst [vmem:[#allocation13_spill] sm:$0xff] %v8937_v8  ;;  %v1480_v20 = vmul.f32 %v8928_v58, %v1364_v21  ;;  %v1363_v52 = vsel %vm1356_vm5, %v1337_v38, %v8937_v8  ;;  %1133 = vrot.lane.b32.xlu1 %v8800_v48, %s7231_s18  ;;  %v8967_v21 = vrot.slane %v8756_v42, %v7663_v49 }
 0x1ca   : > { %v1464_v29 = vmul.f32 %v8928_v58, %v1363_v52  ;;  %1131 = vrot.lane.b32.xlu0 %v8807_v55, %s7231_s18  ;;  %v8971_v52 = vrot.slane %v8761_v50, %v7663_v49 }
 0x1cb   : > { %v8952_v51 = vpop.permute.xlu1 %1334  ;;  %13755 = vst [vmem:[#allocation14_spill] sm:$0xff] %v8967_v21 }
 0x1cc   : > { %v1366_v12 = vsel %vm1356_vm5, %v8952_v51, %v1339_v43  ;;  %v8957_v33 = vpop.permute.xlu0 %1332  ;;  %v6588_v56 = vpack.c.bf16 %v1480_v20, %v1464_v29  ;;  %13756 = vst [vmem:[#allocation122_spill] sm:$0xff] %v8971_v52  ;;  %v13757_v29 = vld [vmem:[#allocation18_spill] sm:$0xff] }
 0x1cd   : > { %v1479_v47 = vmul.f32 %v8947_v4, %v1366_v12  ;;  %v1365_v61 = vsel %vm1356_vm5, %v8957_v33, %v1337_v38  ;;  %1547 = vrot.lane.b32.xlu1 %v8913_v45, %s7233_s20 }
 0x1ce   : > { %v1463_v43 = vmul.f32 %v8947_v4, %v1365_v61  ;;  %1545 = vrot.lane.b32.xlu0 %v8920_v34, %s7233_s20  ;;  %6589 = vmatprep.subr.bf16.mxu1 %v6588_v56  ;;  %v13758_v56 = vld [vmem:[#allocation19_spill] sm:$0xff] }
 0x1cf   : > { %v1118_v20 = vpop.permute.xlu1 %1117 }
 0x1d0   : > { %v6590_v26 = vpack.c.bf16 %v1479_v47, %v1463_v43  ;;  %v1185_v38 = vsel %vm1163_vm4, %v1118_v20, %v8147_v22  ;;  %v1187_v12 = vsel %vm1163_vm4, %v13757_v29, %v1118_v20  ;;  %v1116_v58 = vpop.permute.xlu0 %1115 }
 0x1d1   : > { %v1280_v59 = vmul.f32 %v8967_v21, %v1187_v12  ;;  %v1281_v23 = vmul.f32 %v8971_v52, %v1185_v38  ;;  %v1184_v61 = vsel %vm1163_vm4, %v1116_v58, %v8152_v24  ;;  %v1186_v47 = vsel %vm1163_vm4, %v13758_v56, %v1116_v58  ;;  %1543 = vrot.lane.b32.xlu1 %v8610_v40, %s7233_s20 }
 0x1d2   : > { %v1264_v22 = vmul.f32 %v8967_v21, %v1186_v47  ;;  %v1265_v43 = vmul.f32 %v8971_v52, %v1184_v61  ;;  %1541 = vrot.lane.b32.xlu0 %v8615_v36, %s7233_s20  ;;  %6591 = vmatpush1.bf16.msra.mxu1 %v6590_v26  ;;  %v6476_v24 = vpack.c.bf16 %v8551_v32, %v8561_v30 }
 0x1d3   : > { %v1532_v20 = vpop.permute.xlu1 %1531  ;;  %v9002_v58 = vrot.slane %v8500_v3, %v7769_v2 }
 0x1d4   : > { %v6474_v38 = vpack.c.bf16 %v1280_v59, %v1264_v22  ;;  %v1530_v29 = vpop.permute.xlu0 %1529  ;;  %v6472_v12 = vpack.c.bf16 %v1281_v23, %v1265_v43  ;;  %v6478_v23 = vpack.c.bf16 %v8339_v63, %v8349_v46  ;;  %v9023_v46 = vrot.slane %v8534_v6, %v7769_v2 }
 0x1d5   : > { %1740 = vrot.lane.b32.xlu1 %v8913_v45, %s7234_s21  ;;  %13759 = vst [vmem:[#allocation18_spill] sm:$0xff] %v9002_v58 }
 0x1d6   : > { %1738 = vrot.lane.b32.xlu0 %v8920_v34, %s7234_s21  ;;  %6473 = vmatprep.subr.bf16.mxu0 %v6472_v12  ;;  %13762 = vst [vmem:[#allocation124_spill] sm:$0xff] %v9023_v46 }
 0x1d7   : > { %6475 = vmatpush1.bf16.msra.mxu0 %v6474_v38  ;;  %v9006_v26 = vpop.permute.xlu1 %1535 }
 0x1d8   : > { %13760 = vst [vmem:[#allocation19_spill] sm:$0xff] %v9006_v26  ;;  %v1557_v32 = vsel %vm1549_vm6, %v1532_v20, %v9006_v26  ;;  %v9013_v30 = vpop.permute.xlu0 %1533  ;;  %6477 = vmatprep.subr.bf16.mxu0 %v6476_v24  ;;  %v9040_v24 = vld [vmem:[%s7325_s14 + $0xc8] sm:$0xff] }
 0x1d9   : > { %13761 = vst [vmem:[#allocation123_spill] sm:$0xff] %v9013_v30  ;;  %v1673_v59 = vmul.f32 %v9002_v58, %v1557_v32  ;;  %v1556_v61 = vsel %vm1549_vm6, %v1530_v29, %v9013_v30  ;;  %1736 = vrot.lane.b32.xlu1 %v8610_v40, %s7234_s21  ;;  %v9046_v32 = vld [vmem:[%s7325_s14 + $0x48] sm:$0xff] }
 0x1da   : > { %v1657_v63 = vmul.f32 %v9002_v58, %v1556_v61  ;;  %1734 = vrot.lane.b32.xlu0 %v8615_v36, %s7234_s21 }
 0x1db   : > { %v9028_v56 = vpop.permute.xlu1 %1527  ;;  %6479 = vmatpush1.bf16.msra.mxu0 %v6478_v23 }
 0x1dc   : > { %v1559_v47 = vsel %vm1549_vm6, %v9028_v56, %v1532_v20  ;;  %v9033_v22 = vpop.permute.xlu0 %1525  ;;  %v6592_v43 = vpack.c.bf16 %v1673_v59, %v1657_v63 }
 0x1dd   : > { %v1672_v38 = vmul.f32 %v9023_v46, %v1559_v47  ;;  %v1558_v12 = vsel %vm1549_vm6, %v9033_v22, %v1530_v29  ;;  %1330 = vrot.lane.b32.xlu1 %v9040_v24, %s7232_s19  ;;  %v9054_v29 = vrot.slane %v8500_v3, %v7817_v35  ;;  %v9073_v3 = vrot.slane %v8534_v6, %v7817_v35 }
 0x1de   : > { %v1656_v23 = vmul.f32 %v9023_v46, %v1558_v12  ;;  %1328 = vrot.lane.b32.xlu0 %v9046_v32, %s7232_s19  ;;  %6593 = vmatprep.subr.bf16.mxu1 %v6592_v43 }
 0x1df   : > { %v1725_v20 = vpop.permute.xlu1 %1724  ;;  %13763 = vst [vmem:[#allocation125_spill] sm:$0xff] %v9054_v29  ;;  %13766 = vst [vmem:[#allocation128_spill] sm:$0xff] %v9073_v3 }
 0x1e0   : > { %v6594_v59 = vpack.c.bf16 %v1672_v38, %v1656_v23  ;;  %v1723_v61 = vpop.permute.xlu0 %1722 }
 0x1e1   : > { %1933 = vrot.lane.b32.xlu1 %v8913_v45, %s7235_s22 }
 0x1e2   : > { %1931 = vrot.lane.b32.xlu0 %v8920_v34, %s7235_s22  ;;  %6595 = vmatpush1.bf16.msra.mxu1 %v6594_v59 }
 0x1e3   : > { %v9058_v63 = vpop.permute.xlu1 %1728 }
 0x1e4   : > { %13764 = vst [vmem:[#allocation126_spill] sm:$0xff] %v9058_v63  ;;  %v1750_v47 = vsel %vm1742_vm7, %v1725_v20, %v9058_v63  ;;  %v9063_v43 = vpop.permute.xlu0 %1726 }
 0x1e5   : > { %13765 = vst [vmem:[#allocation127_spill] sm:$0xff] %v9063_v43  ;;  %v1866_v38 = vmul.f32 %v9054_v29, %v1750_v47  ;;  %v1749_v12 = vsel %vm1742_vm7, %v1723_v61, %v9063_v43  ;;  %1929 = vrot.lane.b32.xlu1 %v8610_v40, %s7235_s22 }
 0x1e6   : > { %v1850_v23 = vmul.f32 %v9054_v29, %v1749_v12  ;;  %1927 = vrot.lane.b32.xlu0 %v8615_v36, %s7235_s22  ;;  %v9093_v12 = vrot.slane %v8756_v42, %v7711_v41  ;;  %v9097_v29 = vrot.slane %v8761_v50, %v7711_v41 }
 0x1e7   : > { %v9078_v59 = vpop.permute.xlu1 %1720 }
 0x1e8   : > { %v1752_v47 = vsel %vm1742_vm7, %v9078_v59, %v1725_v20  ;;  %v9083_v58 = vpop.permute.xlu0 %1718  ;;  %v6596_v46 = vpack.c.bf16 %v1866_v38, %v1850_v23  ;;  %13767 = vst [vmem:[#allocation129_spill] sm:$0xff] %v9093_v12  ;;  %13768 = vst [vmem:[#allocation130_spill] sm:$0xff] %v9097_v29 }
 0x1e9   : > { %v1865_v4 = vmul.f32 %v9073_v3, %v1752_v47  ;;  %v1751_v6 = vsel %vm1742_vm7, %v9083_v58, %v1723_v61  ;;  %1523 = vrot.lane.b32.xlu1 %v9040_v24, %s7233_s20  ;;  %v13769_v47 = vld [vmem:[#allocation23_spill] sm:$0xff] }
 0x1ea   : > { %v1849_v20 = vmul.f32 %v9073_v3, %v1751_v6  ;;  %1521 = vrot.lane.b32.xlu0 %v9046_v32, %s7233_s20  ;;  %6597 = vmatprep.subr.bf16.mxu1 %v6596_v46  ;;  %v13770_v46 = vld [vmem:[#allocation24_spill] sm:$0xff] }
 0x1eb   : > { %v1315_v38 = vpop.permute.xlu1 %1314 }
 0x1ec   : > { %v6598_v23 = vpack.c.bf16 %v1865_v4, %v1849_v20  ;;  %v1376_v61 = vsel %vm1356_vm5, %v1315_v38, %v8267_v10  ;;  %v1378_v52 = vsel %vm1356_vm5, %v13769_v47, %v1315_v38  ;;  %v1313_v21 = vpop.permute.xlu0 %1312 }
 0x1ed   : > { %v1473_v43 = vmul.f32 %v9093_v12, %v1378_v52  ;;  %v1474_v63 = vmul.f32 %v9097_v29, %v1376_v61  ;;  %v1375_v6 = vsel %vm1356_vm5, %v1313_v21, %v8272_v62  ;;  %v1377_v4 = vsel %vm1356_vm5, %v13770_v46, %v1313_v21  ;;  %1716 = vrot.lane.b32.xlu1 %v9040_v24, %s7234_s21  ;;  %v6330_v62 = vld [vmem:[%s13248_s0 + $0xd8] ss:$0 sm:$0xff] }
 0x1ee   : > { %v1457_v10 = vmul.f32 %v9093_v12, %v1377_v4  ;;  %v1458_v20 = vmul.f32 %v9097_v29, %v1375_v6  ;;  %1714 = vrot.lane.b32.xlu0 %v9046_v32, %s7234_s21  ;;  %6599 = vmatpush1.bf16.msra.mxu1 %v6598_v23  ;;  %v6329_v4 = vld [vmem:[%s13248_s0 + $0xd0] ss:$0 sm:$0xff] }
 0x1ef   : > { %v1918_v52 = vpop.permute.xlu1 %1917 }
 0x1f0   : > { %v6482_v38 = vpack.c.bf16 %v1473_v43, %v1457_v10  ;;  %v1916_v61 = vpop.permute.xlu0 %1915  ;;  %v6480_v47 = vpack.c.bf16 %v1474_v63, %v1458_v20  ;;  %v9149_v10 = vld [vmem:[%s13248_s0 + $0x78] sm:$0xff] }
 0x1f1   : > { %1909 = vrot.lane.b32.xlu1 %v9040_v24, %s7235_s22  ;;  %v9165_v3 = vrot.slane %v9149_v10, %v7499_v19 }
 0x1f2   : > { %1907 = vrot.lane.b32.xlu0 %v9046_v32, %s7235_s22  ;;  %6481 = vmatprep.subr.bf16.mxu0 %v6480_v47 }
 0x1f3   : > { %6483 = vmatpush1.bf16.msra.mxu0 %v6482_v38  ;;  %v9129_v21 = vpop.permute.xlu1 %1921  ;;  %13773 = vst [vmem:[#allocation131_spill] sm:$0xff] %v9165_v3 }
 0x1f4   : > { %13771 = vst [vmem:[#allocation23_spill] sm:$0xff] %v9129_v21  ;;  %v1943_v43 = vsel %vm1935_vm8, %v1918_v52, %v9129_v21  ;;  %v9134_v23 = vpop.permute.xlu0 %1919 }
 0x1f5   : > { %13772 = vst [vmem:[#allocation24_spill] sm:$0xff] %v9134_v23  ;;  %v2059_v63 = vmul.f32 %v6330_v62, %v1943_v43  ;;  %v1942_v6 = vsel %vm1935_vm8, %v1916_v61, %v9134_v23  ;;  %568 = vrot.lane.b32.xlu1 %v8382_v7, %s7228_s15  ;;  %v13775_v23 = vld [vmem:[#allocation58_spill] sm:$0xff] }
 0x1f6   : > { %v2043_v46 = vmul.f32 %v6330_v62, %v1942_v6  ;;  %566 = vrot.lane.b32.xlu0 %v8387_v27, %s7228_s15 }
 0x1f7   : > { %v9151_v20 = vpop.permute.xlu1 %1913 }
 0x1f8   : > { %v1945_v38 = vsel %vm1935_vm8, %v9151_v20, %v1918_v52  ;;  %v9156_v47 = vpop.permute.xlu0 %1911  ;;  %v6600_v62 = vpack.c.bf16 %v2059_v63, %v2043_v46  ;;  %v13774_v63 = vld [vmem:[#allocation57_spill] sm:$0xff] }
 0x1f9   : > { %v2058_v43 = vmul.f32 %v6329_v4, %v1945_v38  ;;  %v1944_v6 = vsel %vm1935_vm8, %v9156_v47, %v1916_v61  ;;  %763 = vrot.lane.b32.xlu1 %v8382_v7, %s7229_s16 }
 0x1fa   : > { %v2042_v29 = vmul.f32 %v6329_v4, %v1944_v6  ;;  %761 = vrot.lane.b32.xlu0 %v8387_v27, %s7229_s16  ;;  %6601 = vmatprep.subr.bf16.mxu1 %v6600_v62  ;;  %v9180_v4 = vrot.slane %v8756_v42, %v7769_v2  ;;  %v9189_v62 = vld [vmem:[%s13248_s0 + $0x70] sm:$0xff] }
 0x1fb   : > { %v577_v52 = vpop.permute.xlu1 %576  ;;  %v9202_v8 = vrot.slane %v9189_v62, %v7499_v19 }
 0x1fc   : > { %v6602_v12 = vpack.c.bf16 %v2058_v43, %v2042_v29  ;;  %v586_v46 = vsel %vm584_vm1, %v577_v52, %v13774_v63  ;;  %v575_v38 = vpop.permute.xlu0 %574  ;;  %13776 = vst [vmem:[#allocation57_spill] sm:$0xff] %v9180_v4  ;;  %v9184_v29 = vrot.slane %v8761_v50, %v7769_v2  ;;  %v13778_v63 = vld [vmem:[#allocation28_spill] sm:$0xff] }
 0x1fd   : > { %v712_v61 = vmul.f32 %v9165_v3, %v586_v46  ;;  %v585_v21 = vsel %vm584_vm1, %v575_v38, %v13775_v23  ;;  %956 = vrot.lane.b32.xlu1 %v8382_v7, %s7230_s17  ;;  %13779 = vst [vmem:[#allocation28_spill] sm:$0xff] %v9202_v8 }
 0x1fe   : > { %13777 = vst [vmem:[#allocation58_spill] sm:$0xff] %v9184_v29  ;;  %v696_v43 = vmul.f32 %v9165_v3, %v585_v21  ;;  %954 = vrot.lane.b32.xlu0 %v8387_v27, %s7230_s17  ;;  %6603 = vmatpush1.bf16.msra.mxu1 %v6602_v12 }
 0x1ff   : > { %v1508_v23 = vpop.permute.xlu1 %1507 }
 0x200   : > { %v1569_v6 = vsel %vm1549_vm6, %v1508_v23, %v8353_v16  ;;  %v1571_v46 = vsel %vm1549_vm6, %v13778_v63, %v1508_v23  ;;  %v1506_v30 = vpop.permute.xlu0 %1505  ;;  %v6640_v26 = vpack.c.bf16 %v712_v61, %v696_v43  ;;  %v9241_v63 = vrot.slane %v9149_v10, %v7555_v39 }
 0x201   : > { %v1666_v21 = vmul.f32 %v9180_v4, %v1571_v46  ;;  %v1667_v3 = vmul.f32 %v9184_v29, %v1569_v6  ;;  %v1568_v12 = vsel %vm1549_vm6, %v1506_v30, %v8360_v1  ;;  %v1570_v16 = vsel %vm1549_vm6, %v13780_v37, %v1506_v30  ;;  %1149 = vrot.lane.b32.xlu1 %v8382_v7, %s7231_s18  ;;  %v9223_v1 = vld [vmem:[%s13250_s2] sm:$0xff] }
 0x202   : > { %v1650_v61 = vmul.f32 %v9180_v4, %v1570_v16  ;;  %v1651_v43 = vmul.f32 %v9184_v29, %v1568_v12  ;;  %1147 = vrot.lane.b32.xlu0 %v8387_v27, %s7231_s18  ;;  %6641 = vmatprep.subr.bf16.mxu1 %v6640_v26  ;;  %13781 = vst [vmem:[#allocation29_spill] sm:$0xff] %v9241_v63 }
 0x203   : > { %v9218_v23 = vpop.permute.xlu1 %572  ;;  %2496 = vmatmul.mubr.f32.vlgmr.msra.gmra.mrb[4].mxu1 %v9223_v1 }
 0x204   : > { %v6486_v37 = vpack.c.bf16 %v1666_v21, %v1650_v61  ;;  %v588_v7 = vsel %vm584_vm1, %v9218_v23, %v577_v52  ;;  %v9229_v30 = vpop.permute.xlu0 %570  ;;  %v6484_v6 = vpack.c.bf16 %v1667_v3, %v1651_v43  ;;  %6342 = vmatprep.mubr.msk.f32.mxu1 %vm2072_vm0, %v8539_v44  ;;  %v9257_v61 = vrot.slane %v8756_v42, %v7817_v35 }
 0x205   : > { %v711_v27 = vmul.f32 %v9202_v8, %v588_v7  ;;  %v587_v26 = vsel %vm584_vm1, %v9229_v30, %v575_v38  ;;  %1346 = vrot.lane.b32.xlu1 %v8652_v17, %s7232_s19  ;;  %v9261_v43 = vrot.slane %v8761_v50, %v7817_v35  ;;  %v13784_v7 = vld [vmem:[#allocation33_spill] sm:$0xff]  ;;  %v9274_v50 = vrot.slane %v9189_v62, %v7555_v39 }
 0x206   : > { %v695_v52 = vmul.f32 %v9202_v8, %v587_v26  ;;  %1344 = vrot.lane.b32.xlu0 %v8657_v11, %s7232_s19  ;;  %6485 = vmatprep.subr.bf16.mxu0 %v6484_v6  ;;  %13782 = vst [vmem:[#allocation132_spill] sm:$0xff] %v9257_v61 }
 0x207   : > { %6487 = vmatpush1.bf16.msra.mxu0 %v6486_v37  ;;  %v772_v3 = vpop.permute.xlu1 %771  ;;  %13783 = vst [vmem:[#allocation133_spill] sm:$0xff] %v9261_v43  ;;  %13785 = vst [vmem:[#allocation33_spill] sm:$0xff] %v9274_v50 }
 0x208   : > { %v6642_v46 = vpack.c.bf16 %v711_v27, %v695_v52  ;;  %v779_v38 = vsel %vm777_vm2, %v772_v3, %v8185_v13  ;;  %v770_v21 = vpop.permute.xlu0 %769 }
 0x209   : > { %v905_v12 = vmul.f32 %v9241_v63, %v779_v38  ;;  %v778_v16 = vsel %vm777_vm2, %v770_v21, %v8192_v15  ;;  %1539 = vrot.lane.b32.xlu1 %v8652_v17, %s7233_s20  ;;  %v13786_v38 = vld [vmem:[#allocation34_spill] sm:$0xff] }
 0x20a   : > { %v889_v13 = vmul.f32 %v9241_v63, %v778_v16  ;;  %1537 = vrot.lane.b32.xlu0 %v8657_v11, %s7233_s20  ;;  %6643 = vmatpush1.bf16.msra.mxu1 %v6642_v46 }
 0x20b   : > { %v1701_v37 = vpop.permute.xlu1 %1700 }
 0x20c   : > { %v1762_v15 = vsel %vm1742_vm7, %v1701_v37, %v8407_v25  ;;  %v1764_v42 = vsel %vm1742_vm7, %v13784_v7, %v1701_v37  ;;  %v1699_v6 = vpop.permute.xlu0 %1698  ;;  %v6644_v27 = vpack.c.bf16 %v905_v12, %v889_v13 }
 0x20d   : > { %v1859_v26 = vmul.f32 %v9257_v61, %v1764_v42  ;;  %v1860_v52 = vmul.f32 %v9261_v43, %v1762_v15  ;;  %v1761_v46 = vsel %vm1742_vm7, %v1699_v6, %v8412_v14  ;;  %v1763_v25 = vsel %vm1742_vm7, %v13786_v38, %v1699_v6  ;;  %1732 = vrot.lane.b32.xlu1 %v8652_v17, %s7234_s21 }
 0x20e   : > { %v1843_v12 = vmul.f32 %v9257_v61, %v1763_v25  ;;  %v1844_v16 = vmul.f32 %v9261_v43, %v1761_v46  ;;  %1730 = vrot.lane.b32.xlu0 %v8657_v11, %s7234_s21  ;;  %6645 = vmatprep.subr.bf16.mxu1 %v6644_v27  ;;  %v9305_v27 = vrot.slane %v9149_v10, %v7609_v60 }
 0x20f   : > { %v9290_v13 = vpop.permute.xlu1 %767 }
 0x210   : > { %v6490_v37 = vpack.c.bf16 %v1859_v26, %v1843_v12  ;;  %v781_v14 = vsel %vm777_vm2, %v9290_v13, %v772_v3  ;;  %v9295_v15 = vpop.permute.xlu0 %765  ;;  %v6488_v7 = vpack.c.bf16 %v1860_v52, %v1844_v16  ;;  %13787 = vst [vmem:[#allocation34_spill] sm:$0xff] %v9305_v27  ;;  %v9310_v3 = vpop.f32.mrb[0].mxu1 }
 0x211   : > { %v904_v42 = vmul.f32 %v9274_v50, %v781_v14  ;;  %v780_v6 = vsel %vm777_vm2, %v9295_v15, %v770_v21  ;;  %1925 = vrot.lane.b32.xlu1 %v8652_v17, %s7235_s22  ;;  %v2066_v21 = vld [vmem:[%s13251_s3] sm:$0xff]  ;;  %v9315_v46 = vpop.f32.mrb[1].mxu1  ;;  %v6324_v14 = vld [vmem:[%s13248_s0 + $0xa8] ss:$0 sm:$0xff] }
 0x212   : > { %v888_v26 = vmul.f32 %v9274_v50, %v780_v6  ;;  %1923 = vrot.lane.b32.xlu0 %v8657_v11, %s7235_s22  ;;  %6489 = vmatprep.subr.bf16.mxu0 %v6488_v7 }
 0x213   : > { %6491 = vmatpush1.bf16.msra.mxu0 %v6490_v37  ;;  %v965_v52 = vpop.permute.xlu1 %964  ;;  %v6323_v37 = vld [vmem:[%s13248_s0 + $0xa0] ss:$0 sm:$0xff] }
 0x214   : > { %v6646_v17 = vpack.c.bf16 %v904_v42, %v888_v26  ;;  %v972_v38 = vsel %vm970_vm3, %v965_v52, %v8247_v57  ;;  %v963_v25 = vpop.permute.xlu0 %962  ;;  %v13788_v42 = vld [vmem:[#allocation36_spill] sm:$0xff] }
 0x215   : > { %v1098_v12 = vmul.f32 %v9305_v27, %v972_v38  ;;  %v971_v11 = vsel %vm970_vm3, %v963_v25, %v8252_v54 }
 0x216   : > { %v1082_v16 = vmul.f32 %v9305_v27, %v971_v11  ;;  %6647 = vmatpush1.bf16.msra.mxu1 %v6646_v17  ;;  %2069 = vperm.xlu0 %7078, %v2066_v21   ;;  %v9339_v17 = vrot.slane %v9189_v62, %v7609_v60  ;;  %v13790_v27 = vld [vmem:[#allocation37_spill] sm:$0xff] }
 0x217   : > { %v1894_v57 = vpop.permute.xlu1 %1893 }
 0x218   : > { %v1955_v7 = vsel %vm1935_vm8, %v1894_v57, %v8483_v0  ;;  %v1957_v54 = vsel %vm1935_vm8, %v13788_v42, %v1894_v57  ;;  %v1892_v6 = vpop.permute.xlu0 %1891  ;;  %v6648_v26 = vpack.c.bf16 %v1098_v12, %v1082_v16  ;;  %13789 = vst [vmem:[#allocation36_spill] sm:$0xff] %v9339_v17  ;;  %v9350_v12 = vld [vmem:[%s13248_s0 + $0x40] sm:$0xff]  ;;  %v9355_v16 = vld [vmem:[%s13248_s0 + $0x48] sm:$0xff] }
 0x219   : > { %v2052_v38 = vmul.f32 %v6323_v37, %v1957_v54  ;;  %v2053_v11 = vmul.f32 %v6324_v14, %v1955_v7  ;;  %v1954_v21 = vsel %vm1935_vm8, %v1892_v6, %v8488_v53  ;;  %v1956_v0 = vsel %vm1935_vm8, %v13790_v27, %v1892_v6 }
 0x21a   : > { %v2036_v63 = vmul.f32 %v6323_v37, %v1956_v0  ;;  %v2037_v50 = vmul.f32 %v6324_v14, %v1954_v21  ;;  %6649 = vmatprep.subr.bf16.mxu1 %v6648_v26  ;;  %v9370_v54 = vrot.slane %v9350_v12, %v7499_v19  ;;  %v13793_v26 = vld [vmem:[#allocation91_spill] sm:$0xff]  ;;  %v9385_v0 = vrot.slane %v9149_v10, %v7663_v49 }
 0x21b   : > { %v9357_v57 = vpop.permute.xlu1 %960 }
 0x21c   : > { %v6494_v53 = vpack.c.bf16 %v2052_v38, %v2036_v63  ;;  %v974_v27 = vsel %vm970_vm3, %v9357_v57, %v965_v52  ;;  %v9362_v37 = vpop.permute.xlu0 %958  ;;  %v6492_v14 = vpack.c.bf16 %v2053_v11, %v2037_v50  ;;  %13791 = vst [vmem:[#allocation37_spill] sm:$0xff] %v9370_v54  ;;  %v9374_v63 = vrot.slane %v9355_v16, %v7499_v19  ;;  %v13794_v11 = vld [vmem:[#allocation39_spill] sm:$0xff] }
 0x21d   : > { %v1097_v7 = vmul.f32 %v9339_v17, %v974_v27  ;;  %v973_v42 = vsel %vm970_vm3, %v9362_v37, %v963_v25  ;;  %13795 = vst [vmem:[#allocation91_spill] sm:$0xff] %v9385_v0 }
 0x21e   : > { %13792 = vst [vmem:[#allocation134_spill] sm:$0xff] %v9374_v63  ;;  %v1081_v6 = vmul.f32 %v9339_v17, %v973_v42  ;;  %6493 = vmatprep.subr.bf16.mxu0 %v6492_v14  ;;  %v13797_v42 = vld [vmem:[#allocation40_spill] sm:$0xff] }
 0x21f   : > { %6495 = vmatpush1.bf16.msra.mxu0 %v6494_v53  ;;  %v553_v52 = vpop.permute.xlu1 %552  ;;  %v13796_v53 = vld [vmem:[#allocation92_spill] sm:$0xff] }
 0x220   : > { %v6650_v50 = vpack.c.bf16 %v1097_v7, %v1081_v6  ;;  %v598_v38 = vsel %vm584_vm1, %v553_v52, %v13793_v26  ;;  %v600_v25 = vsel %vm584_vm1, %v13794_v11, %v553_v52  ;;  %v551_v21 = vpop.permute.xlu0 %550 }
 0x221   : > { %v705_v27 = vmul.f32 %v9370_v54, %v600_v25  ;;  %v706_v14 = vmul.f32 %v9374_v63, %v598_v38  ;;  %v597_v7 = vsel %vm584_vm1, %v551_v21, %v13796_v53  ;;  %v599_v6 = vsel %vm584_vm1, %v13797_v42, %v551_v21  ;;  %v13798_v25 = vld [vmem:[#allocation73_spill] sm:$0xff]  ;;  %v13799_v42 = vld [vmem:[#allocation74_spill] sm:$0xff] }
 0x222   : > { %v689_v26 = vmul.f32 %v9370_v54, %v599_v6  ;;  %v690_v52 = vmul.f32 %v9374_v63, %v597_v7  ;;  %6651 = vmatpush1.bf16.msra.mxu1 %v6650_v50  ;;  %2283 = vmatmul.mubr.f32.vlgmr.msra.gmra.mrb[2].mxu0 %v9223_v1  ;;  %v9409_v50 = vrot.slane %v9189_v62, %v7663_v49 }
 0x223   : > { %v1158_v11 = vpop.permute.xlu1 %1157  ;;  %6339 = vmatprep.mubr.msk.f32.mxu0 %vm2072_vm0, %v8539_v44 }
 0x224   : > { %v6534_v38 = vpack.c.bf16 %v705_v27, %v689_v26  ;;  %v1165_v53 = vsel %vm1163_vm4, %v1158_v11, %v13798_v25  ;;  %v1156_v17 = vpop.permute.xlu0 %1155  ;;  %v6532_v8 = vpack.c.bf16 %v706_v14, %v690_v52  ;;  %13800 = vst [vmem:[#allocation39_spill] sm:$0xff] %v9409_v50 }
 0x225   : > { %v1291_v21 = vmul.f32 %v9385_v0, %v1165_v53  ;;  %v1164_v7 = vsel %vm1163_vm4, %v1156_v17, %v13799_v42  ;;  %v9425_v53 = vrot.slane %v9350_v12, %v7555_v39  ;;  %v6656_v42 = vpack.c.bf16 %v8913_v45, %v8920_v34  ;;  %v13806_v34 = vld [vmem:[#allocation44_spill] sm:$0xff] }
 0x226   : > { %v1275_v6 = vmul.f32 %v9385_v0, %v1164_v7  ;;  %6533 = vmatprep.subr.bf16.mxu0 %v6532_v8  ;;  %v9429_v8 = vrot.slane %v9355_v16, %v7555_v39 }
 0x227   : > { %6535 = vmatpush1.bf16.msra.mxu0 %v6534_v38  ;;  %v9412_v44 = vpop.permute.xlu1 %1153  ;;  %13801 = vst [vmem:[#allocation92_spill] sm:$0xff] %v9425_v53 }
 0x228   : > { %v1167_v27 = vsel %vm1163_vm4, %v9412_v44, %v1158_v11  ;;  %v9417_v14 = vpop.permute.xlu0 %1151  ;;  %v6652_v26 = vpack.c.bf16 %v1291_v21, %v1275_v6  ;;  %13802 = vst [vmem:[#allocation40_spill] sm:$0xff] %v9429_v8  ;;  %v9434_v21 = vrot.slane %v9350_v12, %v7609_v60  ;;  %v13804_v6 = vld [vmem:[#allocation43_spill] sm:$0xff] }
 0x229   : > { %v1290_v52 = vmul.f32 %v9409_v50, %v1167_v27  ;;  %v1166_v25 = vsel %vm1163_vm4, %v9417_v14, %v1156_v17 }
 0x22a   : > { %v1274_v38 = vmul.f32 %v9409_v50, %v1166_v25  ;;  %6653 = vmatprep.subr.bf16.mxu1 %v6652_v26  ;;  %13803 = vst [vmem:[#allocation73_spill] sm:$0xff] %v9434_v21  ;;  %v9446_v26 = vrot.slane %v9355_v16, %v7609_v60 }
 0x22b   : > { %v748_v11 = vpop.permute.xlu1 %747 }
 0x22c   : > { %v6654_v17 = vpack.c.bf16 %v1290_v52, %v1274_v38  ;;  %v791_v7 = vsel %vm777_vm2, %v748_v11, %v8654_v28  ;;  %v793_v27 = vsel %vm777_vm2, %v13804_v6, %v748_v11  ;;  %v746_v0 = vpop.permute.xlu0 %745  ;;  %13805 = vst [vmem:[#allocation74_spill] sm:$0xff] %v9446_v26  ;;  %v6658_v11 = vpack.c.bf16 %v8610_v40, %v8615_v36  ;;  %v13810_v40 = vld [vmem:[#allocation109_spill] sm:$0xff] }
 0x22d   : > { %v898_v25 = vmul.f32 %v9425_v53, %v793_v27  ;;  %v899_v50 = vmul.f32 %v9429_v8, %v791_v7  ;;  %v790_v45 = vsel %vm777_vm2, %v746_v0, %v8662_v5  ;;  %v792_v28 = vsel %vm777_vm2, %v13806_v34, %v746_v0  ;;  %v13808_v5 = vld [vmem:[#allocation108_spill] sm:$0xff]  ;;  %v13809_v0 = vld [vmem:[#allocation47_spill] sm:$0xff] }
 0x22e   : > { %v882_v52 = vmul.f32 %v9425_v53, %v792_v28  ;;  %v883_v38 = vmul.f32 %v9429_v8, %v790_v45  ;;  %6655 = vmatpush1.bf16.msra.mxu1 %v6654_v17  ;;  %v9462_v7 = vrot.slane %v9149_v10, %v7711_v41  ;;  %v13813_v53 = vld [vmem:[#allocation85_spill] sm:$0xff] }
 0x22f   : > { %v941_v6 = vpop.permute.xlu1 %940  ;;  %6657 = vmatprep.subr.bf16.mxu1 %v6656_v42  ;;  %v13811_v42 = vld [vmem:[#allocation48_spill] sm:$0xff] }
 0x230   : > { %13807 = vst [vmem:[#allocation43_spill] sm:$0xff] %v9462_v7  ;;  %v6538_v27 = vpack.c.bf16 %v898_v25, %v882_v52  ;;  %v984_v54 = vsel %vm970_vm3, %v941_v6, %v13808_v5  ;;  %v986_v34 = vsel %vm970_vm3, %v13809_v0, %v941_v6  ;;  %v939_v45 = vpop.permute.xlu0 %938  ;;  %v6536_v17 = vpack.c.bf16 %v899_v50, %v883_v38  ;;  %v13812_v6 = vld [vmem:[#allocation84_spill] sm:$0xff] }
 0x231   : > { %v1091_v28 = vmul.f32 %v9434_v21, %v986_v34  ;;  %v1092_v36 = vmul.f32 %v9446_v26, %v984_v54  ;;  %v983_v63 = vsel %vm970_vm3, %v939_v45, %v13810_v40  ;;  %v985_v25 = vsel %vm970_vm3, %v13811_v42, %v939_v45 }
 0x232   : > { %v1075_v52 = vmul.f32 %v9434_v21, %v985_v25  ;;  %v1076_v5 = vmul.f32 %v9446_v26, %v983_v63  ;;  %6537 = vmatprep.subr.bf16.mxu0 %v6536_v17  ;;  %6659 = vmatpush1.bf16.msra.mxu1 %v6658_v11  ;;  %v9489_v63 = vrot.slane %v9189_v62, %v7711_v41  ;;  %v13821_v26 = vld [vmem:[#allocation95_spill] sm:$0xff] }
 0x233   : > { %6539 = vmatpush1.bf16.msra.mxu0 %v6538_v27  ;;  %v1355_v50 = vpop.permute.xlu1 %1354  ;;  %v9505_v25 = vrot.slane %v9350_v12, %v7663_v49 }
 0x234   : > { %v6542_v38 = vpack.c.bf16 %v1091_v28, %v1075_v52  ;;  %v1388_v54 = vsel %vm1356_vm5, %v1355_v50, %v13812_v6  ;;  %v1353_v0 = vpop.permute.xlu0 %1352  ;;  %v6540_v34 = vpack.c.bf16 %v1092_v36, %v1076_v5  ;;  %13814 = vst [vmem:[#allocation44_spill] sm:$0xff] %v9489_v63  ;;  %v9509_v52 = vrot.slane %v9355_v16, %v7663_v49 }
 0x235   : > { %v1484_v40 = vmul.f32 %v9462_v7, %v1388_v54  ;;  %v1387_v45 = vsel %vm1356_vm5, %v1353_v0, %v13813_v53  ;;  %13815 = vst [vmem:[#allocation108_spill] sm:$0xff] %v9505_v25  ;;  %v13817_v54 = vld [vmem:[#allocation54_spill] sm:$0xff] }
 0x236   : > { %v1468_v11 = vmul.f32 %v9462_v7, %v1387_v45  ;;  %6541 = vmatprep.subr.bf16.mxu0 %v6540_v34  ;;  %13816 = vst [vmem:[#allocation47_spill] sm:$0xff] %v9509_v52 }
 0x237   : > { %6543 = vmatpush1.bf16.msra.mxu0 %v6542_v38  ;;  %v9492_v27 = vpop.permute.xlu1 %1350 }
 0x238   : > { %v1358_v17 = vsel %vm1356_vm5, %v9492_v27, %v1355_v50  ;;  %v9497_v28 = vpop.permute.xlu0 %1348  ;;  %v6660_v36 = vpack.c.bf16 %v1484_v40, %v1468_v11  ;;  %v9520_v40 = vrot.slane %v9149_v10, %v7769_v2 }
 0x239   : > { %v1483_v42 = vmul.f32 %v9489_v63, %v1358_v17  ;;  %v1357_v53 = vsel %vm1356_vm5, %v9497_v28, %v1353_v0 }
 0x23a   : > { %v1467_v5 = vmul.f32 %v9489_v63, %v1357_v53  ;;  %6661 = vmatprep.subr.bf16.mxu1 %v6660_v36  ;;  %13818 = vst [vmem:[#allocation109_spill] sm:$0xff] %v9520_v40  ;;  %v13819_v36 = vld [vmem:[#allocation55_spill] sm:$0xff] }
 0x23b   : > { %v1134_v50 = vpop.permute.xlu1 %1133 }
 0x23c   : > { %v6662_v38 = vpack.c.bf16 %v1483_v42, %v1467_v5  ;;  %v1177_v6 = vsel %vm1163_vm4, %v1134_v50, %v8842_v9  ;;  %v1179_v0 = vsel %vm1163_vm4, %v13817_v54, %v1134_v50  ;;  %v1132_v34 = vpop.permute.xlu0 %1131  ;;  %v13820_v54 = vld [vmem:[#allocation94_spill] sm:$0xff] }
 0x23d   : > { %v1284_v45 = vmul.f32 %v9505_v25, %v1179_v0  ;;  %v1285_v11 = vmul.f32 %v9509_v52, %v1177_v6  ;;  %v1176_v17 = vsel %vm1163_vm4, %v1132_v34, %v8847_v31  ;;  %v1178_v9 = vsel %vm1163_vm4, %v13819_v36, %v1132_v34 }
 0x23e   : > { %v1268_v42 = vmul.f32 %v9505_v25, %v1178_v9  ;;  %v1269_v53 = vmul.f32 %v9509_v52, %v1176_v17  ;;  %6663 = vmatpush1.bf16.msra.mxu1 %v6662_v38  ;;  %v6548_v31 = vpack.c.bf16 %v9040_v24, %v9046_v32  ;;  %v9543_v38 = vrot.slane %v9189_v62, %v7769_v2 }
 0x23f   : > { %v1548_v5 = vpop.permute.xlu1 %1547  ;;  %v9561_v9 = vrot.slane %v9149_v10, %v7817_v35 }
 0x240   : > { %v6546_v50 = vpack.c.bf16 %v1284_v45, %v1268_v42  ;;  %v1581_v0 = vsel %vm1549_vm6, %v1548_v5, %v13820_v54  ;;  %v1546_v6 = vpop.permute.xlu0 %1545  ;;  %v6544_v7 = vpack.c.bf16 %v1285_v11, %v1269_v53  ;;  %13822 = vst [vmem:[#allocation48_spill] sm:$0xff] %v9543_v38  ;;  %v6550_v11 = vpack.c.bf16 %v8800_v48, %v8807_v55  ;;  %v13824_v53 = vld [vmem:[#allocation102_spill] sm:$0xff] }
 0x241   : > { %v1677_v63 = vmul.f32 %v9520_v40, %v1581_v0  ;;  %v1580_v34 = vsel %vm1549_vm6, %v1546_v6, %v13821_v26  ;;  %13823 = vst [vmem:[#allocation84_spill] sm:$0xff] %v9561_v9  ;;  %v13825_v0 = vld [vmem:[#allocation103_spill] sm:$0xff] }
 0x242   : > { %v1661_v45 = vmul.f32 %v9520_v40, %v1580_v34  ;;  %6545 = vmatprep.subr.bf16.mxu0 %v6544_v7  ;;  %v13832_v40 = vld [vmem:[#allocation111_spill] sm:$0xff] }
 0x243   : > { %6547 = vmatpush1.bf16.msra.mxu0 %v6546_v50  ;;  %v9546_v17 = vpop.permute.xlu1 %1543 }
 0x244   : > { %v1551_v24 = vsel %vm1549_vm6, %v9546_v17, %v1548_v5  ;;  %v9553_v32 = vpop.permute.xlu0 %1541  ;;  %v6664_v26 = vpack.c.bf16 %v1677_v63, %v1661_v45  ;;  %6549 = vmatprep.subr.bf16.mxu0 %v6548_v31 }
 0x245   : > { %v1676_v36 = vmul.f32 %v9543_v38, %v1551_v24  ;;  %v1550_v7 = vsel %vm1549_vm6, %v9553_v32, %v1546_v6  ;;  %v9575_v6 = vrot.slane %v9189_v62, %v7817_v35 }
 0x246   : > { %v1660_v48 = vmul.f32 %v9543_v38, %v1550_v7  ;;  %6665 = vmatprep.subr.bf16.mxu1 %v6664_v26  ;;  %v9593_v7 = vrot.slane %v9350_v12, %v7711_v41 }
 0x247   : > { %v1741_v55 = vpop.permute.xlu1 %1740  ;;  %6551 = vmatpush1.bf16.msra.mxu0 %v6550_v11  ;;  %13826 = vst [vmem:[#allocation85_spill] sm:$0xff] %v9575_v6 }
 0x248   : > { %v6666_v42 = vpack.c.bf16 %v1676_v36, %v1660_v48  ;;  %v1774_v63 = vsel %vm1742_vm7, %v1741_v55, %v13824_v53  ;;  %v1739_v5 = vpop.permute.xlu0 %1738  ;;  %v9567_v50 = vpop.f32.mrb[2].mxu1  ;;  %13827 = vst [vmem:[#allocation54_spill] sm:$0xff] %v9593_v7  ;;  %v9597_v48 = vrot.slane %v9355_v16, %v7711_v41 }
 0x249   : > { %v1870_v54 = vmul.f32 %v9561_v9, %v1774_v63  ;;  %v1773_v10 = vsel %vm1742_vm7, %v1739_v5, %v13825_v0  ;;  %v9577_v31 = vpop.f32.mrb[3].mxu1 }
 0x24a   : > { %v1854_v34 = vmul.f32 %v9561_v9, %v1773_v10  ;;  %6667 = vmatpush1.bf16.msra.mxu1 %v6666_v42  ;;  %13828 = vst [vmem:[#allocation55_spill] sm:$0xff] %v9597_v48 }
 0x24b   : > { %v9580_v45 = vpop.permute.xlu1 %1736 }
 0x24c   : > { %v1744_v11 = vsel %vm1742_vm7, %v9580_v45, %v1741_v55  ;;  %v9585_v24 = vpop.permute.xlu0 %1734  ;;  %v6668_v26 = vpack.c.bf16 %v1870_v54, %v1854_v34  ;;  %v13829_v54 = vld [vmem:[#allocation64_spill] sm:$0xff] }
 0x24d   : > { %v1869_v36 = vmul.f32 %v9575_v6, %v1744_v11  ;;  %v1743_v62 = vsel %vm1742_vm7, %v9585_v24, %v1739_v5 }
 0x24e   : > { %v1853_v42 = vmul.f32 %v9575_v6, %v1743_v62  ;;  %6669 = vmatprep.subr.bf16.mxu1 %v6668_v26  ;;  %v13830_v26 = vld [vmem:[#allocation65_spill] sm:$0xff] }
 0x24f   : > { %v1331_v55 = vpop.permute.xlu1 %1330 }
 0x250   : > { %v6670_v53 = vpack.c.bf16 %v1869_v36, %v1853_v42  ;;  %v1368_v63 = vsel %vm1356_vm5, %v1331_v55, %v8952_v51  ;;  %v1370_v5 = vsel %vm1356_vm5, %v13829_v54, %v1331_v55  ;;  %v1329_v0 = vpop.permute.xlu0 %1328  ;;  %v6334_v42 = vld [vmem:[%s13248_s0 + $0xf8] ss:$0 sm:$0xff] }
 0x251   : > { %v1477_v10 = vmul.f32 %v9593_v7, %v1370_v5  ;;  %v1478_v34 = vmul.f32 %v9597_v48, %v1368_v63  ;;  %v1367_v11 = vsel %vm1356_vm5, %v1329_v0, %v8957_v33  ;;  %v1369_v36 = vsel %vm1356_vm5, %v13830_v26, %v1329_v0  ;;  %v13831_v63 = vld [vmem:[#allocation110_spill] sm:$0xff] }
 0x252   : > { %v1461_v62 = vmul.f32 %v9593_v7, %v1369_v36  ;;  %v1462_v51 = vmul.f32 %v9597_v48, %v1367_v11  ;;  %6671 = vmatpush1.bf16.msra.mxu1 %v6670_v53  ;;  %v6333_v53 = vld [vmem:[%s13248_s0 + $0xf0] ss:$0 sm:$0xff] }
 0x253   : > { %v1934_v55 = vpop.permute.xlu1 %1933 }
 0x254   : > { %v6554_v54 = vpack.c.bf16 %v1477_v10, %v1461_v62  ;;  %v1967_v5 = vsel %vm1935_vm8, %v1934_v55, %v13831_v63  ;;  %v1932_v33 = vpop.permute.xlu0 %1931  ;;  %v6552_v9 = vpack.c.bf16 %v1478_v34, %v1462_v51  ;;  %v9644_v51 = vrot.slane %v9355_v16, %v7769_v2 }
 0x255   : > { %v2063_v6 = vmul.f32 %v6334_v42, %v1967_v5  ;;  %v1966_v0 = vsel %vm1935_vm8, %v1932_v33, %v13832_v40  ;;  %v13836_v5 = vld [vmem:[#allocation70_spill] sm:$0xff] }
 0x256   : > { %v2047_v26 = vmul.f32 %v6334_v42, %v1966_v0  ;;  %6553 = vmatprep.subr.bf16.mxu0 %v6552_v9  ;;  %v9640_v9 = vrot.slane %v9350_v12, %v7769_v2  ;;  %13834 = vst [vmem:[#allocation95_spill] sm:$0xff] %v9644_v51 }
 0x257   : > { %6555 = vmatpush1.bf16.msra.mxu0 %v6554_v54  ;;  %v9628_v11 = vpop.permute.xlu1 %1929 }
 0x258   : > { %v1937_v10 = vsel %vm1935_vm8, %v9628_v11, %v1934_v55  ;;  %v9633_v36 = vpop.permute.xlu0 %1927  ;;  %v6672_v34 = vpack.c.bf16 %v2063_v6, %v2047_v26  ;;  %13833 = vst [vmem:[#allocation94_spill] sm:$0xff] %v9640_v9  ;;  %v9648_v55 = vrot.slane %v9350_v12, %v7817_v35  ;;  %v9658_v26 = vrot.slane %v9355_v16, %v7817_v35 }
 0x259   : > { %v2062_v62 = vmul.f32 %v6333_v53, %v1937_v10  ;;  %v1936_v40 = vsel %vm1935_vm8, %v9633_v36, %v1932_v33 }
 0x25a   : > { %v2046_v42 = vmul.f32 %v6333_v53, %v1936_v40  ;;  %6673 = vmatprep.subr.bf16.mxu1 %v6672_v34  ;;  %13835 = vst [vmem:[#allocation102_spill] sm:$0xff] %v9648_v55  ;;  %13837 = vst [vmem:[#allocation103_spill] sm:$0xff] %v9658_v26  ;;  %v13838_v34 = vld [vmem:[#allocation71_spill] sm:$0xff] }
 0x25b   : > { %v1524_v54 = vpop.permute.xlu1 %1523 }
 0x25c   : > { %v6674_v6 = vpack.c.bf16 %v2062_v62, %v2046_v42  ;;  %v1561_v63 = vsel %vm1549_vm6, %v1524_v54, %v9028_v56  ;;  %v1563_v33 = vsel %vm1549_vm6, %v13836_v5, %v1524_v54  ;;  %v1522_v0 = vpop.permute.xlu0 %1521 }
 0x25d   : > { %v1670_v53 = vmul.f32 %v9640_v9, %v1563_v33  ;;  %v1671_v10 = vmul.f32 %v9644_v51, %v1561_v63  ;;  %v1560_v12 = vsel %vm1549_vm6, %v1522_v0, %v9033_v22  ;;  %v1562_v56 = vsel %vm1549_vm6, %v13838_v34, %v1522_v0  ;;  %v13839_v63 = vld [vmem:[#allocation77_spill] sm:$0xff]  ;;  %v9679_v0 = vld [vmem:[%s13248_s0 + $0x60] sm:$0xff] }
 0x25e   : > { %v1654_v62 = vmul.f32 %v9640_v9, %v1562_v56  ;;  %v1655_v40 = vmul.f32 %v9644_v51, %v1560_v12  ;;  %6675 = vmatpush1.bf16.msra.mxu1 %v6674_v6  ;;  %v9684_v6 = vld [vmem:[%s13248_s0 + $0x68] sm:$0xff]  ;;  %v13840_v34 = vld [vmem:[#allocation78_spill] sm:$0xff] }
 0x25f   : > { %v1717_v42 = vpop.permute.xlu1 %1716 }
 0x260   : > { %v6558_v16 = vpack.c.bf16 %v1670_v53, %v1654_v62  ;;  %v1754_v54 = vsel %vm1742_vm7, %v1717_v42, %v9078_v59  ;;  %v1756_v5 = vsel %vm1742_vm7, %v13839_v63, %v1717_v42  ;;  %v1715_v22 = vpop.permute.xlu0 %1714  ;;  %v6556_v33 = vpack.c.bf16 %v1671_v10, %v1655_v40  ;;  %v6327_v40 = vld [vmem:[%s13248_s0 + $0xc0] ss:$0 sm:$0xff]  ;;  %v6328_v42 = vld [vmem:[%s13248_s0 + $0xc8] ss:$0 sm:$0xff] }
 0x261   : > { %v1863_v53 = vmul.f32 %v9648_v55, %v1756_v5  ;;  %v1864_v59 = vmul.f32 %v9658_v26, %v1754_v54  ;;  %v1753_v12 = vsel %vm1742_vm7, %v1715_v22, %v9083_v58  ;;  %v1755_v10 = vsel %vm1742_vm7, %v13840_v34, %v1715_v22  ;;  %2638 = vmatmul.mubr.f32.vlgmr.msra.gmra.mrb[6].mxu1 %v9223_v1 }
 0x262   : > { %v1847_v56 = vmul.f32 %v9648_v55, %v1755_v10  ;;  %v1848_v62 = vmul.f32 %v9658_v26, %v1753_v12  ;;  %6557 = vmatprep.subr.bf16.mxu0 %v6556_v33  ;;  %v9705_v54 = vrot.slane %v9679_v0, %v7499_v19  ;;  %v9709_v63 = vrot.slane %v9684_v6, %v7499_v19  ;;  %v13843_v33 = vld [vmem:[#allocation81_spill] sm:$0xff]  ;;  %v13844_v55 = vld [vmem:[#allocation82_spill] sm:$0xff] }
 0x263   : > { %6559 = vmatpush1.bf16.msra.mxu0 %v6558_v16  ;;  %v1910_v58 = vpop.permute.xlu1 %1909 }
 0x264   : > { %13841 = vst [vmem:[#allocation64_spill] sm:$0xff] %v9705_v54  ;;  %13842 = vst [vmem:[#allocation65_spill] sm:$0xff] %v9709_v63  ;;  %v6562_v5 = vpack.c.bf16 %v1863_v53, %v1847_v56  ;;  %v1947_v22 = vsel %vm1935_vm8, %v1910_v58, %v9151_v20  ;;  %v1949_v12 = vsel %vm1935_vm8, %v13843_v33, %v1910_v58  ;;  %v1908_v34 = vpop.permute.xlu0 %1907 }
 0x265   : > { %v6560_v16 = vpack.c.bf16 %v1864_v59, %v1848_v62  ;;  %v2056_v10 = vmul.f32 %v6327_v40, %v1949_v12  ;;  %v2057_v38 = vmul.f32 %v6328_v42, %v1947_v22  ;;  %v1946_v26 = vsel %vm1935_vm8, %v1908_v34, %v9156_v47  ;;  %v13847_v22 = vld [vmem:[#allocation87_spill] sm:$0xff]  ;;  %v13848_v12 = vld [vmem:[#allocation88_spill] sm:$0xff] }
 0x266   : > { %v1948_v53 = vsel %vm1935_vm8, %v13844_v55, %v1908_v34  ;;  %v2041_v19 = vmul.f32 %v6328_v42, %v1946_v26  ;;  %v9725_v58 = vrot.slane %v9679_v0, %v7555_v39  ;;  %v9729_v59 = vrot.slane %v9684_v6, %v7555_v39 }
 0x267   : > { %v2040_v56 = vmul.f32 %v6327_v40, %v1948_v53  ;;  %6561 = vmatprep.subr.bf16.mxu0 %v6560_v16  ;;  %v569_v20 = vpop.permute.xlu1 %568 }
 0x268   : > { %6563 = vmatpush1.bf16.msra.mxu0 %v6562_v5  ;;  %13845 = vst [vmem:[#allocation110_spill] sm:$0xff] %v9725_v58  ;;  %13846 = vst [vmem:[#allocation111_spill] sm:$0xff] %v9729_v59  ;;  %v590_v47 = vsel %vm584_vm1, %v569_v20, %v9218_v23  ;;  %v592_v55 = vsel %vm584_vm1, %v13847_v22, %v569_v20  ;;  %v567_v26 = vpop.permute.xlu0 %566  ;;  %v6564_v40 = vpack.c.bf16 %v2057_v38, %v2041_v19 }
 0x269   : > { %v6566_v62 = vpack.c.bf16 %v2056_v10, %v2040_v56  ;;  %v709_v42 = vmul.f32 %v9705_v54, %v592_v55  ;;  %v710_v5 = vmul.f32 %v9709_v63, %v590_v47  ;;  %v589_v33 = vsel %vm584_vm1, %v567_v26, %v9229_v30  ;;  %v13851_v56 = vld [vmem:[#allocation97_spill] sm:$0xff] }
 0x26a   : > { %v591_v34 = vsel %vm584_vm1, %v13848_v12, %v567_v26  ;;  %v694_v16 = vmul.f32 %v9709_v63, %v589_v33  ;;  %6565 = vmatprep.subr.bf16.mxu0 %v6564_v40  ;;  %v9749_v19 = vrot.slane %v9679_v0, %v7609_v60  ;;  %v9753_v38 = vrot.slane %v9684_v6, %v7609_v60  ;;  %v13852_v40 = vld [vmem:[#allocation98_spill] sm:$0xff]  ;;  %v13878_v60 = vld [vmem:[#allocation5_spill] sm:$0xff] }
 0x26b   : > { %v693_v23 = vmul.f32 %v9705_v54, %v591_v34  ;;  %v764_v10 = vpop.permute.xlu1 %763  ;;  %v9774_v12 = vrot.slane %v9679_v0, %v7663_v49  ;;  %v7167_v34 = vld [vmem:[%s13250_s2 + $0x8] sm:$0xff] }
 0x26c   : > { %6567 = vmatpush1.bf16.msra.mxu0 %v6566_v62  ;;  %13849 = vst [vmem:[#allocation70_spill] sm:$0xff] %v9749_v19  ;;  %13850 = vst [vmem:[#allocation71_spill] sm:$0xff] %v9753_v38  ;;  %v783_v53 = vsel %vm777_vm2, %v764_v10, %v9290_v13  ;;  %v785_v20 = vsel %vm777_vm2, %v13851_v56, %v764_v10  ;;  %v762_v47 = vpop.permute.xlu0 %761  ;;  %v6604_v62 = vpack.c.bf16 %v710_v5, %v694_v16  ;;  %v13855_v10 = vld [vmem:[#allocation105_spill] sm:$0xff] }
 0x26d   : > { %v6606_v30 = vpack.c.bf16 %v709_v42, %v693_v23  ;;  %v902_v22 = vmul.f32 %v9725_v58, %v785_v20  ;;  %v903_v55 = vmul.f32 %v9729_v59, %v783_v53  ;;  %v782_v26 = vsel %vm777_vm2, %v762_v47, %v9295_v15  ;;  %13853 = vst [vmem:[#allocation77_spill] sm:$0xff] %v9774_v12 }
 0x26e   : > { %v784_v42 = vsel %vm777_vm2, %v13852_v40, %v762_v47  ;;  %v887_v33 = vmul.f32 %v9729_v59, %v782_v26  ;;  %6605 = vmatprep.subr.bf16.mxu0 %v6604_v62  ;;  %v9778_v15 = vrot.slane %v9684_v6, %v7663_v49  ;;  %v13856_v26 = vld [vmem:[#allocation106_spill] sm:$0xff] }
 0x26f   : > { %v886_v13 = vmul.f32 %v9725_v58, %v784_v42  ;;  %2425 = vmatmul.mubr.f32.vlgmr.msra.gmra.mrb[4].mxu0 %v9223_v1  ;;  %v957_v5 = vpop.permute.xlu1 %956 }
 0x270   : > { %6607 = vmatpush1.bf16.msra.mxu0 %v6606_v30  ;;  %13854 = vst [vmem:[#allocation78_spill] sm:$0xff] %v9778_v15  ;;  %6341 = vmatprep.mubr.msk.f32.mxu0 %vm2072_vm0, %v7167_v34  ;;  %v976_v16 = vsel %vm970_vm3, %v957_v5, %v9357_v57  ;;  %v978_v30 = vsel %vm970_vm3, %v13855_v10, %v957_v5  ;;  %v955_v53 = vpop.permute.xlu0 %954 }
 0x271   : > { %v6610_v23 = vpack.c.bf16 %v902_v22, %v886_v13  ;;  %v6608_v56 = vpack.c.bf16 %v903_v55, %v887_v33  ;;  %v1095_v20 = vmul.f32 %v9749_v19, %v978_v30  ;;  %v1096_v47 = vmul.f32 %v9753_v38, %v976_v16  ;;  %v13857_v33 = vld [vmem:[#allocation115_spill] sm:$0xff]  ;;  %v13858_v30 = vld [vmem:[#allocation116_spill] sm:$0xff] }
 0x272   : > { %v975_v62 = vsel %vm970_vm3, %v955_v53, %v9362_v37  ;;  %v977_v22 = vsel %vm970_vm3, %v13856_v26, %v955_v53 }
 0x273   : > { %v1079_v57 = vmul.f32 %v9749_v19, %v977_v22  ;;  %v1080_v40 = vmul.f32 %v9753_v38, %v975_v62  ;;  %6609 = vmatprep.subr.bf16.mxu0 %v6608_v56  ;;  %v1150_v42 = vpop.permute.xlu1 %1149 }
 0x274   : > { %6611 = vmatpush1.bf16.msra.mxu0 %v6610_v23  ;;  %v1169_v13 = vsel %vm1163_vm4, %v1150_v42, %v9412_v44  ;;  %v1171_v37 = vsel %vm1163_vm4, %v13857_v33, %v1150_v42  ;;  %v1148_v5 = vpop.permute.xlu0 %1147  ;;  %v7169_v42 = vld [vmem:[%s7325_s14 + $0x68] sm:$0xff]  ;;  %v13861_v33 = vld [vmem:[#allocation50_spill] sm:$0xff] }
 0x275   : > { %v6614_v55 = vpack.c.bf16 %v1095_v20, %v1079_v57  ;;  %v6612_v34 = vpack.c.bf16 %v1096_v47, %v1080_v40  ;;  %v1288_v16 = vmul.f32 %v9774_v12, %v1171_v37  ;;  %v1289_v10 = vmul.f32 %v9778_v15, %v1169_v13  ;;  %v7168_v40 = vld [vmem:[%s7325_s14 + $0xe8] sm:$0xff] }
 0x276   : > { %v1168_v23 = vsel %vm1163_vm4, %v1148_v5, %v9417_v14  ;;  %v1170_v44 = vsel %vm1163_vm4, %v13858_v30, %v1148_v5  ;;  %v9818_v20 = vrot.slane %v9684_v6, %v7711_v41  ;;  %v9822_v47 = vrot.slane %v9679_v0, %v7711_v41  ;;  %v7170_v30 = vld [vmem:[%s7325_s14 + $0xe0] sm:$0xff] }
 0x277   : > { %v1272_v53 = vmul.f32 %v9774_v12, %v1170_v44  ;;  %v1273_v56 = vmul.f32 %v9778_v15, %v1168_v23  ;;  %6613 = vmatprep.subr.bf16.mxu0 %v6612_v34  ;;  %v1347_v62 = vpop.permute.xlu1 %1346  ;;  %v6620_v13 = vpack.c.bf16 %v7168_v40, %v7169_v42  ;;  %v13862_v34 = vld [vmem:[#allocation13_spill] sm:$0xff]  ;;  %v7171_v44 = vld [vmem:[%s7325_s14 + $0x60] sm:$0xff]  ;;  %s6387_s14 = sshll.u32 %s14295_s28, 7 }
 0x278   : > { %13859 = vst [vmem:[#allocation81_spill] sm:$0xff] %v9818_v20  ;;  %6615 = vmatpush1.bf16.msra.mxu0 %v6614_v55  ;;  %13860 = vst [vmem:[#allocation82_spill] sm:$0xff] %v9822_v47  ;;  %v1360_v26 = vsel %vm1356_vm5, %v1347_v62, %v9492_v27  ;;  %v1345_v22 = vpop.permute.xlu0 %1344  ;;  %v1362_v55 = vsel %vm1356_vm5, %v13861_v33, %v1347_v62  ;;  %v13866_v42 = vld [vmem:[#allocation123_spill] sm:$0xff] }
 0x279   : > { %v6618_v14 = vpack.c.bf16 %v1288_v16, %v1272_v53  ;;  %v6616_v57 = vpack.c.bf16 %v1289_v10, %v1273_v56  ;;  %v1359_v37 = vsel %vm1356_vm5, %v1345_v22, %v9497_v28  ;;  %v1482_v5 = vmul.f32 %v9818_v20, %v1360_v26 }
 0x27a   : > { %v1361_v27 = vsel %vm1356_vm5, %v13862_v34, %v1345_v22  ;;  %v1466_v16 = vmul.f32 %v9818_v20, %v1359_v37  ;;  %v9842_v10 = vrot.slane %v9684_v6, %v7769_v2  ;;  %v6622_v53 = vpack.c.bf16 %v7170_v30, %v7171_v44 }
 0x27b   : > { %6617 = vmatprep.subr.bf16.mxu0 %v6616_v57  ;;  %v1540_v23 = vpop.permute.xlu1 %1539  ;;  %v1481_v28 = vmul.f32 %v9822_v47, %v1362_v55  ;;  %v9849_v56 = vrot.slane %v9679_v0, %v7769_v2  ;;  %v1465_v22 = vmul.f32 %v9822_v47, %v1361_v27  ;;  %v13865_v57 = vld [vmem:[#allocation19_spill] sm:$0xff] }
 0x27c   : > { %13863 = vst [vmem:[#allocation87_spill] sm:$0xff] %v9842_v10  ;;  %6619 = vmatpush1.bf16.msra.mxu0 %v6618_v14  ;;  %v1553_v62 = vsel %vm1549_vm6, %v1540_v23, %v9546_v17  ;;  %v1538_v26 = vpop.permute.xlu0 %1537  ;;  %v1555_v14 = vsel %vm1549_vm6, %v13865_v57, %v1540_v23  ;;  %v6624_v37 = vpack.c.bf16 %v1482_v5, %v1466_v16 }
 0x27d   : > { %13864 = vst [vmem:[#allocation88_spill] sm:$0xff] %v9849_v56  ;;  %6621 = vmatprep.subr.bf16.mxu0 %v6620_v13  ;;  %v1552_v40 = vsel %vm1549_vm6, %v1538_v26, %v9553_v32  ;;  %v1554_v33 = vsel %vm1549_vm6, %v13866_v42, %v1538_v26  ;;  %v1675_v55 = vmul.f32 %v9842_v10, %v1553_v62  ;;  %v13870_v26 = vld [vmem:[#allocation127_spill] sm:$0xff] }
 0x27e   : > { %v1659_v17 = vmul.f32 %v9842_v10, %v1552_v40  ;;  %v9868_v13 = vrot.slane %v9684_v6, %v7817_v35  ;;  %v1674_v27 = vmul.f32 %v9849_v56, %v1555_v14  ;;  %v1658_v23 = vmul.f32 %v9849_v56, %v1554_v33  ;;  %v13869_v6 = vld [vmem:[#allocation126_spill] sm:$0xff]  ;;  %v13890_v10 = vld [vmem:[#allocation17_spill] sm:$0xff] }
 0x27f   : > { %v1733_v34 = vpop.permute.xlu1 %1732  ;;  %v6626_v44 = vpack.c.bf16 %v1481_v28, %v1465_v22  ;;  %v9877_v62 = vrot.slane %v9679_v0, %v7817_v35  ;;  %v6332_v0 = vld [vmem:[%s13248_s0 + $0xe8] ss:$0 sm:$0xff] }
 0x280   : > { %13867 = vst [vmem:[#allocation97_spill] sm:$0xff] %v9868_v13  ;;  %6623 = vmatpush1.bf16.msra.mxu0 %v6622_v53  ;;  %v1746_v32 = vsel %vm1742_vm7, %v1733_v34, %v9580_v45  ;;  %v1731_v30 = vpop.permute.xlu0 %1730  ;;  %v1748_v5 = vsel %vm1742_vm7, %v13869_v6, %v1733_v34  ;;  %v6628_v22 = vpack.c.bf16 %v1675_v55, %v1659_v17  ;;  %v13871_v34 = vld [vmem:[#allocation23_spill] sm:$0xff] }
 0x281   : > { %6625 = vmatprep.subr.bf16.mxu0 %v6624_v37  ;;  %13868 = vst [vmem:[#allocation98_spill] sm:$0xff] %v9877_v62  ;;  %v1745_v16 = vsel %vm1742_vm7, %v1731_v30, %v9585_v24  ;;  %v1868_v53 = vmul.f32 %v9868_v13, %v1746_v32  ;;  %v1747_v45 = vsel %vm1742_vm7, %v13870_v26, %v1731_v30  ;;  %v13872_v32 = vld [vmem:[#allocation24_spill] sm:$0xff] }
 0x282   : > { %v1852_v28 = vmul.f32 %v9868_v13, %v1745_v16  ;;  %v6630_v14 = vpack.c.bf16 %v1674_v27, %v1658_v23  ;;  %v1867_v33 = vmul.f32 %v9877_v62, %v1748_v5  ;;  %v1851_v37 = vmul.f32 %v9877_v62, %v1747_v45 }
 0x283   : > { %v1926_v57 = vpop.permute.xlu1 %1925 }
 0x284   : > { %6627 = vmatpush1.bf16.msra.mxu0 %v6626_v44  ;;  %v1939_v24 = vsel %vm1935_vm8, %v1926_v57, %v9628_v11  ;;  %v1924_v40 = vpop.permute.xlu0 %1923  ;;  %v2142_v42 = vpop.f32.mrb[0].mxu0  ;;  %v1941_v55 = vsel %vm1935_vm8, %v13871_v34, %v1926_v57  ;;  %v6331_v11 = vld [vmem:[%s13248_s0 + $0xe0] ss:$0 sm:$0xff]  ;;  %v6632_v6 = vpack.c.bf16 %v1868_v53, %v1852_v28  ;;  %v6634_v5 = vpack.c.bf16 %v1867_v33, %v1851_v37 }
 0x285   : > { %6629 = vmatprep.subr.bf16.mxu0 %v6628_v22  ;;  %v1938_v17 = vsel %vm1935_vm8, %v1924_v40, %v9633_v36  ;;  %v2144_v27 = vpop.f32.mrb[1].mxu0  ;;  %v2061_v23 = vmul.f32 %v6332_v0, %v1939_v24  ;;  %v1940_v30 = vsel %vm1935_vm8, %v13872_v32, %v1924_v40  ;;  %v2060_v16 = vmul.f32 %v6331_v11, %v1941_v55 }
 0x286   : > { %v2045_v44 = vmul.f32 %v6332_v0, %v1938_v17  ;;  %v2044_v26 = vmul.f32 %v6331_v11, %v1940_v30 }
 0x288   : > { %6631 = vmatpush1.bf16.msra.mxu0 %v6630_v14  ;;  %v6636_v45 = vpack.c.bf16 %v2061_v23, %v2045_v44  ;;  %v6638_v36 = vpack.c.bf16 %v2060_v16, %v2044_v26  ;;  %v13874_v23 = vld [vmem:[#allocation60_spill] sm:$0xff] }
 0x289   : > { %6633 = vmatprep.subr.bf16.mxu0 %v6632_v6 }
 0x28c   : > { %6635 = vmatpush1.bf16.msra.mxu0 %v6634_v5 }
 0x28d   : > { %6637 = vmatprep.subr.bf16.mxu0 %v6636_v45 }
 0x290   : > { %6639 = vmatpush1.bf16.msra.mxu0 %v6638_v36 }
 0x293   : > { %2567 = vmatmul.mubr.f32.vlgmr.msra.gmra.mrb[6].mxu0 %v9223_v1 }
 0x295   : > { %v9911_v22 = vpop.permute.xlu0 %2069 }
 0x296   : > { %v2143_v57 = vadd.f32 %v2142_v42, %v9911_v22  ;;  %v2145_v24 = vadd.f32 %v2144_v27, %v9911_v22  ;;  %v13873_v27 = vld [vmem:[#allocation52_spill] sm:$0xff]  ;;  %v2214_v26 = vadd.f32 %v9310_v3, %v9911_v22  ;;  %v2216_v45 = vadd.f32 %v9315_v46, %v9911_v22 }
 0x298   : > { %v9915_v0 = vmax.f32 %v2143_v57, 0.0  ;;  %v9917_v53 = vmax.f32 %v2145_v24, 0.0  ;;  %v9962_v36 = vmax.f32 %v2214_v26, 0.0  ;;  %v9964_v57 = vmax.f32 %v2216_v45, 0.0 }
 0x29a   : > { %2660 = vrot.lane.b32.xlu1 %v9915_v0, %s7228_s15  ;;  %2724 = vrot.lane.b32.xlu0 %v9915_v0, %s7229_s16 }
 0x29e   : > { %2662 = vrot.lane.b32.xlu1 %v9917_v53, %s7228_s15 }
 0x2a2   : > { %2726 = vrot.lane.b32.xlu1 %v9917_v53, %s7229_s16 }
 0x2d6   : > { %v9927_v1 = vpop.f32.mrb[4].mxu1 }
 0x2d7   : > { %v9929_v28 = vpop.f32.mrb[5].mxu1 }
 0x2f5   : > { %v2284_v14 = vpop.f32.mrb[2].mxu0 }
 0x2f6   : > { %v2286_v40 = vpop.f32.mrb[3].mxu0  ;;  %v2285_v46 = vadd.f32 %v2284_v14, %v9911_v22 }
 0x2f7   : > { %v2287_v14 = vadd.f32 %v2286_v40, %v9911_v22  ;;  %v2356_v40 = vadd.f32 %v9567_v50, %v9911_v22 }
 0x30c   : > { %v9931_v42 = vpop.permute.xlu1 %2660  ;;  %v9939_v34 = vpop.permute.xlu0 %2724 }
 0x310   : > { %v9933_v33 = vpop.permute.xlu1 %2662 }
 0x311   : > { %v2706_v37 = vsel %vm584_vm1, %v9931_v42, %v9933_v33 }
 0x312   : > { %v2709_v11 = vmul.f32 %v2706_v37, %v13873_v27  ;;  %v10007_v37 = vmax.f32 %v2285_v46, 0.0 }
 0x314   : > { %v9941_v55 = vpop.permute.xlu1 %2726 }
 0x315   : > { %v2770_v17 = vsel %vm777_vm2, %v9939_v34, %v9941_v55 }
 0x316   : > { %v2773_v32 = vmul.f32 %v2770_v17, %v13874_v23 }
 0x318   : > { %v6676_v30 = vpack.c.bf16 %v2773_v32, %v2709_v11  ;;  %v10038_v32 = vmax.f32 %v2287_v14, 0.0 }
 0x31a   : > { %6677 = vmatprep.subr.bf16.mxu0 %v6676_v30  ;;  %v13500_v30 = vmov 0.0  }
 0x31b   : > { %3247 = vmatprep.mubr.f32.mxu0 %v13500_v30  ;;  %3318 = vmatprep.mubr.f32.mxu1 %v13500_v30 }
 0x334   : > { %v9949_v44 = vpop.f32.mrb[6].mxu1 }
 0x335   : > { %v2641_v6 = vpop.f32.mrb[7].mxu1 }
 0x336   : > { %v2642_v5 = vadd.f32 %v2641_v6, %v9911_v22  ;;  %v2358_v6 = vadd.f32 %v9577_v31, %v9911_v22 }
 0x338   : > { %v9952_v16 = vmax.f32 %v2642_v5, 0.0  ;;  %v10058_v5 = vmax.f32 %v2356_v40, 0.0  ;;  %v10060_v26 = vmax.f32 %v2358_v6, 0.0  ;;  %v13875_v40 = vld [vmem:[#allocation56_spill] sm:$0xff] }
 0x33a   : > { %2690 = vrot.lane.b32.xlu0 %v9952_v16, %s7228_s15  ;;  %2754 = vrot.lane.b32.xlu1 %v9952_v16, %s7229_s16 }
 0x33e   : > { %2664 = vrot.lane.b32.xlu0 %v9962_v36, %s7228_s15  ;;  %2666 = vrot.lane.b32.xlu1 %v9964_v57, %s7228_s15 }
 0x342   : > { %v9970_v3 = vpop.f32.mrb[4].mxu0  ;;  %2728 = vrot.lane.b32.xlu0 %v9962_v36, %s7229_s16  ;;  %2730 = vrot.lane.b32.xlu1 %v9964_v57, %s7229_s16 }
 0x343   : > { %v9972_v24 = vpop.f32.mrb[5].mxu0  ;;  %v2427_v50 = vadd.f32 %v9970_v3, %v9911_v22 }
 0x345   : > { %v10096_v31 = vmax.f32 %v2427_v50, 0.0  ;;  %v13876_v50 = vld [vmem:[#allocation61_spill] sm:$0xff] }
 0x346   : > { %2788 = vrot.lane.b32.xlu0 %v9915_v0, %s7230_s17  ;;  %2790 = vrot.lane.b32.xlu1 %v9917_v53, %s7230_s17 }
 0x34a   : > { %2852 = vrot.lane.b32.xlu0 %v9915_v0, %s7231_s18  ;;  %2854 = vrot.lane.b32.xlu1 %v9917_v53, %s7231_s18 }
 0x34e   : > { %2818 = vrot.lane.b32.xlu0 %v9952_v16, %s7230_s17  ;;  %2882 = vrot.lane.b32.xlu1 %v9952_v16, %s7231_s18 }
 0x352   : > { %2792 = vrot.lane.b32.xlu0 %v9962_v36, %s7230_s17  ;;  %2794 = vrot.lane.b32.xlu1 %v9964_v57, %s7230_s17 }
 0x356   : > { %2856 = vrot.lane.b32.xlu0 %v9962_v36, %s7231_s18  ;;  %2858 = vrot.lane.b32.xlu1 %v9964_v57, %s7231_s18 }
 0x35a   : > { %2918 = vrot.lane.b32.xlu0 %v9917_v53, %s7232_s19  ;;  %2920 = vrot.lane.b32.xlu1 %v9962_v36, %s7232_s19 }
 0x35e   : > { %2916 = vrot.lane.b32.xlu0 %v9915_v0, %s7232_s19  ;;  %2922 = vrot.lane.b32.xlu1 %v9964_v57, %s7232_s19 }
 0x362   : > { %2924 = vrot.lane.b32.xlu0 %v10007_v37, %s7232_s19  ;;  %2982 = vrot.lane.b32.xlu1 %v9917_v53, %s7233_s20 }
 0x366   : > { %v10013_v17 = vpop.f32.mrb[6].mxu0  ;;  %2984 = vrot.lane.b32.xlu0 %v9962_v36, %s7233_s20  ;;  %3046 = vrot.lane.b32.xlu1 %v9917_v53, %s7234_s21 }
 0x367   : > { %v10015_v11 = vpop.f32.mrb[7].mxu0 }
 0x36a   : > { %3048 = vrot.lane.b32.xlu0 %v9962_v36, %s7234_s21  ;;  %2980 = vrot.lane.b32.xlu1 %v9915_v0, %s7233_s20 }
 0x36e   : > { %3044 = vrot.lane.b32.xlu0 %v9915_v0, %s7234_s21  ;;  %2986 = vrot.lane.b32.xlu1 %v9964_v57, %s7233_s20 }
 0x372   : > { %2988 = vrot.lane.b32.xlu0 %v10007_v37, %s7233_s20  ;;  %3050 = vrot.lane.b32.xlu1 %v9964_v57, %s7234_s21 }
 0x376   : > { %3052 = vrot.lane.b32.xlu0 %v10007_v37, %s7234_s21  ;;  %2668 = vrot.lane.b32.xlu1 %v10007_v37, %s7228_s15 }
 0x37a   : > { %2670 = vrot.lane.b32.xlu0 %v10038_v32, %s7228_s15  ;;  %2732 = vrot.lane.b32.xlu1 %v10007_v37, %s7229_s16 }
 0x37e   : > { %2734 = vrot.lane.b32.xlu0 %v10038_v32, %s7229_s16  ;;  %3110 = vrot.lane.b32.xlu1 %v9917_v53, %s7235_s22 }
 0x382   : > { %3112 = vrot.lane.b32.xlu0 %v9962_v36, %s7235_s22  ;;  %3108 = vrot.lane.b32.xlu1 %v9915_v0, %s7235_s22 }
 0x386   : > { %2672 = vrot.lane.b32.xlu0 %v10058_v5, %s7228_s15  ;;  %2674 = vrot.lane.b32.xlu1 %v10060_v26, %s7228_s15 }
 0x38a   : > { %2736 = vrot.lane.b32.xlu0 %v10058_v5, %s7229_s16  ;;  %2738 = vrot.lane.b32.xlu1 %v10060_v26, %s7229_s16 }
 0x38e   : > { %2796 = vrot.lane.b32.xlu0 %v10007_v37, %s7230_s17  ;;  %2798 = vrot.lane.b32.xlu1 %v10038_v32, %s7230_s17 }
 0x392   : > { %2860 = vrot.lane.b32.xlu0 %v10007_v37, %s7231_s18  ;;  %2862 = vrot.lane.b32.xlu1 %v10038_v32, %s7231_s18 }
 0x396   : > { %3114 = vrot.lane.b32.xlu0 %v9964_v57, %s7235_s22  ;;  %3116 = vrot.lane.b32.xlu1 %v10007_v37, %s7235_s22 }
 0x39a   : > { %2800 = vrot.lane.b32.xlu0 %v10058_v5, %s7230_s17  ;;  %2802 = vrot.lane.b32.xlu1 %v10060_v26, %s7230_s17 }
 0x39e   : > { %2864 = vrot.lane.b32.xlu0 %v10058_v5, %s7231_s18  ;;  %2866 = vrot.lane.b32.xlu1 %v10060_v26, %s7231_s18 }
 0x3a2   : > { %2926 = vrot.lane.b32.xlu0 %v10038_v32, %s7232_s19  ;;  %2928 = vrot.lane.b32.xlu1 %v10058_v5, %s7232_s19 }
 0x3a6   : > { %2930 = vrot.lane.b32.xlu0 %v10060_v26, %s7232_s19  ;;  %2932 = vrot.lane.b32.xlu1 %v10096_v31, %s7232_s19 }
 0x3aa   : > { %2990 = vrot.lane.b32.xlu0 %v10038_v32, %s7233_s20  ;;  %2992 = vrot.lane.b32.xlu1 %v10058_v5, %s7233_s20 }
 0x3ac   : > { %v10106_v45 = vpop.permute.xlu0 %2690  ;;  %v10108_v3 = vpop.permute.xlu1 %2754 }
 0x3ad   : > { %v2707_v46 = vsel %vm584_vm1, %v10106_v45, %v9931_v42  ;;  %v2771_v14 = vsel %vm777_vm2, %v10108_v3, %v9939_v34 }
 0x3ae   : > { %v2708_v6 = vmul.f32 %v2707_v46, %v13875_v40  ;;  %v2772_v30 = vmul.f32 %v2771_v14, %v13876_v50  ;;  %3054 = vrot.lane.b32.xlu0 %v10038_v32, %s7234_s21  ;;  %3056 = vrot.lane.b32.xlu1 %v10058_v5, %s7234_s21  ;;  %v13880_v40 = vld [vmem:[#allocation8_spill] sm:$0xff] }
 0x3b0   : > { %v6678_v35 = vpack.c.bf16 %v2772_v30, %v2708_v6  ;;  %v2665_v2 = vpop.permute.xlu0 %2664  ;;  %v10124_v41 = vpop.permute.xlu1 %2666  ;;  %v2429_v30 = vadd.f32 %v9972_v24, %v9911_v22  ;;  %v13877_v6 = vld [vmem:[#allocation6_spill] sm:$0xff] }
 0x3b1   : > { %v2705_v42 = vsel %vm584_vm1, %v9933_v33, %v2665_v2  ;;  %v2704_v34 = vsel %vm584_vm1, %v2665_v2, %v10124_v41  ;;  %v13879_v2 = vld [vmem:[#allocation10_spill] sm:$0xff] }
 0x3b2   : > { %2994 = vrot.lane.b32.xlu0 %v10060_v26, %s7233_s20  ;;  %2996 = vrot.lane.b32.xlu1 %v10096_v31, %s7233_s20  ;;  %v2710_v49 = vmul.f32 %v2705_v42, %v13877_v6  ;;  %v2711_v50 = vmul.f32 %v2704_v34, %v13878_v60  ;;  %v10154_v24 = vmax.f32 %v2429_v30, 0.0  ;;  %v13886_v60 = vld [vmem:[#allocation72_spill] sm:$0xff] }
 0x3b3   : > { %6679 = vmatpush1.bf16.msra.mxu0 %v6678_v35 }
 0x3b4   : > { %v2729_v46 = vpop.permute.xlu0 %2728  ;;  %v10138_v14 = vpop.permute.xlu1 %2730 }
 0x3b5   : > { %v2769_v33 = vsel %vm777_vm2, %v9941_v55, %v2729_v46  ;;  %v2768_v39 = vsel %vm777_vm2, %v2729_v46, %v10138_v14 }
 0x3b6   : > { %v2774_v35 = vmul.f32 %v2769_v33, %v13879_v2  ;;  %v2775_v23 = vmul.f32 %v2768_v39, %v13880_v40  ;;  %3058 = vrot.lane.b32.xlu0 %v10060_v26, %s7234_s21  ;;  %3060 = vrot.lane.b32.xlu1 %v10096_v31, %s7234_s21 }
 0x3b8   : > { %v6694_v42 = vpack.c.bf16 %v2774_v35, %v2710_v49  ;;  %v2789_v55 = vpop.permute.xlu0 %2788  ;;  %v2791_v27 = vpop.permute.xlu1 %2790  ;;  %v6692_v6 = vpack.c.bf16 %v2775_v23, %v2711_v50  ;;  %v13881_v49 = vld [vmem:[#allocation62_spill] sm:$0xff]  ;;  %v13882_v35 = vld [vmem:[#allocation68_spill] sm:$0xff]  ;;  %v2498_v50 = vadd.f32 %v9927_v1, %v9911_v22 }
 0x3b9   : > { %v2834_v39 = vsel %vm970_vm3, %v2789_v55, %v2791_v27 }
 0x3ba   : > { %2676 = vrot.lane.b32.xlu0 %v10096_v31, %s7228_s15  ;;  %2678 = vrot.lane.b32.xlu1 %v10154_v24, %s7228_s15  ;;  %v2837_v33 = vmul.f32 %v2834_v39, %v13881_v49 }
 0x3bb   : > { %6693 = vmatprep.subr.bf16.mxu1 %v6692_v6  ;;  %v2500_v6 = vadd.f32 %v9929_v28, %v9911_v22  ;;  %v10190_v28 = vmax.f32 %v2498_v50, 0.0 }
 0x3bc   : > { %6695 = vmatpush1.bf16.msra.mxu1 %v6694_v42  ;;  %v2853_v34 = vpop.permute.xlu0 %2852  ;;  %v2855_v46 = vpop.permute.xlu1 %2854 }
 0x3bd   : > { %v2898_v30 = vsel %vm1163_vm4, %v2853_v34, %v2855_v46 }
 0x3be   : > { %v2901_v23 = vmul.f32 %v2898_v30, %v13882_v35  ;;  %2740 = vrot.lane.b32.xlu0 %v10096_v31, %s7229_s16  ;;  %2742 = vrot.lane.b32.xlu1 %v10154_v24, %s7229_s16  ;;  %v13885_v35 = vld [vmem:[#allocation66_spill] sm:$0xff] }
 0x3c0   : > { %v10174_v42 = vpop.permute.xlu0 %2818  ;;  %v10176_v2 = vpop.permute.xlu1 %2882  ;;  %v6680_v40 = vpack.c.bf16 %v2901_v23, %v2837_v33  ;;  %v10192_v33 = vmax.f32 %v2500_v6, 0.0 }
 0x3c1   : > { %13883 = vst [vmem:[#allocation105_spill] sm:$0xff] %v10174_v42  ;;  %13884 = vst [vmem:[#allocation106_spill] sm:$0xff] %v10176_v2  ;;  %v2835_v39 = vsel %vm970_vm3, %v10174_v42, %v2789_v55  ;;  %v2899_v30 = vsel %vm1163_vm4, %v10176_v2, %v2853_v34  ;;  %v13915_v2 = vld [vmem:[#allocation122_spill] sm:$0xff] }
 0x3c2   : > { %v2836_v49 = vmul.f32 %v2835_v39, %v13885_v35  ;;  %v2900_v1 = vmul.f32 %v2899_v30, %v13886_v60  ;;  %3118 = vrot.lane.b32.xlu0 %v10038_v32, %s7235_s22  ;;  %3120 = vrot.lane.b32.xlu1 %v10058_v5, %s7235_s22  ;;  %v13889_v35 = vld [vmem:[#allocation20_spill] sm:$0xff] }
 0x3c3   : > { %6681 = vmatprep.subr.bf16.mxu0 %v6680_v40 }
 0x3c4   : > { %v6682_v55 = vpack.c.bf16 %v2900_v1, %v2836_v49  ;;  %v2793_v23 = vpop.permute.xlu0 %2792  ;;  %v10194_v56 = vpop.permute.xlu1 %2794  ;;  %v13887_v49 = vld [vmem:[#allocation15_spill] sm:$0xff]  ;;  %v13888_v1 = vld [vmem:[#allocation12_spill] sm:$0xff] }
 0x3c5   : > { %v2833_v34 = vsel %vm970_vm3, %v2791_v27, %v2793_v23  ;;  %v2832_v40 = vsel %vm970_vm3, %v2793_v23, %v10194_v56 }
 0x3c6   : > { %2680 = vrot.lane.b32.xlu0 %v10190_v28, %s7228_s15  ;;  %2682 = vrot.lane.b32.xlu1 %v10192_v33, %s7228_s15  ;;  %v2838_v39 = vmul.f32 %v2833_v34, %v13887_v49  ;;  %v2839_v60 = vmul.f32 %v2832_v40, %v13888_v1 }
 0x3c7   : > { %6683 = vmatpush1.bf16.msra.mxu0 %v6682_v55 }
 0x3c8   : > { %v2857_v50 = vpop.permute.xlu0 %2856  ;;  %v10205_v6 = vpop.permute.xlu1 %2858 }
 0x3c9   : > { %v2897_v30 = vsel %vm1163_vm4, %v2855_v46, %v2857_v50  ;;  %v2896_v27 = vsel %vm1163_vm4, %v2857_v50, %v10205_v6  ;;  %v13891_v50 = vld [vmem:[#allocation80_spill] sm:$0xff] }
 0x3ca   : > { %v2902_v13 = vmul.f32 %v2897_v30, %v13889_v35  ;;  %v2903_v62 = vmul.f32 %v2896_v27, %v13890_v10  ;;  %2744 = vrot.lane.b32.xlu0 %v10190_v28, %s7229_s16  ;;  %2746 = vrot.lane.b32.xlu1 %v10192_v33, %s7229_s16  ;;  %v13904_v10 = vld [vmem:[#allocation32_spill] sm:$0xff] }
 0x3cc   : > { %v6698_v55 = vpack.c.bf16 %v2902_v13, %v2838_v39  ;;  %v2919_v23 = vpop.permute.xlu0 %2918  ;;  %v2921_v34 = vpop.permute.xlu1 %2920  ;;  %v6696_v46 = vpack.c.bf16 %v2903_v62, %v2839_v60  ;;  %v13893_v62 = vld [vmem:[#allocation83_spill] sm:$0xff] }
 0x3cd   : > { %v2961_v49 = vsel %vm1356_vm5, %v2919_v23, %v2921_v34 }
 0x3ce   : > { %v2965_v20 = vmul.f32 %v2961_v49, %v13891_v50  ;;  %2804 = vrot.lane.b32.xlu0 %v10096_v31, %s7230_s17  ;;  %2806 = vrot.lane.b32.xlu1 %v10154_v24, %s7230_s17 }
 0x3cf   : > { %6697 = vmatprep.subr.bf16.mxu1 %v6696_v46 }
 0x3d0   : > { %6699 = vmatpush1.bf16.msra.mxu1 %v6698_v55  ;;  %v10227_v40 = vpop.permute.xlu0 %2916  ;;  %v2923_v30 = vpop.permute.xlu1 %2922  ;;  %v6684_v13 = vpack.c.bf16 %v2965_v20, %v9917_v53 }
 0x3d1   : > { %13892 = vst [vmem:[#allocation115_spill] sm:$0xff] %v10227_v40  ;;  %v2962_v60 = vsel %vm1356_vm5, %v10227_v40, %v2919_v23  ;;  %v2960_v49 = vsel %vm1356_vm5, %v2921_v34, %v2923_v30  ;;  %v13894_v23 = vld [vmem:[#allocation25_spill] sm:$0xff] }
 0x3d2   : > { %v2964_v39 = vmul.f32 %v2962_v60, %v13893_v62  ;;  %2868 = vrot.lane.b32.xlu0 %v10096_v31, %s7231_s18  ;;  %2870 = vrot.lane.b32.xlu1 %v10154_v24, %s7231_s18  ;;  %v2966_v46 = vmul.f32 %v2960_v49, %v13894_v23  ;;  %v13895_v60 = vld [vmem:[#allocation22_spill] sm:$0xff] }
 0x3d3   : > { %6685 = vmatprep.subr.bf16.mxu0 %v6684_v13 }
 0x3d4   : > { %v6686_v27 = vpack.c.bf16 %v2964_v39, %v9915_v0  ;;  %v10241_v55 = vpop.permute.xlu0 %2924  ;;  %v2983_v20 = vpop.permute.xlu1 %2982  ;;  %v6702_v39 = vpack.c.bf16 %v2966_v46, %v9962_v36  ;;  %v13898_v36 = vld [vmem:[#allocation99_spill] sm:$0xff] }
 0x3d5   : > { %v2959_v53 = vsel %vm1356_vm5, %v2923_v30, %v10241_v55 }
 0x3d6   : > { %v2967_v50 = vmul.f32 %v2959_v53, %v13895_v60  ;;  %3122 = vrot.lane.b32.xlu0 %v10060_v26, %s7235_s22  ;;  %3124 = vrot.lane.b32.xlu1 %v10096_v31, %s7235_s22 }
 0x3d7   : > { %6687 = vmatpush1.bf16.msra.mxu0 %v6686_v27 }
 0x3d8   : > { %v2985_v34 = vpop.permute.xlu0 %2984  ;;  %v3047_v0 = vpop.permute.xlu1 %3046  ;;  %v6700_v13 = vpack.c.bf16 %v2967_v50, %v9964_v57  ;;  %v13897_v57 = vld [vmem:[#allocation89_spill] sm:$0xff] }
 0x3d9   : > { %v3025_v30 = vsel %vm1549_vm6, %v2983_v20, %v2985_v34 }
 0x3da   : > { %2808 = vrot.lane.b32.xlu0 %v10190_v28, %s7230_s17  ;;  %2810 = vrot.lane.b32.xlu1 %v10192_v33, %s7230_s17  ;;  %v3029_v50 = vmul.f32 %v3025_v30, %v13897_v57 }
 0x3db   : > { %6701 = vmatprep.subr.bf16.mxu1 %v6700_v13 }
 0x3dc   : > { %6703 = vmatpush1.bf16.msra.mxu1 %v6702_v39  ;;  %v3049_v49 = vpop.permute.xlu0 %3048  ;;  %v10260_v53 = vpop.permute.xlu1 %2980  ;;  %v2569_v39 = vadd.f32 %v10013_v17, %v9911_v22 }
 0x3dd   : > { %13896 = vst [vmem:[#allocation116_spill] sm:$0xff] %v10260_v53  ;;  %v3089_v27 = vsel %vm1742_vm7, %v3047_v0, %v3049_v49  ;;  %v3026_v13 = vsel %vm1549_vm6, %v10260_v53, %v2983_v20 }
 0x3de   : > { %v3093_v46 = vmul.f32 %v3089_v27, %v13898_v36  ;;  %2872 = vrot.lane.b32.xlu0 %v10190_v28, %s7231_s18  ;;  %2874 = vrot.lane.b32.xlu1 %v10192_v33, %s7231_s18  ;;  %v13900_v27 = vld [vmem:[#allocation93_spill] sm:$0xff]  ;;  %v10286_v17 = vmax.f32 %v2569_v39, 0.0  ;;  %v13902_v39 = vld [vmem:[#allocation27_spill] sm:$0xff] }
 0x3df   : > { %v3028_v57 = vmul.f32 %v3026_v13, %v13900_v27  ;;  %v13901_v36 = vld [vmem:[#allocation101_spill] sm:$0xff]  ;;  %v13903_v27 = vld [vmem:[#allocation35_spill] sm:$0xff] }
 0x3e0   : > { %v10275_v62 = vpop.permute.xlu0 %3044  ;;  %v2987_v60 = vpop.permute.xlu1 %2986  ;;  %v6688_v23 = vpack.c.bf16 %v3093_v46, %v3029_v50 }
 0x3e1   : > { %13899 = vst [vmem:[#allocation50_spill] sm:$0xff] %v10275_v62  ;;  %v3090_v30 = vsel %vm1742_vm7, %v10275_v62, %v3047_v0 }
 0x3e2   : > { %v3092_v35 = vmul.f32 %v3090_v30, %v13901_v36  ;;  %2934 = vrot.lane.b32.xlu0 %v10154_v24, %s7232_s19  ;;  %2936 = vrot.lane.b32.xlu1 %v10190_v28, %s7232_s19 }
 0x3e3   : > { %6689 = vmatprep.subr.bf16.mxu0 %v6688_v23 }
 0x3e4   : > { %v6690_v20 = vpack.c.bf16 %v3092_v35, %v3028_v57  ;;  %v10288_v1 = vpop.permute.xlu0 %2988  ;;  %v3051_v50 = vpop.permute.xlu1 %3050  ;;  %v3024_v57 = vsel %vm1549_vm6, %v2985_v34, %v2987_v60 }
 0x3e5   : > { %v3023_v0 = vsel %vm1549_vm6, %v2987_v60, %v10288_v1  ;;  %v3088_v46 = vsel %vm1742_vm7, %v3049_v49, %v3051_v50  ;;  %v13905_v49 = vld [vmem:[#allocation30_spill] sm:$0xff] }
 0x3e6   : > { %2938 = vrot.lane.b32.xlu0 %v10192_v33, %s7232_s19  ;;  %2940 = vrot.lane.b32.xlu1 %v10286_v17, %s7232_s19  ;;  %v3031_v30 = vmul.f32 %v3023_v0, %v13902_v39  ;;  %v3094_v36 = vmul.f32 %v3088_v46, %v13903_v27  ;;  %v7172_v39 = vld [vmem:[%s13248_s0 + $0x80] ss:$0 sm:$0xff] }
 0x3e7   : > { %6691 = vmatpush1.bf16.msra.mxu0 %v6690_v20  ;;  %v3030_v20 = vmul.f32 %v3024_v57, %v13905_v49 }
 0x3e8   : > { %v10299_v23 = vpop.permute.xlu0 %3052  ;;  %v2669_v35 = vpop.permute.xlu1 %2668 }
 0x3e9   : > { %v3087_v13 = vsel %vm1742_vm7, %v3051_v50, %v10299_v23  ;;  %v6706_v40 = vpack.c.bf16 %v3094_v36, %v3030_v20  ;;  %v2571_v36 = vadd.f32 %v10015_v11, %v9911_v22  ;;  %v13907_v20 = vld [vmem:[#allocation119_spill] sm:$0xff] }
 0x3ea   : > { %v3095_v62 = vmul.f32 %v3087_v13, %v13904_v10  ;;  %2998 = vrot.lane.b32.xlu0 %v10154_v24, %s7233_s20  ;;  %3000 = vrot.lane.b32.xlu1 %v10190_v28, %s7233_s20 }
 0x3ec   : > { %v10314_v53 = vpop.permute.xlu0 %2670  ;;  %v2733_v60 = vpop.permute.xlu1 %2732  ;;  %v6704_v34 = vpack.c.bf16 %v3095_v62, %v3031_v30  ;;  %v2703_v30 = vsel %vm584_vm1, %v10124_v41, %v2669_v35  ;;  %v7173_v41 = vld [vmem:[%s13248_s0 + $0x88] ss:$0 sm:$0xff] }
 0x3ed   : > { %v2767_v62 = vsel %vm777_vm2, %v10138_v14, %v2733_v60  ;;  %v13908_v14 = vld [vmem:[#allocation118_spill] sm:$0xff] }
 0x3ee   : > { %3062 = vrot.lane.b32.xlu0 %v10154_v24, %s7234_s21  ;;  %3064 = vrot.lane.b32.xlu1 %v10190_v28, %s7234_s21 }
 0x3ef   : > { %6705 = vmatprep.subr.bf16.mxu1 %v6704_v34 }
 0x3f0   : > { %6707 = vmatpush1.bf16.msra.mxu1 %v6706_v40  ;;  %v2735_v50 = vpop.permute.xlu0 %2734  ;;  %v3111_v0 = vpop.permute.xlu1 %3110  ;;  %v2702_v40 = vsel %vm584_vm1, %v2669_v35, %v10314_v53 }
 0x3f1   : > { %v2766_v46 = vsel %vm777_vm2, %v2733_v60, %v2735_v50  ;;  %v2776_v60 = vmul.f32 %v2767_v62, %v13908_v14  ;;  %v13910_v62 = vld [vmem:[#allocation112_spill] sm:$0xff] }
 0x3f2   : > { %3002 = vrot.lane.b32.xlu0 %v10192_v33, %s7233_s20  ;;  %3004 = vrot.lane.b32.xlu1 %v10286_v17, %s7233_s20  ;;  %v2777_v34 = vmul.f32 %v2766_v46, %v13907_v20  ;;  %v13909_v46 = vld [vmem:[#allocation113_spill] sm:$0xff]  ;;  %v10357_v20 = vmax.f32 %v2571_v36, 0.0  ;;  %v2712_v14 = vmul.f32 %v2703_v30, %v13910_v62 }
 0x3f3   : > { %v13913_v62 = vld [vmem:[#allocation121_spill] sm:$0xff] }
 0x3f4   : > { %v3113_v57 = vpop.permute.xlu0 %3112  ;;  %v10334_v13 = vpop.permute.xlu1 %3108  ;;  %v6710_v47 = vpack.c.bf16 %v2776_v60, %v2712_v14 }
 0x3f5   : > { %13906 = vst [vmem:[#allocation13_spill] sm:$0xff] %v10334_v13  ;;  %v3153_v10 = vsel %vm1935_vm8, %v3111_v0, %v3113_v57  ;;  %v3154_v11 = vsel %vm1935_vm8, %v10334_v13, %v3111_v0  ;;  %v2713_v0 = vmul.f32 %v2702_v40, %v13909_v46  ;;  %v13911_v40 = vmov 0.0  }
 0x3f6   : > { %v3156_v49 = vmul.f32 %v7172_v39, %v3154_v11  ;;  %3066 = vrot.lane.b32.xlu0 %v10192_v33, %s7234_s21  ;;  %3068 = vrot.lane.b32.xlu1 %v10286_v17, %s7234_s21  ;;  %v3157_v35 = vmul.f32 %v7173_v41, %v3153_v10  ;;  %v10365_v11 = vld [vmem:[%s13252_s4] sm:$0xff] }
 0x3f7   : > { %v6708_v13 = vpack.c.bf16 %v2777_v34, %v2713_v0 }
 0x3f8   : > { %v2673_v27 = vpop.permute.xlu0 %2672  ;;  %3199 = vmatprep.subr.mxu0 %v3157_v35  ;;  %v10360_v39 = vpop.permute.xlu1 %2674 }
 0x3f9   : > { %3200 = vmatpush1.msra.mxu0 %v3156_v49  ;;  %v2640_v49 = vadd.f32 %v9949_v44, %v9911_v22  ;;  %v13912_v44 = vld [vmem:[#allocation120_spill] sm:$0xff] }
 0x3fa   : > { %2684 = vrot.lane.b32.xlu0 %v10286_v17, %s7228_s15  ;;  %2686 = vrot.lane.b32.xlu1 %v10357_v20, %s7228_s15 }
 0x3fb   : > { %6343 = vmatmul.mubr.msk.f32.vlgmr.msra.gmra.mrb[8].mxu0 %vm3179_vm9, %v10365_v11  ;;  %6709 = vmatprep.subr.bf16.mxu0 %v6708_v13  ;;  %v10391_v14 = vmax.f32 %v2640_v49, 0.0 }
 0x3fc   : > { %6711 = vmatpush1.bf16.msra.mxu0 %v6710_v47  ;;  %v2737_v10 = vpop.permute.xlu0 %2736  ;;  %v10373_v36 = vpop.permute.xlu1 %2738  ;;  %3389 = vmatprep.mubr.f32.mxu0 %v13911_v40 }
 0x3fd   : > { %v2764_v22 = vsel %vm777_vm2, %v2737_v10, %v10373_v36 }
 0x3fe   : > { %2748 = vrot.lane.b32.xlu0 %v10286_v17, %s7229_s16  ;;  %2750 = vrot.lane.b32.xlu1 %v10357_v20, %s7229_s16 }
 0x400   : > { %v2797_v30 = vpop.permute.xlu0 %2796  ;;  %v2799_v34 = vpop.permute.xlu1 %2798 }
 0x401   : > { %v2831_v47 = vsel %vm970_vm3, %v10194_v56, %v2797_v30  ;;  %v2830_v13 = vsel %vm970_vm3, %v2797_v30, %v2799_v34  ;;  %v13914_v30 = vld [vmem:[#allocation14_spill] sm:$0xff] }
 0x402   : > { %3126 = vrot.lane.b32.xlu0 %v10154_v24, %s7235_s22  ;;  %3128 = vrot.lane.b32.xlu1 %v10190_v28, %s7235_s22  ;;  %v2840_v35 = vmul.f32 %v2831_v47, %v13912_v44  ;;  %v2841_v46 = vmul.f32 %v2830_v13, %v13913_v62  ;;  %v2765_v47 = vsel %vm777_vm2, %v2735_v50, %v2737_v10  ;;  %v13916_v62 = vld [vmem:[#allocation42_spill] sm:$0xff]  ;;  %v13917_v10 = vld [vmem:[#allocation45_spill] sm:$0xff] }
 0x403   : > { %v2778_v15 = vmul.f32 %v2765_v47, %v13917_v10 }
 0x404   : > { %v2861_v60 = vpop.permute.xlu0 %2860  ;;  %v2863_v41 = vpop.permute.xlu1 %2862 }
 0x405   : > { %v2895_v56 = vsel %vm1163_vm4, %v10205_v6, %v2861_v60  ;;  %v2894_v0 = vsel %vm1163_vm4, %v2861_v60, %v2863_v41  ;;  %v2700_v6 = vsel %vm584_vm1, %v2673_v27, %v10360_v39 }
 0x406   : > { %v2904_v49 = vmul.f32 %v2895_v56, %v13914_v30  ;;  %v2905_v42 = vmul.f32 %v2894_v0, %v13915_v2  ;;  %2688 = vrot.lane.b32.xlu0 %v10391_v14, %s7228_s15  ;;  %2752 = vrot.lane.b32.xlu1 %v10391_v14, %s7229_s16  ;;  %v2701_v0 = vsel %vm584_vm1, %v10314_v53, %v2673_v27  ;;  %v7175_v53 = vld [vmem:[%s13248_s0 + $0x98] ss:$0 sm:$0xff] }
 0x407   : > { %v2779_v2 = vmul.f32 %v2764_v22, %v13916_v62  ;;  %v13919_v22 = vld [vmem:[#allocation41_spill] sm:$0xff] }
 0x408   : > { %v6714_v60 = vpack.c.bf16 %v2904_v49, %v2840_v35  ;;  %v3115_v44 = vpop.permute.xlu0 %3114  ;;  %v10414_v13 = vpop.permute.xlu1 %3116  ;;  %v6712_v56 = vpack.c.bf16 %v2905_v42, %v2841_v46  ;;  %v7174_v35 = vld [vmem:[%s13248_s0 + $0x90] ss:$0 sm:$0xff] }
 0x409   : > { %v3152_v30 = vsel %vm1935_vm8, %v3113_v57, %v3115_v44  ;;  %v3151_v50 = vsel %vm1935_vm8, %v3115_v44, %v10414_v13  ;;  %v13918_v57 = vld [vmem:[#allocation38_spill] sm:$0xff]  ;;  %v2714_v44 = vmul.f32 %v2701_v0, %v13919_v22 }
 0x40a   : > { %v3158_v42 = vmul.f32 %v7174_v35, %v3152_v30  ;;  %2812 = vrot.lane.b32.xlu0 %v10286_v17, %s7230_s17  ;;  %2814 = vrot.lane.b32.xlu1 %v10357_v20, %s7230_s17  ;;  %v3159_v27 = vmul.f32 %v7175_v53, %v3151_v50  ;;  %v2715_v46 = vmul.f32 %v2700_v6, %v13918_v57  ;;  %v13921_v50 = vld [vmem:[#allocation46_spill] sm:$0xff]  ;;  %v13922_v53 = vld [vmem:[#allocation59_spill] sm:$0xff] }
 0x40b   : > { %6713 = vmatprep.subr.bf16.mxu0 %v6712_v56  ;;  %v6726_v35 = vpack.c.bf16 %v2778_v15, %v2714_v44 }
 0x40c   : > { %6715 = vmatpush1.bf16.msra.mxu0 %v6714_v60  ;;  %v2801_v49 = vpop.permute.xlu0 %2800  ;;  %3270 = vmatprep.subr.mxu1 %v3159_v27  ;;  %v10438_v30 = vpop.permute.xlu1 %2802  ;;  %v6724_v47 = vpack.c.bf16 %v2779_v2, %v2715_v46  ;;  %v13923_v46 = vld [vmem:[#allocation53_spill] sm:$0xff] }
 0x40d   : > { %3271 = vmatpush1.msra.mxu1 %v3158_v42  ;;  %v2829_v10 = vsel %vm970_vm3, %v2799_v34, %v2801_v49  ;;  %v2828_v6 = vsel %vm970_vm3, %v2801_v49, %v10438_v30  ;;  %v13920_v34 = vld [vmem:[#allocation49_spill] sm:$0xff] }
 0x40e   : > { %2876 = vrot.lane.b32.xlu0 %v10286_v17, %s7231_s18  ;;  %2878 = vrot.lane.b32.xlu1 %v10357_v20, %s7231_s18  ;;  %v2842_v60 = vmul.f32 %v2829_v10, %v13920_v34  ;;  %v2843_v42 = vmul.f32 %v2828_v6, %v13921_v50 }
 0x40f   : > { %6344 = vmatmul.mubr.msk.f32.vlgmr.msra.gmra.mrb[8].mxu1 %vm3179_vm9, %v10365_v11  ;;  %6725 = vmatprep.subr.bf16.mxu1 %v6724_v47 }
 0x410   : > { %6727 = vmatpush1.bf16.msra.mxu1 %v6726_v35  ;;  %v2865_v2 = vpop.permute.xlu0 %2864  ;;  %v10451_v15 = vpop.permute.xlu1 %2866  ;;  %3460 = vmatprep.mubr.f32.mxu1 %v13911_v40 }
 0x411   : > { %v2893_v56 = vsel %vm1163_vm4, %v2863_v41, %v2865_v2  ;;  %v2892_v0 = vsel %vm1163_vm4, %v2865_v2, %v10451_v15  ;;  %v13924_v2 = vld [vmem:[#allocation129_spill] sm:$0xff] }
 0x412   : > { %v2906_v27 = vmul.f32 %v2893_v56, %v13922_v53  ;;  %v2907_v44 = vmul.f32 %v2892_v0, %v13923_v46  ;;  %3130 = vrot.lane.b32.xlu0 %v10192_v33, %s7235_s22  ;;  %3132 = vrot.lane.b32.xlu1 %v10286_v17, %s7235_s22  ;;  %v13925_v0 = vld [vmem:[#allocation130_spill] sm:$0xff] }
 0x414   : > { %v6730_v10 = vpack.c.bf16 %v2906_v27, %v2842_v60  ;;  %v2927_v49 = vpop.permute.xlu0 %2926  ;;  %v2929_v47 = vpop.permute.xlu1 %2928  ;;  %v6728_v41 = vpack.c.bf16 %v2907_v44, %v2843_v42 }
 0x415   : > { %v2958_v35 = vsel %vm1356_vm5, %v10241_v55, %v2927_v49  ;;  %v2957_v6 = vsel %vm1356_vm5, %v2927_v49, %v2929_v47 }
 0x416   : > { %v2968_v56 = vmul.f32 %v2958_v35, %v13924_v2  ;;  %v2969_v34 = vmul.f32 %v2957_v6, %v13925_v0  ;;  %2816 = vrot.lane.b32.xlu0 %v10391_v14, %s7230_s17  ;;  %2880 = vrot.lane.b32.xlu1 %v10391_v14, %s7231_s18  ;;  %v13926_v35 = vld [vmem:[#allocation67_spill] sm:$0xff] }
 0x417   : > { %6729 = vmatprep.subr.bf16.mxu1 %v6728_v41  ;;  %v13927_v0 = vld [vmem:[#allocation63_spill] sm:$0xff] }
 0x418   : > { %v6718_v60 = vpack.c.bf16 %v2968_v56, %v10007_v37  ;;  %6731 = vmatpush1.bf16.msra.mxu1 %v6730_v10  ;;  %v2931_v42 = vpop.permute.xlu0 %2930  ;;  %v10479_v27 = vpop.permute.xlu1 %2932  ;;  %v6716_v55 = vpack.c.bf16 %v2969_v34, %v10038_v32 }
 0x419   : > { %v2956_v44 = vsel %vm1356_vm5, %v2929_v47, %v2931_v42  ;;  %v2955_v49 = vsel %vm1356_vm5, %v2931_v42, %v10479_v27 }
 0x41a   : > { %v2970_v6 = vmul.f32 %v2956_v44, %v13926_v35  ;;  %v2971_v2 = vmul.f32 %v2955_v49, %v13927_v0  ;;  %2942 = vrot.lane.b32.xlu0 %v10357_v20, %s7232_s19  ;;  %2944 = vrot.lane.b32.xlu1 %v10391_v14, %s7232_s19 }
 0x41b   : > { %6717 = vmatprep.subr.bf16.mxu0 %v6716_v55 }
 0x41c   : > { %v6734_v37 = vpack.c.bf16 %v2970_v6, %v10058_v5  ;;  %6719 = vmatpush1.bf16.msra.mxu0 %v6718_v60  ;;  %v2991_v32 = vpop.permute.xlu0 %2990  ;;  %v2993_v34 = vpop.permute.xlu1 %2992  ;;  %v6732_v10 = vpack.c.bf16 %v2971_v2, %v10060_v26 }
 0x41d   : > { %v3022_v47 = vsel %vm1549_vm6, %v10288_v1, %v2991_v32  ;;  %v3021_v41 = vsel %vm1549_vm6, %v2991_v32, %v2993_v34 }
 0x41e   : > { %2946 = vrot.lane.b32.xlu0 %v9952_v16, %s7232_s19  ;;  %3006 = vrot.lane.b32.xlu1 %v10357_v20, %s7233_s20  ;;  %v3032_v60 = vmul.f32 %v3022_v47, %v9180_v4  ;;  %v3033_v2 = vmul.f32 %v3021_v41, %v9184_v29  ;;  %v13928_v41 = vld [vmem:[#allocation75_spill] sm:$0xff]  ;;  %v7176_v4 = vld [vmem:[%s13248_s0 + $0xa0] ss:$0 sm:$0xff] }
 0x41f   : > { %6733 = vmatprep.subr.bf16.mxu1 %v6732_v10 }
 0x420   : > { %6735 = vmatpush1.bf16.msra.mxu1 %v6734_v37  ;;  %v3055_v5 = vpop.permute.xlu0 %3054  ;;  %v3057_v56 = vpop.permute.xlu1 %3056 }
 0x421   : > { %v3086_v26 = vsel %vm1742_vm7, %v10299_v23, %v3055_v5  ;;  %v3085_v1 = vsel %vm1742_vm7, %v3055_v5, %v3057_v56 }
 0x422   : > { %v3096_v42 = vmul.f32 %v3086_v26, %v9257_v61  ;;  %v3097_v55 = vmul.f32 %v3085_v1, %v9261_v43  ;;  %3008 = vrot.lane.b32.xlu0 %v10391_v14, %s7233_s20  ;;  %3070 = vrot.lane.b32.xlu1 %v10357_v20, %s7234_s21  ;;  %v13929_v26 = vld [vmem:[#allocation69_spill] sm:$0xff]  ;;  %v13932_v43 = vld [vmem:[#allocation92_spill] sm:$0xff] }
 0x424   : > { %v6722_v44 = vpack.c.bf16 %v3096_v42, %v3032_v60  ;;  %v2995_v49 = vpop.permute.xlu0 %2994  ;;  %v10517_v6 = vpop.permute.xlu1 %2996  ;;  %v6720_v23 = vpack.c.bf16 %v3097_v55, %v3033_v2  ;;  %v13930_v2 = vld [vmem:[#allocation79_spill] sm:$0xff]  ;;  %v13931_v55 = vld [vmem:[#allocation76_spill] sm:$0xff] }
 0x425   : > { %v3020_v37 = vsel %vm1549_vm6, %v2993_v34, %v2995_v49  ;;  %v3019_v32 = vsel %vm1549_vm6, %v2995_v49, %v10517_v6 }
 0x426   : > { %3072 = vrot.lane.b32.xlu0 %v10391_v14, %s7234_s21  ;;  %3010 = vrot.lane.b32.xlu1 %v9952_v16, %s7233_s20  ;;  %v3034_v5 = vmul.f32 %v3020_v37, %v13928_v41  ;;  %v3035_v1 = vmul.f32 %v3019_v32, %v13929_v26  ;;  %v3173_v32 = vld [vmem:[%s13253_s5] sm:$0xff] }
 0x427   : > { %6721 = vmatprep.subr.bf16.mxu0 %v6720_v23 }
 0x428   : > { %6723 = vmatpush1.bf16.msra.mxu0 %v6722_v44  ;;  %v3059_v10 = vpop.permute.xlu0 %3058  ;;  %v10528_v47 = vpop.permute.xlu1 %3060 }
 0x429   : > { %v3084_v34 = vsel %vm1742_vm7, %v3057_v56, %v3059_v10  ;;  %v3083_v60 = vsel %vm1742_vm7, %v3059_v10, %v10528_v47 }
 0x42a   : > { %v3098_v42 = vmul.f32 %v3084_v34, %v13930_v2  ;;  %v3099_v49 = vmul.f32 %v3083_v60, %v13931_v55  ;;  %3074 = vrot.lane.b32.xlu0 %v9952_v16, %s7234_s21  ;;  %3134 = vrot.lane.b32.xlu1 %v10357_v20, %s7235_s22 }
 0x42c   : > { %v6738_v44 = vpack.c.bf16 %v3098_v42, %v3034_v5  ;;  %v2677_v23 = vpop.permute.xlu0 %2676  ;;  %v2679_v37 = vpop.permute.xlu1 %2678  ;;  %v6736_v56 = vpack.c.bf16 %v3099_v49, %v3035_v1 }
 0x42d   : > { %v2698_v1 = vsel %vm584_vm1, %v2677_v23, %v2679_v37  ;;  %v2699_v42 = vsel %vm584_vm1, %v10360_v39, %v2677_v23  ;;  %v7177_v23 = vld [vmem:[%s13248_s0 + $0xa8] ss:$0 sm:$0xff] }
 0x42e   : > { %3136 = vrot.lane.b32.xlu0 %v10391_v14, %s7235_s22  ;;  %3138 = vrot.lane.b32.xlu1 %v9952_v16, %s7235_s22 }
 0x42f   : > { %6737 = vmatprep.subr.bf16.mxu1 %v6736_v56 }
 0x430   : > { %6739 = vmatpush1.bf16.msra.mxu1 %v6738_v44  ;;  %v2741_v10 = vpop.permute.xlu0 %2740  ;;  %v2743_v34 = vpop.permute.xlu1 %2742 }
 0x431   : > { %v2762_v5 = vsel %vm777_vm2, %v2741_v10, %v2743_v34  ;;  %v2763_v60 = vsel %vm777_vm2, %v10373_v36, %v2741_v10 }
 0x432   : > { %3176 = vperm.xlu0 %7078, %v3173_v32   ;;  %v2781_v49 = vmul.f32 %v2762_v5, %v9429_v8  ;;  %v2780_v61 = vmul.f32 %v2763_v60, %v13932_v43  ;;  %v13933_v32 = vld [vmem:[#allocation134_spill] sm:$0xff]  ;;  %v13934_v60 = vld [vmem:[#allocation37_spill] sm:$0xff] }
 0x433   : > { %v2717_v10 = vmul.f32 %v2698_v1, %v13933_v32  ;;  %v2716_v43 = vmul.f32 %v2699_v42, %v13934_v60  ;;  %v13936_v32 = vld [vmem:[#allocation96_spill] sm:$0xff] }
 0x434   : > { %v3119_v44 = vpop.permute.xlu0 %3118  ;;  %v3121_v56 = vpop.permute.xlu1 %3120 }
 0x435   : > { %v3150_v29 = vsel %vm1935_vm8, %v10414_v13, %v3119_v44  ;;  %v3149_v36 = vsel %vm1935_vm8, %v3119_v44, %v3121_v56  ;;  %v6740_v2 = vpack.c.bf16 %v2781_v49, %v2717_v10  ;;  %v6742_v44 = vpack.c.bf16 %v2780_v61, %v2716_v43 }
 0x436   : > { %v3160_v39 = vmul.f32 %v7176_v4, %v3150_v29  ;;  %v3161_v5 = vmul.f32 %v7177_v23, %v3149_v36 }
 0x438   : > { %v2681_v8 = vpop.permute.xlu0 %2680  ;;  %3341 = vmatprep.subr.mxu0 %v3161_v5  ;;  %v10575_v13 = vpop.permute.xlu1 %2682  ;;  %v13935_v5 = vld [vmem:[#allocation74_spill] sm:$0xff] }
 0x439   : > { %3342 = vmatpush1.msra.mxu0 %v3160_v39 }
 0x43a   : > { %6345 = vmatmul.mubr.msk.f32.vlgmr.msra.gmra.mrb[10].mxu0 %vm3179_vm9, %v10365_v11  ;;  %6741 = vmatprep.subr.bf16.mxu0 %v6740_v2 }
 0x43b   : > { %6743 = vmatpush1.bf16.msra.mxu0 %v6742_v44  ;;  %3531 = vmatprep.mubr.f32.mxu0 %v13911_v40 }
 0x43c   : > { %v2745_v4 = vpop.permute.xlu0 %2744  ;;  %v10580_v29 = vpop.permute.xlu1 %2746 }
 0x43d   : > { %v2761_v2 = vsel %vm777_vm2, %v2743_v34, %v2745_v4  ;;  %v2760_v10 = vsel %vm777_vm2, %v2745_v4, %v10580_v29  ;;  %v2696_v34 = vsel %vm584_vm1, %v2681_v8, %v10575_v13  ;;  %v2697_v4 = vsel %vm584_vm1, %v2679_v37, %v2681_v8  ;;  %v7178_v8 = vld [vmem:[%s13248_s0 + $0xb0] ss:$0 sm:$0xff] }
 0x440   : > { %v2805_v1 = vpop.permute.xlu0 %2804  ;;  %v2807_v36 = vpop.permute.xlu1 %2806 }
 0x441   : > { %v2827_v42 = vsel %vm970_vm3, %v10438_v30, %v2805_v1  ;;  %v2826_v61 = vsel %vm970_vm3, %v2805_v1, %v2807_v36 }
 0x442   : > { %v2844_v30 = vmul.f32 %v2827_v42, %v9434_v21  ;;  %v2845_v44 = vmul.f32 %v2826_v61, %v13935_v5  ;;  %v13937_v21 = vld [vmem:[#allocation100_spill] sm:$0xff] }
 0x443   : > { %v2782_v61 = vmul.f32 %v2761_v2, %v13937_v21  ;;  %v13995_v21 = vld [vmem:[#allocation10_spill] sm:$0xff] }
 0x444   : > { %v2869_v43 = vpop.permute.xlu0 %2868  ;;  %v2871_v49 = vpop.permute.xlu1 %2870 }
 0x445   : > { %v2891_v39 = vsel %vm1163_vm4, %v10451_v15, %v2869_v43  ;;  %v2890_v23 = vsel %vm1163_vm4, %v2869_v43, %v2871_v49  ;;  %v2783_v15 = vmul.f32 %v2760_v10, %v13936_v32  ;;  %v13939_v10 = vld [vmem:[#allocation90_spill] sm:$0xff] }
 0x446   : > { %v2908_v1 = vmul.f32 %v2891_v39, %v9505_v25  ;;  %v2909_v60 = vmul.f32 %v2890_v23, %v9509_v52  ;;  %v13938_v25 = vld [vmem:[#allocation86_spill] sm:$0xff] }
 0x447   : > { %v2719_v52 = vmul.f32 %v2696_v34, %v13938_v25 }
 0x448   : > { %v6746_v55 = vpack.c.bf16 %v2908_v1, %v2844_v30  ;;  %v3123_v26 = vpop.permute.xlu0 %3122  ;;  %v10607_v43 = vpop.permute.xlu1 %3124  ;;  %v6744_v42 = vpack.c.bf16 %v2909_v60, %v2845_v44  ;;  %v7179_v60 = vld [vmem:[%s13248_s0 + $0xb8] ss:$0 sm:$0xff]  ;;  %v2718_v30 = vmul.f32 %v2697_v4, %v13939_v10 }
 0x449   : > { %v3148_v39 = vsel %vm1935_vm8, %v3121_v56, %v3123_v26  ;;  %v3147_v23 = vsel %vm1935_vm8, %v3123_v26, %v10607_v43  ;;  %v6756_v26 = vpack.c.bf16 %v2783_v15, %v2719_v52 }
 0x44a   : > { %v3162_v37 = vmul.f32 %v7178_v8, %v3148_v39  ;;  %6745 = vmatprep.subr.bf16.mxu0 %v6744_v42  ;;  %v3163_v2 = vmul.f32 %v7179_v60, %v3147_v23  ;;  %v6758_v1 = vpack.c.bf16 %v2782_v61, %v2718_v30  ;;  %v13940_v61 = vld [vmem:[#allocation107_spill] sm:$0xff]  ;;  %v13942_v8 = vld [vmem:[#allocation117_spill] sm:$0xff]  ;;  %v13943_v60 = vld [vmem:[#allocation114_spill] sm:$0xff] }
 0x44b   : > { %6747 = vmatpush1.bf16.msra.mxu0 %v6746_v55 }
 0x44c   : > { %v2809_v56 = vpop.permute.xlu0 %2808  ;;  %3412 = vmatprep.subr.mxu1 %v3163_v2  ;;  %v10623_v44 = vpop.permute.xlu1 %2810 }
 0x44d   : > { %3413 = vmatpush1.msra.mxu1 %v3162_v37  ;;  %v2825_v34 = vsel %vm970_vm3, %v2807_v36, %v2809_v56  ;;  %v2824_v42 = vsel %vm970_vm3, %v2809_v56, %v10623_v44  ;;  %v13941_v36 = vld [vmem:[#allocation104_spill] sm:$0xff] }
 0x44e   : > { %6346 = vmatmul.mubr.msk.f32.vlgmr.msra.gmra.mrb[10].mxu1 %vm3179_vm9, %v10365_v11  ;;  %6757 = vmatprep.subr.bf16.mxu1 %v6756_v26  ;;  %v2846_v39 = vmul.f32 %v2825_v34, %v13940_v61  ;;  %v2847_v23 = vmul.f32 %v2824_v42, %v13941_v36 }
 0x44f   : > { %6759 = vmatpush1.bf16.msra.mxu1 %v6758_v1  ;;  %3602 = vmatprep.mubr.f32.mxu1 %v13911_v40 }
 0x450   : > { %v2873_v55 = vpop.permute.xlu0 %2872  ;;  %v10633_v4 = vpop.permute.xlu1 %2874 }
 0x451   : > { %v2889_v52 = vsel %vm1163_vm4, %v2871_v49, %v2873_v55  ;;  %v2888_v15 = vsel %vm1163_vm4, %v2873_v55, %v10633_v4 }
 0x452   : > { %v2910_v37 = vmul.f32 %v2889_v52, %v13942_v8  ;;  %v2911_v2 = vmul.f32 %v2888_v15, %v13943_v60 }
 0x454   : > { %v6762_v30 = vpack.c.bf16 %v2910_v37, %v2846_v39  ;;  %v2935_v56 = vpop.permute.xlu0 %2934  ;;  %v2937_v26 = vpop.permute.xlu1 %2936  ;;  %v6760_v1 = vpack.c.bf16 %v2911_v2, %v2847_v23  ;;  %v13944_v37 = vld [vmem:[#allocation51_spill] sm:$0xff] }
 0x455   : > { %v2954_v49 = vsel %vm1356_vm5, %v10479_v27, %v2935_v56  ;;  %v2953_v5 = vsel %vm1356_vm5, %v2935_v56, %v2937_v26  ;;  %v13945_v56 = vld [vmem:[#allocation9_spill] sm:$0xff] }
 0x456   : > { %v2972_v55 = vmul.f32 %v2954_v49, %v9593_v7  ;;  %v2973_v34 = vmul.f32 %v2953_v5, %v9597_v48  ;;  %6761 = vmatprep.subr.bf16.mxu1 %v6760_v1 }
 0x457   : > { %6763 = vmatpush1.bf16.msra.mxu1 %v6762_v30 }
 0x458   : > { %v6750_v42 = vpack.c.bf16 %v2972_v55, %v10096_v31  ;;  %v2939_v52 = vpop.permute.xlu0 %2938  ;;  %v10652_v15 = vpop.permute.xlu1 %2940  ;;  %v6748_v39 = vpack.c.bf16 %v2973_v34, %v10154_v24 }
 0x459   : > { %v2952_v23 = vsel %vm1356_vm5, %v2937_v26, %v2939_v52  ;;  %v2951_v27 = vsel %vm1356_vm5, %v2939_v52, %v10652_v15 }
 0x45a   : > { %v2974_v2 = vmul.f32 %v2952_v23, %v13944_v37  ;;  %v2975_v5 = vmul.f32 %v2951_v27, %v13945_v56  ;;  %6749 = vmatprep.subr.bf16.mxu0 %v6748_v39  ;;  %v13946_v39 = vld [vmem:[#allocation102_spill] sm:$0xff] }
 0x45b   : > { %6751 = vmatpush1.bf16.msra.mxu0 %v6750_v42 }
 0x45c   : > { %v6766_v31 = vpack.c.bf16 %v2974_v2, %v10190_v28  ;;  %v2999_v30 = vpop.permute.xlu0 %2998  ;;  %v3001_v1 = vpop.permute.xlu1 %3000  ;;  %v6764_v49 = vpack.c.bf16 %v2975_v5, %v10192_v33 }
 0x45d   : > { %v3018_v24 = vsel %vm1549_vm6, %v10517_v6, %v2999_v30  ;;  %v3017_v26 = vsel %vm1549_vm6, %v2999_v30, %v3001_v1  ;;  %v13947_v6 = vld [vmem:[#allocation103_spill] sm:$0xff] }
 0x45e   : > { %6765 = vmatprep.subr.bf16.mxu1 %v6764_v49  ;;  %v3036_v33 = vmul.f32 %v3018_v24, %v9640_v9  ;;  %v3037_v52 = vmul.f32 %v3017_v26, %v9644_v51 }
 0x45f   : > { %6767 = vmatpush1.bf16.msra.mxu1 %v6766_v31 }
 0x460   : > { %v3063_v55 = vpop.permute.xlu0 %3062  ;;  %v3065_v34 = vpop.permute.xlu1 %3064 }
 0x461   : > { %v3082_v42 = vsel %vm1742_vm7, %v10528_v47, %v3063_v55  ;;  %v3081_v28 = vsel %vm1742_vm7, %v3063_v55, %v3065_v34 }
 0x462   : > { %v3100_v23 = vmul.f32 %v3082_v42, %v13946_v39  ;;  %v3101_v27 = vmul.f32 %v3081_v28, %v13947_v6  ;;  %v13948_v28 = vld [vmem:[#allocation124_spill] sm:$0xff] }
 0x464   : > { %v6754_v2 = vpack.c.bf16 %v3100_v23, %v3036_v33  ;;  %v3003_v5 = vpop.permute.xlu0 %3002  ;;  %v10678_v31 = vpop.permute.xlu1 %3004  ;;  %v6752_v30 = vpack.c.bf16 %v3101_v27, %v3037_v52  ;;  %v13949_v52 = vld [vmem:[#allocation18_spill] sm:$0xff] }
 0x465   : > { %v3016_v47 = vsel %vm1549_vm6, %v3001_v1, %v3003_v5  ;;  %v3015_v49 = vsel %vm1549_vm6, %v3003_v5, %v10678_v31  ;;  %v13950_v1 = vld [vmem:[#allocation128_spill] sm:$0xff] }
 0x466   : > { %6753 = vmatprep.subr.bf16.mxu0 %v6752_v30  ;;  %v3038_v33 = vmul.f32 %v3016_v47, %v13948_v28  ;;  %v3039_v23 = vmul.f32 %v3015_v49, %v13949_v52  ;;  %v13951_v30 = vld [vmem:[#allocation125_spill] sm:$0xff] }
 0x467   : > { %6755 = vmatpush1.bf16.msra.mxu0 %v6754_v2 }
 0x468   : > { %v3067_v24 = vpop.permute.xlu0 %3066  ;;  %v10685_v26 = vpop.permute.xlu1 %3068 }
 0x469   : > { %v3080_v55 = vsel %vm1742_vm7, %v3065_v34, %v3067_v24  ;;  %v3079_v42 = vsel %vm1742_vm7, %v3067_v24, %v10685_v26 }
 0x46a   : > { %v3102_v27 = vmul.f32 %v3080_v55, %v13950_v1  ;;  %v3103_v9 = vmul.f32 %v3079_v42, %v13951_v30 }
 0x46c   : > { %v6770_v5 = vpack.c.bf16 %v3102_v27, %v3038_v33  ;;  %v2685_v2 = vpop.permute.xlu0 %2684  ;;  %v2687_v39 = vpop.permute.xlu1 %2686  ;;  %v6768_v6 = vpack.c.bf16 %v3103_v9, %v3039_v23 }
 0x46d   : > { %v2694_v49 = vsel %vm584_vm1, %v2685_v2, %v2687_v39  ;;  %v2695_v9 = vsel %vm584_vm1, %v10575_v13, %v2685_v2  ;;  %v7181_v13 = vld [vmem:[%s13248_s0 + $0xc8] ss:$0 sm:$0xff] }
 0x46e   : > { %6769 = vmatprep.subr.bf16.mxu1 %v6768_v6 }
 0x46f   : > { %6771 = vmatpush1.bf16.msra.mxu1 %v6770_v5  ;;  %v2720_v5 = vmul.f32 %v2695_v9, %v9705_v54 }
 0x470   : > { %v2749_v51 = vpop.permute.xlu0 %2748  ;;  %v2751_v34 = vpop.permute.xlu1 %2750 }
 0x471   : > { %v2758_v7 = vsel %vm777_vm2, %v2749_v51, %v2751_v34  ;;  %v2759_v47 = vsel %vm777_vm2, %v10580_v29, %v2749_v51  ;;  %v7180_v29 = vld [vmem:[%s13248_s0 + $0xc0] ss:$0 sm:$0xff] }
 0x472   : > { %v2785_v6 = vmul.f32 %v2758_v7, %v9729_v59  ;;  %v2784_v51 = vmul.f32 %v2759_v47, %v9725_v58  ;;  %v2721_v7 = vmul.f32 %v2694_v49, %v9709_v63  ;;  %v13956_v63 = vld [vmem:[#allocation29_spill] sm:$0xff] }
 0x474   : > { %v3127_v24 = vpop.permute.xlu0 %3126  ;;  %v3129_v55 = vpop.permute.xlu1 %3128  ;;  %v6774_v47 = vpack.c.bf16 %v2784_v51, %v2720_v5 }
 0x475   : > { %v3146_v42 = vsel %vm1935_vm8, %v10607_v43, %v3127_v24  ;;  %v3145_v33 = vsel %vm1935_vm8, %v3127_v24, %v3129_v55  ;;  %v6772_v24 = vpack.c.bf16 %v2785_v6, %v2721_v7 }
 0x476   : > { %v3164_v23 = vmul.f32 %v7180_v29, %v3146_v42  ;;  %v3165_v27 = vmul.f32 %v7181_v13, %v3145_v33 }
 0x478   : > { %v2689_v43 = vpop.permute.xlu0 %2688  ;;  %3483 = vmatprep.subr.mxu0 %v3165_v27  ;;  %v2753_v2 = vpop.permute.xlu1 %2752 }
 0x479   : > { %3484 = vmatpush1.msra.mxu0 %v3164_v23  ;;  %v2692_v6 = vsel %vm584_vm1, %v2689_v43, %v10106_v45  ;;  %v2693_v33 = vsel %vm584_vm1, %v2687_v39, %v2689_v43  ;;  %v2756_v13 = vsel %vm777_vm2, %v2753_v2, %v10108_v3  ;;  %v2757_v27 = vsel %vm777_vm2, %v2751_v34, %v2753_v2  ;;  %v13952_v43 = vld [vmem:[#allocation78_spill] sm:$0xff]  ;;  %v13955_v34 = vld [vmem:[#allocation33_spill] sm:$0xff] }
 0x47a   : > { %6347 = vmatmul.mubr.msk.f32.vlgmr.msra.gmra.mrb[12].mxu0 %vm3179_vm9, %v10365_v11  ;;  %6773 = vmatprep.subr.bf16.mxu0 %v6772_v24  ;;  %v2786_v2 = vmul.f32 %v2757_v27, %v13955_v34  ;;  %v2787_v58 = vmul.f32 %v2756_v13, %v13956_v63  ;;  %v7183_v13 = vld [vmem:[%s13248_s0 + $0xd8] ss:$0 sm:$0xff] }
 0x47b   : > { %3673 = vmatprep.mubr.f32.mxu0 %v13911_v40  ;;  %6775 = vmatpush1.bf16.msra.mxu0 %v6774_v47  ;;  %v13953_v47 = vld [vmem:[#allocation28_spill] sm:$0xff] }
 0x47c   : > { %v2813_v42 = vpop.permute.xlu0 %2812  ;;  %v2815_v29 = vpop.permute.xlu1 %2814  ;;  %v2722_v3 = vmul.f32 %v2693_v33, %v13953_v47 }
 0x47d   : > { %v2823_v49 = vsel %vm970_vm3, %v10623_v44, %v2813_v42  ;;  %v2822_v9 = vsel %vm970_vm3, %v2813_v42, %v2815_v29  ;;  %v13954_v42 = vld [vmem:[#allocation131_spill] sm:$0xff] }
 0x47e   : > { %v2848_v45 = vmul.f32 %v2823_v49, %v9749_v19  ;;  %v2849_v39 = vmul.f32 %v2822_v9, %v9753_v38  ;;  %v2723_v54 = vmul.f32 %v2692_v6, %v13954_v42  ;;  %v7182_v6 = vld [vmem:[%s13248_s0 + $0xd0] ss:$0 sm:$0xff]  ;;  %v13981_v19 = vld [vmem:[#allocation5_spill] sm:$0xff] }
 0x47f   : > { %v13982_v38 = vld [vmem:[#allocation8_spill] sm:$0xff] }
 0x480   : > { %v2877_v51 = vpop.permute.xlu0 %2876  ;;  %v2879_v23 = vpop.permute.xlu1 %2878 }
 0x481   : > { %v2887_v44 = vsel %vm1163_vm4, %v10633_v4, %v2877_v51  ;;  %v2886_v7 = vsel %vm1163_vm4, %v2877_v51, %v2879_v23 }
 0x482   : > { %v2912_v5 = vmul.f32 %v2887_v44, %v9774_v12  ;;  %v2913_v24 = vmul.f32 %v2886_v7, %v13952_v43  ;;  %v6790_v44 = vpack.c.bf16 %v2786_v2, %v2722_v3  ;;  %v13959_v3 = vld [vmem:[#allocation36_spill] sm:$0xff] }
 0x483   : > { %v13977_v12 = vld [vmem:[#allocation84_spill] sm:$0xff] }
 0x484   : > { %v6778_v4 = vpack.c.bf16 %v2912_v5, %v2848_v45  ;;  %v3131_v59 = vpop.permute.xlu0 %3130  ;;  %v10752_v48 = vpop.permute.xlu1 %3132  ;;  %v6776_v51 = vpack.c.bf16 %v2913_v24, %v2849_v39  ;;  %v6788_v45 = vpack.c.bf16 %v2787_v58, %v2723_v54  ;;  %v13957_v39 = vld [vmem:[#allocation105_spill] sm:$0xff]  ;;  %v13958_v24 = vld [vmem:[#allocation106_spill] sm:$0xff]  ;;  %v13961_v54 = vld [vmem:[#allocation39_spill] sm:$0xff] }
 0x485   : > { %v3144_v49 = vsel %vm1935_vm8, %v3129_v55, %v3131_v59  ;;  %v3143_v9 = vsel %vm1935_vm8, %v3131_v59, %v10752_v48 }
 0x486   : > { %v3166_v33 = vmul.f32 %v7182_v6, %v3144_v49  ;;  %6777 = vmatprep.subr.bf16.mxu0 %v6776_v51  ;;  %v3167_v27 = vmul.f32 %v7183_v13, %v3143_v9  ;;  %v13962_v6 = vld [vmem:[#allocation91_spill] sm:$0xff] }
 0x487   : > { %6779 = vmatpush1.bf16.msra.mxu0 %v6778_v4  ;;  %v13960_v4 = vld [vmem:[#allocation34_spill] sm:$0xff] }
 0x488   : > { %v2817_v7 = vpop.permute.xlu0 %2816  ;;  %3554 = vmatprep.subr.mxu1 %v3167_v27  ;;  %v2881_v55 = vpop.permute.xlu1 %2880 }
 0x489   : > { %v2820_v59 = vsel %vm970_vm3, %v2817_v7, %v13957_v39  ;;  %v2821_v5 = vsel %vm970_vm3, %v2815_v29, %v2817_v7  ;;  %v2884_v51 = vsel %vm1163_vm4, %v2881_v55, %v13958_v24  ;;  %v2885_v49 = vsel %vm1163_vm4, %v2879_v23, %v2881_v55  ;;  %3555 = vmatpush1.msra.mxu1 %v3166_v33  ;;  %v13963_v39 = vld [vmem:[#allocation82_spill] sm:$0xff] }
 0x48a   : > { %v2850_v2 = vmul.f32 %v2821_v5, %v13959_v3  ;;  %v2851_v9 = vmul.f32 %v2820_v59, %v13960_v4  ;;  %v2914_v58 = vmul.f32 %v2885_v49, %v13961_v54  ;;  %v2915_v13 = vmul.f32 %v2884_v51, %v13962_v6  ;;  %6348 = vmatmul.mubr.msk.f32.vlgmr.msra.gmra.mrb[12].mxu1 %vm3179_vm9, %v10365_v11  ;;  %v13964_v5 = vld [vmem:[#allocation81_spill] sm:$0xff] }
 0x48b   : > { %6789 = vmatprep.subr.bf16.mxu1 %v6788_v45  ;;  %3744 = vmatprep.mubr.f32.mxu1 %v13911_v40 }
 0x48c   : > { %v6794_v29 = vpack.c.bf16 %v2914_v58, %v2850_v2  ;;  %6791 = vmatpush1.bf16.msra.mxu1 %v6790_v44  ;;  %v2943_v27 = vpop.permute.xlu0 %2942  ;;  %v2945_v7 = vpop.permute.xlu1 %2944  ;;  %v6792_v23 = vpack.c.bf16 %v2915_v13, %v2851_v9  ;;  %v13965_v9 = vld [vmem:[#allocation115_spill] sm:$0xff]  ;;  %v13966_v58 = vld [vmem:[#allocation44_spill] sm:$0xff] }
 0x48d   : > { %v2950_v33 = vsel %vm1356_vm5, %v10652_v15, %v2943_v27  ;;  %v2949_v55 = vsel %vm1356_vm5, %v2943_v27, %v2945_v7  ;;  %v13967_v27 = vld [vmem:[#allocation43_spill] sm:$0xff] }
 0x48e   : > { %v2976_v59 = vmul.f32 %v2950_v33, %v13963_v39  ;;  %v2977_v24 = vmul.f32 %v2949_v55, %v13964_v5  ;;  %6793 = vmatprep.subr.bf16.mxu1 %v6792_v23 }
 0x490   : > { %v6782_v45 = vpack.c.bf16 %v2976_v59, %v10286_v17  ;;  %6795 = vmatpush1.bf16.msra.mxu1 %v6794_v29  ;;  %v2947_v51 = vpop.permute.xlu0 %2946  ;;  %v3007_v44 = vpop.permute.xlu1 %3006  ;;  %v6780_v49 = vpack.c.bf16 %v2977_v24, %v10357_v20 }
 0x491   : > { %v2948_v2 = vsel %vm1356_vm5, %v2945_v7, %v2947_v51  ;;  %v2963_v15 = vsel %vm1356_vm5, %v2947_v51, %v13965_v9  ;;  %v3014_v59 = vsel %vm1549_vm6, %v10678_v31, %v3007_v44  ;;  %v13970_v9 = vld [vmem:[#allocation97_spill] sm:$0xff] }
 0x492   : > { %v2978_v13 = vmul.f32 %v2948_v2, %v13966_v58  ;;  %v2979_v33 = vmul.f32 %v2963_v15, %v13967_v27  ;;  %6781 = vmatprep.subr.bf16.mxu0 %v6780_v49  ;;  %v13969_v49 = vld [vmem:[#allocation87_spill] sm:$0xff]  ;;  %v13971_v15 = vld [vmem:[#allocation88_spill] sm:$0xff] }
 0x493   : > { %6783 = vmatpush1.bf16.msra.mxu0 %v6782_v45 }
 0x494   : > { %v6798_v17 = vpack.c.bf16 %v2978_v13, %v10391_v14  ;;  %v3009_v29 = vpop.permute.xlu0 %3008  ;;  %v3071_v23 = vpop.permute.xlu1 %3070  ;;  %v6796_v55 = vpack.c.bf16 %v2979_v33, %v9952_v16  ;;  %v13968_v14 = vld [vmem:[#allocation98_spill] sm:$0xff]  ;;  %v3040_v13 = vmul.f32 %v3014_v59, %v13971_v15  ;;  %v13975_v15 = vld [vmem:[#allocation109_spill] sm:$0xff] }
 0x495   : > { %v3078_v20 = vsel %vm1742_vm7, %v10685_v26, %v3071_v23  ;;  %v3013_v7 = vsel %vm1549_vm6, %v3007_v44, %v3009_v29 }
 0x496   : > { %6797 = vmatprep.subr.bf16.mxu1 %v6796_v55  ;;  %v3104_v51 = vmul.f32 %v3078_v20, %v13968_v14  ;;  %v3041_v2 = vmul.f32 %v3013_v7, %v13969_v49  ;;  %v13973_v14 = vld [vmem:[#allocation50_spill] sm:$0xff] }
 0x497   : > { %6799 = vmatpush1.bf16.msra.mxu1 %v6798_v17  ;;  %v13972_v17 = vld [vmem:[#allocation116_spill] sm:$0xff] }
 0x498   : > { %v3073_v24 = vpop.permute.xlu0 %3072  ;;  %v3011_v45 = vpop.permute.xlu1 %3010  ;;  %v6786_v20 = vpack.c.bf16 %v3104_v51, %v3040_v13  ;;  %v13978_v13 = vld [vmem:[#allocation13_spill] sm:$0xff] }
 0x499   : > { %v3077_v16 = vsel %vm1742_vm7, %v3071_v23, %v3073_v24  ;;  %v3012_v33 = vsel %vm1549_vm6, %v3009_v29, %v3011_v45  ;;  %v3027_v31 = vsel %vm1549_vm6, %v3011_v45, %v13972_v17  ;;  %v13976_v29 = vld [vmem:[#allocation85_spill] sm:$0xff] }
 0x49a   : > { %v3105_v26 = vmul.f32 %v3077_v16, %v13970_v9  ;;  %v13974_v16 = vld [vmem:[#allocation48_spill] sm:$0xff]  ;;  %v3043_v49 = vmul.f32 %v3027_v31, %v13975_v15 }
 0x49b   : > { %v3042_v59 = vmul.f32 %v3012_v33, %v13974_v16 }
 0x49c   : > { %v3075_v44 = vpop.permute.xlu0 %3074  ;;  %v3135_v55 = vpop.permute.xlu1 %3134  ;;  %v6784_v39 = vpack.c.bf16 %v3105_v26, %v3041_v2 }
 0x49d   : > { %v3076_v23 = vsel %vm1742_vm7, %v3073_v24, %v3075_v44  ;;  %v3091_v7 = vsel %vm1742_vm7, %v3075_v44, %v13973_v14  ;;  %v3142_v51 = vsel %vm1935_vm8, %v10752_v48, %v3135_v55  ;;  %v7185_v48 = vld [vmem:[%s13248_s0 + $0xf8] ss:$0 sm:$0xff]  ;;  %v7187_v44 = vld [vmem:[%s13248_s0 + $0xf0] ss:$0 sm:$0xff] }
 0x49e   : > { %v3106_v9 = vmul.f32 %v3076_v23, %v13976_v29  ;;  %v3107_v5 = vmul.f32 %v3091_v7, %v13977_v12  ;;  %6785 = vmatprep.subr.bf16.mxu0 %v6784_v39  ;;  %v7184_v39 = vld [vmem:[%s13248_s0 + $0xe8] ss:$0 sm:$0xff] }
 0x49f   : > { %6787 = vmatpush1.bf16.msra.mxu0 %v6786_v20 }
 0x4a0   : > { %v6802_v45 = vpack.c.bf16 %v3106_v9, %v3042_v59  ;;  %v3137_v24 = vpop.permute.xlu0 %3136  ;;  %v3139_v2 = vpop.permute.xlu1 %3138  ;;  %v6800_v26 = vpack.c.bf16 %v3107_v5, %v3043_v49  ;;  %v7186_v49 = vld [vmem:[%s13248_s0 + $0xe0] ss:$0 sm:$0xff] }
 0x4a1   : > { %v3141_v14 = vsel %vm1935_vm8, %v3135_v55, %v3137_v24  ;;  %v3155_v33 = vsel %vm1935_vm8, %v3139_v2, %v13978_v13  ;;  %v3140_v17 = vsel %vm1935_vm8, %v3137_v24, %v3139_v2  ;;  %v3168_v31 = vmul.f32 %v7186_v49, %v3142_v51 }
 0x4a2   : > { %6801 = vmatprep.subr.bf16.mxu1 %v6800_v26  ;;  %v3169_v9 = vmul.f32 %v7184_v39, %v3141_v14  ;;  %v3171_v5 = vmul.f32 %v7185_v48, %v3155_v33  ;;  %v3170_v55 = vmul.f32 %v7187_v44, %v3140_v17 }
 0x4a3   : > { %6803 = vmatpush1.bf16.msra.mxu1 %v6802_v45 }
 0x4a4   : > { %3625 = vmatprep.subr.mxu0 %v3169_v9  ;;  %3696 = vmatprep.subr.mxu1 %v3171_v5 }
 0x4a5   : > { %3626 = vmatpush1.msra.mxu0 %v3168_v31 }
 0x4a6   : > { %6349 = vmatmul.mubr.msk.f32.vlgmr.msra.gmra.mrb[14].mxu0 %vm3179_vm9, %v10365_v11 }
 0x4a7   : > { %3697 = vmatpush1.msra.mxu1 %v3170_v55  ;;  %4353 = vmatprep.mubr.f32.mxu0 %v13911_v40 }
 0x4a8   : > { %6350 = vmatmul.mubr.msk.f32.vlgmr.msra.gmra.mrb[14].mxu1 %vm3179_vm9, %v10365_v11 }
 0x4a9   : > { %4424 = vmatprep.mubr.f32.mxu1 %v13911_v40 }
 0x4b1   : > { %v10858_v7 = vpop.permute.xlu0 %3176 }
 0x4ce   : > { %v10856_v20 = vpop.f32.mrb[8].mxu0 }
 0x4cf   : > { %v3251_v23 = vpop.f32.mrb[9].mxu0  ;;  %v3250_v12 = vadd.f32 %v10856_v20, %v10858_v7 }
 0x4d0   : > { %v3252_v5 = vadd.f32 %v3251_v23, %v10858_v7 }
 0x4d2   : > { %v10925_v49 = vmax.f32 %v3252_v5, 0.0 }
 0x4e2   : > { %v3320_v59 = vpop.f32.mrb[8].mxu1 }
 0x4e3   : > { %v3321_v45 = vadd.f32 %v3320_v59, %v10858_v7  ;;  %v3322_v51 = vpop.f32.mrb[9].mxu1 }
 0x4e4   : > { %v3323_v24 = vadd.f32 %v3322_v51, %v10858_v7 }
 0x4e5   : > { %v10862_v2 = vmax.f32 %v3321_v45, 0.0 }
 0x4e6   : > { %v10864_v26 = vmax.f32 %v3323_v24, 0.0 }
 0x4e7   : > { %3771 = vrot.lane.b32.xlu1 %v10862_v2, %s7228_s15 }
 0x4e8   : > { %3773 = vrot.lane.b32.xlu0 %v10864_v26, %s7228_s15 }
 0x4eb   : > { %3835 = vrot.lane.b32.xlu1 %v10862_v2, %s7229_s16 }
 0x4ec   : > { %3837 = vrot.lane.b32.xlu0 %v10864_v26, %s7229_s16 }
 0x4ef   : > { %3899 = vrot.lane.b32.xlu1 %v10862_v2, %s7230_s17 }
 0x4f0   : > { %3901 = vrot.lane.b32.xlu0 %v10864_v26, %s7230_s17 }
 0x4f3   : > { %3963 = vrot.lane.b32.xlu1 %v10862_v2, %s7231_s18 }
 0x4f4   : > { %3965 = vrot.lane.b32.xlu0 %v10864_v26, %s7231_s18 }
 0x4f7   : > { %4029 = vrot.lane.b32.xlu1 %v10864_v26, %s7232_s19 }
 0x4f8   : > { %4093 = vrot.lane.b32.xlu0 %v10864_v26, %s7233_s20 }
 0x4fb   : > { %4027 = vrot.lane.b32.xlu1 %v10862_v2, %s7232_s19 }
 0x4fc   : > { %4157 = vrot.lane.b32.xlu0 %v10864_v26, %s7234_s21 }
 0x4ff   : > { %4155 = vrot.lane.b32.xlu1 %v10862_v2, %s7234_s21 }
 0x500   : > { %4091 = vrot.lane.b32.xlu0 %v10862_v2, %s7233_s20 }
 0x50d   : > { %v3391_v11 = vpop.f32.mrb[10].mxu0 }
 0x50e   : > { %v3393_v14 = vpop.f32.mrb[11].mxu0  ;;  %v3392_v5 = vadd.f32 %v3391_v11, %v10858_v7 }
 0x521   : > { %v3462_v13 = vpop.f32.mrb[10].mxu1 }
 0x522   : > { %v3463_v33 = vadd.f32 %v3462_v13, %v10858_v7  ;;  %v3464_v17 = vpop.f32.mrb[11].mxu1 }
 0x523   : > { %v3465_v39 = vadd.f32 %v3464_v17, %v10858_v7 }
 0x524   : > { %v10896_v9 = vmax.f32 %v3463_v33, 0.0 }
 0x525   : > { %v10898_v48 = vmax.f32 %v3465_v39, 0.0 }
 0x526   : > { %3779 = vrot.lane.b32.xlu0 %v10896_v9, %s7228_s15 }
 0x527   : > { %3781 = vrot.lane.b32.xlu1 %v10898_v48, %s7228_s15 }
 0x52a   : > { %3843 = vrot.lane.b32.xlu0 %v10896_v9, %s7229_s16 }
 0x52b   : > { %3845 = vrot.lane.b32.xlu1 %v10898_v48, %s7229_s16 }
 0x52e   : > { %4221 = vrot.lane.b32.xlu0 %v10864_v26, %s7235_s22 }
 0x52f   : > { %3907 = vrot.lane.b32.xlu1 %v10896_v9, %s7230_s17 }
 0x532   : > { %4219 = vrot.lane.b32.xlu0 %v10862_v2, %s7235_s22 }
 0x533   : > { %3971 = vrot.lane.b32.xlu1 %v10896_v9, %s7231_s18 }
 0x536   : > { %3909 = vrot.lane.b32.xlu0 %v10898_v48, %s7230_s17 }
 0x537   : > { %4037 = vrot.lane.b32.xlu1 %v10898_v48, %s7232_s19 }
 0x53a   : > { %3973 = vrot.lane.b32.xlu0 %v10898_v48, %s7231_s18 }
 0x53b   : > { %4035 = vrot.lane.b32.xlu1 %v10896_v9, %s7232_s19 }
 0x53e   : > { %4101 = vrot.lane.b32.xlu0 %v10898_v48, %s7233_s20 }
 0x53f   : > { %3769 = vrot.lane.b32.xlu1 %v10925_v49, %s7228_s15 }
 0x542   : > { %4165 = vrot.lane.b32.xlu0 %v10898_v48, %s7234_s21 }
 0x543   : > { %3897 = vrot.lane.b32.xlu1 %v10925_v49, %s7230_s17 }
 0x546   : > { %3833 = vrot.lane.b32.xlu0 %v10925_v49, %s7229_s16 }
 0x547   : > { %4163 = vrot.lane.b32.xlu1 %v10896_v9, %s7234_s21 }
 0x54a   : > { %3961 = vrot.lane.b32.xlu0 %v10925_v49, %s7231_s18 }
 0x54d   : > { %v3533_v31 = vpop.f32.mrb[12].mxu0 }
 0x54e   : > { %4099 = vrot.lane.b32.xlu0 %v10896_v9, %s7233_s20  ;;  %v3535_v44 = vpop.f32.mrb[13].mxu0 }
 0x559   : > { %v10943_v55 = vpop.permute.xlu1 %3771 }
 0x55a   : > { %v10945_v23 = vpop.permute.xlu0 %3773 }
 0x55b   : > { %13979 = vst [vmem:[#allocation19_spill] sm:$0xff] %v10945_v23  ;;  %v3811_v59 = vsel %vm584_vm1, %v10943_v55, %v10945_v23 }
 0x55c   : > { %v3818_v43 = vmul.f32 %v3811_v59, %v13981_v19 }
 0x55d   : > { %v10951_v45 = vpop.permute.xlu1 %3835  ;;  %v3604_v51 = vpop.f32.mrb[12].mxu1 }
 0x55e   : > { %v10953_v24 = vpop.permute.xlu0 %3837  ;;  %v3605_v13 = vadd.f32 %v3604_v51, %v10858_v7  ;;  %v3606_v33 = vpop.f32.mrb[13].mxu1 }
 0x55f   : > { %13980 = vst [vmem:[#allocation123_spill] sm:$0xff] %v10953_v24  ;;  %v3875_v17 = vsel %vm777_vm2, %v10951_v45, %v10953_v24  ;;  %v3607_v39 = vadd.f32 %v3606_v33, %v10858_v7  ;;  %v10972_v24 = vmax.f32 %v3392_v5, 0.0  ;;  %v3394_v33 = vadd.f32 %v3393_v14, %v10858_v7 }
 0x560   : > { %v3882_v29 = vmul.f32 %v3875_v17, %v13982_v38  ;;  %v10964_v16 = vmax.f32 %v3605_v13, 0.0  ;;  %v3536_v14 = vadd.f32 %v3535_v44, %v10858_v7 }
 0x561   : > { %v10966_v15 = vmax.f32 %v3607_v39, 0.0  ;;  %v10979_v11 = vmax.f32 %v3394_v33, 0.0 }
 0x562   : > { %3787 = vrot.lane.b32.xlu0 %v10964_v16, %s7228_s15  ;;  %v6820_v51 = vpack.c.bf16 %v3882_v29, %v3818_v43  ;;  %v3534_v43 = vadd.f32 %v3533_v31, %v10858_v7  ;;  %v11007_v17 = vmax.f32 %v3536_v14, 0.0  ;;  %v11009_v39 = vpop.permute.xlu0 %3901 }
 0x563   : > { %13983 = vst [vmem:[#allocation126_spill] sm:$0xff] %v10966_v15  ;;  %3789 = vrot.lane.b32.xlu1 %v10966_v15, %s7228_s15  ;;  %13985 = vst [vmem:[#allocation23_spill] sm:$0xff] %v11009_v39 }
 0x564   : > { %6821 = vmatprep.subr.bf16.mxu1 %v6820_v51  ;;  %v10998_v29 = vmax.f32 %v3534_v43, 0.0  ;;  %13984 = vst [vmem:[#allocation127_spill] sm:$0xff] %v11007_v17  ;;  %v11011_v51 = vpop.permute.xlu1 %3899 }
 0x566   : > { %4031 = vrot.lane.b32.xlu0 %v10972_v24, %s7232_s19  ;;  %v11017_v44 = vpop.permute.xlu0 %3965 }
 0x567   : > { %4095 = vrot.lane.b32.xlu1 %v10972_v24, %s7233_s20  ;;  %13986 = vst [vmem:[#allocation24_spill] sm:$0xff] %v11017_v44 }
 0x568   : > { %v11021_v33 = vpop.permute.xlu1 %3963 }
 0x56a   : > { %3777 = vrot.lane.b32.xlu0 %v10979_v11, %s7228_s15  ;;  %v11029_v43 = vpop.permute.xlu0 %4093 }
 0x56b   : > { %4159 = vrot.lane.b32.xlu1 %v10972_v24, %s7234_s21 }
 0x56c   : > { %v11031_v14 = vpop.permute.xlu1 %4029 }
 0x56e   : > { %3969 = vrot.lane.b32.xlu0 %v10979_v11, %s7231_s18  ;;  %v11038_v19 = vpop.permute.xlu0 %4157 }
 0x56f   : > { %4223 = vrot.lane.b32.xlu1 %v10972_v24, %s7235_s22 }
 0x570   : > { %v11042_v23 = vpop.permute.xlu1 %4027 }
 0x571   : > { %13987 = vst [vmem:[#allocation105_spill] sm:$0xff] %v11042_v23 }
 0x572   : > { %3851 = vrot.lane.b32.xlu0 %v10964_v16, %s7229_s16  ;;  %v11056_v58 = vpop.permute.xlu0 %4091 }
 0x573   : > { %3841 = vrot.lane.b32.xlu1 %v10979_v11, %s7229_s16  ;;  %13989 = vst [vmem:[#allocation115_spill] sm:$0xff] %v11056_v58 }
 0x574   : > { %v11058_v3 = vpop.permute.xlu1 %4155 }
 0x575   : > { %13990 = vst [vmem:[#allocation116_spill] sm:$0xff] %v11058_v3 }
 0x576   : > { %4229 = vrot.lane.b32.xlu0 %v10898_v48, %s7235_s22 }
 0x577   : > { %3905 = vrot.lane.b32.xlu1 %v10979_v11, %s7230_s17 }
 0x579   : > { %v3675_v59 = vpop.f32.mrb[14].mxu0 }
 0x57a   : > { %4039 = vrot.lane.b32.xlu0 %v10998_v29, %s7232_s19  ;;  %v11003_v13 = vpop.f32.mrb[15].mxu0  ;;  %v3676_v38 = vadd.f32 %v3675_v59, %v10858_v7  ;;  %v11054_v59 = vmax.f32 %v3250_v12, 0.0 }
 0x57b   : > { %3853 = vrot.lane.b32.xlu1 %v10966_v15, %s7229_s16  ;;  %v3746_v31 = vpop.f32.mrb[14].mxu1 }
 0x57c   : > { %v3748_v5 = vpop.f32.mrb[15].mxu1  ;;  %v11048_v27 = vmax.f32 %v3676_v38, 0.0  ;;  %v3747_v1 = vadd.f32 %v3746_v31, %v10858_v7  ;;  %v3678_v31 = vadd.f32 %v11003_v13, %v10858_v7 }
 0x57d   : > { %v3749_v12 = vadd.f32 %v3748_v5, %v10858_v7  ;;  %v3939_v7 = vsel %vm970_vm3, %v11011_v51, %v11009_v39 }
 0x57e   : > { %3785 = vrot.lane.b32.xlu0 %v11007_v17, %s7228_s15  ;;  %13988 = vst [vmem:[#allocation106_spill] sm:$0xff] %v11048_v27  ;;  %v11116_v52 = vmax.f32 %v3747_v1, 0.0  ;;  %v4003_v1 = vsel %vm1163_vm4, %v11021_v33, %v11017_v44  ;;  %v11146_v13 = vmax.f32 %v3678_v31, 0.0  ;;  %v13996_v31 = vld [vmem:[#allocation12_spill] sm:$0xff] }
 0x57f   : > { %4103 = vrot.lane.b32.xlu1 %v10998_v29, %s7233_s20  ;;  %v11081_v6 = vmax.f32 %v3749_v12, 0.0  ;;  %v3946_v39 = vmul.f32 %v3939_v7, %v13996_v31  ;;  %v13998_v7 = vld [vmem:[#allocation20_spill] sm:$0xff] }
 0x580   : > { %13992 = vst [vmem:[#allocation13_spill] sm:$0xff] %v11146_v13 }
 0x582   : > { %4227 = vrot.lane.b32.xlu0 %v10896_v9, %s7235_s22 }
 0x583   : > { %4167 = vrot.lane.b32.xlu1 %v10998_v29, %s7234_s21 }
 0x586   : > { %3917 = vrot.lane.b32.xlu0 %v10966_v15, %s7230_s17 }
 0x587   : > { %4231 = vrot.lane.b32.xlu1 %v10998_v29, %s7235_s22 }
 0x58a   : > { %3981 = vrot.lane.b32.xlu0 %v10966_v15, %s7231_s18 }
 0x58b   : > { %3849 = vrot.lane.b32.xlu1 %v11007_v17, %s7229_s16 }
 0x58e   : > { %3977 = vrot.lane.b32.xlu0 %v11007_v17, %s7231_s18 }
 0x58f   : > { %3915 = vrot.lane.b32.xlu1 %v10964_v16, %s7230_s17 }
 0x592   : > { %4047 = vrot.lane.b32.xlu0 %v11048_v27, %s7232_s19 }
 0x593   : > { %3979 = vrot.lane.b32.xlu1 %v10964_v16, %s7231_s18 }
 0x596   : > { %3767 = vrot.lane.b32.xlu0 %v11054_v59, %s7228_s15 }
 0x597   : > { %3913 = vrot.lane.b32.xlu1 %v11007_v17, %s7230_s17 }
 0x598   : > { %v11064_v38 = vpop.permute.xlu0 %3779 }
 0x599   : > { %v11066_v20 = vpop.permute.xlu1 %3781 }
 0x59a   : > { %4109 = vrot.lane.b32.xlu0 %v10966_v15, %s7233_s20 }
 0x59b   : > { %4045 = vrot.lane.b32.xlu1 %v10966_v15, %s7232_s19 }
 0x59c   : > { %v11073_v54 = vpop.permute.xlu0 %3843 }
 0x59d   : > { %v11075_v4 = vpop.permute.xlu1 %3845 }
 0x59e   : > { %4173 = vrot.lane.b32.xlu0 %v10966_v15, %s7234_s21 }
 0x59f   : > { %4043 = vrot.lane.b32.xlu1 %v10964_v16, %s7232_s19 }
 0x5a0   : > { %v11083_v34 = vpop.permute.xlu0 %4221 }
 0x5a1   : > { %v11085_v47 = vpop.permute.xlu1 %3907 }
 0x5a2   : > { %3797 = vrot.lane.b32.xlu0 %v11081_v6, %s7228_s15 }
 0x5a3   : > { %3831 = vrot.lane.b32.xlu1 %v11054_v59, %s7229_s16 }
 0x5a4   : > { %v11091_v5 = vpop.permute.xlu0 %4219 }
 0x5a5   : > { %v11093_v42 = vpop.permute.xlu1 %3971 }
 0x5a6   : > { %4107 = vrot.lane.b32.xlu0 %v10964_v16, %s7233_s20 }
 0x5a7   : > { %4111 = vrot.lane.b32.xlu1 %v11048_v27, %s7233_s20 }
 0x5a8   : > { %v11099_v12 = vpop.permute.xlu0 %3909 }
 0x5a9   : > { %v11101_v63 = vpop.permute.xlu1 %4037 }
 0x5aa   : > { %3895 = vrot.lane.b32.xlu0 %v11054_v59, %s7230_s17 }
 0x5ab   : > { %4175 = vrot.lane.b32.xlu1 %v11048_v27, %s7234_s21 }
 0x5ac   : > { %v11108_v28 = vpop.permute.xlu0 %3973 }
 0x5ad   : > { %v11110_v30 = vpop.permute.xlu1 %4035 }
 0x5ae   : > { %3925 = vrot.lane.b32.xlu0 %v11081_v6, %s7230_s17 }
 0x5af   : > { %3861 = vrot.lane.b32.xlu1 %v11081_v6, %s7229_s16 }
 0x5b0   : > { %v11118_v37 = vpop.permute.xlu0 %4101 }
 0x5b1   : > { %v11120_v56 = vpop.permute.xlu1 %3769 }
 0x5b2   : > { %13991 = vst [vmem:[#allocation50_spill] sm:$0xff] %v11120_v56  ;;  %3795 = vrot.lane.b32.xlu0 %v11116_v52, %s7228_s15  ;;  %v3812_v8 = vsel %vm584_vm1, %v11120_v56, %v10943_v55  ;;  %v13994_v56 = vld [vmem:[#allocation6_spill] sm:$0xff] }
 0x5b3   : > { %4171 = vrot.lane.b32.xlu1 %v10964_v16, %s7234_s21  ;;  %v3817_v17 = vmul.f32 %v3812_v8, %v13994_v56 }
 0x5b4   : > { %v11128_v61 = vpop.permute.xlu0 %4165 }
 0x5b5   : > { %v11148_v60 = vpop.permute.xlu1 %3897 }
 0x5b6   : > { %4237 = vrot.lane.b32.xlu0 %v10966_v15, %s7235_s22  ;;  %v13993_v15 = vld [vmem:[#allocation17_spill] sm:$0xff]  ;;  %v3940_v25 = vsel %vm970_vm3, %v11148_v60, %v11011_v51 }
 0x5b7   : > { %3959 = vrot.lane.b32.xlu1 %v11054_v59, %s7231_s18  ;;  %v4010_v36 = vmul.f32 %v4003_v1, %v13993_v15 }
 0x5b8   : > { %v11150_v44 = vpop.permute.xlu0 %3833 }
 0x5b9   : > { %v3876_v55 = vsel %vm777_vm2, %v11150_v44, %v10951_v45  ;;  %v6824_v45 = vpack.c.bf16 %v4010_v36, %v3946_v39  ;;  %v11198_v36 = vpop.permute.xlu1 %4163  ;;  %v4067_v39 = vsel %vm1356_vm5, %v11042_v23, %v11031_v14 }
 0x5ba   : > { %v3881_v10 = vmul.f32 %v3876_v55, %v13995_v21  ;;  %3793 = vrot.lane.b32.xlu0 %v11146_v13, %s7228_s15  ;;  %v13997_v55 = vld [vmem:[#allocation15_spill] sm:$0xff] }
 0x5bb   : > { %3989 = vrot.lane.b32.xlu1 %v11081_v6, %s7231_s18  ;;  %v3945_v56 = vmul.f32 %v3940_v25, %v13997_v55  ;;  %v4195_v55 = vsel %vm1742_vm7, %v11058_v3, %v11038_v19  ;;  %v14002_v21 = vld [vmem:[#allocation35_spill] sm:$0xff]  ;;  %v14003_v3 = vld [vmem:[#allocation30_spill] sm:$0xff] }
 0x5bc   : > { %v6822_v1 = vpack.c.bf16 %v3881_v10, %v3817_v17  ;;  %v11168_v15 = vpop.permute.xlu0 %3961 }
 0x5bd   : > { %v4004_v8 = vsel %vm1163_vm4, %v11168_v15, %v11021_v33  ;;  %v14000_v33 = vld [vmem:[#allocation25_spill] sm:$0xff] }
 0x5be   : > { %v4009_v31 = vmul.f32 %v4004_v8, %v13998_v7  ;;  %4235 = vrot.lane.b32.xlu0 %v10964_v16, %s7235_s22  ;;  %6823 = vmatpush1.bf16.msra.mxu1 %v6822_v1 }
 0x5bf   : > { %3859 = vrot.lane.b32.xlu1 %v11116_v52, %s7229_s16  ;;  %6825 = vmatprep.subr.bf16.mxu1 %v6824_v45  ;;  %v14001_v45 = vld [vmem:[#allocation22_spill] sm:$0xff] }
 0x5c0   : > { %v6826_v10 = vpack.c.bf16 %v4009_v31, %v3945_v56  ;;  %v11196_v25 = vpop.permute.xlu0 %4099  ;;  %v4073_v31 = vmul.f32 %v4067_v39, %v14000_v33  ;;  %v4131_v39 = vsel %vm1549_vm6, %v11056_v58, %v11029_v43 }
 0x5c1   : > { %v4137_v58 = vmul.f32 %v4131_v39, %v14003_v3 }
 0x5c2   : > { %4023 = vrot.lane.b32.xlu0 %v11054_v59, %s7232_s19  ;;  %6827 = vmatpush1.bf16.msra.mxu1 %v6826_v10  ;;  %v6830_v33 = vpack.c.bf16 %v4073_v31, %v10862_v2  ;;  %v3871_v2 = vsel %vm777_vm2, %v11073_v54, %v11075_v4  ;;  %v14005_v31 = vld [vmem:[#allocation32_spill] sm:$0xff] }
 0x5c3   : > { %4239 = vrot.lane.b32.xlu1 %v11048_v27, %s7235_s22 }
 0x5c6   : > { %3987 = vrot.lane.b32.xlu0 %v11116_v52, %s7231_s18 }
 0x5c7   : > { %3857 = vrot.lane.b32.xlu1 %v11146_v13, %s7229_s16 }
 0x5ca   : > { %3985 = vrot.lane.b32.xlu0 %v11146_v13, %s7231_s18 }
 0x5cb   : > { %4025 = vrot.lane.b32.xlu1 %v10925_v49, %s7232_s19 }
 0x5ce   : > { %4153 = vrot.lane.b32.xlu0 %v10925_v49, %s7234_s21 }
 0x5cf   : > { %3923 = vrot.lane.b32.xlu1 %v11116_v52, %s7230_s17 }
 0x5d2   : > { %4151 = vrot.lane.b32.xlu0 %v11054_v59, %s7234_s21 }
 0x5d3   : > { %3921 = vrot.lane.b32.xlu1 %v11146_v13, %s7230_s17 }
 0x5d4   : > { %v11204_v56 = vpop.permute.xlu0 %3787 }
 0x5d5   : > { %v11206_v17 = vpop.permute.xlu1 %3789 }
 0x5d6   : > { %4051 = vrot.lane.b32.xlu0 %v11116_v52, %s7232_s19 }
 0x5d7   : > { %4089 = vrot.lane.b32.xlu1 %v10925_v49, %s7233_s20 }
 0x5d8   : > { %v11216_v51 = vpop.permute.xlu0 %4031 }
 0x5d9   : > { %13999 = vst [vmem:[#allocation135_spill] sm:$0xff] %v11216_v51  ;;  %v4066_v1 = vsel %vm1356_vm5, %v11031_v14, %v11216_v51  ;;  %v11223_v8 = vpop.permute.xlu1 %4095  ;;  %v4201_v51 = vmul.f32 %v4195_v55, %v14002_v21  ;;  %v3886_v21 = vmul.f32 %v3871_v2, %v13916_v62  ;;  %v14006_v62 = vld [vmem:[#allocation45_spill] sm:$0xff] }
 0x5da   : > { %v4074_v10 = vmul.f32 %v4066_v1, %v14001_v45  ;;  %3839 = vrot.lane.b32.xlu0 %v10972_v24, %s7229_s16  ;;  %v4130_v14 = vsel %vm1549_vm6, %v11029_v43, %v11223_v8 }
 0x5db   : > { %4087 = vrot.lane.b32.xlu1 %v11054_v59, %s7233_s20  ;;  %v6834_v3 = vpack.c.bf16 %v4201_v51, %v4137_v58  ;;  %v4259_v58 = vsel %vm1935_vm8, %v11091_v5, %v11083_v34  ;;  %v3999_v51 = vsel %vm1163_vm4, %v11093_v42, %v11108_v28 }
 0x5dc   : > { %v11242_v1 = vpop.permute.xlu0 %3777  ;;  %v6828_v45 = vpack.c.bf16 %v4074_v10, %v10864_v26  ;;  %v14004_v26 = vld [vmem:[#allocation27_spill] sm:$0xff] }
 0x5dd   : > { %v11246_v7 = vpop.permute.xlu1 %4159  ;;  %v4138_v43 = vmul.f32 %v4130_v14, %v14004_v26  ;;  %v3808_v2 = vsel %vm584_vm1, %v11242_v1, %v11064_v38  ;;  %v14031_v26 = vld [vmem:[#allocation125_spill] sm:$0xff] }
 0x5de   : > { %v4194_v23 = vsel %vm1742_vm7, %v11038_v19, %v11246_v7  ;;  %4181 = vrot.lane.b32.xlu0 %v11081_v6, %s7234_s21  ;;  %6829 = vmatprep.subr.bf16.mxu1 %v6828_v45  ;;  %v3807_v45 = vsel %vm584_vm1, %v11064_v38, %v11066_v20  ;;  %v4014_v38 = vmul.f32 %v3999_v51, %v13923_v46 }
 0x5df   : > { %v4202_v55 = vmul.f32 %v4194_v23, %v14005_v31  ;;  %4053 = vrot.lane.b32.xlu1 %v11081_v6, %s7232_s19  ;;  %6831 = vmatpush1.bf16.msra.mxu1 %v6830_v33  ;;  %v7188_v33 = vld [vmem:[%s13248_s0 + $0x98] ss:$0 sm:$0xff] }
 0x5e0   : > { %v11264_v10 = vpop.permute.xlu0 %3969 }
 0x5e1   : > { %v11266_v19 = vpop.permute.xlu1 %4223  ;;  %v6832_v39 = vpack.c.bf16 %v4202_v55, %v4138_v43  ;;  %v3822_v43 = vmul.f32 %v3807_v45, %v13918_v57  ;;  %v3935_v55 = vsel %vm970_vm3, %v11085_v47, %v11099_v12  ;;  %v11318_v45 = vld [vmem:[%s13254_s6] sm:$0xff] }
 0x5e2   : > { %v4258_v23 = vsel %vm1935_vm8, %v11083_v34, %v11266_v19  ;;  %4115 = vrot.lane.b32.xlu0 %v11116_v52, %s7233_s20  ;;  %v3950_v51 = vmul.f32 %v3935_v55, %v13921_v50 }
 0x5e3   : > { %3775 = vrot.lane.b32.xlu1 %v10972_v24, %s7228_s15  ;;  %6833 = vmatprep.subr.bf16.mxu1 %v6832_v39  ;;  %v4266_v14 = vmul.f32 %v7188_v33, %v4258_v23  ;;  %v7189_v23 = vld [vmem:[%s13248_s0 + $0x90] ss:$0 sm:$0xff] }
 0x5e4   : > { %v11296_v34 = vpop.permute.xlu0 %3851  ;;  %6835 = vmatpush1.bf16.msra.mxu1 %v6834_v3  ;;  %v4265_v33 = vmul.f32 %v7189_v23, %v4259_v58  ;;  %v6852_v58 = vpack.c.bf16 %v3886_v21, %v3822_v43  ;;  %v4063_v21 = vsel %vm1356_vm5, %v11110_v30, %v11101_v63  ;;  %v14007_v43 = vld [vmem:[#allocation49_spill] sm:$0xff] }
 0x5e5   : > { %4376 = vmatprep.subr.mxu1 %v4266_v14  ;;  %v11303_v39 = vpop.permute.xlu1 %3841  ;;  %v3821_v14 = vmul.f32 %v3808_v2, %v13919_v22 }
 0x5e6   : > { %v3872_v3 = vsel %vm777_vm2, %v11303_v39, %v11073_v54  ;;  %4215 = vrot.lane.b32.xlu0 %v11054_v59, %s7235_s22  ;;  %v4000_v54 = vsel %vm1163_vm4, %v11264_v10, %v11093_v42 }
 0x5e7   : > { %v3885_v57 = vmul.f32 %v3872_v3, %v14006_v62  ;;  %4117 = vrot.lane.b32.xlu1 %v11081_v6, %s7233_s20  ;;  %v4013_v42 = vmul.f32 %v4000_v54, %v13922_v53  ;;  %v4077_v3 = vmul.f32 %v4063_v21, %v13926_v35  ;;  %v14027_v53 = vld [vmem:[#allocation60_spill] sm:$0xff] }
 0x5e8   : > { %v4230_v23 = vpop.permute.xlu0 %4229  ;;  %4377 = vmatpush1.msra.mxu1 %v4265_v33 }
 0x5e9   : > { %v6854_v46 = vpack.c.bf16 %v3885_v57, %v3821_v14  ;;  %6853 = vmatprep.subr.bf16.mxu1 %v6852_v58  ;;  %v11329_v31 = vpop.permute.xlu1 %3905  ;;  %6352 = vmatmul.mubr.msk.f32.vlgmr.msra.gmra.mrb[16].mxu1 %vm3179_vm9, %v11318_v45  ;;  %v6856_v57 = vpack.c.bf16 %v4014_v38, %v3950_v51  ;;  %v6862_v54 = vpack.c.bf16 %v4077_v3, %v10896_v9 }
 0x5ea   : > { %v3936_v2 = vsel %vm970_vm3, %v11329_v31, %v11085_v47  ;;  %3967 = vrot.lane.b32.xlu0 %v10972_v24, %s7231_s18  ;;  %4566 = vmatprep.mubr.f32.mxu1 %v13911_v40 }
 0x5eb   : > { %v3949_v55 = vmul.f32 %v3936_v2, %v14007_v43  ;;  %4217 = vrot.lane.b32.xlu1 %v10925_v49, %s7235_s22  ;;  %6855 = vmatpush1.bf16.msra.mxu1 %v6854_v46  ;;  %v4191_v2 = vsel %vm1742_vm7, %v11198_v36, %v11128_v61 }
 0x5ec   : > { %v11348_v33 = vpop.permute.xlu0 %4039  ;;  %6857 = vmatprep.subr.bf16.mxu1 %v6856_v57 }
 0x5ed   : > { %v6858_v47 = vpack.c.bf16 %v4013_v42, %v3949_v55  ;;  %v4062_v38 = vsel %vm1356_vm5, %v11101_v63, %v11348_v33  ;;  %v11355_v14 = vpop.permute.xlu1 %3853  ;;  %v4127_v63 = vsel %vm1549_vm6, %v11196_v25, %v11118_v37 }
 0x5ee   : > { %v4078_v58 = vmul.f32 %v4062_v38, %v13927_v0  ;;  %4243 = vrot.lane.b32.xlu0 %v11116_v52, %s7235_s22  ;;  %v4141_v42 = vmul.f32 %v4127_v63, %v13928_v41 }
 0x5ef   : > { %4179 = vrot.lane.b32.xlu1 %v11116_v52, %s7234_s21  ;;  %6859 = vmatpush1.bf16.msra.mxu1 %v6858_v47  ;;  %v14009_v47 = vld [vmem:[#allocation76_spill] sm:$0xff] }
 0x5f0   : > { %v11362_v46 = vpop.permute.xlu0 %3785  ;;  %v6860_v51 = vpack.c.bf16 %v4078_v58, %v10898_v48  ;;  %v14010_v58 = vld [vmem:[#allocation79_spill] sm:$0xff] }
 0x5f1   : > { %v11366_v21 = vpop.permute.xlu1 %4103 }
 0x5f2   : > { %4097 = vrot.lane.b32.xlu0 %v10979_v11, %s7233_s20  ;;  %6861 = vmatprep.subr.bf16.mxu1 %v6860_v51  ;;  %v4126_v9 = vsel %vm1549_vm6, %v11118_v37, %v11366_v21  ;;  %v14008_v37 = vld [vmem:[#allocation69_spill] sm:$0xff]  ;;  %v4205_v51 = vmul.f32 %v4191_v2, %v14010_v58 }
 0x5f3   : > { %3903 = vrot.lane.b32.xlu1 %v10972_v24, %s7230_s17  ;;  %6863 = vmatpush1.bf16.msra.mxu1 %v6862_v54  ;;  %v4142_v3 = vmul.f32 %v4126_v9, %v14008_v37  ;;  %v3867_v54 = vsel %vm777_vm2, %v11296_v34, %v11355_v14  ;;  %v3803_v9 = vsel %vm584_vm1, %v11204_v56, %v11206_v17 }
 0x5f4   : > { %v11380_v48 = vpop.permute.xlu0 %4227  ;;  %v6866_v0 = vpack.c.bf16 %v4205_v51, %v4141_v42  ;;  %v7190_v42 = vld [vmem:[%s13248_s0 + $0xb8] ss:$0 sm:$0xff] }
 0x5f5   : > { %v11386_v57 = vpop.permute.xlu1 %4167 }
 0x5f6   : > { %v4190_v55 = vsel %vm1742_vm7, %v11128_v61, %v11386_v57  ;;  %3783 = vrot.lane.b32.xlu0 %v10998_v29, %s7228_s15 }
 0x5f7   : > { %v4206_v38 = vmul.f32 %v4190_v55, %v14009_v47  ;;  %4245 = vrot.lane.b32.xlu1 %v11081_v6, %s7235_s22  ;;  %v3890_v55 = vmul.f32 %v3867_v54, %v13936_v32  ;;  %v4255_v47 = vsel %vm1935_vm8, %v11380_v48, %v4230_v23  ;;  %v14013_v54 = vld [vmem:[#allocation86_spill] sm:$0xff] }
 0x5f8   : > { %v11404_v63 = vpop.permute.xlu0 %3917  ;;  %v3826_v32 = vmul.f32 %v3803_v9, %v14013_v54 }
 0x5f9   : > { %14011 = vst [vmem:[#allocation136_spill] sm:$0xff] %v11404_v63  ;;  %v11406_v61 = vpop.permute.xlu1 %4231  ;;  %v6864_v41 = vpack.c.bf16 %v4206_v38, %v4142_v3  ;;  %v3804_v38 = vsel %vm584_vm1, %v11362_v46, %v11204_v56  ;;  %v14014_v56 = vld [vmem:[#allocation90_spill] sm:$0xff] }
 0x5fa   : > { %v4254_v2 = vsel %vm1935_vm8, %v4230_v23, %v11406_v61  ;;  %4225 = vrot.lane.b32.xlu0 %v10979_v11, %s7235_s22 }
 0x5fb   : > { %4033 = vrot.lane.b32.xlu1 %v10979_v11, %s7232_s19  ;;  %6865 = vmatprep.subr.bf16.mxu1 %v6864_v41  ;;  %v4270_v3 = vmul.f32 %v7190_v42, %v4254_v2  ;;  %v7191_v41 = vld [vmem:[%s13248_s0 + $0xb0] ss:$0 sm:$0xff] }
 0x5fc   : > { %v11430_v51 = vpop.permute.xlu0 %3981  ;;  %6867 = vmatpush1.bf16.msra.mxu1 %v6866_v0  ;;  %v4269_v58 = vmul.f32 %v7191_v41, %v4255_v47  ;;  %v3825_v0 = vmul.f32 %v3804_v38, %v14014_v56  ;;  %v14015_v42 = vld [vmem:[#allocation100_spill] sm:$0xff] }
 0x5fd   : > { %14012 = vst [vmem:[#allocation137_spill] sm:$0xff] %v11430_v51  ;;  %4518 = vmatprep.subr.mxu1 %v4270_v3  ;;  %v11433_v23 = vpop.permute.xlu1 %3849  ;;  %v6884_v3 = vpack.c.bf16 %v3890_v55, %v3826_v32 }
 0x5fe   : > { %v3868_v2 = vsel %vm777_vm2, %v11433_v23, %v11296_v34  ;;  %3975 = vrot.lane.b32.xlu0 %v10998_v29, %s7231_s18  ;;  %v14016_v34 = vld [vmem:[#allocation127_spill] sm:$0xff] }
 0x5ff   : > { %v3889_v9 = vmul.f32 %v3868_v2, %v14015_v42  ;;  %4161 = vrot.lane.b32.xlu1 %v10979_v11, %s7234_s21  ;;  %v14018_v2 = vld [vmem:[#allocation104_spill] sm:$0xff] }
 0x600   : > { %v11448_v54 = vpop.permute.xlu0 %3977  ;;  %4519 = vmatpush1.msra.mxu1 %v4269_v58 }
 0x601   : > { %v6886_v47 = vpack.c.bf16 %v3889_v9, %v3825_v0  ;;  %6885 = vmatprep.subr.bf16.mxu1 %v6884_v3  ;;  %v3916_v41 = vpop.permute.xlu1 %3915  ;;  %6354 = vmatmul.mubr.msk.f32.vlgmr.msra.gmra.mrb[18].mxu1 %vm3179_vm9, %v11318_v45  ;;  %v14019_v9 = vld [vmem:[#allocation114_spill] sm:$0xff] }
 0x602   : > { %4105 = vrot.lane.b32.xlu0 %v14016_v34, %s7233_s20  ;;  %4708 = vmatprep.mubr.f32.mxu1 %v13911_v40  ;;  %v3931_v32 = vsel %vm970_vm3, %v3916_v41, %v11404_v63  ;;  %v14050_v63 = vld [vmem:[#allocation34_spill] sm:$0xff] }
 0x603   : > { %3847 = vrot.lane.b32.xlu1 %v10998_v29, %s7229_s16  ;;  %6887 = vmatpush1.bf16.msra.mxu1 %v6886_v47  ;;  %v3954_v0 = vmul.f32 %v3931_v32, %v14018_v2  ;;  %v14020_v32 = vld [vmem:[#allocation117_spill] sm:$0xff] }
 0x604   : > { %v11460_v58 = vpop.permute.xlu0 %4047 }
 0x605   : > { %14017 = vst [vmem:[#allocation127_spill] sm:$0xff] %v11460_v58  ;;  %v3980_v55 = vpop.permute.xlu1 %3979 }
 0x606   : > { %v3995_v38 = vsel %vm1163_vm4, %v3980_v55, %v11430_v51  ;;  %3791 = vrot.lane.b32.xlu0 %v11048_v27, %s7228_s15  ;;  %v3996_v47 = vsel %vm1163_vm4, %v11448_v54, %v3980_v55  ;;  %v14035_v51 = vld [vmem:[#allocation128_spill] sm:$0xff] }
 0x607   : > { %v4018_v3 = vmul.f32 %v3995_v38, %v14019_v9  ;;  %3911 = vrot.lane.b32.xlu1 %v10998_v29, %s7230_s17  ;;  %v4017_v38 = vmul.f32 %v3996_v47, %v14020_v32  ;;  %v14021_v9 = vld [vmem:[#allocation107_spill] sm:$0xff] }
 0x608   : > { %v3768_v42 = vpop.permute.xlu0 %3767 }
 0x609   : > { %v11474_v56 = vpop.permute.xlu1 %3913  ;;  %v6888_v37 = vpack.c.bf16 %v4018_v3, %v3954_v0 }
 0x60a   : > { %v3932_v35 = vsel %vm970_vm3, %v11474_v56, %v3916_v41  ;;  %4233 = vrot.lane.b32.xlu0 %v14016_v34, %s7235_s22  ;;  %v14022_v41 = vld [vmem:[#allocation9_spill] sm:$0xff] }
 0x60b   : > { %v3953_v2 = vmul.f32 %v3932_v35, %v14021_v9  ;;  %4041 = vrot.lane.b32.xlu1 %v14016_v34, %s7232_s19  ;;  %6889 = vmatprep.subr.bf16.mxu1 %v6888_v37  ;;  %v14023_v37 = vld [vmem:[#allocation126_spill] sm:$0xff] }
 0x60c   : > { %v4110_v55 = vpop.permute.xlu0 %4109 }
 0x60d   : > { %v6890_v50 = vpack.c.bf16 %v4017_v38, %v3953_v2  ;;  %v4046_v43 = vpop.permute.xlu1 %4045  ;;  %v14024_v38 = vld [vmem:[#allocation51_spill] sm:$0xff] }
 0x60e   : > { %v4058_v0 = vsel %vm1356_vm5, %v4046_v43, %v11460_v58  ;;  %3983 = vrot.lane.b32.xlu0 %v11048_v27, %s7231_s18  ;;  %v14034_v58 = vld [vmem:[#allocation124_spill] sm:$0xff] }
 0x60f   : > { %v4082_v3 = vmul.f32 %v4058_v0, %v14022_v41  ;;  %4169 = vrot.lane.b32.xlu1 %v14016_v34, %s7234_s21  ;;  %6891 = vmatpush1.bf16.msra.mxu1 %v6890_v50  ;;  %v14025_v0 = vld [vmem:[#allocation50_spill] sm:$0xff] }
 0x610   : > { %v4174_v35 = vpop.permute.xlu0 %4173  ;;  %v3813_v50 = vsel %vm584_vm1, %v3768_v42, %v14025_v0 }
 0x611   : > { %v11493_v47 = vpop.permute.xlu1 %4043  ;;  %v6892_v32 = vpack.c.bf16 %v4082_v3, %v14023_v37 }
 0x612   : > { %v4059_v2 = vsel %vm1356_vm5, %v11493_v47, %v4046_v43  ;;  %4113 = vrot.lane.b32.xlu0 %v11146_v13, %s7233_s20 }
 0x613   : > { %v4081_v9 = vmul.f32 %v4059_v2, %v14024_v38  ;;  %3855 = vrot.lane.b32.xlu1 %v11048_v27, %s7229_s16  ;;  %6893 = vmatprep.subr.bf16.mxu1 %v6892_v32  ;;  %v14026_v2 = vld [vmem:[#allocation52_spill] sm:$0xff] }
 0x614   : > { %v3798_v41 = vpop.permute.xlu0 %3797  ;;  %v3816_v38 = vmul.f32 %v3813_v50, %v14026_v2 }
 0x615   : > { %v6894_v3 = vpack.c.bf16 %v4081_v9, %v10964_v16  ;;  %v3832_v37 = vpop.permute.xlu1 %3831 }
 0x616   : > { %v3877_v43 = vsel %vm777_vm2, %v3832_v37, %v11150_v44  ;;  %4241 = vrot.lane.b32.xlu0 %v11146_v13, %s7235_s22 }
 0x617   : > { %v3880_v62 = vmul.f32 %v3877_v43, %v14027_v53  ;;  %3919 = vrot.lane.b32.xlu1 %v11048_v27, %s7230_s17  ;;  %6895 = vmatpush1.bf16.msra.mxu1 %v6894_v3  ;;  %v14030_v43 = vld [vmem:[#allocation18_spill] sm:$0xff] }
 0x618   : > { %v11517_v32 = vpop.permute.xlu0 %4107  ;;  %v4280_v27 = vld [vmem:[%s13255_s7] sm:$0xff] }
 0x619   : > { %v11519_v0 = vpop.permute.xlu1 %4111  ;;  %v6804_v16 = vpack.c.bf16 %v3880_v62, %v3816_v38  ;;  %v3814_v62 = vsel %vm584_vm1, %v3798_v41, %v3768_v42  ;;  %v4123_v42 = vsel %vm1549_vm6, %v11517_v32, %v4110_v55 }
 0x61a   : > { %14028 = vst [vmem:[#allocation126_spill] sm:$0xff] %v11519_v0  ;;  %v4122_v44 = vsel %vm1549_vm6, %v4110_v55, %v11519_v0 }
 0x61b   : > { %4049 = vrot.lane.b32.xlu1 %v11146_v13, %s7232_s19  ;;  %6805 = vmatprep.subr.bf16.mxu0 %v6804_v16  ;;  %v4146_v22 = vmul.f32 %v4122_v44, %v14030_v43  ;;  %v14032_v44 = vld [vmem:[#allocation56_spill] sm:$0xff] }
 0x61c   : > { %v3896_v9 = vpop.permute.xlu0 %3895  ;;  %v3815_v43 = vmul.f32 %v3814_v62, %v14032_v44 }
 0x61d   : > { %v11526_v50 = vpop.permute.xlu1 %4175 }
 0x61e   : > { %14029 = vst [vmem:[#allocation50_spill] sm:$0xff] %v11526_v50  ;;  %v4186_v3 = vsel %vm1742_vm7, %v4174_v35, %v11526_v50 }
 0x61f   : > { %v4210_v53 = vmul.f32 %v4186_v3, %v14031_v26  ;;  %4177 = vrot.lane.b32.xlu1 %v11146_v13, %s7234_s21  ;;  %v14033_v3 = vld [vmem:[#allocation61_spill] sm:$0xff] }
 0x620   : > { %v11537_v38 = vpop.permute.xlu0 %3925 }
 0x621   : > { %v3862_v16 = vpop.permute.xlu1 %3861  ;;  %v6896_v2 = vpack.c.bf16 %v4210_v53, %v4146_v22 }
 0x622   : > { %v3878_v0 = vsel %vm777_vm2, %v3862_v16, %v3832_v37  ;;  %v4145_v37 = vmul.f32 %v4123_v42, %v14034_v58  ;;  %v14039_v58 = vld [vmem:[#allocation72_spill] sm:$0xff] }
 0x623   : > { %v3879_v26 = vmul.f32 %v3878_v0, %v14033_v3  ;;  %6897 = vmatprep.subr.bf16.mxu1 %v6896_v2  ;;  %4283 = vperm.xlu1 %7079, %v4280_v27   ;;  %v3941_v27 = vsel %vm970_vm3, %v3896_v9, %v11148_v60  ;;  %v14037_v3 = vld [vmem:[#allocation68_spill] sm:$0xff] }
 0x624   : > { %v3796_v13 = vpop.permute.xlu0 %3795 }
 0x625   : > { %v6806_v50 = vpack.c.bf16 %v3879_v26, %v3815_v43  ;;  %v11549_v22 = vpop.permute.xlu1 %4171  ;;  %v14036_v43 = vld [vmem:[#allocation62_spill] sm:$0xff] }
 0x626   : > { %v4187_v53 = vsel %vm1742_vm7, %v11549_v22, %v4174_v35  ;;  %v3944_v44 = vmul.f32 %v3941_v27, %v14036_v43 }
 0x627   : > { %v4209_v62 = vmul.f32 %v4187_v53, %v14035_v51  ;;  %6807 = vmatpush1.bf16.msra.mxu0 %v6806_v50  ;;  %v3942_v50 = vsel %vm970_vm3, %v11537_v38, %v3896_v9  ;;  %v3799_v9 = vsel %vm584_vm1, %v3796_v13, %v3798_v41  ;;  %v7192_v41 = vld [vmem:[%s13248_s0 + $0xd8] ss:$0 sm:$0xff] }
 0x628   : > { %v4238_v2 = vpop.permute.xlu0 %4237 }
 0x629   : > { %v6898_v0 = vpack.c.bf16 %v4209_v62, %v4145_v37  ;;  %v3960_v55 = vpop.permute.xlu1 %3959  ;;  %v14038_v62 = vld [vmem:[#allocation66_spill] sm:$0xff] }
 0x62a   : > { %v4005_v26 = vsel %vm1163_vm4, %v3960_v55, %v11168_v15  ;;  %v3943_v51 = vmul.f32 %v3942_v50, %v14038_v62 }
 0x62b   : > { %v4008_v35 = vmul.f32 %v4005_v26, %v14037_v3  ;;  %6899 = vmatpush1.bf16.msra.mxu1 %v6898_v0 }
 0x62c   : > { %v11567_v42 = vpop.permute.xlu0 %3793 }
 0x62d   : > { %v3990_v53 = vpop.permute.xlu1 %3989  ;;  %v6808_v60 = vpack.c.bf16 %v4008_v35, %v3944_v44  ;;  %v14040_v35 = vld [vmem:[#allocation29_spill] sm:$0xff] }
 0x62e   : > { %v4006_v37 = vsel %vm1163_vm4, %v3990_v53, %v3960_v55 }
 0x62f   : > { %v4007_v15 = vmul.f32 %v4006_v37, %v14039_v58  ;;  %6809 = vmatprep.subr.bf16.mxu0 %v6808_v60  ;;  %v14042_v37 = vld [vmem:[#allocation131_spill] sm:$0xff] }
 0x630   : > { %v11573_v27 = vpop.permute.xlu0 %4235 }
 0x631   : > { %v6810_v26 = vpack.c.bf16 %v4007_v15, %v3943_v51  ;;  %v3860_v0 = vpop.permute.xlu1 %3859  ;;  %v4251_v55 = vsel %vm1935_vm8, %v11573_v27, %v4238_v2 }
 0x632   : > { %v3863_v43 = vsel %vm777_vm2, %v3860_v0, %v3862_v16  ;;  %v3830_v16 = vmul.f32 %v3799_v9, %v14042_v37  ;;  %v14044_v37 = vld [vmem:[#allocation33_spill] sm:$0xff] }
 0x633   : > { %6811 = vmatpush1.bf16.msra.mxu0 %v6810_v26  ;;  %v3894_v50 = vmul.f32 %v3863_v43, %v14040_v35  ;;  %v3800_v26 = vsel %vm584_vm1, %v11567_v42, %v3796_v13  ;;  %v7193_v43 = vld [vmem:[%s13248_s0 + $0xd0] ss:$0 sm:$0xff] }
 0x634   : > { %v11579_v44 = vpop.permute.xlu0 %4023  ;;  %v4273_v35 = vmul.f32 %v7193_v43, %v4251_v55  ;;  %v14048_v43 = vld [vmem:[#allocation80_spill] sm:$0xff] }
 0x635   : > { %v11585_v60 = vpop.permute.xlu1 %4239 }
 0x636   : > { %14041 = vst [vmem:[#allocation138_spill] sm:$0xff] %v11585_v60  ;;  %v4250_v51 = vsel %vm1935_vm8, %v4238_v2, %v11585_v60  ;;  %v6916_v2 = vpack.c.bf16 %v3894_v50, %v3830_v16  ;;  %v14046_v50 = vld [vmem:[#allocation105_spill] sm:$0xff]  ;;  %v14049_v60 = vld [vmem:[#allocation91_spill] sm:$0xff] }
 0x637   : > { %v4274_v15 = vmul.f32 %v7192_v41, %v4250_v51  ;;  %v14043_v51 = vld [vmem:[#allocation28_spill] sm:$0xff] }
 0x638   : > { %v3988_v62 = vpop.permute.xlu0 %3987  ;;  %v3829_v41 = vmul.f32 %v3800_v26, %v14043_v51 }
 0x639   : > { %4660 = vmatprep.subr.mxu1 %v4274_v15  ;;  %v11600_v58 = vpop.permute.xlu1 %3857 }
 0x63a   : > { %v3864_v9 = vsel %vm777_vm2, %v11600_v58, %v3860_v0  ;;  %4661 = vmatpush1.msra.mxu1 %v4273_v35  ;;  %v14047_v35 = vld [vmem:[#allocation83_spill] sm:$0xff] }
 0x63b   : > { %v3893_v3 = vmul.f32 %v3864_v9, %v14044_v37  ;;  %6917 = vmatprep.subr.bf16.mxu1 %v6916_v2  ;;  %6356 = vmatmul.mubr.msk.f32.vlgmr.msra.gmra.mrb[20].mxu1 %vm3179_vm9, %v11318_v45  ;;  %v3991_v9 = vsel %vm1163_vm4, %v3988_v62, %v3990_v53 }
 0x63c   : > { %v11609_v13 = vpop.permute.xlu0 %3985  ;;  %4850 = vmatprep.mubr.f32.mxu1 %v13911_v40 }
 0x63d   : > { %14045 = vst [vmem:[#allocation139_spill] sm:$0xff] %v11609_v13  ;;  %v6918_v55 = vpack.c.bf16 %v3893_v3, %v3829_v41  ;;  %v4026_v15 = vpop.permute.xlu1 %4025 }
 0x63e   : > { %v4068_v16 = vsel %vm1356_vm5, %v4026_v15, %v14046_v50  ;;  %v4069_v0 = vsel %vm1356_vm5, %v11579_v44, %v4026_v15  ;;  %v4022_v15 = vmul.f32 %v3991_v9, %v14049_v60  ;;  %v14055_v60 = vld [vmem:[#allocation115_spill] sm:$0xff] }
 0x63f   : > { %v4071_v26 = vmul.f32 %v4069_v0, %v14047_v35  ;;  %v4072_v2 = vmul.f32 %v4068_v16, %v14048_v43  ;;  %6919 = vmatpush1.bf16.msra.mxu1 %v6918_v55  ;;  %v3992_v55 = vsel %vm1163_vm4, %v11609_v13, %v3988_v62 }
 0x640   : > { %v4154_v51 = vpop.permute.xlu0 %4153 }
 0x641   : > { %v6814_v3 = vpack.c.bf16 %v4071_v26, %v11054_v59  ;;  %v3924_v41 = vpop.permute.xlu1 %3923  ;;  %v6812_v37 = vpack.c.bf16 %v4072_v2, %v10925_v49  ;;  %v14052_v26 = vld [vmem:[#allocation39_spill] sm:$0xff]  ;;  %v14053_v2 = vld [vmem:[#allocation36_spill] sm:$0xff] }
 0x642   : > { %v3927_v50 = vsel %vm970_vm3, %v3924_v41, %v11537_v38  ;;  %v4021_v38 = vmul.f32 %v3992_v55, %v14052_v26  ;;  %v14059_v26 = vld [vmem:[#allocation93_spill] sm:$0xff] }
 0x643   : > { %v3958_v0 = vmul.f32 %v3927_v50, %v14050_v63  ;;  %6813 = vmatprep.subr.bf16.mxu0 %v6812_v37  ;;  %v14054_v50 = vld [vmem:[#allocation116_spill] sm:$0xff] }
 0x644   : > { %v4152_v53 = vpop.permute.xlu0 %4151  ;;  %6815 = vmatpush1.bf16.msra.mxu0 %v6814_v3  ;;  %v4196_v37 = vsel %vm1742_vm7, %v4154_v51, %v14054_v50 }
 0x645   : > { %v11632_v16 = vpop.permute.xlu1 %3921  ;;  %v6920_v59 = vpack.c.bf16 %v4022_v15, %v3958_v0  ;;  %v14056_v0 = vld [vmem:[#allocation99_spill] sm:$0xff]  ;;  %v4197_v55 = vsel %vm1742_vm7, %v4152_v53, %v4154_v51 }
 0x646   : > { %14051 = vst [vmem:[#allocation105_spill] sm:$0xff] %v11632_v16  ;;  %v3928_v49 = vsel %vm970_vm3, %v11632_v16, %v3924_v41  ;;  %v4200_v35 = vmul.f32 %v4196_v37, %v14056_v0  ;;  %v14057_v41 = vld [vmem:[#allocation89_spill] sm:$0xff] }
 0x647   : > { %v3957_v9 = vmul.f32 %v3928_v49, %v14053_v2  ;;  %6921 = vmatprep.subr.bf16.mxu1 %v6920_v59 }
 0x648   : > { %v11642_v63 = vpop.permute.xlu0 %4051 }
 0x649   : > { %v6922_v62 = vpack.c.bf16 %v4021_v38, %v3957_v9  ;;  %v4090_v3 = vpop.permute.xlu1 %4089  ;;  %v14058_v38 = vld [vmem:[#allocation101_spill] sm:$0xff] }
 0x64a   : > { %v4132_v15 = vsel %vm1549_vm6, %v4090_v3, %v14055_v60  ;;  %v4199_v9 = vmul.f32 %v4197_v55, %v14058_v38 }
 0x64b   : > { %v4136_v43 = vmul.f32 %v4132_v15, %v14057_v41  ;;  %6923 = vmatpush1.bf16.msra.mxu1 %v6922_v62  ;;  %v14061_v15 = vld [vmem:[#allocation43_spill] sm:$0xff] }
 0x64c   : > { %v3840_v59 = vpop.permute.xlu0 %3839 }
 0x64d   : > { %v4088_v49 = vpop.permute.xlu1 %4087  ;;  %v6816_v2 = vpack.c.bf16 %v4200_v35, %v4136_v43  ;;  %v14060_v35 = vld [vmem:[#allocation44_spill] sm:$0xff] }
 0x64e   : > { %v4133_v50 = vsel %vm1549_vm6, %v4088_v49, %v4090_v3 }
 0x64f   : > { %v4135_v16 = vmul.f32 %v4133_v50, %v14059_v26  ;;  %6817 = vmatprep.subr.bf16.mxu0 %v6816_v2 }
 0x650   : > { %v4182_v60 = vpop.permute.xlu0 %4181 }
 0x651   : > { %v6818_v13 = vpack.c.bf16 %v4199_v9, %v4135_v16  ;;  %v4054_v37 = vpop.permute.xlu1 %4053  ;;  %v4198_v9 = vsel %vm1742_vm7, %v4182_v60, %v4152_v53  ;;  %v3873_v53 = vsel %vm777_vm2, %v3840_v59, %v11303_v39 }
 0x652   : > { %v4055_v62 = vsel %vm1356_vm5, %v11642_v63, %v4054_v37  ;;  %v4070_v51 = vsel %vm1356_vm5, %v4054_v37, %v11579_v44  ;;  %v14062_v37 = vld [vmem:[#allocation84_spill] sm:$0xff] }
 0x653   : > { %v4085_v43 = vmul.f32 %v4055_v62, %v14060_v35  ;;  %v4086_v3 = vmul.f32 %v4070_v51, %v14061_v15  ;;  %6819 = vmatpush1.bf16.msra.mxu0 %v6818_v13  ;;  %v4214_v62 = vmul.f32 %v4198_v9, %v14062_v37  ;;  %v14064_v51 = vld [vmem:[#allocation109_spill] sm:$0xff]  ;;  %v14067_v9 = vld [vmem:[#allocation112_spill] sm:$0xff] }
 0x654   : > { %v11663_v55 = vpop.permute.xlu0 %4115 }
 0x655   : > { %v6926_v2 = vpack.c.bf16 %v4085_v43, %v11116_v52  ;;  %v3776_v50 = vpop.permute.xlu1 %3775  ;;  %v6924_v16 = vpack.c.bf16 %v4086_v3, %v11081_v6  ;;  %v14063_v52 = vld [vmem:[#allocation19_spill] sm:$0xff] }
 0x656   : > { %v3809_v44 = vsel %vm584_vm1, %v3776_v50, %v11242_v1  ;;  %v3810_v6 = vsel %vm584_vm1, %v14063_v52, %v3776_v50  ;;  %v14068_v52 = vld [vmem:[#allocation119_spill] sm:$0xff] }
 0x657   : > { %6925 = vmatprep.subr.bf16.mxu1 %v6924_v16  ;;  %v14066_v16 = vld [vmem:[#allocation113_spill] sm:$0xff]  ;;  %v3819_v37 = vmul.f32 %v3810_v6, %v14067_v9  ;;  %v3884_v39 = vmul.f32 %v3873_v53, %v14068_v52  ;;  %v14069_v6 = vld [vmem:[#allocation118_spill] sm:$0xff] }
 0x658   : > { %v4216_v26 = vpop.permute.xlu0 %4215  ;;  %6927 = vmatpush1.bf16.msra.mxu1 %v6926_v2  ;;  %v14065_v2 = vld [vmem:[#allocation123_spill] sm:$0xff]  ;;  %v3820_v15 = vmul.f32 %v3809_v44, %v14066_v16 }
 0x659   : > { %v4118_v38 = vpop.permute.xlu1 %4117  ;;  %v3874_v1 = vsel %vm777_vm2, %v14065_v2, %v3840_v59  ;;  %v7195_v44 = vld [vmem:[%s13248_s0 + $0x88] ss:$0 sm:$0xff] }
 0x65a   : > { %v4134_v13 = vsel %vm1549_vm6, %v4118_v38, %v4088_v49 }
 0x65b   : > { %v4150_v43 = vmul.f32 %v4134_v13, %v14064_v51  ;;  %v7194_v51 = vld [vmem:[%s13248_s0 + $0x80] ss:$0 sm:$0xff] }
 0x65c   : > { %v3968_v3 = vpop.permute.xlu0 %3967 }
 0x65d   : > { %v4218_v49 = vpop.permute.xlu1 %4217  ;;  %v6928_v35 = vpack.c.bf16 %v4214_v62, %v4150_v43  ;;  %v3883_v43 = vmul.f32 %v3874_v1, %v14069_v6 }
 0x65e   : > { %v4260_v50 = vsel %vm1935_vm8, %v4218_v49, %v11091_v5  ;;  %v4261_v13 = vsel %vm1935_vm8, %v4216_v26, %v4218_v49  ;;  %v4119_v5 = vsel %vm1549_vm6, %v11663_v55, %v4118_v38  ;;  %v6836_v49 = vpack.c.bf16 %v3884_v39, %v3820_v15 }
 0x65f   : > { %v4263_v59 = vmul.f32 %v7194_v51, %v4261_v13  ;;  %6929 = vmatprep.subr.bf16.mxu1 %v6928_v35  ;;  %v4264_v62 = vmul.f32 %v7195_v44, %v4260_v50  ;;  %v6838_v41 = vpack.c.bf16 %v3883_v43, %v3819_v37  ;;  %v14070_v51 = vld [vmem:[#allocation48_spill] sm:$0xff]  ;;  %v14071_v13 = vld [vmem:[#allocation85_spill] sm:$0xff]  ;;  %v4001_v38 = vsel %vm1163_vm4, %v3968_v3, %v11264_v10 }
 0x660   : > { %v11703_v2 = vpop.permute.xlu0 %4243  ;;  %v4149_v50 = vmul.f32 %v4119_v5, %v14070_v51  ;;  %v14072_v44 = vld [vmem:[#allocation24_spill] sm:$0xff]  ;;  %v14074_v5 = vld [vmem:[#allocation14_spill] sm:$0xff] }
 0x661   : > { %4305 = vmatprep.subr.mxu0 %v4264_v62  ;;  %v11705_v53 = vpop.permute.xlu1 %4179  ;;  %v4002_v15 = vsel %vm1163_vm4, %v14072_v44, %v3968_v3  ;;  %v14073_v62 = vld [vmem:[#allocation23_spill] sm:$0xff]  ;;  %v14077_v44 = vld [vmem:[#allocation121_spill] sm:$0xff] }
 0x662   : > { %v4183_v35 = vsel %vm1742_vm7, %v11705_v53, %v4182_v60  ;;  %4306 = vmatpush1.msra.mxu0 %v4263_v59  ;;  %v4011_v10 = vmul.f32 %v4002_v15, %v14074_v5 }
 0x663   : > { %v4213_v1 = vmul.f32 %v4183_v35, %v14071_v13  ;;  %6351 = vmatmul.mubr.msk.f32.vlgmr.msra.gmra.mrb[16].mxu0 %vm3179_vm9, %v11318_v45  ;;  %6837 = vmatprep.subr.bf16.mxu0 %v6836_v49  ;;  %v14075_v49 = vld [vmem:[#allocation122_spill] sm:$0xff]  ;;  %v14076_v13 = vld [vmem:[#allocation120_spill] sm:$0xff] }
 0x664   : > { %v4098_v37 = vpop.permute.xlu0 %4097  ;;  %6839 = vmatpush1.bf16.msra.mxu0 %v6838_v41  ;;  %4495 = vmatprep.mubr.f32.mxu0 %v13911_v40  ;;  %v4012_v35 = vmul.f32 %v4001_v38, %v14075_v49  ;;  %v7196_v38 = vld [vmem:[%s13248_s0 + $0xf0] ss:$0 sm:$0xff] }
 0x665   : > { %v6930_v60 = vpack.c.bf16 %v4213_v1, %v4149_v50  ;;  %v3904_v39 = vpop.permute.xlu1 %3903 }
 0x666   : > { %v3937_v59 = vsel %vm970_vm3, %v3904_v39, %v11329_v31  ;;  %v3938_v43 = vsel %vm970_vm3, %v14073_v62, %v3904_v39 }
 0x667   : > { %v3947_v3 = vmul.f32 %v3938_v43, %v14076_v13  ;;  %v3948_v41 = vmul.f32 %v3937_v59, %v14077_v44  ;;  %6931 = vmatpush1.bf16.msra.mxu1 %v6930_v60  ;;  %v7197_v60 = vld [vmem:[%s13248_s0 + $0xf8] ss:$0 sm:$0xff] }
 0x668   : > { %v3784_v51 = vpop.permute.xlu0 %3783 }
 0x669   : > { %v6842_v50 = vpack.c.bf16 %v4011_v10, %v3947_v3  ;;  %v4246_v1 = vpop.permute.xlu1 %4245  ;;  %v6840_v0 = vpack.c.bf16 %v4012_v35, %v3948_v41  ;;  %v14079_v3 = vld [vmem:[#allocation129_spill] sm:$0xff]  ;;  %v14080_v41 = vld [vmem:[#allocation130_spill] sm:$0xff] }
 0x66a   : > { %v4247_v31 = vsel %vm1935_vm8, %v11703_v2, %v4246_v1  ;;  %v4262_v39 = vsel %vm1935_vm8, %v4246_v1, %v4216_v26  ;;  %v14078_v26 = vld [vmem:[#allocation135_spill] sm:$0xff] }
 0x66b   : > { %v4277_v15 = vmul.f32 %v7196_v38, %v4247_v31  ;;  %6841 = vmatprep.subr.bf16.mxu0 %v6840_v0  ;;  %v4278_v59 = vmul.f32 %v7197_v60, %v4262_v39 }
 0x66c   : > { %v4226_v62 = vpop.permute.xlu0 %4225  ;;  %6843 = vmatpush1.bf16.msra.mxu0 %v6842_v50  ;;  %v4128_v50 = vsel %vm1549_vm6, %v4098_v37, %v11196_v25 }
 0x66d   : > { %4802 = vmatprep.subr.mxu1 %v4278_v59  ;;  %v4034_v43 = vpop.permute.xlu1 %4033  ;;  %v14081_v59 = vld [vmem:[#allocation57_spill] sm:$0xff] }
 0x66e   : > { %v4064_v10 = vsel %vm1356_vm5, %v4034_v43, %v11110_v30  ;;  %v4065_v35 = vsel %vm1356_vm5, %v14078_v26, %v4034_v43  ;;  %4803 = vmatpush1.msra.mxu1 %v4277_v15  ;;  %v4129_v30 = vsel %vm1549_vm6, %v11223_v8, %v4098_v37  ;;  %v14083_v37 = vld [vmem:[#allocation132_spill] sm:$0xff] }
 0x66f   : > { %v4075_v0 = vmul.f32 %v4065_v35, %v14079_v3  ;;  %v4076_v1 = vmul.f32 %v4064_v10, %v14080_v41  ;;  %6358 = vmatmul.mubr.msk.f32.vlgmr.msra.gmra.mrb[22].mxu1 %vm3179_vm9, %v11318_v45  ;;  %v4139_v43 = vmul.f32 %v4129_v30, %v14081_v59  ;;  %v14082_v10 = vld [vmem:[#allocation58_spill] sm:$0xff]  ;;  %v14084_v35 = vld [vmem:[#allocation133_spill] sm:$0xff] }
 0x670   : > { %v3976_v31 = vpop.permute.xlu0 %3975  ;;  %5530 = vmatprep.mubr.f32.mxu1 %v13911_v40  ;;  %v4140_v8 = vmul.f32 %v4128_v50, %v14082_v10 }
 0x671   : > { %v6846_v39 = vpack.c.bf16 %v4075_v0, %v10972_v24  ;;  %v4162_v38 = vpop.permute.xlu1 %4161  ;;  %v6844_v15 = vpack.c.bf16 %v4076_v1, %v10979_v11  ;;  %v4256_v24 = vsel %vm1935_vm8, %v4226_v62, %v11380_v48  ;;  %v3806_v48 = vsel %vm584_vm1, %v11066_v20, %v3784_v51 }
 0x672   : > { %v4192_v60 = vsel %vm1742_vm7, %v4162_v38, %v11198_v36  ;;  %v4193_v25 = vsel %vm1742_vm7, %v11246_v7, %v4162_v38  ;;  %v3805_v7 = vsel %vm584_vm1, %v3784_v51, %v11362_v46  ;;  %v7198_v46 = vld [vmem:[%s13248_s0 + $0xa8] ss:$0 sm:$0xff]  ;;  %v3997_v20 = vsel %vm1163_vm4, %v3976_v31, %v11448_v54 }
 0x673   : > { %v4203_v26 = vmul.f32 %v4193_v25, %v14083_v37  ;;  %v4204_v3 = vmul.f32 %v4192_v60, %v14084_v35  ;;  %6845 = vmatprep.subr.bf16.mxu0 %v6844_v15  ;;  %v14086_v15 = vld [vmem:[#allocation92_spill] sm:$0xff]  ;;  %v3998_v54 = vsel %vm1163_vm4, %v11108_v28, %v3976_v31 }
 0x674   : > { %6847 = vmatpush1.bf16.msra.mxu0 %v6846_v39  ;;  %v4106_v36 = vpop.permute.xlu0 %4105  ;;  %v14085_v39 = vld [vmem:[#allocation40_spill] sm:$0xff] }
 0x675   : > { %v6850_v11 = vpack.c.bf16 %v4203_v26, %v4139_v43  ;;  %v3848_v0 = vpop.permute.xlu1 %3847  ;;  %v6848_v1 = vpack.c.bf16 %v4204_v3, %v4140_v8  ;;  %v4257_v3 = vsel %vm1935_vm8, %v11266_v19, %v4226_v62  ;;  %v14088_v19 = vld [vmem:[#allocation37_spill] sm:$0xff]  ;;  %v7199_v43 = vld [vmem:[%s13248_s0 + $0xa0] ss:$0 sm:$0xff] }
 0x676   : > { %v3869_v50 = vsel %vm777_vm2, %v3848_v0, %v11433_v23  ;;  %v3870_v30 = vsel %vm777_vm2, %v11075_v4, %v3848_v0  ;;  %v4268_v23 = vmul.f32 %v7198_v46, %v4256_v24  ;;  %v14087_v4 = vld [vmem:[#allocation134_spill] sm:$0xff]  ;;  %v3823_v62 = vmul.f32 %v3806_v48, %v14088_v19 }
 0x677   : > { %v3888_v38 = vmul.f32 %v3869_v50, %v14085_v39  ;;  %6849 = vmatprep.subr.bf16.mxu0 %v6848_v1  ;;  %v3887_v60 = vmul.f32 %v3870_v30, %v14086_v15  ;;  %v3824_v25 = vmul.f32 %v3805_v7, %v14087_v4  ;;  %v4267_v8 = vmul.f32 %v7199_v43, %v4257_v3  ;;  %v14089_v0 = vld [vmem:[#allocation74_spill] sm:$0xff]  ;;  %v14090_v50 = vld [vmem:[#allocation47_spill] sm:$0xff]  ;;  %v14091_v3 = vld [vmem:[#allocation73_spill] sm:$0xff] }
 0x678   : > { %6851 = vmatpush1.bf16.msra.mxu0 %v6850_v11  ;;  %v3792_v11 = vpop.permute.xlu0 %3791  ;;  %v4016_v30 = vmul.f32 %v3997_v20, %v14090_v50  ;;  %v4124_v20 = vsel %vm1549_vm6, %v4106_v36, %v11517_v32  ;;  %v4125_v32 = vsel %vm1549_vm6, %v11366_v21, %v4106_v36 }
 0x679   : > { %4447 = vmatprep.subr.mxu0 %v4268_v23  ;;  %v3912_v51 = vpop.permute.xlu1 %3911  ;;  %v6868_v7 = vpack.c.bf16 %v3888_v38, %v3824_v25  ;;  %v6870_v48 = vpack.c.bf16 %v3887_v60, %v3823_v62  ;;  %v14093_v60 = vld [vmem:[#allocation55_spill] sm:$0xff]  ;;  %v14094_v62 = vld [vmem:[#allocation54_spill] sm:$0xff] }
 0x67a   : > { %v3933_v26 = vsel %vm970_vm3, %v3912_v51, %v11474_v56  ;;  %v3934_v24 = vsel %vm970_vm3, %v11099_v12, %v3912_v51  ;;  %v14092_v12 = vld [vmem:[#allocation108_spill] sm:$0xff] }
 0x67b   : > { %v3952_v1 = vmul.f32 %v3933_v26, %v14089_v0  ;;  %v3951_v46 = vmul.f32 %v3934_v24, %v14091_v3  ;;  %v4015_v23 = vmul.f32 %v3998_v54, %v14092_v12  ;;  %v14095_v54 = vld [vmem:[#allocation95_spill] sm:$0xff]  ;;  %v14134_v0 = vld [vmem:[#allocation5_spill] sm:$0xff] }
 0x67c   : > { %4448 = vmatpush1.msra.mxu0 %v4267_v8  ;;  %v4234_v8 = vpop.permute.xlu0 %4233 }
 0x67d   : > { %6353 = vmatmul.mubr.msk.f32.vlgmr.msra.gmra.mrb[18].mxu0 %vm3179_vm9, %v11318_v45  ;;  %6869 = vmatprep.subr.bf16.mxu0 %v6868_v7  ;;  %v4042_v56 = vpop.permute.xlu1 %4041  ;;  %v6872_v38 = vpack.c.bf16 %v4016_v30, %v3952_v1  ;;  %v6874_v51 = vpack.c.bf16 %v4015_v23, %v3951_v46  ;;  %v4144_v1 = vmul.f32 %v4124_v20, %v14095_v54  ;;  %v14096_v7 = vld [vmem:[#allocation103_spill] sm:$0xff]  ;;  %v14098_v23 = vld [vmem:[#allocation94_spill] sm:$0xff]  ;;  %v14131_v54 = vld [vmem:[#allocation60_spill] sm:$0xff] }
 0x67e   : > { %v4060_v28 = vsel %vm1356_vm5, %v4042_v56, %v11493_v47  ;;  %v4061_v31 = vsel %vm1356_vm5, %v11348_v33, %v4042_v56  ;;  %6871 = vmatpush1.bf16.msra.mxu0 %v6870_v48  ;;  %4637 = vmatprep.mubr.f32.mxu0 %v13911_v40  ;;  %v14097_v48 = vld [vmem:[#allocation102_spill] sm:$0xff] }
 0x67f   : > { %v4080_v25 = vmul.f32 %v4060_v28, %v14093_v60  ;;  %v4079_v43 = vmul.f32 %v4061_v31, %v14094_v62  ;;  %6873 = vmatprep.subr.bf16.mxu0 %v6872_v38  ;;  %v4143_v28 = vmul.f32 %v4125_v32, %v14098_v23  ;;  %v3801_v31 = vsel %vm584_vm1, %v3792_v11, %v11567_v42 }
 0x680   : > { %v3984_v36 = vpop.permute.xlu0 %3983 }
 0x681   : > { %v4170_v47 = vpop.permute.xlu1 %4169  ;;  %v6876_v26 = vpack.c.bf16 %v4080_v25, %v14016_v34  ;;  %v6878_v34 = vpack.c.bf16 %v4079_v43, %v10998_v29  ;;  %v14099_v25 = vld [vmem:[#allocation111_spill] sm:$0xff] }
 0x682   : > { %v4188_v33 = vsel %vm1742_vm7, %v4170_v47, %v11549_v22  ;;  %v4189_v24 = vsel %vm1742_vm7, %v11386_v57, %v4170_v47  ;;  %6875 = vmatpush1.bf16.msra.mxu0 %v6874_v51  ;;  %v4252_v57 = vsel %vm1935_vm8, %v4234_v8, %v11573_v27  ;;  %v3802_v27 = vsel %vm584_vm1, %v11206_v17, %v3792_v11  ;;  %v14100_v47 = vld [vmem:[#allocation139_spill] sm:$0xff] }
 0x683   : > { %v4208_v30 = vmul.f32 %v4188_v33, %v14096_v7  ;;  %6877 = vmatprep.subr.bf16.mxu0 %v6876_v26  ;;  %v4207_v46 = vmul.f32 %v4189_v24, %v14097_v48  ;;  %v3993_v42 = vsel %vm1163_vm4, %v3984_v36, %v14100_v47  ;;  %v14101_v26 = vld [vmem:[#allocation110_spill] sm:$0xff]  ;;  %v14102_v24 = vld [vmem:[#allocation105_spill] sm:$0xff] }
 0x685   : > { %v3856_v56 = vpop.permute.xlu1 %3855  ;;  %v6880_v22 = vpack.c.bf16 %v4208_v30, %v4144_v1  ;;  %v6882_v38 = vpack.c.bf16 %v4207_v46, %v4143_v28  ;;  %v14105_v1 = vld [vmem:[#allocation71_spill] sm:$0xff]  ;;  %v14107_v28 = vld [vmem:[#allocation137_spill] sm:$0xff] }
 0x686   : > { %v3865_v21 = vsel %vm777_vm2, %v3856_v56, %v11600_v58  ;;  %6879 = vmatpush1.bf16.msra.mxu0 %v6878_v34  ;;  %v3866_v29 = vsel %vm777_vm2, %v11355_v14, %v3856_v56  ;;  %v4253_v58 = vsel %vm1935_vm8, %v11406_v61, %v4234_v8  ;;  %v7200_v14 = vld [vmem:[%s13248_s0 + $0xc8] ss:$0 sm:$0xff]  ;;  %v14103_v61 = vld [vmem:[#allocation65_spill] sm:$0xff]  ;;  %v14104_v8 = vld [vmem:[#allocation136_spill] sm:$0xff] }
 0x687   : > { %6881 = vmatprep.subr.bf16.mxu0 %v6880_v22  ;;  %v3892_v20 = vmul.f32 %v3865_v21, %v14099_v25  ;;  %v4272_v43 = vmul.f32 %v7200_v14, %v4252_v57  ;;  %v3891_v33 = vmul.f32 %v3866_v29, %v14101_v26  ;;  %v3828_v11 = vmul.f32 %v3801_v31, %v14103_v61  ;;  %v14106_v34 = vld [vmem:[#allocation64_spill] sm:$0xff]  ;;  %v7201_v56 = vld [vmem:[%s13248_s0 + $0xc0] ss:$0 sm:$0xff] }
 0x688   : > { %v3827_v46 = vmul.f32 %v3802_v27, %v14106_v34  ;;  %v4271_v22 = vmul.f32 %v7201_v56, %v4253_v58  ;;  %v3994_v57 = vsel %vm1163_vm4, %v14107_v28, %v3984_v36  ;;  %v14108_v21 = vld [vmem:[#allocation78_spill] sm:$0xff]  ;;  %v14115_v28 = vld [vmem:[#allocation97_spill] sm:$0xff] }
 0x689   : > { %v3920_v51 = vpop.permute.xlu1 %3919  ;;  %v4020_v29 = vmul.f32 %v3993_v42, %v14108_v21  ;;  %v14130_v21 = vld [vmem:[#allocation52_spill] sm:$0xff]  ;;  %v14141_v34 = vld [vmem:[#allocation17_spill] sm:$0xff] }
 0x68a   : > { %v3929_v17 = vsel %vm970_vm3, %v3920_v51, %v14102_v24  ;;  %6883 = vmatpush1.bf16.msra.mxu0 %v6882_v38  ;;  %v3930_v32 = vsel %vm970_vm3, %v14104_v8, %v3920_v51  ;;  %v6900_v38 = vpack.c.bf16 %v3892_v20, %v3828_v11  ;;  %v6902_v14 = vpack.c.bf16 %v3891_v33, %v3827_v46  ;;  %v14109_v51 = vld [vmem:[#allocation70_spill] sm:$0xff]  ;;  %v14110_v24 = vld [vmem:[#allocation127_spill] sm:$0xff]  ;;  %v14112_v20 = vld [vmem:[#allocation77_spill] sm:$0xff] }
 0x68b   : > { %v3956_v30 = vmul.f32 %v3929_v17, %v14105_v1  ;;  %4589 = vmatprep.subr.mxu0 %v4272_v43  ;;  %v3955_v47 = vmul.f32 %v3930_v32, %v14109_v51  ;;  %v4114_v43 = vpop.permute.xlu0 %4113  ;;  %v14111_v17 = vld [vmem:[#allocation81_spill] sm:$0xff]  ;;  %v4019_v42 = vmul.f32 %v3994_v57, %v14112_v20  ;;  %v14113_v32 = vld [vmem:[#allocation82_spill] sm:$0xff] }
 0x68c   : > { %v4120_v33 = vsel %vm1549_vm6, %v4114_v43, %v11663_v55 }
 0x68d   : > { %v4050_v31 = vpop.permute.xlu1 %4049  ;;  %v6904_v36 = vpack.c.bf16 %v4020_v29, %v3956_v30  ;;  %v6906_v11 = vpack.c.bf16 %v4019_v42, %v3955_v47  ;;  %v14116_v29 = vld [vmem:[#allocation13_spill] sm:$0xff] }
 0x68e   : > { %v4056_v27 = vsel %vm1356_vm5, %v4050_v31, %v11642_v63  ;;  %4590 = vmatpush1.msra.mxu0 %v4271_v22  ;;  %v4057_v58 = vsel %vm1356_vm5, %v14110_v24, %v4050_v31  ;;  %v14114_v22 = vld [vmem:[#allocation50_spill] sm:$0xff] }
 0x68f   : > { %v4084_v8 = vmul.f32 %v4056_v27, %v14111_v17  ;;  %6355 = vmatmul.mubr.msk.f32.vlgmr.msra.gmra.mrb[20].mxu0 %vm3179_vm9, %v11318_v45  ;;  %6901 = vmatprep.subr.bf16.mxu0 %v6900_v38  ;;  %v4083_v46 = vmul.f32 %v4057_v58, %v14113_v32  ;;  %v14117_v38 = vld [vmem:[#allocation126_spill] sm:$0xff]  ;;  %v4242_v27 = vpop.permute.xlu0 %4241  ;;  %v14121_v32 = vld [vmem:[#allocation88_spill] sm:$0xff] }
 0x690   : > { %6903 = vmatpush1.bf16.msra.mxu0 %v6902_v14  ;;  %4779 = vmatprep.mubr.f32.mxu0 %v13911_v40  ;;  %v4121_v55 = vsel %vm1549_vm6, %v14117_v38, %v4114_v43  ;;  %v14118_v14 = vld [vmem:[#allocation87_spill] sm:$0xff]  ;;  %v14119_v24 = vld [vmem:[#allocation106_spill] sm:$0xff] }
 0x691   : > { %6905 = vmatprep.subr.bf16.mxu0 %v6904_v36  ;;  %v4178_v63 = vpop.permute.xlu1 %4177  ;;  %v6908_v31 = vpack.c.bf16 %v4084_v8, %v14116_v29  ;;  %v4148_v47 = vmul.f32 %v4120_v33, %v14118_v14  ;;  %v6910_v58 = vpack.c.bf16 %v4083_v46, %v14119_v24  ;;  %v4248_v8 = vsel %vm1935_vm8, %v4242_v27, %v11703_v2  ;;  %v7202_v33 = vld [vmem:[%s13248_s0 + $0xe8] ss:$0 sm:$0xff] }
 0x692   : > { %v4184_v56 = vsel %vm1742_vm7, %v4178_v63, %v11705_v53  ;;  %v4185_v30 = vsel %vm1742_vm7, %v14114_v22, %v4178_v63  ;;  %v14120_v53 = vld [vmem:[#allocation98_spill] sm:$0xff]  ;;  %v4147_v63 = vmul.f32 %v4121_v55, %v14121_v32  ;;  %v4276_v46 = vmul.f32 %v7202_v33, %v4248_v8 }
 0x693   : > { %v4212_v57 = vmul.f32 %v4184_v56, %v14115_v28  ;;  %v4211_v36 = vmul.f32 %v4185_v30, %v14120_v53  ;;  %v14122_v56 = vld [vmem:[#allocation138_spill] sm:$0xff] }
 0x694   : > { %6907 = vmatpush1.bf16.msra.mxu0 %v6906_v11  ;;  %v4249_v43 = vsel %vm1935_vm8, %v14122_v56, %v4242_v27  ;;  %v7203_v22 = vld [vmem:[%s13248_s0 + $0xe0] ss:$0 sm:$0xff] }
 0x695   : > { %6909 = vmatprep.subr.bf16.mxu0 %v6908_v31  ;;  %v6912_v42 = vpack.c.bf16 %v4212_v57, %v4148_v47  ;;  %v6914_v11 = vpack.c.bf16 %v4211_v36, %v4147_v63  ;;  %v4275_v30 = vmul.f32 %v7203_v22, %v4249_v43 }
 0x698   : > { %6911 = vmatpush1.bf16.msra.mxu0 %v6910_v58 }
 0x699   : > { %6913 = vmatprep.subr.bf16.mxu0 %v6912_v42 }
 0x69c   : > { %6915 = vmatpush1.bf16.msra.mxu0 %v6914_v11 }
 0x69d   : > { %4731 = vmatprep.subr.mxu0 %v4276_v46 }
 0x6a0   : > { %4732 = vmatpush1.msra.mxu0 %v4275_v30 }
 0x6a1   : > { %6357 = vmatmul.mubr.msk.f32.vlgmr.msra.gmra.mrb[22].mxu0 %vm3179_vm9, %v11318_v45 }
 0x6a2   : > { %5459 = vmatprep.mubr.f32.mxu0 %v13911_v40  ;;  %v11932_v2 = vpop.permute.xlu1 %4283 }
 0x6bc   : > { %v4426_v57 = vpop.f32.mrb[16].mxu1 }
 0x6bd   : > { %v4428_v29 = vpop.f32.mrb[17].mxu1  ;;  %v4427_v31 = vadd.f32 %v4426_v57, %v11932_v2 }
 0x6be   : > { %v4429_v43 = vadd.f32 %v4428_v29, %v11932_v2 }
 0x6bf   : > { %v11935_v38 = vmax.f32 %v4427_v31, 0.0 }
 0x6c0   : > { %v11972_v33 = vmax.f32 %v4429_v43, 0.0 }
 0x6c1   : > { %5133 = vrot.lane.b32.xlu1 %v11935_v38, %s7232_s19 }
 0x6d4   : > { %v4568_v55 = vpop.f32.mrb[18].mxu1 }
 0x6d5   : > { %v11939_v47 = vpop.f32.mrb[19].mxu1 }
 0x70e   : > { %v11941_v27 = vpop.f32.mrb[20].mxu1 }
 0x70f   : > { %v11943_v24 = vpop.f32.mrb[21].mxu1  ;;  %v4711_v53 = vadd.f32 %v11941_v27, %v11932_v2 }
 0x711   : > { %v12132_v62 = vmax.f32 %v4711_v53, 0.0 }
 0x736   : > { %v4355_v45 = vpop.f32.mrb[16].mxu0 }
 0x737   : > { %v4356_v58 = vadd.f32 %v4355_v45, %v11932_v2  ;;  %v4357_v36 = vpop.f32.mrb[17].mxu0 }
 0x738   : > { %v4358_v63 = vadd.f32 %v4357_v36, %v11932_v2  ;;  %v4569_v36 = vadd.f32 %v4568_v55, %v11932_v2  ;;  %v4571_v55 = vadd.f32 %v11939_v47, %v11932_v2  ;;  %v12089_v47 = vpop.permute.xlu1 %5133 }
 0x739   : > { %v11946_v42 = vmax.f32 %v4356_v58, 0.0 }
 0x73a   : > { %v11957_v8 = vmax.f32 %v4358_v63, 0.0  ;;  %v12040_v63 = vmax.f32 %v4569_v36, 0.0  ;;  %v12064_v43 = vmax.f32 %v4571_v55, 0.0 }
 0x73b   : > { %14123 = vst [vmem:[#allocation116_spill] sm:$0xff] %v11946_v42  ;;  %5193 = vrot.lane.b32.xlu1 %v11946_v42, %s7233_s20  ;;  %4873 = vrot.lane.b32.xlu0 %v11946_v42, %s7228_s15 }
 0x73c   : > { %14124 = vst [vmem:[#allocation115_spill] sm:$0xff] %v11957_v8 }
 0x73f   : > { %5321 = vrot.lane.b32.xlu1 %v11946_v42, %s7235_s22  ;;  %4937 = vrot.lane.b32.xlu0 %v11946_v42, %s7229_s16 }
 0x742   : > { %v11959_v11 = vpop.f32.mrb[22].mxu1 }
 0x743   : > { %v11961_v56 = vpop.f32.mrb[23].mxu1  ;;  %4875 = vrot.lane.b32.xlu1 %v11957_v8, %s7228_s15  ;;  %4877 = vrot.lane.b32.xlu0 %v11935_v38, %s7228_s15 }
 0x747   : > { %4939 = vrot.lane.b32.xlu1 %v11957_v8, %s7229_s16  ;;  %4941 = vrot.lane.b32.xlu0 %v11935_v38, %s7229_s16 }
 0x74b   : > { %4879 = vrot.lane.b32.xlu1 %v11972_v33, %s7228_s15  ;;  %5001 = vrot.lane.b32.xlu0 %v11946_v42, %s7230_s17 }
 0x74f   : > { %4943 = vrot.lane.b32.xlu1 %v11972_v33, %s7229_s16  ;;  %5065 = vrot.lane.b32.xlu0 %v11946_v42, %s7231_s18 }
 0x750   : > { %v4497_v46 = vpop.f32.mrb[18].mxu0 }
 0x751   : > { %v4499_v22 = vpop.f32.mrb[19].mxu0  ;;  %v4498_v29 = vadd.f32 %v4497_v46, %v11932_v2 }
 0x752   : > { %v4500_v46 = vadd.f32 %v4499_v22, %v11932_v2 }
 0x753   : > { %5003 = vrot.lane.b32.xlu1 %v11957_v8, %s7230_s17  ;;  %5005 = vrot.lane.b32.xlu0 %v11935_v38, %s7230_s17  ;;  %v12023_v45 = vmax.f32 %v4498_v29, 0.0 }
 0x754   : > { %v12071_v29 = vmax.f32 %v4500_v46, 0.0 }
 0x755   : > { %14125 = vst [vmem:[#allocation19_spill] sm:$0xff] %v12023_v45 }
 0x756   : > { %14126 = vst [vmem:[#allocation123_spill] sm:$0xff] %v12071_v29 }
 0x757   : > { %5067 = vrot.lane.b32.xlu1 %v11957_v8, %s7231_s18  ;;  %5069 = vrot.lane.b32.xlu0 %v11935_v38, %s7231_s18 }
 0x75b   : > { %5007 = vrot.lane.b32.xlu1 %v11972_v33, %s7230_s17  ;;  %5129 = vrot.lane.b32.xlu0 %v11946_v42, %s7232_s19 }
 0x75f   : > { %5071 = vrot.lane.b32.xlu1 %v11972_v33, %s7231_s18  ;;  %5197 = vrot.lane.b32.xlu0 %v11935_v38, %s7233_s20 }
 0x762   : > { %v4639_v30 = vpop.f32.mrb[20].mxu0 }
 0x763   : > { %v11998_v57 = vpop.f32.mrb[21].mxu0  ;;  %5135 = vrot.lane.b32.xlu1 %v11972_v33, %s7232_s19  ;;  %5261 = vrot.lane.b32.xlu0 %v11935_v38, %s7234_s21  ;;  %v4640_v22 = vadd.f32 %v4639_v30, %v11932_v2 }
 0x764   : > { %v4642_v27 = vadd.f32 %v11998_v57, %v11932_v2  ;;  %v14133_v57 = vld [vmem:[#allocation10_spill] sm:$0xff] }
 0x765   : > { %v12096_v36 = vmax.f32 %v4640_v22, 0.0 }
 0x767   : > { %5195 = vrot.lane.b32.xlu1 %v11957_v8, %s7233_s20  ;;  %5257 = vrot.lane.b32.xlu0 %v11946_v42, %s7234_s21  ;;  %14127 = vst [vmem:[#allocation113_spill] sm:$0xff] %v12096_v36 }
 0x76b   : > { %5259 = vrot.lane.b32.xlu1 %v11957_v8, %s7234_s21  ;;  %5325 = vrot.lane.b32.xlu0 %v11935_v38, %s7235_s22 }
 0x76f   : > { %5199 = vrot.lane.b32.xlu1 %v11972_v33, %s7233_s20  ;;  %5131 = vrot.lane.b32.xlu0 %v11957_v8, %s7232_s19 }
 0x773   : > { %5263 = vrot.lane.b32.xlu1 %v11972_v33, %s7234_s21  ;;  %5327 = vrot.lane.b32.xlu0 %v11972_v33, %s7235_s22 }
 0x774   : > { %v12021_v31 = vpop.f32.mrb[22].mxu0 }
 0x775   : > { %v12025_v58 = vpop.f32.mrb[23].mxu0 }
 0x777   : > { %5323 = vrot.lane.b32.xlu1 %v11957_v8, %s7235_s22  ;;  %5137 = vrot.lane.b32.xlu0 %v12023_v45, %s7232_s19 }
 0x77b   : > { %4881 = vrot.lane.b32.xlu1 %v12023_v45, %s7228_s15  ;;  %5201 = vrot.lane.b32.xlu0 %v12023_v45, %s7233_s20 }
 0x77f   : > { %4945 = vrot.lane.b32.xlu1 %v12023_v45, %s7229_s16  ;;  %5265 = vrot.lane.b32.xlu0 %v12023_v45, %s7234_s21 }
 0x783   : > { %5329 = vrot.lane.b32.xlu1 %v12023_v45, %s7235_s22  ;;  %4885 = vrot.lane.b32.xlu0 %v12040_v63, %s7228_s15 }
 0x787   : > { %5141 = vrot.lane.b32.xlu1 %v12040_v63, %s7232_s19  ;;  %4949 = vrot.lane.b32.xlu0 %v12040_v63, %s7229_s16 }
 0x78b   : > { %5205 = vrot.lane.b32.xlu1 %v12040_v63, %s7233_s20  ;;  %5009 = vrot.lane.b32.xlu0 %v12023_v45, %s7230_s17 }
 0x78f   : > { %5269 = vrot.lane.b32.xlu1 %v12040_v63, %s7234_s21  ;;  %5073 = vrot.lane.b32.xlu0 %v12023_v45, %s7231_s18  ;;  %v14135_v45 = vld [vmem:[#allocation8_spill] sm:$0xff] }
 0x793   : > { %5333 = vrot.lane.b32.xlu1 %v12040_v63, %s7235_s22  ;;  %5013 = vrot.lane.b32.xlu0 %v12040_v63, %s7230_s17 }
 0x797   : > { %4887 = vrot.lane.b32.xlu1 %v12064_v43, %s7228_s15  ;;  %5077 = vrot.lane.b32.xlu0 %v12040_v63, %s7231_s18 }
 0x79b   : > { %4951 = vrot.lane.b32.xlu1 %v12064_v43, %s7229_s16  ;;  %4883 = vrot.lane.b32.xlu0 %v12071_v29, %s7228_s15 }
 0x79f   : > { %5011 = vrot.lane.b32.xlu1 %v12071_v29, %s7230_s17  ;;  %4947 = vrot.lane.b32.xlu0 %v12071_v29, %s7229_s16 }
 0x7a3   : > { %5075 = vrot.lane.b32.xlu1 %v12071_v29, %s7231_s18  ;;  %5139 = vrot.lane.b32.xlu0 %v12071_v29, %s7232_s19 }
 0x7a7   : > { %5015 = vrot.lane.b32.xlu1 %v12064_v43, %s7230_s17  ;;  %5143 = vrot.lane.b32.xlu0 %v12064_v43, %s7232_s19 }
 0x7ab   : > { %5079 = vrot.lane.b32.xlu1 %v12064_v43, %s7231_s18  ;;  %5203 = vrot.lane.b32.xlu0 %v12071_v29, %s7233_s20 }
 0x7ad   : > { %v12098_v55 = vpop.permute.xlu1 %5193  ;;  %v12100_v46 = vpop.permute.xlu0 %4873 }
 0x7ae   : > { %14128 = vst [vmem:[#allocation112_spill] sm:$0xff] %v12098_v55 }
 0x7af   : > { %5145 = vrot.lane.b32.xlu1 %v12096_v36, %s7232_s19  ;;  %5267 = vrot.lane.b32.xlu0 %v12071_v29, %s7234_s21 }
 0x7b1   : > { %v12106_v32 = vpop.permute.xlu1 %5321  ;;  %v12108_v30 = vpop.permute.xlu0 %4937 }
 0x7b2   : > { %14129 = vst [vmem:[#allocation119_spill] sm:$0xff] %v12106_v32  ;;  %v14142_v32 = vld [vmem:[#allocation15_spill] sm:$0xff] }
 0x7b3   : > { %5209 = vrot.lane.b32.xlu1 %v12096_v36, %s7233_s20  ;;  %5207 = vrot.lane.b32.xlu0 %v12064_v43, %s7233_s20 }
 0x7b5   : > { %v4876_v22 = vpop.permute.xlu1 %4875  ;;  %v4878_v28 = vpop.permute.xlu0 %4877 }
 0x7b6   : > { %v4919_v14 = vsel %vm584_vm1, %v12100_v46, %v4876_v22 }
 0x7b7   : > { %5273 = vrot.lane.b32.xlu1 %v12096_v36, %s7234_s21  ;;  %5271 = vrot.lane.b32.xlu0 %v12064_v43, %s7234_s21  ;;  %v4922_v25 = vmul.f32 %v4919_v14, %v14130_v21  ;;  %v12149_v21 = vmax.f32 %v4642_v27, 0.0 }
 0x7b9   : > { %v4940_v17 = vpop.permute.xlu1 %4939  ;;  %v4942_v1 = vpop.permute.xlu0 %4941  ;;  %14132 = vst [vmem:[#allocation118_spill] sm:$0xff] %v12149_v21 }
 0x7ba   : > { %v4983_v61 = vsel %vm777_vm2, %v12108_v30, %v4940_v17 }
 0x7bb   : > { %v4986_v7 = vmul.f32 %v4983_v61, %v14131_v54  ;;  %5337 = vrot.lane.b32.xlu1 %v12096_v36, %s7235_s22  ;;  %5331 = vrot.lane.b32.xlu0 %v12071_v29, %s7235_s22  ;;  %v4982_v54 = vsel %vm777_vm2, %v4940_v17, %v4942_v1 }
 0x7bc   : > { %v4987_v17 = vmul.f32 %v4982_v54, %v14133_v57 }
 0x7bd   : > { %v12136_v20 = vpop.permute.xlu1 %4879  ;;  %v12138_v51 = vpop.permute.xlu0 %5001  ;;  %v6932_v60 = vpack.c.bf16 %v4986_v7, %v4922_v25  ;;  %v4918_v7 = vsel %vm584_vm1, %v4876_v22, %v4878_v28 }
 0x7be   : > { %v4917_v61 = vsel %vm584_vm1, %v4878_v28, %v12136_v20  ;;  %v14136_v28 = vld [vmem:[#allocation6_spill] sm:$0xff] }
 0x7bf   : > { %5149 = vrot.lane.b32.xlu1 %v12132_v62, %s7232_s19  ;;  %5335 = vrot.lane.b32.xlu0 %v12064_v43, %s7235_s22  ;;  %v4924_v50 = vmul.f32 %v4917_v61, %v14134_v0  ;;  %v4923_v22 = vmul.f32 %v4918_v7, %v14136_v28 }
 0x7c0   : > { %6933 = vmatprep.subr.bf16.mxu0 %v6932_v60  ;;  %v4713_v60 = vadd.f32 %v11943_v24, %v11932_v2 }
 0x7c1   : > { %v12151_v14 = vpop.permute.xlu1 %4943  ;;  %v12153_v53 = vpop.permute.xlu0 %5065  ;;  %v6950_v54 = vpack.c.bf16 %v4987_v17, %v4923_v22  ;;  %v14140_v22 = vld [vmem:[#allocation12_spill] sm:$0xff] }
 0x7c2   : > { %v4981_v25 = vsel %vm777_vm2, %v4942_v1, %v12151_v14  ;;  %v12176_v0 = vmax.f32 %v4713_v60, 0.0  ;;  %v14139_v60 = vld [vmem:[#allocation20_spill] sm:$0xff] }
 0x7c3   : > { %v4988_v29 = vmul.f32 %v4981_v25, %v14135_v45  ;;  %4891 = vrot.lane.b32.xlu1 %v12149_v21, %s7228_s15  ;;  %4889 = vrot.lane.b32.xlu0 %v12096_v36, %s7228_s15 }
 0x7c5   : > { %v12170_v27 = vpop.permute.xlu1 %5003  ;;  %v5006_v1 = vpop.permute.xlu0 %5005  ;;  %v6948_v26 = vpack.c.bf16 %v4988_v29, %v4924_v50 }
 0x7c6   : > { %v5046_v57 = vsel %vm970_vm3, %v12170_v27, %v5006_v1 }
 0x7c7   : > { %4955 = vrot.lane.b32.xlu1 %v12149_v21, %s7229_s16  ;;  %4953 = vrot.lane.b32.xlu0 %v12096_v36, %s7229_s16  ;;  %v5051_v42 = vmul.f32 %v5046_v57, %v14142_v32 }
 0x7c8   : > { %6949 = vmatprep.subr.bf16.mxu1 %v6948_v26 }
 0x7c9   : > { %6951 = vmatpush1.bf16.msra.mxu1 %v6950_v54  ;;  %v12178_v45 = vpop.permute.xlu1 %5067  ;;  %v5070_v24 = vpop.permute.xlu0 %5069 }
 0x7ca   : > { %v5110_v26 = vsel %vm1163_vm4, %v12178_v45, %v5070_v24 }
 0x7cb   : > { %4895 = vrot.lane.b32.xlu1 %v12176_v0, %s7228_s15  ;;  %4893 = vrot.lane.b32.xlu0 %v12132_v62, %s7228_s15  ;;  %v5115_v28 = vmul.f32 %v5110_v26, %v14139_v60 }
 0x7cd   : > { %v12184_v50 = vpop.permute.xlu1 %5007  ;;  %v12186_v29 = vpop.permute.xlu0 %5129  ;;  %v6954_v23 = vpack.c.bf16 %v5115_v28, %v5051_v42 }
 0x7ce   : > { %14137 = vst [vmem:[#allocation24_spill] sm:$0xff] %v12186_v29  ;;  %v5045_v61 = vsel %vm970_vm3, %v5006_v1, %v12184_v50 }
 0x7cf   : > { %4959 = vrot.lane.b32.xlu1 %v12176_v0, %s7229_s16  ;;  %4957 = vrot.lane.b32.xlu0 %v12132_v62, %s7229_s16  ;;  %v5052_v54 = vmul.f32 %v5045_v61, %v14140_v22 }
 0x7d1   : > { %v12198_v7 = vpop.permute.xlu1 %5071  ;;  %v12200_v25 = vpop.permute.xlu0 %5197 }
 0x7d2   : > { %14138 = vst [vmem:[#allocation23_spill] sm:$0xff] %v12200_v25  ;;  %v5109_v17 = vsel %vm1163_vm4, %v5070_v24, %v12198_v7 }
 0x7d3   : > { %v5116_v41 = vmul.f32 %v5109_v17, %v14141_v34  ;;  %5019 = vrot.lane.b32.xlu1 %v12149_v21, %s7230_s17  ;;  %5017 = vrot.lane.b32.xlu0 %v12096_v36, %s7230_s17 }
 0x7d5   : > { %v5136_v55 = vpop.permute.xlu1 %5135  ;;  %v12216_v1 = vpop.permute.xlu0 %5261  ;;  %v6952_v48 = vpack.c.bf16 %v5116_v41, %v5052_v54  ;;  %v4782_v41 = vadd.f32 %v12021_v31, %v11932_v2  ;;  %v14152_v54 = vld [vmem:[#allocation25_spill] sm:$0xff] }
 0x7d6   : > { %14143 = vst [vmem:[#allocation14_spill] sm:$0xff] %v12216_v1 }
 0x7d7   : > { %5083 = vrot.lane.b32.xlu1 %v12149_v21, %s7231_s18  ;;  %5081 = vrot.lane.b32.xlu0 %v12096_v36, %s7231_s18 }
 0x7d8   : > { %6953 = vmatprep.subr.bf16.mxu1 %v6952_v48  ;;  %v4855_v48 = vadd.f32 %v11961_v56, %v11932_v2  ;;  %v5173_v56 = vsel %vm1356_vm5, %v12089_v47, %v5136_v55 }
 0x7d9   : > { %6955 = vmatpush1.bf16.msra.mxu1 %v6954_v23  ;;  %v12222_v34 = vpop.permute.xlu1 %5195  ;;  %v12224_v24 = vpop.permute.xlu0 %5257  ;;  %v12242_v23 = vmax.f32 %v4782_v41, 0.0  ;;  %v5179_v41 = vmul.f32 %v5173_v56, %v14152_v54 }
 0x7da   : > { %14144 = vst [vmem:[#allocation122_spill] sm:$0xff] %v12222_v34  ;;  %14145 = vst [vmem:[#allocation120_spill] sm:$0xff] %v12224_v24  ;;  %v12250_v31 = vmax.f32 %v4855_v48, 0.0  ;;  %v14153_v48 = vld [vmem:[#allocation22_spill] sm:$0xff] }
 0x7db   : > { %5023 = vrot.lane.b32.xlu1 %v12176_v0, %s7230_s17  ;;  %5021 = vrot.lane.b32.xlu0 %v12132_v62, %s7230_s17  ;;  %14148 = vst [vmem:[#allocation57_spill] sm:$0xff] %v12242_v23  ;;  %v6958_v34 = vpack.c.bf16 %v5179_v41, %v11935_v38 }
 0x7dc   : > { %14149 = vst [vmem:[#allocation58_spill] sm:$0xff] %v12250_v31 }
 0x7dd   : > { %v12232_v32 = vpop.permute.xlu1 %5259  ;;  %v12234_v42 = vpop.permute.xlu0 %5325 }
 0x7de   : > { %14146 = vst [vmem:[#allocation121_spill] sm:$0xff] %v12232_v32  ;;  %14147 = vst [vmem:[#allocation135_spill] sm:$0xff] %v12234_v42 }
 0x7df   : > { %5087 = vrot.lane.b32.xlu1 %v12176_v0, %s7231_s18  ;;  %5085 = vrot.lane.b32.xlu0 %v12132_v62, %s7231_s18 }
 0x7e1   : > { %v5200_v26 = vpop.permute.xlu1 %5199  ;;  %v12244_v61 = vpop.permute.xlu0 %5131 }
 0x7e2   : > { %v5237_v38 = vsel %vm1549_vm6, %v12200_v25, %v5200_v26  ;;  %v14158_v25 = vld [vmem:[#allocation32_spill] sm:$0xff] }
 0x7e3   : > { %5153 = vrot.lane.b32.xlu1 %v12242_v23, %s7232_s19  ;;  %5147 = vrot.lane.b32.xlu0 %v12149_v21, %s7232_s19 }
 0x7e5   : > { %v5264_v57 = vpop.permute.xlu1 %5263  ;;  %v5328_v17 = vpop.permute.xlu0 %5327 }
 0x7e7   : > { %4967 = vrot.lane.b32.xlu1 %v12250_v31, %s7229_s16  ;;  %5151 = vrot.lane.b32.xlu0 %v12176_v0, %s7232_s19 }
 0x7e9   : > { %v12259_v60 = vpop.permute.xlu1 %5323  ;;  %v12261_v28 = vpop.permute.xlu0 %5137 }
 0x7ea   : > { %14150 = vst [vmem:[#allocation132_spill] sm:$0xff] %v12259_v60  ;;  %14151 = vst [vmem:[#allocation133_spill] sm:$0xff] %v12261_v28  ;;  %v5172_v22 = vsel %vm1356_vm5, %v5136_v55, %v12261_v28  ;;  %v5301_v55 = vsel %vm1742_vm7, %v12216_v1, %v5264_v57 }
 0x7eb   : > { %v5180_v36 = vmul.f32 %v5172_v22, %v14153_v48  ;;  %5095 = vrot.lane.b32.xlu1 %v12250_v31, %s7231_s18  ;;  %5211 = vrot.lane.b32.xlu0 %v12149_v21, %s7233_s20 }
 0x7ed   : > { %v12272_v8 = vpop.permute.xlu1 %4881  ;;  %v12274_v24 = vpop.permute.xlu0 %5201  ;;  %v6956_v60 = vpack.c.bf16 %v5180_v36, %v11972_v33 }
 0x7ee   : > { %v4916_v56 = vsel %vm584_vm1, %v12136_v20, %v12272_v8  ;;  %v5236_v33 = vsel %vm1549_vm6, %v5200_v26, %v12274_v24  ;;  %v14154_v20 = vld [vmem:[#allocation35_spill] sm:$0xff] }
 0x7ef   : > { %5213 = vrot.lane.b32.xlu1 %v12132_v62, %s7233_s20  ;;  %4903 = vrot.lane.b32.xlu0 %v12250_v31, %s7228_s15  ;;  %v5307_v54 = vmul.f32 %v5301_v55, %v14154_v20  ;;  %v12301_v41 = vmul.f32 %v4916_v56, %v14067_v9  ;;  %v14156_v26 = vld [vmem:[#allocation27_spill] sm:$0xff]  ;;  %v14159_v9 = vld [vmem:[#allocation30_spill] sm:$0xff]  ;;  %v7204_v20 = vld [vmem:[%s13248_s0 + $0x98] ss:$0 sm:$0xff] }
 0x7f0   : > { %6957 = vmatprep.subr.bf16.mxu1 %v6956_v60  ;;  %v5243_v55 = vmul.f32 %v5237_v38, %v14159_v9 }
 0x7f1   : > { %6959 = vmatpush1.bf16.msra.mxu1 %v6958_v34  ;;  %v12295_v36 = vpop.permute.xlu1 %4945  ;;  %v12297_v22 = vpop.permute.xlu0 %5265  ;;  %14155 = vst [vmem:[#allocation40_spill] sm:$0xff] %v12301_v41  ;;  %v5244_v34 = vmul.f32 %v5236_v33, %v14156_v26 }
 0x7f2   : > { %v4980_v48 = vsel %vm777_vm2, %v12151_v14, %v12295_v36  ;;  %v5300_v60 = vsel %vm1742_vm7, %v5264_v57, %v12297_v22  ;;  %v14164_v14 = vld [vmem:[#allocation38_spill] sm:$0xff] }
 0x7f3   : > { %v12312_v28 = vmul.f32 %v4980_v48, %v14069_v6  ;;  %v5308_v32 = vmul.f32 %v5300_v60, %v14158_v25  ;;  %5277 = vrot.lane.b32.xlu1 %v12132_v62, %s7234_s21  ;;  %5031 = vrot.lane.b32.xlu0 %v12250_v31, %s7230_s17  ;;  %v6962_v25 = vpack.c.bf16 %v5307_v54, %v5243_v55  ;;  %v7205_v60 = vld [vmem:[%s13248_s0 + $0x90] ss:$0 sm:$0xff] }
 0x7f5   : > { %14157 = vst [vmem:[#allocation92_spill] sm:$0xff] %v12312_v28  ;;  %v12322_v56 = vpop.permute.xlu1 %5329  ;;  %v4886_v57 = vpop.permute.xlu0 %4885  ;;  %v6960_v33 = vpack.c.bf16 %v5308_v32, %v5244_v34  ;;  %v5365_v32 = vsel %vm1935_vm8, %v12234_v42, %v5328_v17  ;;  %v4853_v34 = vadd.f32 %v11959_v11, %v11932_v2 }
 0x7f6   : > { %v5364_v6 = vsel %vm1935_vm8, %v5328_v17, %v12322_v56  ;;  %v5371_v26 = vmul.f32 %v7205_v60, %v5365_v32  ;;  %v12349_v17 = vld [vmem:[%s13256_s8] sm:$0xff] }
 0x7f7   : > { %v5372_v48 = vmul.f32 %v7204_v20, %v5364_v6  ;;  %5217 = vrot.lane.b32.xlu1 %v12242_v23, %s7233_s20  ;;  %5275 = vrot.lane.b32.xlu0 %v12149_v21, %s7234_s21  ;;  %v12365_v11 = vmax.f32 %v4853_v34, 0.0 }
 0x7f8   : > { %6961 = vmatprep.subr.bf16.mxu1 %v6960_v33 }
 0x7f9   : > { %6963 = vmatpush1.bf16.msra.mxu1 %v6962_v25  ;;  %v12337_v38 = vpop.permute.xlu1 %5141  ;;  %v4950_v54 = vpop.permute.xlu0 %4949  ;;  %14160 = vst [vmem:[#allocation134_spill] sm:$0xff] %v12365_v11 }
 0x7fa   : > { %5482 = vmatprep.subr.mxu1 %v5372_v48 }
 0x7fb   : > { %5281 = vrot.lane.b32.xlu1 %v12242_v23, %s7234_s21  ;;  %5215 = vrot.lane.b32.xlu0 %v12176_v0, %s7233_s20 }
 0x7fd   : > { %5483 = vmatpush1.msra.mxu1 %v5371_v26  ;;  %v12353_v9 = vpop.permute.xlu1 %5205  ;;  %v5010_v55 = vpop.permute.xlu0 %5009 }
 0x7fe   : > { %6360 = vmatmul.mubr.msk.f32.vlgmr.msra.gmra.mrb[24].mxu1 %vm3179_vm9, %v12349_v17  ;;  %v5044_v33 = vsel %vm970_vm3, %v12184_v50, %v5010_v55 }
 0x7ff   : > { %5341 = vrot.lane.b32.xlu1 %v12132_v62, %s7235_s22  ;;  %5279 = vrot.lane.b32.xlu0 %v12176_v0, %s7234_s21  ;;  %v12373_v48 = vmul.f32 %v5044_v33, %v14076_v13  ;;  %v4784_v13 = vadd.f32 %v12025_v58, %v11932_v2 }
 0x800   : > { %5672 = vmatprep.mubr.f32.mxu1 %v13911_v40 }
 0x801   : > { %v12367_v6 = vpop.permute.xlu1 %5269  ;;  %v5074_v25 = vpop.permute.xlu0 %5073  ;;  %14161 = vst [vmem:[#allocation37_spill] sm:$0xff] %v12373_v48  ;;  %v12401_v33 = vmax.f32 %v4784_v13, 0.0 }
 0x802   : > { %v5108_v20 = vsel %vm1163_vm4, %v12198_v7, %v5074_v25 }
 0x803   : > { %v12376_v32 = vmul.f32 %v5108_v20, %v14074_v5  ;;  %4965 = vrot.lane.b32.xlu1 %v12365_v11, %s7229_s16  ;;  %4897 = vrot.lane.b32.xlu0 %v12242_v23, %s7228_s15  ;;  %14163 = vst [vmem:[#allocation108_spill] sm:$0xff] %v12401_v33 }
 0x805   : > { %14162 = vst [vmem:[#allocation73_spill] sm:$0xff] %v12376_v32  ;;  %v12384_v60 = vpop.permute.xlu1 %5333  ;;  %v5014_v26 = vpop.permute.xlu0 %5013 }
 0x807   : > { %5345 = vrot.lane.b32.xlu1 %v12242_v23, %s7235_s22  ;;  %4961 = vrot.lane.b32.xlu0 %v12242_v23, %s7229_s16 }
 0x809   : > { %v12392_v5 = vpop.permute.xlu1 %4887  ;;  %v5078_v7 = vpop.permute.xlu0 %5077 }
 0x80a   : > { %v4913_v34 = vsel %vm584_vm1, %v4886_v57, %v12392_v5 }
 0x80b   : > { %5093 = vrot.lane.b32.xlu1 %v12365_v11, %s7231_s18  ;;  %5339 = vrot.lane.b32.xlu0 %v12149_v21, %s7235_s22  ;;  %v4928_v48 = vmul.f32 %v4913_v34, %v14164_v14  ;;  %v14165_v21 = vld [vmem:[#allocation42_spill] sm:$0xff]  ;;  %v14166_v34 = vld [vmem:[#allocation41_spill] sm:$0xff] }
 0x80d   : > { %v12403_v20 = vpop.permute.xlu1 %4951  ;;  %v4884_v50 = vpop.permute.xlu0 %4883 }
 0x80e   : > { %v4977_v2 = vsel %vm777_vm2, %v4950_v54, %v12403_v20  ;;  %v4915_v58 = vsel %vm584_vm1, %v12272_v8, %v4884_v50  ;;  %v4914_v13 = vsel %vm584_vm1, %v4884_v50, %v4886_v57  ;;  %v14167_v50 = vld [vmem:[#allocation45_spill] sm:$0xff] }
 0x80f   : > { %v4992_v32 = vmul.f32 %v4977_v2, %v14165_v21  ;;  %4899 = vrot.lane.b32.xlu1 %v12401_v33, %s7228_s15  ;;  %4901 = vrot.lane.b32.xlu0 %v12365_v11, %s7228_s15  ;;  %v12427_v14 = vmul.f32 %v4915_v58, %v14066_v16  ;;  %v4927_v2 = vmul.f32 %v4914_v13, %v14166_v34 }
 0x811   : > { %v5012_v41 = vpop.permute.xlu1 %5011  ;;  %v4948_v28 = vpop.permute.xlu0 %4947  ;;  %v6980_v42 = vpack.c.bf16 %v4992_v32, %v4928_v48 }
 0x812   : > { %v5043_v1 = vsel %vm970_vm3, %v5010_v55, %v5012_v41  ;;  %v4978_v8 = vsel %vm777_vm2, %v4948_v28, %v4950_v54  ;;  %v4979_v21 = vsel %vm777_vm2, %v12295_v36, %v4948_v28 }
 0x813   : > { %v12431_v57 = vmul.f32 %v4979_v21, %v14068_v52  ;;  %v4991_v48 = vmul.f32 %v4978_v8, %v14167_v50  ;;  %4963 = vrot.lane.b32.xlu1 %v12401_v33, %s7229_s16  ;;  %5025 = vrot.lane.b32.xlu0 %v12242_v23, %s7230_s17  ;;  %v12451_v32 = vmul.f32 %v5043_v1, %v14077_v44  ;;  %v14169_v8 = vld [vmem:[#allocation59_spill] sm:$0xff]  ;;  %s13132_s16 = scalar_lea.vmem %s13260_s12, %s6387_s14 }
 0x814   : > { %6981 = vmatprep.subr.bf16.mxu1 %v6980_v42 }
 0x815   : > { %v6982_v54 = vpack.c.bf16 %v4991_v48, %v4927_v2  ;;  %v5076_v55 = vpop.permute.xlu1 %5075  ;;  %v12438_v28 = vpop.permute.xlu0 %5139  ;;  %14168 = vst [vmem:[#allocation139_spill] sm:$0xff] %v12451_v32 }
 0x816   : > { %v5107_v52 = vsel %vm1163_vm4, %v5074_v25, %v5076_v55  ;;  %v12448_v36 = vsel %vm1356_vm5, %v12438_v28, %v12337_v38  ;;  %v5106_v44 = vsel %vm1163_vm4, %v5076_v55, %v5078_v7 }
 0x817   : > { %v12454_v42 = vmul.f32 %v5107_v52, %v14075_v49  ;;  %5027 = vrot.lane.b32.xlu1 %v12401_v33, %s7230_s17  ;;  %5089 = vrot.lane.b32.xlu0 %v12242_v23, %s7231_s18  ;;  %v5042_v49 = vsel %vm970_vm3, %v5012_v41, %v5014_v26  ;;  %v5119_v21 = vmul.f32 %v5106_v44, %v14169_v8  ;;  %v14171_v52 = vld [vmem:[#allocation46_spill] sm:$0xff]  ;;  %v14172_v8 = vld [vmem:[#allocation53_spill] sm:$0xff] }
 0x818   : > { %6983 = vmatpush1.bf16.msra.mxu1 %v6982_v54  ;;  %v14170_v54 = vld [vmem:[#allocation49_spill] sm:$0xff] }
 0x819   : > { %v12460_v25 = vpop.permute.xlu1 %5015  ;;  %v5144_v58 = vpop.permute.xlu0 %5143  ;;  %v5055_v55 = vmul.f32 %v5042_v49, %v14170_v54 }
 0x81a   : > { %v5041_v1 = vsel %vm970_vm3, %v5014_v26, %v12460_v25  ;;  %v5169_v50 = vsel %vm1356_vm5, %v12337_v38, %v5144_v58 }
 0x81b   : > { %5091 = vrot.lane.b32.xlu1 %v12401_v33, %s7231_s18  ;;  %5343 = vrot.lane.b32.xlu0 %v12176_v0, %s7235_s22  ;;  %v5056_v44 = vmul.f32 %v5041_v1, %v14171_v52  ;;  %v6986_v38 = vpack.c.bf16 %v5119_v21, %v5055_v55 }
 0x81d   : > { %v12476_v34 = vpop.permute.xlu1 %5079  ;;  %v5204_v2 = vpop.permute.xlu0 %5203 }
 0x81e   : > { %v5105_v41 = vsel %vm1163_vm4, %v5078_v7, %v12476_v34  ;;  %v5234_v26 = vsel %vm1549_vm6, %v5204_v2, %v12353_v9  ;;  %v5235_v48 = vsel %vm1549_vm6, %v12274_v24, %v5204_v2  ;;  %v14173_v7 = vld [vmem:[#allocation67_spill] sm:$0xff] }
 0x81f   : > { %v5120_v13 = vmul.f32 %v5105_v41, %v14172_v8  ;;  %5157 = vrot.lane.b32.xlu1 %v12365_v11, %s7232_s19  ;;  %5029 = vrot.lane.b32.xlu0 %v12365_v11, %s7230_s17  ;;  %v5183_v16 = vmul.f32 %v5169_v50, %v14173_v7  ;;  %v12499_v23 = vmul.f32 %v5235_v48, %v14081_v59  ;;  %v14174_v50 = vld [vmem:[#allocation63_spill] sm:$0xff] }
 0x820   : > { %v12504_v1 = vmul.f32 %v5234_v26, %v14082_v10 }
 0x821   : > { %v12501_v32 = vpop.permute.xlu1 %5145  ;;  %v5268_v24 = vpop.permute.xlu0 %5267  ;;  %v6984_v49 = vpack.c.bf16 %v5120_v13, %v5056_v44  ;;  %v6990_v26 = vpack.c.bf16 %v5183_v16, %v12040_v63  ;;  %v14175_v44 = vld [vmem:[#allocation75_spill] sm:$0xff] }
 0x822   : > { %v5168_v2 = vsel %vm1356_vm5, %v5144_v58, %v12501_v32  ;;  %v5298_v21 = vsel %vm1742_vm7, %v5268_v24, %v12367_v6  ;;  %v5299_v59 = vsel %vm1742_vm7, %v12297_v22, %v5268_v24 }
 0x823   : > { %v5184_v41 = vmul.f32 %v5168_v2, %v14174_v50  ;;  %v12517_v48 = vmul.f32 %v5299_v59, %v14083_v37  ;;  %v12520_v10 = vmul.f32 %v5298_v21, %v14084_v35  ;;  %5219 = vrot.lane.b32.xlu1 %v12401_v33, %s7233_s20  ;;  %6985 = vmatprep.subr.bf16.mxu1 %v6984_v49  ;;  %v14178_v49 = vld [vmem:[#allocation76_spill] sm:$0xff] }
 0x824   : > { %5155 = vrot.lane.b32.xlu0 %v12401_v33, %s7232_s19  ;;  %6987 = vmatpush1.bf16.msra.mxu1 %v6986_v38  ;;  %v14176_v38 = vld [vmem:[#allocation69_spill] sm:$0xff] }
 0x825   : > { %v12528_v22 = vpop.permute.xlu1 %5209  ;;  %v5208_v13 = vpop.permute.xlu0 %5207  ;;  %v6988_v37 = vpack.c.bf16 %v5184_v41, %v12064_v43 }
 0x826   : > { %v5232_v54 = vsel %vm1549_vm6, %v5208_v13, %v12528_v22  ;;  %v5233_v55 = vsel %vm1549_vm6, %v12353_v9, %v5208_v13  ;;  %v14177_v9 = vld [vmem:[#allocation79_spill] sm:$0xff] }
 0x827   : > { %5283 = vrot.lane.b32.xlu1 %v12401_v33, %s7234_s21  ;;  %6989 = vmatprep.subr.bf16.mxu1 %v6988_v37  ;;  %v5247_v8 = vmul.f32 %v5233_v55, %v14175_v44  ;;  %v5248_v7 = vmul.f32 %v5232_v54, %v14176_v38  ;;  %v7206_v55 = vld [vmem:[%s13248_s0 + $0xb0] ss:$0 sm:$0xff] }
 0x828   : > { %5159 = vrot.lane.b32.xlu0 %v12250_v31, %s7232_s19  ;;  %6991 = vmatpush1.bf16.msra.mxu1 %v6990_v26  ;;  %s6318_s19 = sshll.u32 %s14295_s28, 1 }
 0x829   : > { %v12544_v43 = vpop.permute.xlu1 %5273  ;;  %v5272_v52 = vpop.permute.xlu0 %5271 }
 0x82a   : > { %v5296_v63 = vsel %vm1742_vm7, %v5272_v52, %v12544_v43  ;;  %v5297_v16 = vsel %vm1742_vm7, %v12367_v6, %v5272_v52 }
 0x82b   : > { %v5311_v24 = vmul.f32 %v5297_v16, %v14177_v9  ;;  %v5312_v2 = vmul.f32 %v5296_v63, %v14178_v49  ;;  %5223 = vrot.lane.b32.xlu1 %v12250_v31, %s7233_s20  ;;  %v7207_v63 = vld [vmem:[%s13248_s0 + $0xb8] ss:$0 sm:$0xff] }
 0x82c   : > { %5221 = vrot.lane.b32.xlu0 %v12365_v11, %s7233_s20 }
 0x82d   : > { %v6994_v21 = vpack.c.bf16 %v5311_v24, %v5247_v8  ;;  %v12560_v59 = vpop.permute.xlu1 %5337  ;;  %v5332_v50 = vpop.permute.xlu0 %5331  ;;  %v6992_v41 = vpack.c.bf16 %v5312_v2, %v5248_v7  ;;  %v5386_v24 = vld [vmem:[%s13257_s9] sm:$0xff] }
 0x82e   : > { %v12565_v6 = vsel %vm1935_vm8, %v5332_v50, %v12384_v60  ;;  %v12570_v13 = vsel %vm1935_vm8, %v12322_v56, %v5332_v50 }
 0x82f   : > { %5347 = vrot.lane.b32.xlu1 %v12401_v33, %s7235_s22  ;;  %6993 = vmatprep.subr.bf16.mxu1 %v6992_v41 }
 0x830   : > { %5285 = vrot.lane.b32.xlu0 %v12365_v11, %s7234_s21  ;;  %6995 = vmatpush1.bf16.msra.mxu1 %v6994_v21 }
 0x831   : > { %v12576_v37 = vpop.permute.xlu1 %5149  ;;  %v5336_v26 = vpop.permute.xlu0 %5335 }
 0x832   : > { %v5360_v54 = vsel %vm1935_vm8, %v5336_v26, %v12560_v59  ;;  %v5361_v56 = vsel %vm1935_vm8, %v12384_v60, %v5336_v26 }
 0x833   : > { %v5375_v52 = vmul.f32 %v7206_v55, %v5361_v56  ;;  %v5376_v16 = vmul.f32 %v7207_v63, %v5360_v54  ;;  %5351 = vrot.lane.b32.xlu1 %v12250_v31, %s7235_s22  ;;  %v14179_v63 = vld [vmem:[#allocation90_spill] sm:$0xff] }
 0x834   : > { %5287 = vrot.lane.b32.xlu0 %v12250_v31, %s7234_s21  ;;  %v14208_v31 = vld [vmem:[#allocation112_spill] sm:$0xff] }
 0x835   : > { %v4892_v44 = vpop.permute.xlu1 %4891  ;;  %5624 = vmatprep.subr.mxu1 %v5376_v16  ;;  %v4890_v8 = vpop.permute.xlu0 %4889 }
 0x836   : > { %v4911_v60 = vsel %vm584_vm1, %v4890_v8, %v4892_v44  ;;  %v4912_v38 = vsel %vm584_vm1, %v12392_v5, %v4890_v8  ;;  %5625 = vmatpush1.msra.mxu1 %v5375_v52  ;;  %v14180_v8 = vld [vmem:[#allocation86_spill] sm:$0xff] }
 0x837   : > { %6362 = vmatmul.mubr.msk.f32.vlgmr.msra.gmra.mrb[26].mxu1 %vm3179_vm9, %v12349_v17  ;;  %v12613_v2 = vmul.f32 %v4912_v38, %v14088_v19  ;;  %v12616_v21 = vmul.f32 %v4911_v60, %v14087_v4  ;;  %v14181_v38 = vld [vmem:[#allocation100_spill] sm:$0xff] }
 0x838   : > { %5349 = vrot.lane.b32.xlu0 %v12365_v11, %s7235_s22  ;;  %5814 = vmatprep.mubr.f32.mxu1 %v13911_v40  ;;  %s453_s22 = scalar_lea.vmem %s13261_s13, %s6318_s19 }
 0x839   : > { %v4956_v7 = vpop.permute.xlu1 %4955  ;;  %v4954_v9 = vpop.permute.xlu0 %4953 }
 0x83a   : > { %v4975_v49 = vsel %vm777_vm2, %v4954_v9, %v4956_v7  ;;  %v4976_v5 = vsel %vm777_vm2, %v12403_v20, %v4954_v9 }
 0x83b   : > { %v12619_v50 = vmul.f32 %v4976_v5, %v14086_v15  ;;  %v12622_v41 = vmul.f32 %v4975_v49, %v14085_v39 }
 0x83c   : > { %5389 = vperm.xlu0 %7078, %v5386_v24   ;;  %v14182_v24 = vld [vmem:[#allocation96_spill] sm:$0xff] }
 0x83d   : > { %v12626_v54 = vpop.permute.xlu1 %4895  ;;  %v4894_v56 = vpop.permute.xlu0 %4893 }
 0x83e   : > { %v4909_v4 = vsel %vm584_vm1, %v4894_v56, %v12626_v54  ;;  %v4910_v15 = vsel %vm584_vm1, %v4892_v44, %v4894_v56 }
 0x83f   : > { %v4931_v16 = vmul.f32 %v4910_v15, %v14179_v63  ;;  %v4932_v60 = vmul.f32 %v4909_v4, %v14180_v8 }
 0x841   : > { %v12635_v20 = vpop.permute.xlu1 %4959  ;;  %v4958_v39 = vpop.permute.xlu0 %4957 }
 0x842   : > { %v4973_v55 = vsel %vm777_vm2, %v4958_v39, %v12635_v20  ;;  %v4974_v52 = vsel %vm777_vm2, %v4956_v7, %v4958_v39 }
 0x843   : > { %v4995_v9 = vmul.f32 %v4974_v52, %v14181_v38  ;;  %v4996_v49 = vmul.f32 %v4973_v55, %v14182_v24  ;;  %v14183_v38 = vld [vmem:[#allocation107_spill] sm:$0xff]  ;;  %v14184_v24 = vld [vmem:[#allocation104_spill] sm:$0xff] }
 0x845   : > { %v7014_v5 = vpack.c.bf16 %v4995_v9, %v4931_v16  ;;  %v5020_v44 = vpop.permute.xlu1 %5019  ;;  %v5018_v56 = vpop.permute.xlu0 %5017  ;;  %v7012_v26 = vpack.c.bf16 %v4996_v49, %v4932_v60 }
 0x846   : > { %v12648_v19 = vsel %vm970_vm3, %v5018_v56, %v5020_v44  ;;  %v5040_v7 = vsel %vm970_vm3, %v12460_v25, %v5018_v56 }
 0x847   : > { %7013 = vmatprep.subr.bf16.mxu1 %v7012_v26  ;;  %v12662_v55 = vmul.f32 %v5040_v7, %v14091_v3  ;;  %v14186_v7 = vld [vmem:[#allocation114_spill] sm:$0xff] }
 0x848   : > { %7015 = vmatpush1.bf16.msra.mxu1 %v7014_v5  ;;  %v14185_v5 = vld [vmem:[#allocation117_spill] sm:$0xff] }
 0x849   : > { %v12653_v15 = vpop.permute.xlu1 %5083  ;;  %v12655_v4 = vpop.permute.xlu0 %5081 }
 0x84a   : > { %v5104_v39 = vsel %vm1163_vm4, %v12476_v34, %v12655_v4 }
 0x84b   : > { %v12665_v52 = vmul.f32 %v5104_v39, %v14092_v12 }
 0x84d   : > { %v12669_v26 = vpop.permute.xlu1 %5023  ;;  %v5022_v63 = vpop.permute.xlu0 %5021 }
 0x84e   : > { %v5037_v16 = vsel %vm970_vm3, %v5022_v63, %v12669_v26  ;;  %v5038_v8 = vsel %vm970_vm3, %v5020_v44, %v5022_v63 }
 0x84f   : > { %v5059_v9 = vmul.f32 %v5038_v8, %v14183_v38  ;;  %v5060_v49 = vmul.f32 %v5037_v16, %v14184_v24 }
 0x851   : > { %v12676_v34 = vpop.permute.xlu1 %5087  ;;  %v5086_v3 = vpop.permute.xlu0 %5085 }
 0x852   : > { %v5101_v12 = vsel %vm1163_vm4, %v5086_v3, %v12676_v34  ;;  %v5102_v60 = vsel %vm1163_vm4, %v12653_v15, %v5086_v3  ;;  %v14188_v3 = vld [vmem:[#allocation51_spill] sm:$0xff] }
 0x853   : > { %v5123_v56 = vmul.f32 %v5102_v60, %v14185_v5  ;;  %v5124_v39 = vmul.f32 %v5101_v12, %v14186_v7  ;;  %v14189_v60 = vld [vmem:[#allocation9_spill] sm:$0xff]  ;;  %v5111_v5 = vsel %vm1163_vm4, %v12153_v53, %v12178_v45  ;;  %v14190_v7 = vld [vmem:[#allocation68_spill] sm:$0xff] }
 0x855   : > { %v7018_v44 = vpack.c.bf16 %v5123_v56, %v5059_v9  ;;  %v12688_v63 = vpop.permute.xlu1 %5153  ;;  %v12690_v25 = vpop.permute.xlu0 %5147  ;;  %v7016_v58 = vpack.c.bf16 %v5124_v39, %v5060_v49  ;;  %v5114_v39 = vmul.f32 %v5111_v5, %v14190_v7  ;;  %v14195_v7 = vld [vmem:[#allocation14_spill] sm:$0xff] }
 0x856   : > { %14187 = vst [vmem:[#allocation105_spill] sm:$0xff] %v12688_v63 }
 0x857   : > { %7017 = vmatprep.subr.bf16.mxu1 %v7016_v58 }
 0x858   : > { %7019 = vmatpush1.bf16.msra.mxu1 %v7018_v44  ;;  %v14191_v44 = vld [vmem:[#allocation61_spill] sm:$0xff] }
 0x859   : > { %v12692_v35 = vpop.permute.xlu1 %4967  ;;  %v5152_v33 = vpop.permute.xlu0 %5151 }
 0x85a   : > { %v5164_v8 = vsel %vm1356_vm5, %v5152_v33, %v12688_v63  ;;  %v5165_v16 = vsel %vm1356_vm5, %v12576_v37, %v5152_v33  ;;  %v4984_v33 = vsel %vm777_vm2, %v12692_v35, %v12108_v30  ;;  %v5174_v30 = vsel %vm1356_vm5, %v12244_v61, %v12089_v47  ;;  %v14214_v63 = vld [vmem:[#allocation132_spill] sm:$0xff] }
 0x85b   : > { %v5187_v12 = vmul.f32 %v5165_v16, %v14188_v3  ;;  %v5188_v38 = vmul.f32 %v5164_v8, %v14189_v60  ;;  %v4985_v8 = vmul.f32 %v4984_v33, %v14191_v44  ;;  %v14192_v16 = vld [vmem:[#allocation56_spill] sm:$0xff]  ;;  %v14193_v3 = vld [vmem:[#allocation62_spill] sm:$0xff]  ;;  %v5175_v47 = vsel %vm1356_vm5, %v12186_v29, %v12244_v61 }
 0x85c   : > { %v14197_v44 = vld [vmem:[#allocation72_spill] sm:$0xff] }
 0x85d   : > { %v7022_v9 = vpack.c.bf16 %v5187_v12, %v12132_v62  ;;  %v12703_v24 = vpop.permute.xlu1 %5095  ;;  %v12705_v58 = vpop.permute.xlu0 %5211  ;;  %v7020_v49 = vpack.c.bf16 %v5188_v38, %v12176_v0  ;;  %v5047_v62 = vsel %vm970_vm3, %v12138_v51, %v12170_v27 }
 0x85e   : > { %v5050_v12 = vmul.f32 %v5047_v62, %v14193_v3  ;;  %v5112_v60 = vsel %vm1163_vm4, %v12703_v24, %v12153_v53  ;;  %v14196_v53 = vld [vmem:[#allocation121_spill] sm:$0xff]  ;;  %v5231_v61 = vsel %vm1549_vm6, %v12528_v22, %v12705_v58  ;;  %v14200_v3 = vld [vmem:[#allocation122_spill] sm:$0xff] }
 0x85f   : > { %7021 = vmatprep.subr.bf16.mxu1 %v7020_v49  ;;  %v14194_v49 = vld [vmem:[#allocation80_spill] sm:$0xff] }
 0x860   : > { %7023 = vmatpush1.bf16.msra.mxu1 %v7022_v9  ;;  %v5178_v5 = vmul.f32 %v5174_v30, %v14194_v49  ;;  %v6936_v62 = vpack.c.bf16 %v5114_v39, %v5050_v12  ;;  %v14199_v30 = vld [vmem:[#allocation23_spill] sm:$0xff] }
 0x861   : > { %v12720_v56 = vpop.permute.xlu1 %5213  ;;  %v12722_v0 = vpop.permute.xlu0 %4903  ;;  %v14201_v39 = vld [vmem:[#allocation83_spill] sm:$0xff] }
 0x862   : > { %v4920_v45 = vsel %vm584_vm1, %v12722_v0, %v12100_v46  ;;  %v5177_v12 = vmul.f32 %v5175_v47, %v14201_v39  ;;  %v14206_v47 = vld [vmem:[#allocation94_spill] sm:$0xff] }
 0x863   : > { %v4921_v27 = vmul.f32 %v4920_v45, %v14192_v16  ;;  %v5302_v45 = vsel %vm1742_vm7, %v14196_v53, %v14195_v7  ;;  %v14198_v16 = vld [vmem:[#allocation66_spill] sm:$0xff] }
 0x865   : > { %v6934_v38 = vpack.c.bf16 %v4985_v8, %v4921_v27  ;;  %v12740_v9 = vpop.permute.xlu1 %5277  ;;  %v12742_v46 = vpop.permute.xlu0 %5031  ;;  %v5113_v8 = vmul.f32 %v5112_v60, %v14197_v44  ;;  %v14204_v44 = vld [vmem:[#allocation99_spill] sm:$0xff] }
 0x866   : > { %v5048_v33 = vsel %vm970_vm3, %v12742_v46, %v12138_v51  ;;  %v5238_v51 = vsel %vm1549_vm6, %v14200_v3, %v14199_v30  ;;  %v5306_v22 = vmul.f32 %v5302_v45, %v14204_v44  ;;  %v14209_v45 = vld [vmem:[#allocation89_spill] sm:$0xff] }
 0x867   : > { %v5049_v27 = vmul.f32 %v5048_v33, %v14198_v16  ;;  %6935 = vmatpush1.bf16.msra.mxu0 %v6934_v38  ;;  %v14203_v38 = vld [vmem:[#allocation120_spill] sm:$0xff]  ;;  %v14205_v16 = vld [vmem:[#allocation115_spill] sm:$0xff]  ;;  %v5242_v44 = vmul.f32 %v5238_v51, %v14209_v45 }
 0x868   : > { %6937 = vmatprep.subr.bf16.mxu0 %v6936_v62  ;;  %v5303_v33 = vsel %vm1742_vm7, %v14203_v38, %v14196_v53  ;;  %v6940_v30 = vpack.c.bf16 %v5178_v5, %v14205_v16  ;;  %v5239_v53 = vsel %vm1549_vm6, %v14208_v31, %v14200_v3  ;;  %v14210_v38 = vld [vmem:[#allocation101_spill] sm:$0xff] }
 0x869   : > { %v6938_v49 = vpack.c.bf16 %v5113_v8, %v5049_v27  ;;  %v12768_v7 = vpop.permute.xlu1 %5217  ;;  %v12770_v60 = vpop.permute.xlu0 %5275  ;;  %v12783_v8 = vmul.f32 %v5231_v61, %v14206_v47  ;;  %v14207_v27 = vld [vmem:[#allocation102_spill] sm:$0xff]  ;;  %v5305_v11 = vmul.f32 %v5303_v33, %v14210_v38  ;;  %v6944_v16 = vpack.c.bf16 %v5306_v22, %v5242_v44 }
 0x86a   : > { %14202 = vst [vmem:[#allocation136_spill] sm:$0xff] %v12768_v7  ;;  %v5295_v62 = vsel %vm1742_vm7, %v12544_v43, %v12770_v60  ;;  %v14211_v43 = vld [vmem:[#allocation116_spill] sm:$0xff] }
 0x86b   : > { %v12786_v39 = vmul.f32 %v5295_v62, %v14207_v27  ;;  %6939 = vmatpush1.bf16.msra.mxu0 %v6938_v49  ;;  %v6942_v29 = vpack.c.bf16 %v5177_v12, %v14211_v43  ;;  %v14212_v49 = vld [vmem:[#allocation93_spill] sm:$0xff]  ;;  %v14213_v27 = vld [vmem:[#allocation135_spill] sm:$0xff]  ;;  %v14216_v43 = vld [vmem:[#allocation124_spill] sm:$0xff] }
 0x86c   : > { %6941 = vmatprep.subr.bf16.mxu0 %v6940_v30  ;;  %v5241_v47 = vmul.f32 %v5239_v53, %v14212_v49  ;;  %v5366_v3 = vsel %vm1935_vm8, %v14214_v63, %v14213_v27  ;;  %v14215_v30 = vld [vmem:[#allocation119_spill] sm:$0xff] }
 0x86d   : > { %v12797_v61 = vpop.permute.xlu1 %5281  ;;  %v5216_v62 = vpop.permute.xlu0 %5215  ;;  %v5367_v53 = vsel %vm1935_vm8, %v14215_v30, %v14214_v63  ;;  %v14219_v63 = vld [vmem:[#allocation125_spill] sm:$0xff] }
 0x86e   : > { %v5228_v51 = vsel %vm1549_vm6, %v5216_v62, %v12768_v7  ;;  %v5229_v12 = vsel %vm1549_vm6, %v12720_v56, %v5216_v62  ;;  %v6946_v38 = vpack.c.bf16 %v5305_v11, %v5241_v47  ;;  %v14218_v47 = vld [vmem:[#allocation128_spill] sm:$0xff] }
 0x86f   : > { %6943 = vmatpush1.bf16.msra.mxu0 %v6942_v29  ;;  %v7208_v29 = vld [vmem:[%s13248_s0 + $0x88] ss:$0 sm:$0xff]  ;;  %v5251_v62 = vmul.f32 %v5229_v12, %v14216_v43 }
 0x870   : > { %6945 = vmatprep.subr.bf16.mxu0 %v6944_v16  ;;  %v5370_v45 = vmul.f32 %v7208_v29, %v5366_v3  ;;  %v14217_v16 = vld [vmem:[#allocation18_spill] sm:$0xff] }
 0x871   : > { %v12810_v33 = vpop.permute.xlu1 %5341  ;;  %v5280_v22 = vpop.permute.xlu0 %5279  ;;  %v5252_v49 = vmul.f32 %v5228_v51, %v14217_v16  ;;  %v7209_v3 = vld [vmem:[%s13248_s0 + $0x80] ss:$0 sm:$0xff]  ;;  %v14220_v51 = vld [vmem:[#allocation133_spill] sm:$0xff] }
 0x872   : > { %v5292_v44 = vsel %vm1742_vm7, %v5280_v22, %v12797_v61  ;;  %v5293_v11 = vsel %vm1742_vm7, %v12740_v9, %v5280_v22  ;;  %v5369_v29 = vmul.f32 %v7209_v3, %v5367_v53  ;;  %v5171_v12 = vsel %vm1356_vm5, %v14220_v51, %v12438_v28  ;;  %v14224_v28 = vld [vmem:[#allocation40_spill] sm:$0xff] }
 0x873   : > { %v5315_v27 = vmul.f32 %v5293_v11, %v14218_v47  ;;  %v5316_v5 = vmul.f32 %v5292_v44, %v14219_v63  ;;  %6947 = vmatpush1.bf16.msra.mxu0 %v6946_v38  ;;  %v14221_v38 = vld [vmem:[#allocation130_spill] sm:$0xff]  ;;  %v14223_v11 = vld [vmem:[#allocation92_spill] sm:$0xff]  ;;  %v14231_v63 = vld [vmem:[#allocation123_spill] sm:$0xff] }
 0x874   : > { %5411 = vmatprep.subr.mxu0 %v5370_v45  ;;  %v5182_v45 = vmul.f32 %v12448_v36, %v14221_v38  ;;  %v14225_v43 = vpack.c.bf16 %v14223_v11, %v14224_v28  ;;  %v14230_v47 = vld [vmem:[#allocation110_spill] sm:$0xff]  ;;  %v14236_v28 = vpack.c.bf16 %v12520_v10, %v12504_v1 }
 0x875   : > { %v7026_v30 = vpack.c.bf16 %v5315_v27, %v5251_v62  ;;  %v12832_v31 = vpop.permute.xlu1 %4965  ;;  %v12834_v7 = vpop.permute.xlu0 %4897  ;;  %v7024_v22 = vpack.c.bf16 %v5316_v5, %v5252_v49  ;;  %v14222_v5 = vpack.c.bf16 %v12431_v57, %v12427_v14  ;;  %v14226_v62 = vld [vmem:[#allocation139_spill] sm:$0xff]  ;;  %v14228_v14 = vld [vmem:[#allocation129_spill] sm:$0xff]  ;;  %v7211_v1 = vld [vmem:[%s13248_s0 + $0xa0] ss:$0 sm:$0xff] }
 0x876   : > { %v4908_v53 = vsel %vm584_vm1, %v12626_v54, %v12834_v7  ;;  %v14227_v16 = vpack.c.bf16 %v12454_v42, %v14226_v62  ;;  %v5181_v57 = vmul.f32 %v5171_v12, %v14228_v14  ;;  %v6972_v3 = vpack.c.bf16 %v5182_v45, %v14231_v63  ;;  %v14233_v42 = vld [vmem:[#allocation37_spill] sm:$0xff]  ;;  %v14235_v12 = vld [vmem:[#allocation19_spill] sm:$0xff] }
 0x877   : > { %5412 = vmatpush1.msra.mxu0 %v5369_v29  ;;  %7025 = vmatprep.subr.bf16.mxu1 %v7024_v22  ;;  %v14232_v22 = vld [vmem:[#allocation73_spill] sm:$0xff]  ;;  %v5103_v45 = vsel %vm1163_vm4, %v12655_v4, %v12653_v15  ;;  %v14237_v62 = vld [vmem:[#allocation47_spill] sm:$0xff]  ;;  %v5373_v10 = vmul.f32 %v7211_v1, %v12570_v13  ;;  %v14239_v15 = vld [vmem:[#allocation74_spill] sm:$0xff]  ;;  %v5167_v13 = vsel %vm1356_vm5, %v12501_v32, %v12690_v25 }
 0x878   : > { %6359 = vmatmul.mubr.msk.f32.vlgmr.msra.gmra.mrb[24].mxu0 %vm3179_vm9, %v12349_v17  ;;  %6965 = vmatprep.subr.bf16.mxu0 %v14222_v5  ;;  %v14234_v51 = vpack.c.bf16 %v14232_v22, %v14233_v42  ;;  %v5058_v4 = vmul.f32 %v12648_v19, %v14239_v15  ;;  %v14240_v19 = vld [vmem:[#allocation55_spill] sm:$0xff]  ;;  %v14251_v15 = vpack.c.bf16 %v12665_v52, %v12662_v55 }
 0x879   : > { %7027 = vmatpush1.bf16.msra.mxu1 %v7026_v30  ;;  %v12851_v44 = vpop.permute.xlu1 %5345  ;;  %6967 = vmatpush1.bf16.msra.mxu0 %v14225_v43  ;;  %v12856_v36 = vpop.permute.xlu0 %4961  ;;  %v14229_v30 = vld [vmem:[#allocation64_spill] sm:$0xff]  ;;  %v7210_v43 = vld [vmem:[%s13248_s0 + $0xa8] ss:$0 sm:$0xff] }
 0x87a   : > { %v4972_v54 = vsel %vm777_vm2, %v12635_v20, %v12856_v36  ;;  %6969 = vmatprep.subr.bf16.mxu0 %v14227_v16  ;;  %5601 = vmatprep.mubr.f32.mxu0 %v13911_v40  ;;  %v12868_v49 = vmul.f32 %v4908_v53, %v14229_v30  ;;  %v6974_v53 = vpack.c.bf16 %v5181_v57, %v14235_v12  ;;  %v14246_v12 = vld [vmem:[#allocation103_spill] sm:$0xff] }
 0x87b   : > { %v12871_v27 = vmul.f32 %v4972_v54, %v14230_v47  ;;  %v5374_v54 = vmul.f32 %v7210_v43, %v12565_v6  ;;  %v5122_v16 = vmul.f32 %v5103_v45, %v14237_v62  ;;  %v14238_v57 = vpack.c.bf16 %v12517_v48, %v12499_v23  ;;  %v14250_v1 = vld [vmem:[#allocation95_spill] sm:$0xff] }
 0x87c   : > { %v5166_v6 = vsel %vm1356_vm5, %v12690_v25, %v12576_v37  ;;  %v5294_v37 = vsel %vm1742_vm7, %v12770_v60, %v12740_v9  ;;  %v14242_v9 = vpack.c.bf16 %v12619_v50, %v12613_v2  ;;  %v14244_v60 = vld [vmem:[#allocation77_spill] sm:$0xff]  ;;  %v4969_v2 = vsel %vm777_vm2, %v12832_v31, %v12692_v35 }
 0x87d   : > { %v7030_v29 = vpack.c.bf16 %v12871_v27, %v12868_v49  ;;  %v12876_v20 = vpop.permute.xlu1 %5093  ;;  %6971 = vmatpush1.bf16.msra.mxu0 %v14234_v51  ;;  %v12881_v38 = vpop.permute.xlu0 %5339  ;;  %v7000_v47 = vpack.c.bf16 %v5122_v16, %v5058_v4  ;;  %v5186_v63 = vmul.f32 %v5166_v6, %v14240_v19  ;;  %v14245_v51 = vld [vmem:[#allocation54_spill] sm:$0xff]  ;;  %v14252_v4 = vld [vmem:[#allocation29_spill] sm:$0xff]  ;;  %v14273_v27 = vld [vmem:[#allocation136_spill] sm:$0xff] }
 0x87e   : > { %6973 = vmatprep.subr.bf16.mxu0 %v6972_v3  ;;  %v14249_v16 = vld [vmem:[#allocation118_spill] sm:$0xff]  ;;  %v5000_v6 = vmul.f32 %v4969_v2, %v14252_v4  ;;  %v7213_v19 = vld [vmem:[%s13248_s0 + $0xd8] ss:$0 sm:$0xff]  ;;  %v5358_v55 = vsel %vm1935_vm8, %v12881_v38, %v12810_v33 }
 0x87f   : > { %v14258_v2 = vld [vmem:[#allocation34_spill] sm:$0xff] }
 0x881   : > { %v12884_v5 = vpop.permute.xlu1 %4899  ;;  %6975 = vmatpush1.bf16.msra.mxu0 %v6974_v53  ;;  %v4902_v11 = vpop.permute.xlu0 %4901  ;;  %v5314_v53 = vmul.f32 %v5294_v37, %v14246_v12  ;;  %v14254_v37 = vld [vmem:[#allocation113_spill] sm:$0xff]  ;;  %v14256_v12 = vld [vmem:[#allocation39_spill] sm:$0xff] }
 0x882   : > { %6977 = vmatprep.subr.bf16.mxu0 %v14236_v28  ;;  %v4905_v22 = vsel %vm584_vm1, %v4902_v11, %v12722_v0  ;;  %v4906_v50 = vsel %vm584_vm1, %v12884_v5, %v4902_v11  ;;  %v14248_v28 = vld [vmem:[#allocation33_spill] sm:$0xff] }
 0x885   : > { %v4964_v14 = vpop.permute.xlu1 %4963  ;;  %6979 = vmatpush1.bf16.msra.mxu0 %v14238_v57  ;;  %v12901_v30 = vpop.permute.xlu0 %5025  ;;  %v7004_v57 = vpack.c.bf16 %v5186_v63, %v14249_v16 }
 0x886   : > { %5553 = vmatprep.subr.mxu0 %v5374_v54  ;;  %v5036_v23 = vsel %vm970_vm3, %v12669_v26, %v12901_v30  ;;  %v14241_v26 = vpack.c.bf16 %v12622_v41, %v12616_v21  ;;  %v4970_v32 = vsel %vm777_vm2, %v4964_v14, %v12832_v31  ;;  %v5230_v21 = vsel %vm1549_vm6, %v12705_v58, %v12720_v56  ;;  %v14243_v41 = vld [vmem:[#allocation70_spill] sm:$0xff]  ;;  %v14247_v56 = vld [vmem:[#allocation131_spill] sm:$0xff] }
 0x887   : > { %v12951_v0 = vmul.f32 %v5036_v23, %v14243_v41  ;;  %v4936_v45 = vmul.f32 %v4905_v22, %v14247_v56  ;;  %v4999_v43 = vmul.f32 %v4970_v32, %v14248_v28  ;;  %v5097_v31 = vsel %vm1163_vm4, %v12876_v20, %v12703_v24  ;;  %v14253_v23 = vld [vmem:[#allocation28_spill] sm:$0xff]  ;;  %v14259_v28 = vld [vmem:[#allocation111_spill] sm:$0xff] }
 0x888   : > { %v7212_v24 = vld [vmem:[%s13248_s0 + $0xd0] ss:$0 sm:$0xff]  ;;  %v4907_v56 = vsel %vm584_vm1, %v12834_v7, %v12884_v5  ;;  %v14261_v7 = vpack.c.bf16 %v12786_v39, %v12783_v8  ;;  %v14262_v5 = vld [vmem:[#allocation65_spill] sm:$0xff] }
 0x889   : > { %v12917_v48 = vpop.permute.xlu1 %5027  ;;  %5554 = vmatpush1.msra.mxu0 %v5373_v10  ;;  %v5090_v3 = vpop.permute.xlu0 %5089  ;;  %v5250_v10 = vmul.f32 %v5230_v21, %v14250_v1  ;;  %v4971_v21 = vsel %vm777_vm2, %v12856_v36, %v4964_v14  ;;  %v14257_v36 = vld [vmem:[#allocation36_spill] sm:$0xff]  ;;  %v14264_v8 = vld [vmem:[#allocation105_spill] sm:$0xff] }
 0x88a   : > { %6361 = vmatmul.mubr.msk.f32.vlgmr.msra.gmra.mrb[26].mxu0 %vm3179_vm9, %v12349_v17  ;;  %6997 = vmatprep.subr.bf16.mxu0 %v14241_v26  ;;  %v5100_v25 = vsel %vm1163_vm4, %v12676_v34, %v5090_v3  ;;  %v5185_v34 = vmul.f32 %v5167_v13, %v14245_v51  ;;  %v7044_v51 = vpack.c.bf16 %v5000_v6, %v4936_v45 }
 0x88b   : > { %6999 = vmatpush1.bf16.msra.mxu0 %v14242_v9  ;;  %5743 = vmatprep.mubr.f32.mxu0 %v13911_v40  ;;  %v12954_v42 = vmul.f32 %v5100_v25, %v14244_v60  ;;  %v7008_v32 = vpack.c.bf16 %v5314_v53, %v5250_v10  ;;  %v14255_v25 = vld [vmem:[#allocation91_spill] sm:$0xff]  ;;  %v4934_v10 = vmul.f32 %v4907_v56, %v14262_v5  ;;  %v14278_v56 = vld [vmem:[#allocation88_spill] sm:$0xff] }
 0x88c   : > { %7001 = vmatprep.subr.bf16.mxu0 %v7000_v47  ;;  %v4935_v47 = vmul.f32 %v4906_v50, %v14253_v23  ;;  %v7006_v26 = vpack.c.bf16 %v5185_v34, %v14254_v37  ;;  %v5128_v9 = vmul.f32 %v5097_v31, %v14255_v25  ;;  %v7215_v31 = vld [vmem:[%s13248_s0 + $0xc0] ss:$0 sm:$0xff]  ;;  %v14267_v37 = vld [vmem:[#allocation44_spill] sm:$0xff] }
 0x88d   : > { %v5092_v58 = vpop.permute.xlu1 %5091  ;;  %v7034_v54 = vpack.c.bf16 %v12954_v42, %v12951_v0  ;;  %v5344_v62 = vpop.permute.xlu0 %5343  ;;  %v14279_v42 = vld [vmem:[#allocation112_spill] sm:$0xff] }
 0x88e   : > { %v5356_v35 = vsel %vm1935_vm8, %v5344_v62, %v12851_v44  ;;  %v5357_v11 = vsel %vm1935_vm8, %v12810_v33, %v5344_v62  ;;  %v5098_v52 = vsel %vm1163_vm4, %v5092_v58, %v12876_v20  ;;  %v7046_v41 = vpack.c.bf16 %v4999_v43, %v4935_v47  ;;  %v14265_v47 = vld [vmem:[#allocation24_spill] sm:$0xff] }
 0x88f   : > { %7003 = vmatpush1.bf16.msra.mxu0 %v14251_v15  ;;  %v5379_v13 = vmul.f32 %v7212_v24, %v5357_v11  ;;  %v5380_v63 = vmul.f32 %v7213_v19, %v5356_v35  ;;  %v5099_v34 = vsel %vm1163_vm4, %v5090_v3, %v5092_v58  ;;  %v5127_v53 = vmul.f32 %v5098_v52, %v14256_v12  ;;  %v7214_v3 = vld [vmem:[%s13248_s0 + $0xc8] ss:$0 sm:$0xff]  ;;  %v14266_v19 = vld [vmem:[#allocation81_spill] sm:$0xff]  ;;  %v14282_v5 = vld [vmem:[#allocation48_spill] sm:$0xff] }
 0x890   : > { %7005 = vmatprep.subr.bf16.mxu0 %v7004_v57  ;;  %v5378_v58 = vmul.f32 %v7214_v3, %v5358_v55  ;;  %v4998_v43 = vmul.f32 %v4971_v21, %v14259_v28  ;;  %v14260_v57 = vld [vmem:[#allocation78_spill] sm:$0xff]  ;;  %v14268_v55 = vld [vmem:[#allocation43_spill] sm:$0xff]  ;;  %v14277_v3 = vld [vmem:[#allocation97_spill] sm:$0xff] }
 0x891   : > { %v5158_v22 = vpop.permute.xlu1 %5157  ;;  %5766 = vmatprep.subr.mxu1 %v5380_v63  ;;  %v5030_v60 = vpop.permute.xlu0 %5029  ;;  %v5126_v1 = vmul.f32 %v5099_v34, %v14260_v57  ;;  %v14270_v21 = vld [vmem:[#allocation58_spill] sm:$0xff] }
 0x892   : > { %v5033_v33 = vsel %vm970_vm3, %v5030_v60, %v12742_v46  ;;  %v5034_v20 = vsel %vm970_vm3, %v12917_v48, %v5030_v60  ;;  %5767 = vmatpush1.msra.mxu1 %v5379_v13  ;;  %v5359_v46 = vsel %vm1935_vm8, %v12560_v59, %v12881_v38  ;;  %v5035_v59 = vsel %vm970_vm3, %v12901_v30, %v12917_v48  ;;  %v14263_v48 = vld [vmem:[#allocation71_spill] sm:$0xff]  ;;  %v14271_v60 = vld [vmem:[#allocation82_spill] sm:$0xff] }
 0x893   : > { %7007 = vmatpush1.bf16.msra.mxu0 %v7006_v26  ;;  %v5063_v14 = vmul.f32 %v5034_v20, %v14257_v36  ;;  %v5064_v50 = vmul.f32 %v5033_v33, %v14258_v2  ;;  %6364 = vmatmul.mubr.msk.f32.vlgmr.msra.gmra.mrb[28].mxu1 %vm3179_vm9, %v12349_v17  ;;  %v5377_v30 = vmul.f32 %v7215_v31, %v5359_v46  ;;  %v14272_v33 = vld [vmem:[#allocation108_spill] sm:$0xff]  ;;  %v14275_v36 = vld [vmem:[#allocation98_spill] sm:$0xff]  ;;  %v14283_v31 = vld [vmem:[#allocation85_spill] sm:$0xff] }
 0x894   : > { %7045 = vmatprep.subr.bf16.mxu1 %v7044_v51  ;;  %7009 = vmatprep.subr.bf16.mxu0 %v7008_v32  ;;  %v5062_v35 = vmul.f32 %v5035_v59, %v14263_v48  ;;  %v7028_v6 = vpack.c.bf16 %v4998_v43, %v4934_v10  ;;  %v14284_v48 = vld [vmem:[#allocation84_spill] sm:$0xff] }
 0x895   : > { %7047 = vmatpush1.bf16.msra.mxu1 %v7046_v41  ;;  %v5220_v45 = vpop.permute.xlu1 %5219  ;;  %v7050_v38 = vpack.c.bf16 %v5127_v53, %v5063_v14  ;;  %v7048_v16 = vpack.c.bf16 %v5128_v9, %v5064_v50  ;;  %5956 = vmatprep.mubr.f32.mxu1 %v13911_v40  ;;  %v14274_v53 = vld [vmem:[#allocation57_spill] sm:$0xff]  ;;  %v14276_v50 = vld [vmem:[#allocation87_spill] sm:$0xff] }
 0x896   : > { %v5156_v62 = vpop.permute.xlu0 %5155  ;;  %v7032_v13 = vpack.c.bf16 %v5126_v1, %v5062_v35  ;;  %v14281_v1 = vld [vmem:[#allocation109_spill] sm:$0xff] }
 0x897   : > { %7011 = vmatpush1.bf16.msra.mxu0 %v14261_v7  ;;  %7049 = vmatprep.subr.bf16.mxu1 %v7048_v16  ;;  %v5162_v11 = vsel %vm1356_vm5, %v5156_v62, %v5158_v22  ;;  %v5163_v39 = vsel %vm1356_vm5, %v14264_v8, %v5156_v62  ;;  %v14280_v16 = vld [vmem:[#allocation120_spill] sm:$0xff] }
 0x898   : > { %5695 = vmatprep.subr.mxu0 %v5378_v58  ;;  %v5190_v63 = vmul.f32 %v5162_v11, %v14266_v19  ;;  %v5189_v51 = vmul.f32 %v5163_v39, %v14271_v60  ;;  %v14285_v11 = vld [vmem:[#allocation119_spill] sm:$0xff] }
 0x899   : > { %7051 = vmatpush1.bf16.msra.mxu1 %v7050_v38  ;;  %v5284_v15 = vpop.permute.xlu1 %5283  ;;  %v7217_v19 = vld [vmem:[%s13248_s0 + $0xe8] ss:$0 sm:$0xff] }
 0x89a   : > { %v5160_v4 = vpop.permute.xlu0 %5159  ;;  %v5291_v34 = vsel %vm1742_vm7, %v12797_v61, %v5284_v15  ;;  %v7036_v20 = vpack.c.bf16 %v5190_v63, %v14272_v33  ;;  %v7038_v61 = vpack.c.bf16 %v5189_v51, %v14274_v53 }
 0x89b   : > { %v5161_v23 = vsel %vm1356_vm5, %v5158_v22, %v5160_v4  ;;  %v5176_v24 = vsel %vm1356_vm5, %v5160_v4, %v14265_v47  ;;  %5696 = vmatpush1.msra.mxu0 %v5377_v30  ;;  %v14269_v22 = vld [vmem:[#allocation134_spill] sm:$0xff]  ;;  %v5317_v14 = vmul.f32 %v5291_v34, %v14275_v36  ;;  %v7216_v47 = vld [vmem:[%s13248_s0 + $0xf8] ss:$0 sm:$0xff] }
 0x89c   : > { %v5191_v26 = vmul.f32 %v5161_v23, %v14267_v37  ;;  %v5192_v52 = vmul.f32 %v5176_v24, %v14268_v55  ;;  %6363 = vmatmul.mubr.msk.f32.vlgmr.msra.gmra.mrb[28].mxu0 %vm3179_vm9, %v12349_v17  ;;  %7029 = vmatprep.subr.bf16.mxu0 %v7028_v6 }
 0x89d   : > { %v5224_v32 = vpop.permute.xlu1 %5223  ;;  %7031 = vmatpush1.bf16.msra.mxu0 %v7030_v29  ;;  %5885 = vmatprep.mubr.f32.mxu0 %v13911_v40  ;;  %v5227_v29 = vsel %vm1549_vm6, %v14273_v27, %v5220_v45 }
 0x89e   : > { %v7054_v25 = vpack.c.bf16 %v5191_v26, %v14269_v22  ;;  %v5222_v9 = vpop.permute.xlu0 %5221  ;;  %7033 = vmatprep.subr.bf16.mxu0 %v7032_v13  ;;  %v7052_v41 = vpack.c.bf16 %v5192_v52, %v14270_v21  ;;  %v5253_v0 = vmul.f32 %v5227_v29, %v14278_v56  ;;  %v7219_v26 = vld [vmem:[%s13248_s0 + $0xf0] ss:$0 sm:$0xff] }
 0x89f   : > { %v5226_v49 = vsel %vm1549_vm6, %v5220_v45, %v5222_v9  ;;  %v5225_v45 = vsel %vm1549_vm6, %v5222_v9, %v5224_v32 }
 0x8a0   : > { %7053 = vmatprep.subr.bf16.mxu1 %v7052_v41  ;;  %v5254_v46 = vmul.f32 %v5226_v49, %v14276_v50  ;;  %v7042_v38 = vpack.c.bf16 %v5317_v14, %v5253_v0  ;;  %v5255_v10 = vmul.f32 %v5225_v45, %v14282_v5  ;;  %v6091_v0 = vld [vmem:[%s13258_s10] sm:$0xff]  ;;  %v14286_v45 = vld [vmem:[#allocation4_spill] sm:$0xff] }
 0x8a1   : > { %7055 = vmatpush1.bf16.msra.mxu1 %v7054_v25  ;;  %v5348_v40 = vpop.permute.xlu1 %5347  ;;  %7035 = vmatpush1.bf16.msra.mxu0 %v7034_v54  ;;  %v5240_v54 = vsel %vm1549_vm6, %v5224_v32, %v14279_v42 }
 0x8a2   : > { %v5286_v12 = vpop.permute.xlu0 %5285  ;;  %7037 = vmatprep.subr.bf16.mxu0 %v7036_v20  ;;  %v5256_v7 = vmul.f32 %v5240_v54, %v14281_v1  ;;  %v5355_v4 = vsel %vm1935_vm8, %v12851_v44, %v5348_v40  ;;  %v7218_v44 = vld [vmem:[%s13248_s0 + $0xe0] ss:$0 sm:$0xff] }
 0x8a3   : > { %v5290_v2 = vsel %vm1742_vm7, %v5284_v15, %v5286_v12  ;;  %v5381_v37 = vmul.f32 %v7218_v44, %v5355_v4 }
 0x8a4   : > { %v5318_v58 = vmul.f32 %v5290_v2, %v14277_v3 }
 0x8a5   : > { %7039 = vmatpush1.bf16.msra.mxu0 %v7038_v61  ;;  %v5352_v28 = vpop.permute.xlu1 %5351 }
 0x8a6   : > { %v5288_v43 = vpop.permute.xlu0 %5287  ;;  %v7040_v59 = vpack.c.bf16 %v5318_v58, %v5254_v46  ;;  %v5368_v15 = vsel %vm1935_vm8, %v5352_v28, %v14285_v11 }
 0x8a7   : > { %v5289_v62 = vsel %vm1742_vm7, %v5286_v12, %v5288_v43  ;;  %v5304_v57 = vsel %vm1742_vm7, %v5288_v43, %v14280_v16  ;;  %v5384_v24 = vmul.f32 %v7216_v47, %v5368_v15  ;;  %v14288_v16 = vld [vmem:[#allocation7_spill] sm:$0xff] }
 0x8a8   : > { %v5319_v30 = vmul.f32 %v5289_v62, %v14283_v31  ;;  %v5320_v35 = vmul.f32 %v5304_v57, %v14284_v48  ;;  %7041 = vmatprep.subr.bf16.mxu0 %v7040_v59  ;;  %v14287_v59 = vld [vmem:[#allocation11_spill] sm:$0xff]  ;;  %v13162_v57 = vrot.slane %v6091_v0, %v14288_v16 }
 0x8a9   : > { %7043 = vmatpush1.bf16.msra.mxu0 %v7042_v38  ;;  %v13158_v38 = vrot.slane %v6091_v0, %v14287_v59 }
 0x8aa   : > { %v7058_v6 = vpack.c.bf16 %v5319_v30, %v5255_v10  ;;  %v5350_v8 = vpop.permute.xlu0 %5349  ;;  %v7056_v39 = vpack.c.bf16 %v5320_v35, %v5256_v7  ;;  %v14289_v7 = vld [vmem:[#allocation16_spill] sm:$0xff] }
 0x8ab   : > { %v5354_v23 = vsel %vm1935_vm8, %v5348_v40, %v5350_v8  ;;  %v5353_v13 = vsel %vm1935_vm8, %v5350_v8, %v5352_v28  ;;  %v13155_v28 = vrot.slane %v6091_v0, %v14286_v45  ;;  %v13165_v5 = vrot.slane %v6091_v0, %v14289_v7 }
 0x8ac   : > { %v5382_v63 = vmul.f32 %v7217_v19, %v5354_v23  ;;  %7057 = vmatprep.subr.bf16.mxu1 %v7056_v39  ;;  %v5383_v18 = vmul.f32 %v7219_v26, %v5353_v13  ;;  %v14290_v13 = vld [vmem:[#allocation3_spill] sm:$0xff] }
 0x8ad   : > { %7059 = vmatpush1.bf16.msra.mxu1 %v7058_v6  ;;  %v6114_v19 = vsub.s32 4, %v14290_v13  ;;  %vm6175_vm11 = vcmp.eq.s32.totalorder %v14290_v13, 0  ;;  %vm6214_vm12 = vcmp.eq.s32.totalorder %v14290_v13, 1 }
 0x8ae   : > { %5837 = vmatprep.subr.mxu0 %v5382_v63  ;;  %5908 = vmatprep.subr.mxu1 %v5384_v24 }
 0x8af   : > { %5838 = vmatpush1.msra.mxu0 %v5381_v37 }
 0x8b0   : > { %6365 = vmatmul.mubr.msk.f32.vlgmr.msra.gmra.mrb[30].mxu0 %vm3179_vm9, %v12349_v17 }
 0x8b1   : > { %5909 = vmatpush1.msra.mxu1 %v5383_v18 }
 0x8b2   : > { %6366 = vmatmul.mubr.msk.f32.vlgmr.msra.gmra.mrb[30].mxu1 %vm3179_vm9, %v12349_v17 }
 0x8bb   : > { %v13124_v55 = vpop.permute.xlu0 %5389 }
 0x8d1   : > { %v5532_v52 = vpop.f32.mrb[24].mxu1 }
 0x8d2   : > { %v5533_v32 = vadd.f32 %v5532_v52, %v13124_v55  ;;  %v5534_v22 = vpop.f32.mrb[25].mxu1 }
 0x8d3   : > { %v5535_v25 = vadd.f32 %v5534_v22, %v13124_v55 }
 0x8d4   : > { %v5965_v9 = vmax.f32 %v5533_v32, 0.0  ;;  %v13177_v32 = vrot.slane %v6091_v0, %v6114_v19 }
 0x8d5   : > { %v5966_v21 = vmax.f32 %v5535_v25, 0.0 }
 0x8d6   : > { %v6369_v41 = vmul.f32 -1.442695, %v5965_v9  ;;  %v6138_v48 = vmul.f32 %v13158_v38, %v5965_v9  ;;  %v14291_v9 = vld [vmem:[#allocation21_spill] sm:$0xff] }
 0x8d7   : > { %v6370_v60 = vmul.f32 -1.442695, %v5966_v21  ;;  %v6139_v4 = vmul.f32 %v13165_v5, %v5966_v21  ;;  %v13181_v21 = vrot.slane %v6091_v0, %v14291_v9 }
 0x8d8   : > { %7080 = vpow2.f32 %v6369_v41  ;;  %v6148_v39 = vsel %vm6144_vm10, %v6138_v48, 0.0  ;;  %v14292_v41 = vld [vmem:[#allocation26_spill] sm:$0xff] }
 0x8d9   : > { %7082 = vpow2.f32 %v6370_v60  ;;  %v6150_v47 = vsel %vm6144_vm10, %v6139_v4, 0.0  ;;  %v13184_v60 = vrot.slane %v6091_v0, %v14292_v41 }
 0x8e2   : > { %v7081_v51 = vpop.eup %7080 }
 0x8e3   : > { %v7083_v34 = vpop.eup %7082  ;;  %v6029_v33 = vadd.f32 1.0, %v7081_v51 }
 0x8e4   : > { %v6030_v20 = vadd.f32 1.0, %v7083_v34 }
 0x8e5   : > { %7084 = vrcp.f32 %v6029_v33  ;;  %v14293_v33 = vld [vmem:[#allocation31_spill] sm:$0xff] }
 0x8e6   : > { %7086 = vrcp.f32 %v6030_v20  ;;  %v13187_v20 = vrot.slane %v6091_v0, %v14293_v33 }
 0x8ef   : > { %v7085_v17 = vpop.eup %7084 }
 0x8f0   : > { %v7087_v49 = vpop.eup %7086  ;;  %6077 = vst [vmem:[%s13132_s16 + $0x10] sm:$0x3f] %v7085_v17 }
 0x8f1   : > { %6078 = vst [vmem:[%s13132_s16 + $0x18] sm:$0x3f] %v7087_v49 }
 0x90a   : > { %v5674_v40 = vpop.f32.mrb[26].mxu1 }
 0x90b   : > { %v13137_v27 = vadd.f32 %v5674_v40, %v13124_v55  ;;  %v5676_v29 = vpop.f32.mrb[27].mxu1 }
 0x90c   : > { %v13140_v12 = vadd.f32 %v5676_v29, %v13124_v55 }
 0x90d   : > { %v5969_v53 = vmax.f32 %v13137_v27, 0.0 }
 0x90e   : > { %v5970_v61 = vmax.f32 %v13140_v12, 0.0 }
 0x90f   : > { %v6373_v36 = vmul.f32 -1.442695, %v5969_v53 }
 0x910   : > { %v6374_v14 = vmul.f32 -1.442695, %v5970_v61 }
 0x911   : > { %7088 = vpow2.f32 %v6373_v36  ;;  %v6142_v36 = vmul.f32 %v13184_v60, %v5969_v53 }
 0x912   : > { %7090 = vpow2.f32 %v6374_v14 }
 0x91b   : > { %v7089_v2 = vpop.eup %7088 }
 0x91c   : > { %v7091_v50 = vpop.eup %7090  ;;  %v6033_v46 = vadd.f32 1.0, %v7089_v2 }
 0x91d   : > { %v6034_v3 = vadd.f32 1.0, %v7091_v50 }
 0x91e   : > { %7092 = vrcp.f32 %v6033_v46  ;;  %v6143_v46 = vmul.f32 %v13187_v20, %v5970_v61 }
 0x91f   : > { %7094 = vrcp.f32 %v6034_v3 }
 0x920   : > { %v6158_v59 = vsel %vm6144_vm10, %v6143_v46, 0.0 }
 0x928   : > { %v7093_v58 = vpop.eup %7092 }
 0x929   : > { %v7095_v56 = vpop.eup %7094  ;;  %6081 = vst [vmem:[%s13132_s16 + $0x30] sm:$0x3f] %v7093_v58 }
 0x92a   : > { %6082 = vst [vmem:[%s13132_s16 + $0x38] sm:$0x3f] %v7095_v56  ;;  %v6156_v56 = vsel %vm6144_vm10, %v6142_v36, 0.0 }
 0x94b   : > { %v5461_v42 = vpop.f32.mrb[24].mxu0 }
 0x94c   : > { %v5462_v54 = vadd.f32 %v5461_v42, %v13124_v55  ;;  %v5463_v43 = vpop.f32.mrb[25].mxu0 }
 0x94d   : > { %v5464_v62 = vadd.f32 %v5463_v43, %v13124_v55 }
 0x94e   : > { %v5963_v1 = vmax.f32 %v5462_v54, 0.0 }
 0x94f   : > { %v5964_v10 = vmax.f32 %v5464_v62, 0.0 }
 0x950   : > { %v6367_v31 = vmul.f32 -1.442695, %v5963_v1  ;;  %v6136_v30 = vmul.f32 %v13155_v28, %v5963_v1 }
 0x951   : > { %v6368_v35 = vmul.f32 -1.442695, %v5964_v10  ;;  %v6137_v11 = vmul.f32 %v13162_v57, %v5964_v10 }
 0x952   : > { %7096 = vpow2.f32 %v6367_v31  ;;  %v6145_v15 = vsel %vm6144_vm10, %v6136_v30, 0.0 }
 0x953   : > { %7098 = vpow2.f32 %v6368_v35  ;;  %v6146_v6 = vsel %vm6144_vm10, %v6137_v11, 0.0 }
 0x954   : > { %v6147_v8 = vadd.f32 %v6146_v6, %v6145_v15 }
 0x956   : > { %v6149_v23 = vadd.f32 %v6148_v39, %v6147_v8 }
 0x958   : > { %v6151_v24 = vadd.f32 %v6150_v47, %v6149_v23 }
 0x95c   : > { %v7097_v63 = vpop.eup %7096 }
 0x95d   : > { %v7099_v44 = vpop.eup %7098  ;;  %v6027_v37 = vadd.f32 1.0, %v7097_v63  ;;  %v5603_v26 = vpop.f32.mrb[26].mxu0 }
 0x95e   : > { %v6028_v18 = vadd.f32 1.0, %v7099_v44  ;;  %v5604_v52 = vadd.f32 %v5603_v26, %v13124_v55  ;;  %v5605_v22 = vpop.f32.mrb[27].mxu0 }
 0x95f   : > { %7100 = vrcp.f32 %v6027_v37  ;;  %v5606_v25 = vadd.f32 %v5605_v22, %v13124_v55 }
 0x960   : > { %7102 = vrcp.f32 %v6028_v18  ;;  %v5967_v51 = vmax.f32 %v5604_v52, 0.0 }
 0x961   : > { %v5968_v34 = vmax.f32 %v5606_v25, 0.0 }
 0x962   : > { %v6371_v17 = vmul.f32 -1.442695, %v5967_v51  ;;  %v6140_v49 = vmul.f32 %v13177_v32, %v5967_v51 }
 0x963   : > { %v6372_v40 = vmul.f32 -1.442695, %v5968_v34  ;;  %v6141_v29 = vmul.f32 %v13181_v21, %v5968_v34 }
 0x964   : > { %7104 = vpow2.f32 %v6371_v17  ;;  %v6152_v14 = vsel %vm6144_vm10, %v6140_v49, 0.0 }
 0x965   : > { %v6153_v2 = vadd.f32 %v6152_v14, %v6151_v24  ;;  %7106 = vpow2.f32 %v6372_v40  ;;  %v6154_v50 = vsel %vm6144_vm10, %v6141_v29, 0.0 }
 0x966   : > { %v5816_v58 = vpop.f32.mrb[28].mxu1 }
 0x967   : > { %v6155_v3 = vadd.f32 %v6154_v50, %v6153_v2  ;;  %v5817_v27 = vadd.f32 %v5816_v58, %v13124_v55  ;;  %v5818_v53 = vpop.f32.mrb[29].mxu1 }
 0x968   : > { %v5819_v42 = vadd.f32 %v5818_v53, %v13124_v55 }
 0x969   : > { %v7101_v0 = vpop.eup %7100  ;;  %v6157_v54 = vadd.f32 %v6156_v56, %v6155_v3  ;;  %v5973_v43 = vmax.f32 %v5817_v27, 0.0 }
 0x96a   : > { %v7103_v45 = vpop.eup %7102  ;;  %6075 = vst [vmem:[%s13132_s16] sm:$0x3f] %v7101_v0  ;;  %v5974_v12 = vmax.f32 %v5819_v42, 0.0 }
 0x96b   : > { %6076 = vst [vmem:[%s13132_s16 + $0x8] sm:$0x3f] %v7103_v45  ;;  %v6159_v62 = vadd.f32 %v6158_v59, %v6157_v54  ;;  %v6377_v61 = vmul.f32 -1.442695, %v5973_v43  ;;  %v6184_v39 = vmul.f32 %v13158_v38, %v5973_v43 }
 0x96c   : > { %v6378_v16 = vmul.f32 -1.442695, %v5974_v12  ;;  %v6185_v19 = vmul.f32 %v13165_v5, %v5974_v12 }
 0x96d   : > { %6160 = vadd.xlane.f32.xlu1 %v6159_v62  ;;  %7108 = vpow2.f32 %v6377_v61 }
 0x96e   : > { %v7105_v1 = vpop.eup %7104  ;;  %7110 = vpow2.f32 %v6378_v16 }
 0x96f   : > { %v7107_v7 = vpop.eup %7106  ;;  %v6031_v10 = vadd.f32 1.0, %v7105_v1  ;;  %v5745_v31 = vpop.f32.mrb[28].mxu0 }
 0x970   : > { %v6032_v30 = vadd.f32 1.0, %v7107_v7  ;;  %v5746_v48 = vadd.f32 %v5745_v31, %v13124_v55  ;;  %v5747_v35 = vpop.f32.mrb[29].mxu0 }
 0x971   : > { %7112 = vrcp.f32 %v6031_v10  ;;  %v5748_v11 = vadd.f32 %v5747_v35, %v13124_v55 }
 0x972   : > { %7114 = vrcp.f32 %v6032_v30  ;;  %v5971_v15 = vmax.f32 %v5746_v48, 0.0 }
 0x973   : > { %v5972_v4 = vmax.f32 %v5748_v11, 0.0 }
 0x974   : > { %v6375_v6 = vmul.f32 -1.442695, %v5971_v15  ;;  %v6182_v8 = vmul.f32 %v13155_v28, %v5971_v15  ;;  %v6193_v28 = vsel %vm6144_vm10, %v6184_v39, 0.0 }
 0x975   : > { %v6376_v23 = vmul.f32 -1.442695, %v5972_v4  ;;  %v6183_v47 = vmul.f32 %v13162_v57, %v5972_v4  ;;  %v6195_v57 = vsel %vm6144_vm10, %v6185_v19, 0.0 }
 0x976   : > { %7116 = vpow2.f32 %v6375_v6  ;;  %v6190_v24 = vsel %vm6144_vm10, %v6182_v8, 0.0 }
 0x977   : > { %7118 = vpow2.f32 %v6376_v23  ;;  %v6191_v63 = vsel %vm6144_vm10, %v6183_v47, 0.0  ;;  %v7109_v44 = vpop.eup %7108 }
 0x978   : > { %v6192_v37 = vadd.f32 %v6191_v63, %v6190_v24  ;;  %v7111_v26 = vpop.eup %7110  ;;  %v6037_v18 = vadd.f32 1.0, %v7109_v44  ;;  %v6383_v24 = vld [vmem:[#allocation2] ss:$0 sm:$0xff] }
 0x979   : > { %v6038_v38 = vadd.f32 1.0, %v7111_v26 }
 0x97a   : > { %v6194_v52 = vadd.f32 %v6193_v28, %v6192_v37  ;;  %7120 = vrcp.f32 %v6037_v18 }
 0x97b   : > { %v7113_v22 = vpop.eup %7112  ;;  %7122 = vrcp.f32 %v6038_v38 }
 0x97c   : > { %v7115_v25 = vpop.eup %7114  ;;  %6079 = vst [vmem:[%s13132_s16 + $0x20] sm:$0x3f] %v7113_v22  ;;  %v6196_v5 = vadd.f32 %v6195_v57, %v6194_v52 }
 0x97d   : > { %6080 = vst [vmem:[%s13132_s16 + $0x28] sm:$0x3f] %v7115_v25 }
 0x980   : > { %v7117_v9 = vpop.eup %7116 }
 0x981   : > { %v7119_v51 = vpop.eup %7118  ;;  %v6035_v34 = vadd.f32 1.0, %v7117_v9 }
 0x982   : > { %v6036_v33 = vadd.f32 1.0, %v7119_v51 }
 0x983   : > { %7124 = vrcp.f32 %v6035_v34  ;;  %v5887_v17 = vpop.f32.mrb[30].mxu0 }
 0x984   : > { %7126 = vrcp.f32 %v6036_v33  ;;  %v5888_v49 = vadd.f32 %v5887_v17, %v13124_v55  ;;  %v5889_v40 = vpop.f32.mrb[31].mxu0  ;;  %v7121_v29 = vpop.eup %7120 }
 0x985   : > { %v5890_v36 = vadd.f32 %v5889_v40, %v13124_v55  ;;  %v5958_v14 = vpop.f32.mrb[30].mxu1  ;;  %v7123_v2 = vpop.eup %7122  ;;  %6085 = vst [vmem:[%s13132_s16 + $0x50] sm:$0x3f] %v7121_v29 }
 0x986   : > { %v5975_v50 = vmax.f32 %v5888_v49, 0.0  ;;  %v5959_v46 = vadd.f32 %v5958_v14, %v13124_v55  ;;  %v5960_v3 = vpop.f32.mrb[31].mxu1  ;;  %6086 = vst [vmem:[%s13132_s16 + $0x58] sm:$0x3f] %v7123_v2 }
 0x987   : > { %v5976_v58 = vmax.f32 %v5890_v36, 0.0  ;;  %v5961_v56 = vadd.f32 %v5960_v3, %v13124_v55 }
 0x988   : > { %v6379_v27 = vmul.f32 -1.442695, %v5975_v50  ;;  %v6186_v53 = vmul.f32 %v13177_v32, %v5975_v50  ;;  %v5977_v0 = vmax.f32 %v5959_v46, 0.0 }
 0x989   : > { %v6380_v42 = vmul.f32 -1.442695, %v5976_v58  ;;  %v6187_v54 = vmul.f32 %v13181_v21, %v5976_v58  ;;  %v5978_v45 = vmax.f32 %v5961_v56, 0.0 }
 0x98a   : > { %7128 = vpow2.f32 %v6379_v27  ;;  %v6197_v43 = vsel %vm6144_vm10, %v6186_v53, 0.0  ;;  %v6381_v59 = vmul.f32 -1.442695, %v5977_v0  ;;  %v6188_v12 = vmul.f32 %v13184_v60, %v5977_v0 }
 0x98b   : > { %v6198_v62 = vadd.f32 %v6197_v43, %v6196_v5  ;;  %7130 = vpow2.f32 %v6380_v42  ;;  %v6199_v55 = vsel %vm6144_vm10, %v6187_v54, 0.0  ;;  %v6382_v61 = vmul.f32 -1.442695, %v5978_v45 }
 0x98c   : > { %7132 = vpow2.f32 %v6381_v59  ;;  %v6189_v32 = vmul.f32 %v13187_v20, %v5978_v45  ;;  %v6201_v7 = vsel %vm6144_vm10, %v6188_v12, 0.0 }
 0x98d   : > { %v7125_v16 = vpop.eup %7124  ;;  %v6200_v1 = vadd.f32 %v6199_v55, %v6198_v62  ;;  %7134 = vpow2.f32 %v6382_v61 }
 0x98e   : > { %v7127_v21 = vpop.eup %7126  ;;  %6083 = vst [vmem:[%s13132_s16 + $0x40] sm:$0x3f] %v7125_v16  ;;  %v6203_v31 = vsel %vm6144_vm10, %v6189_v32, 0.0 }
 0x98f   : > { %6084 = vst [vmem:[%s13132_s16 + $0x48] sm:$0x3f] %v7127_v21  ;;  %v6202_v10 = vadd.f32 %v6201_v7, %v6200_v1 }
 0x991   : > { %v6204_v60 = vadd.f32 %v6203_v31, %v6202_v10 }
 0x993   : > { %6205 = vadd.xlane.f32.xlu0 %v6204_v60 }
 0x994   : > { %v7129_v30 = vpop.eup %7128 }
 0x995   : > { %v7131_v48 = vpop.eup %7130  ;;  %v6039_v35 = vadd.f32 1.0, %v7129_v30 }
 0x996   : > { %v7133_v20 = vpop.eup %7132  ;;  %v6040_v11 = vadd.f32 1.0, %v7131_v48 }
 0x997   : > { %v7135_v15 = vpop.eup %7134  ;;  %7136 = vrcp.f32 %v6039_v35  ;;  %v6041_v4 = vadd.f32 1.0, %v7133_v20 }
 0x998   : > { %7138 = vrcp.f32 %v6040_v11  ;;  %v6042_v6 = vadd.f32 1.0, %v7135_v15 }
 0x999   : > { %7140 = vrcp.f32 %v6041_v4 }
 0x99a   : > { %7142 = vrcp.f32 %v6042_v6 }
 0x9a1   : > { %v7137_v8 = vpop.eup %7136 }
 0x9a2   : > { %v7139_v39 = vpop.eup %7138  ;;  %6087 = vst [vmem:[%s13132_s16 + $0x60] sm:$0x3f] %v7137_v8 }
 0x9a3   : > { %v7141_v23 = vpop.eup %7140  ;;  %6088 = vst [vmem:[%s13132_s16 + $0x68] sm:$0x3f] %v7139_v39 }
 0x9a4   : > { %v7143_v47 = vpop.eup %7142  ;;  %6089 = vst [vmem:[%s13132_s16 + $0x70] sm:$0x3f] %v7141_v23 }
 0x9a5   : > { %6090 = vst [vmem:[%s13132_s16 + $0x78] sm:$0x3f] %v7143_v47 }
 0x9fa   : > { %v6161_v19 = vpop.xlane.xlu1 %6160 }
 0x9fb   : > { %v6168_v63 = vadd.f32 %v6383_v24, %v6161_v19 }
 0x9fd   : > { %v6169_v44 = vsub.f32 %v6168_v63, %v6168_v63 }
 0x9ff   : > { %v6170_v37 = vmul.f32 1.442695, %v6169_v44 }
 0xa01   : > { %7144 = vpow2.f32 %v6170_v37 }
 0xa0b   : > { %v7145_v52 = vpop.eup %7144 }
 0xa20   : > { %v6206_v26 = vpop.xlane.xlu0 %6205 }
 0xa21   : > { %v6207_v18 = vadd.f32 %v6383_v24, %v6206_v26 }
 0xa23   : > { %v6208_v28 = vsub.f32 %v6207_v18, %v6207_v18 }
 0xa25   : > { %v6209_v38 = vmul.f32 1.442695, %v6208_v28 }
 0xa27   : > { %7146 = vpow2.f32 %v6209_v38 }
 0xa28   : > { %7148 = vrcp.f32 %v7145_v52 }
 0xa31   : > { %v7147_v22 = vpop.eup %7146 }
 0xa32   : > { %7150 = vrcp.f32 %v7147_v22  ;;  %v7149_v57 = vpop.eup %7148 }
 0xa33   : > { %v6174_v25 = vmul.f32 %v7149_v57, %v7145_v52 }
 0xa35   : > { %v6179_v9 = vrot.slane %v6174_v25, %v14292_v41 }
 0xa37   : > { %v6180_v33 = vsel %vm6175_vm11, %v6179_v9, 0.0 }
 0xa3c   : > { %v7151_v5 = vpop.eup %7150 }
 0xa3d   : > { %v6213_v51 = vmul.f32 %v7151_v5, %v7147_v22 }
 0xa3f   : > { %v6218_v34 = vrot.slane %v6213_v51, %v14292_v41 }
 0xa41   : > { %v6219_v17 = vsel %vm6214_vm12, %v6218_v34, 0.0 }
 0xa42   : > { %v6220_v49 = vadd.f32 %v6219_v17, %v6180_v33 }
 0xa44   : > { %6222 = vst.msk [vmem:[%s453_s22] sm:$0x3] %vm6221_vm13, %v6220_v49 }
 0xa45 PF: > { %s26_s27 = sadd.s32 1, %s7226_s27  }
 0xa46   : > { %p23_p4 = scmp.ge.s32.totalorder %s26_s27, 4  }
 0xa48   :  { %25 = sbr.rel (!%p23_p4) target bundleno = 3 (0x3), region = 110 }

</bundles_post_ra>
